<compile_context>
chip_gen: v6e
topology: v6e:2x2x1
jax: 0.10.0
libtpu: 0.0.40
codegen_flags: <defaults>
</compile_context>

<pallas_src>
import functools

import jax
import jax.numpy as jnp
from jax.experimental import pallas as pl
from jax.experimental.pallas import tpu as pltpu

K = 5        # kernel_size
C_IN = 1
C_OUT = 3


def _pick_batch_tile(n):
    """Largest per-step batch tile (<=8) that divides n and still leaves >=2
    grid slices (keeps both v7x TensorCores busy); 1 if n == 1."""
    if n <= 1:
        return 1
    for bt in range(min(8, n // 2), 0, -1):
        if n % bt == 0:
            return bt
    return 1


def _conv_t_sigmoid_kernel(x_ref, wtab_ref, bias_ref, o_ref, xpad_scr,
                           *, B_TILE, H, W, Ho, Wo):
    """One grid step = B_TILE batch elements.

    x_ref    : VMEM (B_TILE, H, W)            raw (unpadded) input planes
    wtab_ref : VMEM (C_OUT, K*K, K*Wo)        lane-replicated, H/W-flipped weights
                                              wtab[co, kh*K+kw, od*Wo+ow] = w[0,co,od,K-1-kh,K-1-kw]
    bias_ref : SMEM (C_OUT,)
    o_ref    : VMEM (B_TILE, C_OUT, Ho, K*Wo) depth vectorized along lanes
    xpad_scr : VMEM (Hp, Wp)                  zero-padded input scratch
    """
    P = K - 1
    DoWo = K * Wo

    # Zero the padded scratch once per grid step; only the interior is
    # rewritten per batch, the pad ring stays zero.
    xpad_scr[...] = jnp.zeros_like(xpad_scr)

    for b in range(B_TILE):                       # static unroll over batch tile
        xpad_scr[P:P + H, P:P + W] = x_ref[b]     # fold zero-pad into the kernel

        # One lane-vectorized accumulator per output channel, kept as vreg
        # values (3 x ~4 vregs) -- NOT a VMEM scratch with per-tap RMW.
        accs = [jnp.full((Ho, DoWo), bias_ref[co], dtype=jnp.float32)
                for co in range(C_OUT)]

        for kh in range(K):                       # taps outermost (static 5x5)
            for kw in range(K):
                t = kh * K + kw
                view = xpad_scr[kh:kh + Ho, kw:kw + Wo]        # (Ho, Wo)
                tiled = jnp.concatenate([view] * K, axis=-1)   # (Ho, Do*Wo)
                for co in range(C_OUT):
                    accs[co] = accs[co] + tiled * wtab_ref[co, t:t + 1, :]

        for co in range(C_OUT):
            o_ref[b, co] = jax.nn.sigmoid(accs[co])


def conv_transpose3d_sigmoid(x, w, b):
    """x: (N, 1, 1, H, W); w: (C_in=1, C_out=3, K, K, K); b: (C_out,). NCDHW out."""
    N, ci, d_in, H, W = x.shape
    assert ci == C_IN and d_in == 1 and w.shape == (C_IN, C_OUT, K, K, K)

    Ho, Wo, Do = H + K - 1, W + K - 1, K          # stride=1, pad=0, dilation=1
    Hp, Wp = H + 2 * (K - 1), W + 2 * (K - 1)
    DoWo = Do * Wo

    B_TILE = _pick_batch_tile(N)
    grid = (N // B_TILE,)

    # Squeeze unit C_in / D dims (metadata-only reshape); pad happens in-kernel.
    x3 = x.reshape(N, H, W).astype(jnp.float32)

    # Lane-replicated, H/W-flipped weight table (tiny, built once per call):
    #   wtab[co, kh*K+kw, od*Wo + ow] = w[0, co, od, K-1-kh, K-1-kw]   (const in ow)
    wflip = w[0, :, :, ::-1, ::-1].astype(jnp.float32)          # (C_OUT, od, kh, kw)
    wt = jnp.transpose(wflip, (0, 2, 3, 1)).reshape(C_OUT, K * K, Do, 1)
    wtab = jnp.broadcast_to(wt, (C_OUT, K * K, Do, Wo)).reshape(C_OUT, K * K, DoWo)

    kernel = functools.partial(_conv_t_sigmoid_kernel,
                               B_TILE=B_TILE, H=H, W=W, Ho=Ho, Wo=Wo)

    out = pl.pallas_call(
        kernel,
        out_shape=jax.ShapeDtypeStruct((N, C_OUT, Ho, DoWo), jnp.float32),
        grid=grid,
        in_specs=[
            pl.BlockSpec((B_TILE, H, W), lambda g: (g, 0, 0)),
            pl.BlockSpec((C_OUT, K * K, DoWo), lambda g: (0, 0, 0)),
            pl.BlockSpec(memory_space=pltpu.MemorySpace.SMEM),
        ],
        out_specs=pl.BlockSpec((B_TILE, C_OUT, Ho, DoWo),
                               lambda g: (g, 0, 0, 0)),
        scratch_shapes=[pltpu.VMEM((Hp, Wp), jnp.float32)],
        compiler_params=pltpu.CompilerParams(
            dimension_semantics=("parallel",)),
    )(x3, wtab, b.astype(jnp.float32))

    # Layout plumbing back to NCDHW: (N, C, Ho, Do*Wo) -> (N, C, Do, Ho, Wo).
    return jnp.transpose(out.reshape(N, C_OUT, Ho, Do, Wo), (0, 1, 3, 2, 4))


def reference(x, w, b):
    """Transposed conv (stride 1) == full-padding conv with spatially flipped
    kernel, via lax.conv_general_dilated."""
    w_flip = w[:, :, ::-1, ::-1, ::-1]                  # flip all spatial dims
    w_oidhw = jnp.transpose(w_flip, (1, 0, 2, 3, 4))    # (O, I, kD, kH, kW)
    out = jax.lax.conv_general_dilated(
        x, w_oidhw, window_strides=(1, 1, 1),
        padding=[(K - 1, K - 1)] * 3,
        dimension_numbers=("NCDHW", "OIDHW", "NCDHW"))
    return jax.nn.sigmoid(out + b[None, :, None, None, None])


if __name__ == "__main__":
    # Small shapes consistent with the module: (N, C_in=1, D=1, H, W)
    N, H, W = 4, 8, 32
    key = jax.random.PRNGKey(0)
    kx, kw, kb = jax.random.split(key, 3)

    x = jax.random.normal(kx, (N, 1, 1, H, W), dtype=jnp.float32)
    # Deterministic parameter init (shapes from ConvTranspose3d(1, 3, 5)).
    fan = C_IN * K * K * K
    weight = jax.random.normal(kw, (C_IN, C_OUT, K, K, K), jnp.float32) / jnp.sqrt(fan)
    bias = jax.random.normal(kb, (C_OUT,), jnp.float32) * 0.1

    fn = jax.jit(conv_transpose3d_sigmoid)
    out = jax.block_until_ready(fn(x, weight, bias))

    ref = reference(x, weight, bias)
    assert out.shape == (N, C_OUT, K, H + K - 1, W + K - 1), out.shape
    if not jnp.allclose(out, ref, rtol=2e-5, atol=2e-5):
        raise AssertionError("Pallas kernel does not match reference")

    print("KERNEL_OK")
</pallas_src>

<mosaic_0001>
module attributes {stable_mosaic.version = 11 : i64} {
  func.func @_conv_t_sigmoid_kernel(%arg0: i32, %arg1: memref<2x8x32xf32, #tpu.memory_space<vmem>>, %arg2: memref<3x25x180xf32, #tpu.memory_space<vmem>>, %arg3: memref<3xf32, #tpu.memory_space<smem>>, %arg4: memref<2x3x12x180xf32, #tpu.memory_space<vmem>>, %arg5: memref<16x40xf32, #tpu.memory_space<vmem>>) attributes {dimension_semantics = [#tpu.dimension_semantics<parallel>], iteration_bounds = array<i64: 2>, scalar_prefetch = 0 : i64, scratch_operands = 1 : i64, tpu.core_type = #tpu.core_type<tc>, window_params = [{transform_indices = @transform_0, window_bounds = array<i64: 2, 8, 32>}, {pipeline_mode = #tpu.pipeline_mode<synchronous>, transform_indices = @transform_1, window_bounds = array<i64: 3, 25, 180>}, {transform_indices = @transform_2, window_bounds = array<i64: 3>}, {transform_indices = @transform_3, window_bounds = array<i64: 2, 3, 12, 180>}]} {
    %cst = arith.constant 0.000000e+00 : f32
    %0 = vector.broadcast %cst : f32 to vector<16x40xf32>
    %c0 = arith.constant 0 : index
    %c0_0 = arith.constant 0 : index
    %1 = vector.load %arg5[%c0, %c0_0] : memref<16x40xf32, #tpu.memory_space<vmem>>, vector<16x40xf32>
    tpu.vector_store %arg5[%c0, %c0_0], %0 {strides = array<i32>} : memref<16x40xf32, #tpu.memory_space<vmem>>, vector<16x40xf32>,
    %c0_1 = arith.constant 0 : index
    %c0_2 = arith.constant 0 : index
    %c0_3 = arith.constant 0 : index
    %2 = vector.load %arg1[%c0_1, %c0_2, %c0_3] : memref<2x8x32xf32, #tpu.memory_space<vmem>>, vector<1x8x32xf32>
    %3 = vector.shape_cast %2 : vector<1x8x32xf32> to vector<8x32xf32>
    %c4 = arith.constant 4 : index
    %c4_4 = arith.constant 4 : index
    %4 = vector.load %arg5[%c4, %c4_4] : memref<16x40xf32, #tpu.memory_space<vmem>>, vector<8x32xf32>
    tpu.vector_store %arg5[%c4, %c4_4], %3 {strides = array<i32>} : memref<16x40xf32, #tpu.memory_space<vmem>>, vector<8x32xf32>,
    %c0_5 = arith.constant 0 : index
    %5 = memref.load %arg3[%c0_5] : memref<3xf32, #tpu.memory_space<smem>>
    %6 = vector.broadcast %5 : f32 to vector<12x180xf32>
    %c1 = arith.constant 1 : index
    %7 = memref.load %arg3[%c1] : memref<3xf32, #tpu.memory_space<smem>>
    %8 = vector.broadcast %7 : f32 to vector<12x180xf32>
    %c2 = arith.constant 2 : index
    %9 = memref.load %arg3[%c2] : memref<3xf32, #tpu.memory_space<smem>>
    %10 = vector.broadcast %9 : f32 to vector<12x180xf32>
    %c0_6 = arith.constant 0 : index
    %c0_7 = arith.constant 0 : index
    %11 = vector.load %arg5[%c0_6, %c0_7] : memref<16x40xf32, #tpu.memory_space<vmem>>, vector<12x36xf32>
    %12 = tpu.concatenate %11, %11, %11, %11, %11 in 1 : vector<12x36xf32>, vector<12x36xf32>, vector<12x36xf32>, vector<12x36xf32>, vector<12x36xf32> -> vector<12x180xf32>
    %c0_8 = arith.constant 0 : index
    %c0_9 = arith.constant 0 : index
    %c0_10 = arith.constant 0 : index
    %13 = vector.load %arg2[%c0_8, %c0_9, %c0_10] : memref<3x25x180xf32, #tpu.memory_space<vmem>>, vector<1x1x180xf32>
    %14 = vector.shape_cast %13 : vector<1x1x180xf32> to vector<1x180xf32>
    %15 = vector.broadcast %14 : vector<1x180xf32> to vector<12x180xf32>
    %16 = arith.mulf %12, %15 : vector<12x180xf32>
    %17 = arith.addf %6, %16 : vector<12x180xf32>
    %c1_11 = arith.constant 1 : index
    %c0_12 = arith.constant 0 : index
    %c0_13 = arith.constant 0 : index
    %18 = vector.load %arg2[%c1_11, %c0_12, %c0_13] : memref<3x25x180xf32, #tpu.memory_space<vmem>>, vector<1x1x180xf32>
    %19 = vector.shape_cast %18 : vector<1x1x180xf32> to vector<1x180xf32>
    %20 = vector.broadcast %19 : vector<1x180xf32> to vector<12x180xf32>
    %21 = arith.mulf %12, %20 : vector<12x180xf32>
    %22 = arith.addf %8, %21 : vector<12x180xf32>
    %c2_14 = arith.constant 2 : index
    %c0_15 = arith.constant 0 : index
    %c0_16 = arith.constant 0 : index
    %23 = vector.load %arg2[%c2_14, %c0_15, %c0_16] : memref<3x25x180xf32, #tpu.memory_space<vmem>>, vector<1x1x180xf32>
    %24 = vector.shape_cast %23 : vector<1x1x180xf32> to vector<1x180xf32>
    %25 = vector.broadcast %24 : vector<1x180xf32> to vector<12x180xf32>
    %26 = arith.mulf %12, %25 : vector<12x180xf32>
    %27 = arith.addf %10, %26 : vector<12x180xf32>
    %c0_17 = arith.constant 0 : index
    %c1_18 = arith.constant 1 : index
    %28 = vector.load %arg5[%c0_17, %c1_18] : memref<16x40xf32, #tpu.memory_space<vmem>>, vector<12x36xf32>
    %29 = tpu.concatenate %28, %28, %28, %28, %28 in 1 : vector<12x36xf32>, vector<12x36xf32>, vector<12x36xf32>, vector<12x36xf32>, vector<12x36xf32> -> vector<12x180xf32>
    %c0_19 = arith.constant 0 : index
    %c1_20 = arith.constant 1 : index
    %c0_21 = arith.constant 0 : index
    %30 = vector.load %arg2[%c0_19, %c1_20, %c0_21] : memref<3x25x180xf32, #tpu.memory_space<vmem>>, vector<1x1x180xf32>
    %31 = vector.shape_cast %30 : vector<1x1x180xf32> to vector<1x180xf32>
    %32 = vector.broadcast %31 : vector<1x180xf32> to vector<12x180xf32>
    %33 = arith.mulf %29, %32 : vector<12x180xf32>
    %34 = arith.addf %17, %33 : vector<12x180xf32>
    %c1_22 = arith.constant 1 : index
    %c1_23 = arith.constant 1 : index
    %c0_24 = arith.constant 0 : index
    %35 = vector.load %arg2[%c1_22, %c1_23, %c0_24] : memref<3x25x180xf32, #tpu.memory_space<vmem>>, vector<1x1x180xf32>
    %36 = vector.shape_cast %35 : vector<1x1x180xf32> to vector<1x180xf32>
    %37 = vector.broadcast %36 : vector<1x180xf32> to vector<12x180xf32>
    %38 = arith.mulf %29, %37 : vector<12x180xf32>
    %39 = arith.addf %22, %38 : vector<12x180xf32>
    %c2_25 = arith.constant 2 : index
    %c1_26 = arith.constant 1 : index
    %c0_27 = arith.constant 0 : index
    %40 = vector.load %arg2[%c2_25, %c1_26, %c0_27] : memref<3x25x180xf32, #tpu.memory_space<vmem>>, vector<1x1x180xf32>
    %41 = vector.shape_cast %40 : vector<1x1x180xf32> to vector<1x180xf32>
    %42 = vector.broadcast %41 : vector<1x180xf32> to vector<12x180xf32>
    %43 = arith.mulf %29, %42 : vector<12x180xf32>
    %44 = arith.addf %27, %43 : vector<12x180xf32>
    %c0_28 = arith.constant 0 : index
    %c2_29 = arith.constant 2 : index
    %45 = vector.load %arg5[%c0_28, %c2_29] : memref<16x40xf32, #tpu.memory_space<vmem>>, vector<12x36xf32>
    %46 = tpu.concatenate %45, %45, %45, %45, %45 in 1 : vector<12x36xf32>, vector<12x36xf32>, vector<12x36xf32>, vector<12x36xf32>, vector<12x36xf32> -> vector<12x180xf32>
    %c0_30 = arith.constant 0 : index
    %c2_31 = arith.constant 2 : index
    %c0_32 = arith.constant 0 : index
    %47 = vector.load %arg2[%c0_30, %c2_31, %c0_32] : memref<3x25x180xf32, #tpu.memory_space<vmem>>, vector<1x1x180xf32>
    %48 = vector.shape_cast %47 : vector<1x1x180xf32> to vector<1x180xf32>
    %49 = vector.broadcast %48 : vector<1x180xf32> to vector<12x180xf32>
    %50 = arith.mulf %46, %49 : vector<12x180xf32>
    %51 = arith.addf %34, %50 : vector<12x180xf32>
    %c1_33 = arith.constant 1 : index
    %c2_34 = arith.constant 2 : index
    %c0_35 = arith.constant 0 : index
    %52 = vector.load %arg2[%c1_33, %c2_34, %c0_35] : memref<3x25x180xf32, #tpu.memory_space<vmem>>, vector<1x1x180xf32>
    %53 = vector.shape_cast %52 : vector<1x1x180xf32> to vector<1x180xf32>
    %54 = vector.broadcast %53 : vector<1x180xf32> to vector<12x180xf32>
    %55 = arith.mulf %46, %54 : vector<12x180xf32>
    %56 = arith.addf %39, %55 : vector<12x180xf32>
    %c2_36 = arith.constant 2 : index
    %c2_37 = arith.constant 2 : index
    %c0_38 = arith.constant 0 : index
    %57 = vector.load %arg2[%c2_36, %c2_37, %c0_38] : memref<3x25x180xf32, #tpu.memory_space<vmem>>, vector<1x1x180xf32>
    %58 = vector.shape_cast %57 : vector<1x1x180xf32> to vector<1x180xf32>
    %59 = vector.broadcast %58 : vector<1x180xf32> to vector<12x180xf32>
    %60 = arith.mulf %46, %59 : vector<12x180xf32>
    %61 = arith.addf %44, %60 : vector<12x180xf32>
    %c0_39 = arith.constant 0 : index
    %c3 = arith.constant 3 : index
    %62 = vector.load %arg5[%c0_39, %c3] : memref<16x40xf32, #tpu.memory_space<vmem>>, vector<12x36xf32>
    %63 = tpu.concatenate %62, %62, %62, %62, %62 in 1 : vector<12x36xf32>, vector<12x36xf32>, vector<12x36xf32>, vector<12x36xf32>, vector<12x36xf32> -> vector<12x180xf32>
    %c0_40 = arith.constant 0 : index
    %c3_41 = arith.constant 3 : index
    %c0_42 = arith.constant 0 : index
    %64 = vector.load %arg2[%c0_40, %c3_41, %c0_42] : memref<3x25x180xf32, #tpu.memory_space<vmem>>, vector<1x1x180xf32>
    %65 = vector.shape_cast %64 : vector<1x1x180xf32> to vector<1x180xf32>
    %66 = vector.broadcast %65 : vector<1x180xf32> to vector<12x180xf32>
    %67 = arith.mulf %63, %66 : vector<12x180xf32>
    %68 = arith.addf %51, %67 : vector<12x180xf32>
    %c1_43 = arith.constant 1 : index
    %c3_44 = arith.constant 3 : index
    %c0_45 = arith.constant 0 : index
    %69 = vector.load %arg2[%c1_43, %c3_44, %c0_45] : memref<3x25x180xf32, #tpu.memory_space<vmem>>, vector<1x1x180xf32>
    %70 = vector.shape_cast %69 : vector<1x1x180xf32> to vector<1x180xf32>
    %71 = vector.broadcast %70 : vector<1x180xf32> to vector<12x180xf32>
    %72 = arith.mulf %63, %71 : vector<12x180xf32>
    %73 = arith.addf %56, %72 : vector<12x180xf32>
    %c2_46 = arith.constant 2 : index
    %c3_47 = arith.constant 3 : index
    %c0_48 = arith.constant 0 : index
    %74 = vector.load %arg2[%c2_46, %c3_47, %c0_48] : memref<3x25x180xf32, #tpu.memory_space<vmem>>, vector<1x1x180xf32>
    %75 = vector.shape_cast %74 : vector<1x1x180xf32> to vector<1x180xf32>
    %76 = vector.broadcast %75 : vector<1x180xf32> to vector<12x180xf32>
    %77 = arith.mulf %63, %76 : vector<12x180xf32>
    %78 = arith.addf %61, %77 : vector<12x180xf32>
    %c0_49 = arith.constant 0 : index
    %c4_50 = arith.constant 4 : index
    %79 = vector.load %arg5[%c0_49, %c4_50] : memref<16x40xf32, #tpu.memory_space<vmem>>, vector<12x36xf32>
    %80 = tpu.concatenate %79, %79, %79, %79, %79 in 1 : vector<12x36xf32>, vector<12x36xf32>, vector<12x36xf32>, vector<12x36xf32>, vector<12x36xf32> -> vector<12x180xf32>
    %c0_51 = arith.constant 0 : index
    %c4_52 = arith.constant 4 : index
    %c0_53 = arith.constant 0 : index
    %81 = vector.load %arg2[%c0_51, %c4_52, %c0_53] : memref<3x25x180xf32, #tpu.memory_space<vmem>>, vector<1x1x180xf32>
    %82 = vector.shape_cast %81 : vector<1x1x180xf32> to vector<1x180xf32>
    %83 = vector.broadcast %82 : vector<1x180xf32> to vector<12x180xf32>
    %84 = arith.mulf %80, %83 : vector<12x180xf32>
    %85 = arith.addf %68, %84 : vector<12x180xf32>
    %c1_54 = arith.constant 1 : index
    %c4_55 = arith.constant 4 : index
    %c0_56 = arith.constant 0 : index
    %86 = vector.load %arg2[%c1_54, %c4_55, %c0_56] : memref<3x25x180xf32, #tpu.memory_space<vmem>>, vector<1x1x180xf32>
    %87 = vector.shape_cast %86 : vector<1x1x180xf32> to vector<1x180xf32>
    %88 = vector.broadcast %87 : vector<1x180xf32> to vector<12x180xf32>
    %89 = arith.mulf %80, %88 : vector<12x180xf32>
    %90 = arith.addf %73, %89 : vector<12x180xf32>
    %c2_57 = arith.constant 2 : index
    %c4_58 = arith.constant 4 : index
    %c0_59 = arith.constant 0 : index
    %91 = vector.load %arg2[%c2_57, %c4_58, %c0_59] : memref<3x25x180xf32, #tpu.memory_space<vmem>>, vector<1x1x180xf32>
    %92 = vector.shape_cast %91 : vector<1x1x180xf32> to vector<1x180xf32>
    %93 = vector.broadcast %92 : vector<1x180xf32> to vector<12x180xf32>
    %94 = arith.mulf %80, %93 : vector<12x180xf32>
    %95 = arith.addf %78, %94 : vector<12x180xf32>
    %c1_60 = arith.constant 1 : index
    %c0_61 = arith.constant 0 : index
    %96 = vector.load %arg5[%c1_60, %c0_61] : memref<16x40xf32, #tpu.memory_space<vmem>>, vector<12x36xf32>
    %97 = tpu.concatenate %96, %96, %96, %96, %96 in 1 : vector<12x36xf32>, vector<12x36xf32>, vector<12x36xf32>, vector<12x36xf32>, vector<12x36xf32> -> vector<12x180xf32>
    %c0_62 = arith.constant 0 : index
    %c5 = arith.constant 5 : index
    %c0_63 = arith.constant 0 : index
    %98 = vector.load %arg2[%c0_62, %c5, %c0_63] : memref<3x25x180xf32, #tpu.memory_space<vmem>>, vector<1x1x180xf32>
    %99 = vector.shape_cast %98 : vector<1x1x180xf32> to vector<1x180xf32>
    %100 = vector.broadcast %99 : vector<1x180xf32> to vector<12x180xf32>
    %101 = arith.mulf %97, %100 : vector<12x180xf32>
    %102 = arith.addf %85, %101 : vector<12x180xf32>
    %c1_64 = arith.constant 1 : index
    %c5_65 = arith.constant 5 : index
    %c0_66 = arith.constant 0 : index
    %103 = vector.load %arg2[%c1_64, %c5_65, %c0_66] : memref<3x25x180xf32, #tpu.memory_space<vmem>>, vector<1x1x180xf32>
    %104 = vector.shape_cast %103 : vector<1x1x180xf32> to vector<1x180xf32>
    %105 = vector.broadcast %104 : vector<1x180xf32> to vector<12x180xf32>
    %106 = arith.mulf %97, %105 : vector<12x180xf32>
    %107 = arith.addf %90, %106 : vector<12x180xf32>
    %c2_67 = arith.constant 2 : index
    %c5_68 = arith.constant 5 : index
    %c0_69 = arith.constant 0 : index
    %108 = vector.load %arg2[%c2_67, %c5_68, %c0_69] : memref<3x25x180xf32, #tpu.memory_space<vmem>>, vector<1x1x180xf32>
    %109 = vector.shape_cast %108 : vector<1x1x180xf32> to vector<1x180xf32>
    %110 = vector.broadcast %109 : vector<1x180xf32> to vector<12x180xf32>
    %111 = arith.mulf %97, %110 : vector<12x180xf32>
    %112 = arith.addf %95, %111 : vector<12x180xf32>
    %c1_70 = arith.constant 1 : index
    %c1_71 = arith.constant 1 : index
    %113 = vector.load %arg5[%c1_70, %c1_71] : memref<16x40xf32, #tpu.memory_space<vmem>>, vector<12x36xf32>
    %114 = tpu.concatenate %113, %113, %113, %113, %113 in 1 : vector<12x36xf32>, vector<12x36xf32>, vector<12x36xf32>, vector<12x36xf32>, vector<12x36xf32> -> vector<12x180xf32>
    %c0_72 = arith.constant 0 : index
    %c6 = arith.constant 6 : index
    %c0_73 = arith.constant 0 : index
    %115 = vector.load %arg2[%c0_72, %c6, %c0_73] : memref<3x25x180xf32, #tpu.memory_space<vmem>>, vector<1x1x180xf32>
    %116 = vector.shape_cast %115 : vector<1x1x180xf32> to vector<1x180xf32>
    %117 = vector.broadcast %116 : vector<1x180xf32> to vector<12x180xf32>
    %118 = arith.mulf %114, %117 : vector<12x180xf32>
    %119 = arith.addf %102, %118 : vector<12x180xf32>
    %c1_74 = arith.constant 1 : index
    %c6_75 = arith.constant 6 : index
    %c0_76 = arith.constant 0 : index
    %120 = vector.load %arg2[%c1_74, %c6_75, %c0_76] : memref<3x25x180xf32, #tpu.memory_space<vmem>>, vector<1x1x180xf32>
    %121 = vector.shape_cast %120 : vector<1x1x180xf32> to vector<1x180xf32>
    %122 = vector.broadcast %121 : vector<1x180xf32> to vector<12x180xf32>
    %123 = arith.mulf %114, %122 : vector<12x180xf32>
    %124 = arith.addf %107, %123 : vector<12x180xf32>
    %c2_77 = arith.constant 2 : index
    %c6_78 = arith.constant 6 : index
    %c0_79 = arith.constant 0 : index
    %125 = vector.load %arg2[%c2_77, %c6_78, %c0_79] : memref<3x25x180xf32, #tpu.memory_space<vmem>>, vector<1x1x180xf32>
    %126 = vector.shape_cast %125 : vector<1x1x180xf32> to vector<1x180xf32>
    %127 = vector.broadcast %126 : vector<1x180xf32> to vector<12x180xf32>
    %128 = arith.mulf %114, %127 : vector<12x180xf32>
    %129 = arith.addf %112, %128 : vector<12x180xf32>
    %c1_80 = arith.constant 1 : index
    %c2_81 = arith.constant 2 : index
    %130 = vector.load %arg5[%c1_80, %c2_81] : memref<16x40xf32, #tpu.memory_space<vmem>>, vector<12x36xf32>
    %131 = tpu.concatenate %130, %130, %130, %130, %130 in 1 : vector<12x36xf32>, vector<12x36xf32>, vector<12x36xf32>, vector<12x36xf32>, vector<12x36xf32> -> vector<12x180xf32>
    %c0_82 = arith.constant 0 : index
    %c7 = arith.constant 7 : index
    %c0_83 = arith.constant 0 : index
    %132 = vector.load %arg2[%c0_82, %c7, %c0_83] : memref<3x25x180xf32, #tpu.memory_space<vmem>>, vector<1x1x180xf32>
    %133 = vector.shape_cast %132 : vector<1x1x180xf32> to vector<1x180xf32>
    %134 = vector.broadcast %133 : vector<1x180xf32> to vector<12x180xf32>
    %135 = arith.mulf %131, %134 : vector<12x180xf32>
    %136 = arith.addf %119, %135 : vector<12x180xf32>
    %c1_84 = arith.constant 1 : index
    %c7_85 = arith.constant 7 : index
    %c0_86 = arith.constant 0 : index
    %137 = vector.load %arg2[%c1_84, %c7_85, %c0_86] : memref<3x25x180xf32, #tpu.memory_space<vmem>>, vector<1x1x180xf32>
    %138 = vector.shape_cast %137 : vector<1x1x180xf32> to vector<1x180xf32>
    %139 = vector.broadcast %138 : vector<1x180xf32> to vector<12x180xf32>
    %140 = arith.mulf %131, %139 : vector<12x180xf32>
    %141 = arith.addf %124, %140 : vector<12x180xf32>
    %c2_87 = arith.constant 2 : index
    %c7_88 = arith.constant 7 : index
    %c0_89 = arith.constant 0 : index
    %142 = vector.load %arg2[%c2_87, %c7_88, %c0_89] : memref<3x25x180xf32, #tpu.memory_space<vmem>>, vector<1x1x180xf32>
    %143 = vector.shape_cast %142 : vector<1x1x180xf32> to vector<1x180xf32>
    %144 = vector.broadcast %143 : vector<1x180xf32> to vector<12x180xf32>
    %145 = arith.mulf %131, %144 : vector<12x180xf32>
    %146 = arith.addf %129, %145 : vector<12x180xf32>
    %c1_90 = arith.constant 1 : index
    %c3_91 = arith.constant 3 : index
    %147 = vector.load %arg5[%c1_90, %c3_91] : memref<16x40xf32, #tpu.memory_space<vmem>>, vector<12x36xf32>
    %148 = tpu.concatenate %147, %147, %147, %147, %147 in 1 : vector<12x36xf32>, vector<12x36xf32>, vector<12x36xf32>, vector<12x36xf32>, vector<12x36xf32> -> vector<12x180xf32>
    %c0_92 = arith.constant 0 : index
    %c8 = arith.constant 8 : index
    %c0_93 = arith.constant 0 : index
    %149 = vector.load %arg2[%c0_92, %c8, %c0_93] : memref<3x25x180xf32, #tpu.memory_space<vmem>>, vector<1x1x180xf32>
    %150 = vector.shape_cast %149 : vector<1x1x180xf32> to vector<1x180xf32>
    %151 = vector.broadcast %150 : vector<1x180xf32> to vector<12x180xf32>
    %152 = arith.mulf %148, %151 : vector<12x180xf32>
    %153 = arith.addf %136, %152 : vector<12x180xf32>
    %c1_94 = arith.constant 1 : index
    %c8_95 = arith.constant 8 : index
    %c0_96 = arith.constant 0 : index
    %154 = vector.load %arg2[%c1_94, %c8_95, %c0_96] : memref<3x25x180xf32, #tpu.memory_space<vmem>>, vector<1x1x180xf32>
    %155 = vector.shape_cast %154 : vector<1x1x180xf32> to vector<1x180xf32>
    %156 = vector.broadcast %155 : vector<1x180xf32> to vector<12x180xf32>
    %157 = arith.mulf %148, %156 : vector<12x180xf32>
    %158 = arith.addf %141, %157 : vector<12x180xf32>
    %c2_97 = arith.constant 2 : index
    %c8_98 = arith.constant 8 : index
    %c0_99 = arith.constant 0 : index
    %159 = vector.load %arg2[%c2_97, %c8_98, %c0_99] : memref<3x25x180xf32, #tpu.memory_space<vmem>>, vector<1x1x180xf32>
    %160 = vector.shape_cast %159 : vector<1x1x180xf32> to vector<1x180xf32>
    %161 = vector.broadcast %160 : vector<1x180xf32> to vector<12x180xf32>
    %162 = arith.mulf %148, %161 : vector<12x180xf32>
    %163 = arith.addf %146, %162 : vector<12x180xf32>
    %c1_100 = arith.constant 1 : index
    %c4_101 = arith.constant 4 : index
    %164 = vector.load %arg5[%c1_100, %c4_101] : memref<16x40xf32, #tpu.memory_space<vmem>>, vector<12x36xf32>
    %165 = tpu.concatenate %164, %164, %164, %164, %164 in 1 : vector<12x36xf32>, vector<12x36xf32>, vector<12x36xf32>, vector<12x36xf32>, vector<12x36xf32> -> vector<12x180xf32>
    %c0_102 = arith.constant 0 : index
    %c9 = arith.constant 9 : index
    %c0_103 = arith.constant 0 : index
    %166 = vector.load %arg2[%c0_102, %c9, %c0_103] : memref<3x25x180xf32, #tpu.memory_space<vmem>>, vector<1x1x180xf32>
    %167 = vector.shape_cast %166 : vector<1x1x180xf32> to vector<1x180xf32>
    %168 = vector.broadcast %167 : vector<1x180xf32> to vector<12x180xf32>
    %169 = arith.mulf %165, %168 : vector<12x180xf32>
    %170 = arith.addf %153, %169 : vector<12x180xf32>
    %c1_104 = arith.constant 1 : index
    %c9_105 = arith.constant 9 : index
    %c0_106 = arith.constant 0 : index
    %171 = vector.load %arg2[%c1_104, %c9_105, %c0_106] : memref<3x25x180xf32, #tpu.memory_space<vmem>>, vector<1x1x180xf32>
    %172 = vector.shape_cast %171 : vector<1x1x180xf32> to vector<1x180xf32>
    %173 = vector.broadcast %172 : vector<1x180xf32> to vector<12x180xf32>
    %174 = arith.mulf %165, %173 : vector<12x180xf32>
    %175 = arith.addf %158, %174 : vector<12x180xf32>
    %c2_107 = arith.constant 2 : index
    %c9_108 = arith.constant 9 : index
    %c0_109 = arith.constant 0 : index
    %176 = vector.load %arg2[%c2_107, %c9_108, %c0_109] : memref<3x25x180xf32, #tpu.memory_space<vmem>>, vector<1x1x180xf32>
    %177 = vector.shape_cast %176 : vector<1x1x180xf32> to vector<1x180xf32>
    %178 = vector.broadcast %177 : vector<1x180xf32> to vector<12x180xf32>
    %179 = arith.mulf %165, %178 : vector<12x180xf32>
    %180 = arith.addf %163, %179 : vector<12x180xf32>
    %c2_110 = arith.constant 2 : index
    %c0_111 = arith.constant 0 : index
    %181 = vector.load %arg5[%c2_110, %c0_111] : memref<16x40xf32, #tpu.memory_space<vmem>>, vector<12x36xf32>
    %182 = tpu.concatenate %181, %181, %181, %181, %181 in 1 : vector<12x36xf32>, vector<12x36xf32>, vector<12x36xf32>, vector<12x36xf32>, vector<12x36xf32> -> vector<12x180xf32>
    %c0_112 = arith.constant 0 : index
    %c10 = arith.constant 10 : index
    %c0_113 = arith.constant 0 : index
    %183 = vector.load %arg2[%c0_112, %c10, %c0_113] : memref<3x25x180xf32, #tpu.memory_space<vmem>>, vector<1x1x180xf32>
    %184 = vector.shape_cast %183 : vector<1x1x180xf32> to vector<1x180xf32>
    %185 = vector.broadcast %184 : vector<1x180xf32> to vector<12x180xf32>
    %186 = arith.mulf %182, %185 : vector<12x180xf32>
    %187 = arith.addf %170, %186 : vector<12x180xf32>
    %c1_114 = arith.constant 1 : index
    %c10_115 = arith.constant 10 : index
    %c0_116 = arith.constant 0 : index
    %188 = vector.load %arg2[%c1_114, %c10_115, %c0_116] : memref<3x25x180xf32, #tpu.memory_space<vmem>>, vector<1x1x180xf32>
    %189 = vector.shape_cast %188 : vector<1x1x180xf32> to vector<1x180xf32>
    %190 = vector.broadcast %189 : vector<1x180xf32> to vector<12x180xf32>
    %191 = arith.mulf %182, %190 : vector<12x180xf32>
    %192 = arith.addf %175, %191 : vector<12x180xf32>
    %c2_117 = arith.constant 2 : index
    %c10_118 = arith.constant 10 : index
    %c0_119 = arith.constant 0 : index
    %193 = vector.load %arg2[%c2_117, %c10_118, %c0_119] : memref<3x25x180xf32, #tpu.memory_space<vmem>>, vector<1x1x180xf32>
    %194 = vector.shape_cast %193 : vector<1x1x180xf32> to vector<1x180xf32>
    %195 = vector.broadcast %194 : vector<1x180xf32> to vector<12x180xf32>
    %196 = arith.mulf %182, %195 : vector<12x180xf32>
    %197 = arith.addf %180, %196 : vector<12x180xf32>
    %c2_120 = arith.constant 2 : index
    %c1_121 = arith.constant 1 : index
    %198 = vector.load %arg5[%c2_120, %c1_121] : memref<16x40xf32, #tpu.memory_space<vmem>>, vector<12x36xf32>
    %199 = tpu.concatenate %198, %198, %198, %198, %198 in 1 : vector<12x36xf32>, vector<12x36xf32>, vector<12x36xf32>, vector<12x36xf32>, vector<12x36xf32> -> vector<12x180xf32>
    %c0_122 = arith.constant 0 : index
    %c11 = arith.constant 11 : index
    %c0_123 = arith.constant 0 : index
    %200 = vector.load %arg2[%c0_122, %c11, %c0_123] : memref<3x25x180xf32, #tpu.memory_space<vmem>>, vector<1x1x180xf32>
    %201 = vector.shape_cast %200 : vector<1x1x180xf32> to vector<1x180xf32>
    %202 = vector.broadcast %201 : vector<1x180xf32> to vector<12x180xf32>
    %203 = arith.mulf %199, %202 : vector<12x180xf32>
    %204 = arith.addf %187, %203 : vector<12x180xf32>
    %c1_124 = arith.constant 1 : index
    %c11_125 = arith.constant 11 : index
    %c0_126 = arith.constant 0 : index
    %205 = vector.load %arg2[%c1_124, %c11_125, %c0_126] : memref<3x25x180xf32, #tpu.memory_space<vmem>>, vector<1x1x180xf32>
    %206 = vector.shape_cast %205 : vector<1x1x180xf32> to vector<1x180xf32>
    %207 = vector.broadcast %206 : vector<1x180xf32> to vector<12x180xf32>
    %208 = arith.mulf %199, %207 : vector<12x180xf32>
    %209 = arith.addf %192, %208 : vector<12x180xf32>
    %c2_127 = arith.constant 2 : index
    %c11_128 = arith.constant 11 : index
    %c0_129 = arith.constant 0 : index
    %210 = vector.load %arg2[%c2_127, %c11_128, %c0_129] : memref<3x25x180xf32, #tpu.memory_space<vmem>>, vector<1x1x180xf32>
    %211 = vector.shape_cast %210 : vector<1x1x180xf32> to vector<1x180xf32>
    %212 = vector.broadcast %211 : vector<1x180xf32> to vector<12x180xf32>
    %213 = arith.mulf %199, %212 : vector<12x180xf32>
    %214 = arith.addf %197, %213 : vector<12x180xf32>
    %c2_130 = arith.constant 2 : index
    %c2_131 = arith.constant 2 : index
    %215 = vector.load %arg5[%c2_130, %c2_131] : memref<16x40xf32, #tpu.memory_space<vmem>>, vector<12x36xf32>
    %216 = tpu.concatenate %215, %215, %215, %215, %215 in 1 : vector<12x36xf32>, vector<12x36xf32>, vector<12x36xf32>, vector<12x36xf32>, vector<12x36xf32> -> vector<12x180xf32>
    %c0_132 = arith.constant 0 : index
    %c12 = arith.constant 12 : index
    %c0_133 = arith.constant 0 : index
    %217 = vector.load %arg2[%c0_132, %c12, %c0_133] : memref<3x25x180xf32, #tpu.memory_space<vmem>>, vector<1x1x180xf32>
    %218 = vector.shape_cast %217 : vector<1x1x180xf32> to vector<1x180xf32>
    %219 = vector.broadcast %218 : vector<1x180xf32> to vector<12x180xf32>
    %220 = arith.mulf %216, %219 : vector<12x180xf32>
    %221 = arith.addf %204, %220 : vector<12x180xf32>
    %c1_134 = arith.constant 1 : index
    %c12_135 = arith.constant 12 : index
    %c0_136 = arith.constant 0 : index
    %222 = vector.load %arg2[%c1_134, %c12_135, %c0_136] : memref<3x25x180xf32, #tpu.memory_space<vmem>>, vector<1x1x180xf32>
    %223 = vector.shape_cast %222 : vector<1x1x180xf32> to vector<1x180xf32>
    %224 = vector.broadcast %223 : vector<1x180xf32> to vector<12x180xf32>
    %225 = arith.mulf %216, %224 : vector<12x180xf32>
    %226 = arith.addf %209, %225 : vector<12x180xf32>
    %c2_137 = arith.constant 2 : index
    %c12_138 = arith.constant 12 : index
    %c0_139 = arith.constant 0 : index
    %227 = vector.load %arg2[%c2_137, %c12_138, %c0_139] : memref<3x25x180xf32, #tpu.memory_space<vmem>>, vector<1x1x180xf32>
    %228 = vector.shape_cast %227 : vector<1x1x180xf32> to vector<1x180xf32>
    %229 = vector.broadcast %228 : vector<1x180xf32> to vector<12x180xf32>
    %230 = arith.mulf %216, %229 : vector<12x180xf32>
    %231 = arith.addf %214, %230 : vector<12x180xf32>
    %c2_140 = arith.constant 2 : index
    %c3_141 = arith.constant 3 : index
    %232 = vector.load %arg5[%c2_140, %c3_141] : memref<16x40xf32, #tpu.memory_space<vmem>>, vector<12x36xf32>
    %233 = tpu.concatenate %232, %232, %232, %232, %232 in 1 : vector<12x36xf32>, vector<12x36xf32>, vector<12x36xf32>, vector<12x36xf32>, vector<12x36xf32> -> vector<12x180xf32>
    %c0_142 = arith.constant 0 : index
    %c13 = arith.constant 13 : index
    %c0_143 = arith.constant 0 : index
    %234 = vector.load %arg2[%c0_142, %c13, %c0_143] : memref<3x25x180xf32, #tpu.memory_space<vmem>>, vector<1x1x180xf32>
    %235 = vector.shape_cast %234 : vector<1x1x180xf32> to vector<1x180xf32>
    %236 = vector.broadcast %235 : vector<1x180xf32> to vector<12x180xf32>
    %237 = arith.mulf %233, %236 : vector<12x180xf32>
    %238 = arith.addf %221, %237 : vector<12x180xf32>
    %c1_144 = arith.constant 1 : index
    %c13_145 = arith.constant 13 : index
    %c0_146 = arith.constant 0 : index
    %239 = vector.load %arg2[%c1_144, %c13_145, %c0_146] : memref<3x25x180xf32, #tpu.memory_space<vmem>>, vector<1x1x180xf32>
    %240 = vector.shape_cast %239 : vector<1x1x180xf32> to vector<1x180xf32>
    %241 = vector.broadcast %240 : vector<1x180xf32> to vector<12x180xf32>
    %242 = arith.mulf %233, %241 : vector<12x180xf32>
    %243 = arith.addf %226, %242 : vector<12x180xf32>
    %c2_147 = arith.constant 2 : index
    %c13_148 = arith.constant 13 : index
    %c0_149 = arith.constant 0 : index
    %244 = vector.load %arg2[%c2_147, %c13_148, %c0_149] : memref<3x25x180xf32, #tpu.memory_space<vmem>>, vector<1x1x180xf32>
    %245 = vector.shape_cast %244 : vector<1x1x180xf32> to vector<1x180xf32>
    %246 = vector.broadcast %245 : vector<1x180xf32> to vector<12x180xf32>
    %247 = arith.mulf %233, %246 : vector<12x180xf32>
    %248 = arith.addf %231, %247 : vector<12x180xf32>
    %c2_150 = arith.constant 2 : index
    %c4_151 = arith.constant 4 : index
    %249 = vector.load %arg5[%c2_150, %c4_151] : memref<16x40xf32, #tpu.memory_space<vmem>>, vector<12x36xf32>
    %250 = tpu.concatenate %249, %249, %249, %249, %249 in 1 : vector<12x36xf32>, vector<12x36xf32>, vector<12x36xf32>, vector<12x36xf32>, vector<12x36xf32> -> vector<12x180xf32>
    %c0_152 = arith.constant 0 : index
    %c14 = arith.constant 14 : index
    %c0_153 = arith.constant 0 : index
    %251 = vector.load %arg2[%c0_152, %c14, %c0_153] : memref<3x25x180xf32, #tpu.memory_space<vmem>>, vector<1x1x180xf32>
    %252 = vector.shape_cast %251 : vector<1x1x180xf32> to vector<1x180xf32>
    %253 = vector.broadcast %252 : vector<1x180xf32> to vector<12x180xf32>
    %254 = arith.mulf %250, %253 : vector<12x180xf32>
    %255 = arith.addf %238, %254 : vector<12x180xf32>
    %c1_154 = arith.constant 1 : index
    %c14_155 = arith.constant 14 : index
    %c0_156 = arith.constant 0 : index
    %256 = vector.load %arg2[%c1_154, %c14_155, %c0_156] : memref<3x25x180xf32, #tpu.memory_space<vmem>>, vector<1x1x180xf32>
    %257 = vector.shape_cast %256 : vector<1x1x180xf32> to vector<1x180xf32>
    %258 = vector.broadcast %257 : vector<1x180xf32> to vector<12x180xf32>
    %259 = arith.mulf %250, %258 : vector<12x180xf32>
    %260 = arith.addf %243, %259 : vector<12x180xf32>
    %c2_157 = arith.constant 2 : index
    %c14_158 = arith.constant 14 : index
    %c0_159 = arith.constant 0 : index
    %261 = vector.load %arg2[%c2_157, %c14_158, %c0_159] : memref<3x25x180xf32, #tpu.memory_space<vmem>>, vector<1x1x180xf32>
    %262 = vector.shape_cast %261 : vector<1x1x180xf32> to vector<1x180xf32>
    %263 = vector.broadcast %262 : vector<1x180xf32> to vector<12x180xf32>
    %264 = arith.mulf %250, %263 : vector<12x180xf32>
    %265 = arith.addf %248, %264 : vector<12x180xf32>
    %c3_160 = arith.constant 3 : index
    %c0_161 = arith.constant 0 : index
    %266 = vector.load %arg5[%c3_160, %c0_161] : memref<16x40xf32, #tpu.memory_space<vmem>>, vector<12x36xf32>
    %267 = tpu.concatenate %266, %266, %266, %266, %266 in 1 : vector<12x36xf32>, vector<12x36xf32>, vector<12x36xf32>, vector<12x36xf32>, vector<12x36xf32> -> vector<12x180xf32>
    %c0_162 = arith.constant 0 : index
    %c15 = arith.constant 15 : index
    %c0_163 = arith.constant 0 : index
    %268 = vector.load %arg2[%c0_162, %c15, %c0_163] : memref<3x25x180xf32, #tpu.memory_space<vmem>>, vector<1x1x180xf32>
    %269 = vector.shape_cast %268 : vector<1x1x180xf32> to vector<1x180xf32>
    %270 = vector.broadcast %269 : vector<1x180xf32> to vector<12x180xf32>
    %271 = arith.mulf %267, %270 : vector<12x180xf32>
    %272 = arith.addf %255, %271 : vector<12x180xf32>
    %c1_164 = arith.constant 1 : index
    %c15_165 = arith.constant 15 : index
    %c0_166 = arith.constant 0 : index
    %273 = vector.load %arg2[%c1_164, %c15_165, %c0_166] : memref<3x25x180xf32, #tpu.memory_space<vmem>>, vector<1x1x180xf32>
    %274 = vector.shape_cast %273 : vector<1x1x180xf32> to vector<1x180xf32>
    %275 = vector.broadcast %274 : vector<1x180xf32> to vector<12x180xf32>
    %276 = arith.mulf %267, %275 : vector<12x180xf32>
    %277 = arith.addf %260, %276 : vector<12x180xf32>
    %c2_167 = arith.constant 2 : index
    %c15_168 = arith.constant 15 : index
    %c0_169 = arith.constant 0 : index
    %278 = vector.load %arg2[%c2_167, %c15_168, %c0_169] : memref<3x25x180xf32, #tpu.memory_space<vmem>>, vector<1x1x180xf32>
    %279 = vector.shape_cast %278 : vector<1x1x180xf32> to vector<1x180xf32>
    %280 = vector.broadcast %279 : vector<1x180xf32> to vector<12x180xf32>
    %281 = arith.mulf %267, %280 : vector<12x180xf32>
    %282 = arith.addf %265, %281 : vector<12x180xf32>
    %c3_170 = arith.constant 3 : index
    %c1_171 = arith.constant 1 : index
    %283 = vector.load %arg5[%c3_170, %c1_171] : memref<16x40xf32, #tpu.memory_space<vmem>>, vector<12x36xf32>
    %284 = tpu.concatenate %283, %283, %283, %283, %283 in 1 : vector<12x36xf32>, vector<12x36xf32>, vector<12x36xf32>, vector<12x36xf32>, vector<12x36xf32> -> vector<12x180xf32>
    %c0_172 = arith.constant 0 : index
    %c16 = arith.constant 16 : index
    %c0_173 = arith.constant 0 : index
    %285 = vector.load %arg2[%c0_172, %c16, %c0_173] : memref<3x25x180xf32, #tpu.memory_space<vmem>>, vector<1x1x180xf32>
    %286 = vector.shape_cast %285 : vector<1x1x180xf32> to vector<1x180xf32>
    %287 = vector.broadcast %286 : vector<1x180xf32> to vector<12x180xf32>
    %288 = arith.mulf %284, %287 : vector<12x180xf32>
    %289 = arith.addf %272, %288 : vector<12x180xf32>
    %c1_174 = arith.constant 1 : index
    %c16_175 = arith.constant 16 : index
    %c0_176 = arith.constant 0 : index
    %290 = vector.load %arg2[%c1_174, %c16_175, %c0_176] : memref<3x25x180xf32, #tpu.memory_space<vmem>>, vector<1x1x180xf32>
    %291 = vector.shape_cast %290 : vector<1x1x180xf32> to vector<1x180xf32>
    %292 = vector.broadcast %291 : vector<1x180xf32> to vector<12x180xf32>
    %293 = arith.mulf %284, %292 : vector<12x180xf32>
    %294 = arith.addf %277, %293 : vector<12x180xf32>
    %c2_177 = arith.constant 2 : index
    %c16_178 = arith.constant 16 : index
    %c0_179 = arith.constant 0 : index
    %295 = vector.load %arg2[%c2_177, %c16_178, %c0_179] : memref<3x25x180xf32, #tpu.memory_space<vmem>>, vector<1x1x180xf32>
    %296 = vector.shape_cast %295 : vector<1x1x180xf32> to vector<1x180xf32>
    %297 = vector.broadcast %296 : vector<1x180xf32> to vector<12x180xf32>
    %298 = arith.mulf %284, %297 : vector<12x180xf32>
    %299 = arith.addf %282, %298 : vector<12x180xf32>
    %c3_180 = arith.constant 3 : index
    %c2_181 = arith.constant 2 : index
    %300 = vector.load %arg5[%c3_180, %c2_181] : memref<16x40xf32, #tpu.memory_space<vmem>>, vector<12x36xf32>
    %301 = tpu.concatenate %300, %300, %300, %300, %300 in 1 : vector<12x36xf32>, vector<12x36xf32>, vector<12x36xf32>, vector<12x36xf32>, vector<12x36xf32> -> vector<12x180xf32>
    %c0_182 = arith.constant 0 : index
    %c17 = arith.constant 17 : index
    %c0_183 = arith.constant 0 : index
    %302 = vector.load %arg2[%c0_182, %c17, %c0_183] : memref<3x25x180xf32, #tpu.memory_space<vmem>>, vector<1x1x180xf32>
    %303 = vector.shape_cast %302 : vector<1x1x180xf32> to vector<1x180xf32>
    %304 = vector.broadcast %303 : vector<1x180xf32> to vector<12x180xf32>
    %305 = arith.mulf %301, %304 : vector<12x180xf32>
    %306 = arith.addf %289, %305 : vector<12x180xf32>
    %c1_184 = arith.constant 1 : index
    %c17_185 = arith.constant 17 : index
    %c0_186 = arith.constant 0 : index
    %307 = vector.load %arg2[%c1_184, %c17_185, %c0_186] : memref<3x25x180xf32, #tpu.memory_space<vmem>>, vector<1x1x180xf32>
    %308 = vector.shape_cast %307 : vector<1x1x180xf32> to vector<1x180xf32>
    %309 = vector.broadcast %308 : vector<1x180xf32> to vector<12x180xf32>
    %310 = arith.mulf %301, %309 : vector<12x180xf32>
    %311 = arith.addf %294, %310 : vector<12x180xf32>
    %c2_187 = arith.constant 2 : index
    %c17_188 = arith.constant 17 : index
    %c0_189 = arith.constant 0 : index
    %312 = vector.load %arg2[%c2_187, %c17_188, %c0_189] : memref<3x25x180xf32, #tpu.memory_space<vmem>>, vector<1x1x180xf32>
    %313 = vector.shape_cast %312 : vector<1x1x180xf32> to vector<1x180xf32>
    %314 = vector.broadcast %313 : vector<1x180xf32> to vector<12x180xf32>
    %315 = arith.mulf %301, %314 : vector<12x180xf32>
    %316 = arith.addf %299, %315 : vector<12x180xf32>
    %c3_190 = arith.constant 3 : index
    %c3_191 = arith.constant 3 : index
    %317 = vector.load %arg5[%c3_190, %c3_191] : memref<16x40xf32, #tpu.memory_space<vmem>>, vector<12x36xf32>
    %318 = tpu.concatenate %317, %317, %317, %317, %317 in 1 : vector<12x36xf32>, vector<12x36xf32>, vector<12x36xf32>, vector<12x36xf32>, vector<12x36xf32> -> vector<12x180xf32>
    %c0_192 = arith.constant 0 : index
    %c18 = arith.constant 18 : index
    %c0_193 = arith.constant 0 : index
    %319 = vector.load %arg2[%c0_192, %c18, %c0_193] : memref<3x25x180xf32, #tpu.memory_space<vmem>>, vector<1x1x180xf32>
    %320 = vector.shape_cast %319 : vector<1x1x180xf32> to vector<1x180xf32>
    %321 = vector.broadcast %320 : vector<1x180xf32> to vector<12x180xf32>
    %322 = arith.mulf %318, %321 : vector<12x180xf32>
    %323 = arith.addf %306, %322 : vector<12x180xf32>
    %c1_194 = arith.constant 1 : index
    %c18_195 = arith.constant 18 : index
    %c0_196 = arith.constant 0 : index
    %324 = vector.load %arg2[%c1_194, %c18_195, %c0_196] : memref<3x25x180xf32, #tpu.memory_space<vmem>>, vector<1x1x180xf32>
    %325 = vector.shape_cast %324 : vector<1x1x180xf32> to vector<1x180xf32>
    %326 = vector.broadcast %325 : vector<1x180xf32> to vector<12x180xf32>
    %327 = arith.mulf %318, %326 : vector<12x180xf32>
    %328 = arith.addf %311, %327 : vector<12x180xf32>
    %c2_197 = arith.constant 2 : index
    %c18_198 = arith.constant 18 : index
    %c0_199 = arith.constant 0 : index
    %329 = vector.load %arg2[%c2_197, %c18_198, %c0_199] : memref<3x25x180xf32, #tpu.memory_space<vmem>>, vector<1x1x180xf32>
    %330 = vector.shape_cast %329 : vector<1x1x180xf32> to vector<1x180xf32>
    %331 = vector.broadcast %330 : vector<1x180xf32> to vector<12x180xf32>
    %332 = arith.mulf %318, %331 : vector<12x180xf32>
    %333 = arith.addf %316, %332 : vector<12x180xf32>
    %c3_200 = arith.constant 3 : index
    %c4_201 = arith.constant 4 : index
    %334 = vector.load %arg5[%c3_200, %c4_201] : memref<16x40xf32, #tpu.memory_space<vmem>>, vector<12x36xf32>
    %335 = tpu.concatenate %334, %334, %334, %334, %334 in 1 : vector<12x36xf32>, vector<12x36xf32>, vector<12x36xf32>, vector<12x36xf32>, vector<12x36xf32> -> vector<12x180xf32>
    %c0_202 = arith.constant 0 : index
    %c19 = arith.constant 19 : index
    %c0_203 = arith.constant 0 : index
    %336 = vector.load %arg2[%c0_202, %c19, %c0_203] : memref<3x25x180xf32, #tpu.memory_space<vmem>>, vector<1x1x180xf32>
    %337 = vector.shape_cast %336 : vector<1x1x180xf32> to vector<1x180xf32>
    %338 = vector.broadcast %337 : vector<1x180xf32> to vector<12x180xf32>
    %339 = arith.mulf %335, %338 : vector<12x180xf32>
    %340 = arith.addf %323, %339 : vector<12x180xf32>
    %c1_204 = arith.constant 1 : index
    %c19_205 = arith.constant 19 : index
    %c0_206 = arith.constant 0 : index
    %341 = vector.load %arg2[%c1_204, %c19_205, %c0_206] : memref<3x25x180xf32, #tpu.memory_space<vmem>>, vector<1x1x180xf32>
    %342 = vector.shape_cast %341 : vector<1x1x180xf32> to vector<1x180xf32>
    %343 = vector.broadcast %342 : vector<1x180xf32> to vector<12x180xf32>
    %344 = arith.mulf %335, %343 : vector<12x180xf32>
    %345 = arith.addf %328, %344 : vector<12x180xf32>
    %c2_207 = arith.constant 2 : index
    %c19_208 = arith.constant 19 : index
    %c0_209 = arith.constant 0 : index
    %346 = vector.load %arg2[%c2_207, %c19_208, %c0_209] : memref<3x25x180xf32, #tpu.memory_space<vmem>>, vector<1x1x180xf32>
    %347 = vector.shape_cast %346 : vector<1x1x180xf32> to vector<1x180xf32>
    %348 = vector.broadcast %347 : vector<1x180xf32> to vector<12x180xf32>
    %349 = arith.mulf %335, %348 : vector<12x180xf32>
    %350 = arith.addf %333, %349 : vector<12x180xf32>
    %c4_210 = arith.constant 4 : index
    %c0_211 = arith.constant 0 : index
    %351 = vector.load %arg5[%c4_210, %c0_211] : memref<16x40xf32, #tpu.memory_space<vmem>>, vector<12x36xf32>
    %352 = tpu.concatenate %351, %351, %351, %351, %351 in 1 : vector<12x36xf32>, vector<12x36xf32>, vector<12x36xf32>, vector<12x36xf32>, vector<12x36xf32> -> vector<12x180xf32>
    %c0_212 = arith.constant 0 : index
    %c20 = arith.constant 20 : index
    %c0_213 = arith.constant 0 : index
    %353 = vector.load %arg2[%c0_212, %c20, %c0_213] : memref<3x25x180xf32, #tpu.memory_space<vmem>>, vector<1x1x180xf32>
    %354 = vector.shape_cast %353 : vector<1x1x180xf32> to vector<1x180xf32>
    %355 = vector.broadcast %354 : vector<1x180xf32> to vector<12x180xf32>
    %356 = arith.mulf %352, %355 : vector<12x180xf32>
    %357 = arith.addf %340, %356 : vector<12x180xf32>
    %c1_214 = arith.constant 1 : index
    %c20_215 = arith.constant 20 : index
    %c0_216 = arith.constant 0 : index
    %358 = vector.load %arg2[%c1_214, %c20_215, %c0_216] : memref<3x25x180xf32, #tpu.memory_space<vmem>>, vector<1x1x180xf32>
    %359 = vector.shape_cast %358 : vector<1x1x180xf32> to vector<1x180xf32>
    %360 = vector.broadcast %359 : vector<1x180xf32> to vector<12x180xf32>
    %361 = arith.mulf %352, %360 : vector<12x180xf32>
    %362 = arith.addf %345, %361 : vector<12x180xf32>
    %c2_217 = arith.constant 2 : index
    %c20_218 = arith.constant 20 : index
    %c0_219 = arith.constant 0 : index
    %363 = vector.load %arg2[%c2_217, %c20_218, %c0_219] : memref<3x25x180xf32, #tpu.memory_space<vmem>>, vector<1x1x180xf32>
    %364 = vector.shape_cast %363 : vector<1x1x180xf32> to vector<1x180xf32>
    %365 = vector.broadcast %364 : vector<1x180xf32> to vector<12x180xf32>
    %366 = arith.mulf %352, %365 : vector<12x180xf32>
    %367 = arith.addf %350, %366 : vector<12x180xf32>
    %c4_220 = arith.constant 4 : index
    %c1_221 = arith.constant 1 : index
    %368 = vector.load %arg5[%c4_220, %c1_221] : memref<16x40xf32, #tpu.memory_space<vmem>>, vector<12x36xf32>
    %369 = tpu.concatenate %368, %368, %368, %368, %368 in 1 : vector<12x36xf32>, vector<12x36xf32>, vector<12x36xf32>, vector<12x36xf32>, vector<12x36xf32> -> vector<12x180xf32>
    %c0_222 = arith.constant 0 : index
    %c21 = arith.constant 21 : index
    %c0_223 = arith.constant 0 : index
    %370 = vector.load %arg2[%c0_222, %c21, %c0_223] : memref<3x25x180xf32, #tpu.memory_space<vmem>>, vector<1x1x180xf32>
    %371 = vector.shape_cast %370 : vector<1x1x180xf32> to vector<1x180xf32>
    %372 = vector.broadcast %371 : vector<1x180xf32> to vector<12x180xf32>
    %373 = arith.mulf %369, %372 : vector<12x180xf32>
    %374 = arith.addf %357, %373 : vector<12x180xf32>
    %c1_224 = arith.constant 1 : index
    %c21_225 = arith.constant 21 : index
    %c0_226 = arith.constant 0 : index
    %375 = vector.load %arg2[%c1_224, %c21_225, %c0_226] : memref<3x25x180xf32, #tpu.memory_space<vmem>>, vector<1x1x180xf32>
    %376 = vector.shape_cast %375 : vector<1x1x180xf32> to vector<1x180xf32>
    %377 = vector.broadcast %376 : vector<1x180xf32> to vector<12x180xf32>
    %378 = arith.mulf %369, %377 : vector<12x180xf32>
    %379 = arith.addf %362, %378 : vector<12x180xf32>
    %c2_227 = arith.constant 2 : index
    %c21_228 = arith.constant 21 : index
    %c0_229 = arith.constant 0 : index
    %380 = vector.load %arg2[%c2_227, %c21_228, %c0_229] : memref<3x25x180xf32, #tpu.memory_space<vmem>>, vector<1x1x180xf32>
    %381 = vector.shape_cast %380 : vector<1x1x180xf32> to vector<1x180xf32>
    %382 = vector.broadcast %381 : vector<1x180xf32> to vector<12x180xf32>
    %383 = arith.mulf %369, %382 : vector<12x180xf32>
    %384 = arith.addf %367, %383 : vector<12x180xf32>
    %c4_230 = arith.constant 4 : index
    %c2_231 = arith.constant 2 : index
    %385 = vector.load %arg5[%c4_230, %c2_231] : memref<16x40xf32, #tpu.memory_space<vmem>>, vector<12x36xf32>
    %386 = tpu.concatenate %385, %385, %385, %385, %385 in 1 : vector<12x36xf32>, vector<12x36xf32>, vector<12x36xf32>, vector<12x36xf32>, vector<12x36xf32> -> vector<12x180xf32>
    %c0_232 = arith.constant 0 : index
    %c22 = arith.constant 22 : index
    %c0_233 = arith.constant 0 : index
    %387 = vector.load %arg2[%c0_232, %c22, %c0_233] : memref<3x25x180xf32, #tpu.memory_space<vmem>>, vector<1x1x180xf32>
    %388 = vector.shape_cast %387 : vector<1x1x180xf32> to vector<1x180xf32>
    %389 = vector.broadcast %388 : vector<1x180xf32> to vector<12x180xf32>
    %390 = arith.mulf %386, %389 : vector<12x180xf32>
    %391 = arith.addf %374, %390 : vector<12x180xf32>
    %c1_234 = arith.constant 1 : index
    %c22_235 = arith.constant 22 : index
    %c0_236 = arith.constant 0 : index
    %392 = vector.load %arg2[%c1_234, %c22_235, %c0_236] : memref<3x25x180xf32, #tpu.memory_space<vmem>>, vector<1x1x180xf32>
    %393 = vector.shape_cast %392 : vector<1x1x180xf32> to vector<1x180xf32>
    %394 = vector.broadcast %393 : vector<1x180xf32> to vector<12x180xf32>
    %395 = arith.mulf %386, %394 : vector<12x180xf32>
    %396 = arith.addf %379, %395 : vector<12x180xf32>
    %c2_237 = arith.constant 2 : index
    %c22_238 = arith.constant 22 : index
    %c0_239 = arith.constant 0 : index
    %397 = vector.load %arg2[%c2_237, %c22_238, %c0_239] : memref<3x25x180xf32, #tpu.memory_space<vmem>>, vector<1x1x180xf32>
    %398 = vector.shape_cast %397 : vector<1x1x180xf32> to vector<1x180xf32>
    %399 = vector.broadcast %398 : vector<1x180xf32> to vector<12x180xf32>
    %400 = arith.mulf %386, %399 : vector<12x180xf32>
    %401 = arith.addf %384, %400 : vector<12x180xf32>
    %c4_240 = arith.constant 4 : index
    %c3_241 = arith.constant 3 : index
    %402 = vector.load %arg5[%c4_240, %c3_241] : memref<16x40xf32, #tpu.memory_space<vmem>>, vector<12x36xf32>
    %403 = tpu.concatenate %402, %402, %402, %402, %402 in 1 : vector<12x36xf32>, vector<12x36xf32>, vector<12x36xf32>, vector<12x36xf32>, vector<12x36xf32> -> vector<12x180xf32>
    %c0_242 = arith.constant 0 : index
    %c23 = arith.constant 23 : index
    %c0_243 = arith.constant 0 : index
    %404 = vector.load %arg2[%c0_242, %c23, %c0_243] : memref<3x25x180xf32, #tpu.memory_space<vmem>>, vector<1x1x180xf32>
    %405 = vector.shape_cast %404 : vector<1x1x180xf32> to vector<1x180xf32>
    %406 = vector.broadcast %405 : vector<1x180xf32> to vector<12x180xf32>
    %407 = arith.mulf %403, %406 : vector<12x180xf32>
    %408 = arith.addf %391, %407 : vector<12x180xf32>
    %c1_244 = arith.constant 1 : index
    %c23_245 = arith.constant 23 : index
    %c0_246 = arith.constant 0 : index
    %409 = vector.load %arg2[%c1_244, %c23_245, %c0_246] : memref<3x25x180xf32, #tpu.memory_space<vmem>>, vector<1x1x180xf32>
    %410 = vector.shape_cast %409 : vector<1x1x180xf32> to vector<1x180xf32>
    %411 = vector.broadcast %410 : vector<1x180xf32> to vector<12x180xf32>
    %412 = arith.mulf %403, %411 : vector<12x180xf32>
    %413 = arith.addf %396, %412 : vector<12x180xf32>
    %c2_247 = arith.constant 2 : index
    %c23_248 = arith.constant 23 : index
    %c0_249 = arith.constant 0 : index
    %414 = vector.load %arg2[%c2_247, %c23_248, %c0_249] : memref<3x25x180xf32, #tpu.memory_space<vmem>>, vector<1x1x180xf32>
    %415 = vector.shape_cast %414 : vector<1x1x180xf32> to vector<1x180xf32>
    %416 = vector.broadcast %415 : vector<1x180xf32> to vector<12x180xf32>
    %417 = arith.mulf %403, %416 : vector<12x180xf32>
    %418 = arith.addf %401, %417 : vector<12x180xf32>
    %c4_250 = arith.constant 4 : index
    %c4_251 = arith.constant 4 : index
    %419 = vector.load %arg5[%c4_250, %c4_251] : memref<16x40xf32, #tpu.memory_space<vmem>>, vector<12x36xf32>
    %420 = tpu.concatenate %419, %419, %419, %419, %419 in 1 : vector<12x36xf32>, vector<12x36xf32>, vector<12x36xf32>, vector<12x36xf32>, vector<12x36xf32> -> vector<12x180xf32>
    %c0_252 = arith.constant 0 : index
    %c24 = arith.constant 24 : index
    %c0_253 = arith.constant 0 : index
    %421 = vector.load %arg2[%c0_252, %c24, %c0_253] : memref<3x25x180xf32, #tpu.memory_space<vmem>>, vector<1x1x180xf32>
    %422 = vector.shape_cast %421 : vector<1x1x180xf32> to vector<1x180xf32>
    %423 = vector.broadcast %422 : vector<1x180xf32> to vector<12x180xf32>
    %424 = arith.mulf %420, %423 : vector<12x180xf32>
    %425 = arith.addf %408, %424 : vector<12x180xf32>
    %c1_254 = arith.constant 1 : index
    %c24_255 = arith.constant 24 : index
    %c0_256 = arith.constant 0 : index
    %426 = vector.load %arg2[%c1_254, %c24_255, %c0_256] : memref<3x25x180xf32, #tpu.memory_space<vmem>>, vector<1x1x180xf32>
    %427 = vector.shape_cast %426 : vector<1x1x180xf32> to vector<1x180xf32>
    %428 = vector.broadcast %427 : vector<1x180xf32> to vector<12x180xf32>
    %429 = arith.mulf %420, %428 : vector<12x180xf32>
    %430 = arith.addf %413, %429 : vector<12x180xf32>
    %c2_257 = arith.constant 2 : index
    %c24_258 = arith.constant 24 : index
    %c0_259 = arith.constant 0 : index
    %431 = vector.load %arg2[%c2_257, %c24_258, %c0_259] : memref<3x25x180xf32, #tpu.memory_space<vmem>>, vector<1x1x180xf32>
    %432 = vector.shape_cast %431 : vector<1x1x180xf32> to vector<1x180xf32>
    %433 = vector.broadcast %432 : vector<1x180xf32> to vector<12x180xf32>
    %434 = arith.mulf %420, %433 : vector<12x180xf32>
    %435 = arith.addf %418, %434 : vector<12x180xf32>
    %436 = arith.negf %425 : vector<12x180xf32>
    %437 = math.exp %436 : vector<12x180xf32>
    %cst_260 = arith.constant 1.000000e+00 : f32
    %438 = vector.broadcast %cst_260 : f32 to vector<12x180xf32>
    %439 = arith.addf %438, %437 : vector<12x180xf32>
    %440 = arith.divf %438, %439 : vector<12x180xf32>
    %c0_261 = arith.constant 0 : index
    %c0_262 = arith.constant 0 : index
    %c0_263 = arith.constant 0 : index
    %c0_264 = arith.constant 0 : index
    %441 = vector.load %arg4[%c0_261, %c0_262, %c0_263, %c0_264] : memref<2x3x12x180xf32, #tpu.memory_space<vmem>>, vector<1x1x12x180xf32>
    %442 = vector.shape_cast %441 : vector<1x1x12x180xf32> to vector<12x180xf32>
    %443 = vector.shape_cast %440 : vector<12x180xf32> to vector<1x1x12x180xf32>
    tpu.vector_store %arg4[%c0_261, %c0_262, %c0_263, %c0_264], %443 {strides = array<i32>} : memref<2x3x12x180xf32, #tpu.memory_space<vmem>>, vector<1x1x12x180xf32>,
    %444 = arith.negf %430 : vector<12x180xf32>
    %445 = math.exp %444 : vector<12x180xf32>
    %cst_265 = arith.constant 1.000000e+00 : f32
    %446 = vector.broadcast %cst_265 : f32 to vector<12x180xf32>
    %447 = arith.addf %446, %445 : vector<12x180xf32>
    %448 = arith.divf %446, %447 : vector<12x180xf32>
    %c0_266 = arith.constant 0 : index
    %c1_267 = arith.constant 1 : index
    %c0_268 = arith.constant 0 : index
    %c0_269 = arith.constant 0 : index
    %449 = vector.load %arg4[%c0_266, %c1_267, %c0_268, %c0_269] : memref<2x3x12x180xf32, #tpu.memory_space<vmem>>, vector<1x1x12x180xf32>
    %450 = vector.shape_cast %449 : vector<1x1x12x180xf32> to vector<12x180xf32>
    %451 = vector.shape_cast %448 : vector<12x180xf32> to vector<1x1x12x180xf32>
    tpu.vector_store %arg4[%c0_266, %c1_267, %c0_268, %c0_269], %451 {strides = array<i32>} : memref<2x3x12x180xf32, #tpu.memory_space<vmem>>, vector<1x1x12x180xf32>,
    %452 = arith.negf %435 : vector<12x180xf32>
    %453 = math.exp %452 : vector<12x180xf32>
    %cst_270 = arith.constant 1.000000e+00 : f32
    %454 = vector.broadcast %cst_270 : f32 to vector<12x180xf32>
    %455 = arith.addf %454, %453 : vector<12x180xf32>
    %456 = arith.divf %454, %455 : vector<12x180xf32>
    %c0_271 = arith.constant 0 : index
    %c2_272 = arith.constant 2 : index
    %c0_273 = arith.constant 0 : index
    %c0_274 = arith.constant 0 : index
    %457 = vector.load %arg4[%c0_271, %c2_272, %c0_273, %c0_274] : memref<2x3x12x180xf32, #tpu.memory_space<vmem>>, vector<1x1x12x180xf32>
    %458 = vector.shape_cast %457 : vector<1x1x12x180xf32> to vector<12x180xf32>
    %459 = vector.shape_cast %456 : vector<12x180xf32> to vector<1x1x12x180xf32>
    tpu.vector_store %arg4[%c0_271, %c2_272, %c0_273, %c0_274], %459 {strides = array<i32>} : memref<2x3x12x180xf32, #tpu.memory_space<vmem>>, vector<1x1x12x180xf32>,
    %c1_275 = arith.constant 1 : index
    %c0_276 = arith.constant 0 : index
    %c0_277 = arith.constant 0 : index
    %460 = vector.load %arg1[%c1_275, %c0_276, %c0_277] : memref<2x8x32xf32, #tpu.memory_space<vmem>>, vector<1x8x32xf32>
    %461 = vector.shape_cast %460 : vector<1x8x32xf32> to vector<8x32xf32>
    %c4_278 = arith.constant 4 : index
    %c4_279 = arith.constant 4 : index
    %462 = vector.load %arg5[%c4_278, %c4_279] : memref<16x40xf32, #tpu.memory_space<vmem>>, vector<8x32xf32>
    tpu.vector_store %arg5[%c4_278, %c4_279], %461 {strides = array<i32>} : memref<16x40xf32, #tpu.memory_space<vmem>>, vector<8x32xf32>,
    %c0_280 = arith.constant 0 : index
    %463 = memref.load %arg3[%c0_280] : memref<3xf32, #tpu.memory_space<smem>>
    %464 = vector.broadcast %463 : f32 to vector<12x180xf32>
    %c1_281 = arith.constant 1 : index
    %465 = memref.load %arg3[%c1_281] : memref<3xf32, #tpu.memory_space<smem>>
    %466 = vector.broadcast %465 : f32 to vector<12x180xf32>
    %c2_282 = arith.constant 2 : index
    %467 = memref.load %arg3[%c2_282] : memref<3xf32, #tpu.memory_space<smem>>
    %468 = vector.broadcast %467 : f32 to vector<12x180xf32>
    %c0_283 = arith.constant 0 : index
    %c0_284 = arith.constant 0 : index
    %469 = vector.load %arg5[%c0_283, %c0_284] : memref<16x40xf32, #tpu.memory_space<vmem>>, vector<12x36xf32>
    %470 = tpu.concatenate %469, %469, %469, %469, %469 in 1 : vector<12x36xf32>, vector<12x36xf32>, vector<12x36xf32>, vector<12x36xf32>, vector<12x36xf32> -> vector<12x180xf32>
    %c0_285 = arith.constant 0 : index
    %c0_286 = arith.constant 0 : index
    %c0_287 = arith.constant 0 : index
    %471 = vector.load %arg2[%c0_285, %c0_286, %c0_287] : memref<3x25x180xf32, #tpu.memory_space<vmem>>, vector<1x1x180xf32>
    %472 = vector.shape_cast %471 : vector<1x1x180xf32> to vector<1x180xf32>
    %473 = vector.broadcast %472 : vector<1x180xf32> to vector<12x180xf32>
    %474 = arith.mulf %470, %473 : vector<12x180xf32>
    %475 = arith.addf %464, %474 : vector<12x180xf32>
    %c1_288 = arith.constant 1 : index
    %c0_289 = arith.constant 0 : index
    %c0_290 = arith.constant 0 : index
    %476 = vector.load %arg2[%c1_288, %c0_289, %c0_290] : memref<3x25x180xf32, #tpu.memory_space<vmem>>, vector<1x1x180xf32>
    %477 = vector.shape_cast %476 : vector<1x1x180xf32> to vector<1x180xf32>
    %478 = vector.broadcast %477 : vector<1x180xf32> to vector<12x180xf32>
    %479 = arith.mulf %470, %478 : vector<12x180xf32>
    %480 = arith.addf %466, %479 : vector<12x180xf32>
    %c2_291 = arith.constant 2 : index
    %c0_292 = arith.constant 0 : index
    %c0_293 = arith.constant 0 : index
    %481 = vector.load %arg2[%c2_291, %c0_292, %c0_293] : memref<3x25x180xf32, #tpu.memory_space<vmem>>, vector<1x1x180xf32>
    %482 = vector.shape_cast %481 : vector<1x1x180xf32> to vector<1x180xf32>
    %483 = vector.broadcast %482 : vector<1x180xf32> to vector<12x180xf32>
    %484 = arith.mulf %470, %483 : vector<12x180xf32>
    %485 = arith.addf %468, %484 : vector<12x180xf32>
    %c0_294 = arith.constant 0 : index
    %c1_295 = arith.constant 1 : index
    %486 = vector.load %arg5[%c0_294, %c1_295] : memref<16x40xf32, #tpu.memory_space<vmem>>, vector<12x36xf32>
    %487 = tpu.concatenate %486, %486, %486, %486, %486 in 1 : vector<12x36xf32>, vector<12x36xf32>, vector<12x36xf32>, vector<12x36xf32>, vector<12x36xf32> -> vector<12x180xf32>
    %c0_296 = arith.constant 0 : index
    %c1_297 = arith.constant 1 : index
    %c0_298 = arith.constant 0 : index
    %488 = vector.load %arg2[%c0_296, %c1_297, %c0_298] : memref<3x25x180xf32, #tpu.memory_space<vmem>>, vector<1x1x180xf32>
    %489 = vector.shape_cast %488 : vector<1x1x180xf32> to vector<1x180xf32>
    %490 = vector.broadcast %489 : vector<1x180xf32> to vector<12x180xf32>
    %491 = arith.mulf %487, %490 : vector<12x180xf32>
    %492 = arith.addf %475, %491 : vector<12x180xf32>
    %c1_299 = arith.constant 1 : index
    %c1_300 = arith.constant 1 : index
    %c0_301 = arith.constant 0 : index
    %493 = vector.load %arg2[%c1_299, %c1_300, %c0_301] : memref<3x25x180xf32, #tpu.memory_space<vmem>>, vector<1x1x180xf32>
    %494 = vector.shape_cast %493 : vector<1x1x180xf32> to vector<1x180xf32>
    %495 = vector.broadcast %494 : vector<1x180xf32> to vector<12x180xf32>
    %496 = arith.mulf %487, %495 : vector<12x180xf32>
    %497 = arith.addf %480, %496 : vector<12x180xf32>
    %c2_302 = arith.constant 2 : index
    %c1_303 = arith.constant 1 : index
    %c0_304 = arith.constant 0 : index
    %498 = vector.load %arg2[%c2_302, %c1_303, %c0_304] : memref<3x25x180xf32, #tpu.memory_space<vmem>>, vector<1x1x180xf32>
    %499 = vector.shape_cast %498 : vector<1x1x180xf32> to vector<1x180xf32>
    %500 = vector.broadcast %499 : vector<1x180xf32> to vector<12x180xf32>
    %501 = arith.mulf %487, %500 : vector<12x180xf32>
    %502 = arith.addf %485, %501 : vector<12x180xf32>
    %c0_305 = arith.constant 0 : index
    %c2_306 = arith.constant 2 : index
    %503 = vector.load %arg5[%c0_305, %c2_306] : memref<16x40xf32, #tpu.memory_space<vmem>>, vector<12x36xf32>
    %504 = tpu.concatenate %503, %503, %503, %503, %503 in 1 : vector<12x36xf32>, vector<12x36xf32>, vector<12x36xf32>, vector<12x36xf32>, vector<12x36xf32> -> vector<12x180xf32>
    %c0_307 = arith.constant 0 : index
    %c2_308 = arith.constant 2 : index
    %c0_309 = arith.constant 0 : index
    %505 = vector.load %arg2[%c0_307, %c2_308, %c0_309] : memref<3x25x180xf32, #tpu.memory_space<vmem>>, vector<1x1x180xf32>
    %506 = vector.shape_cast %505 : vector<1x1x180xf32> to vector<1x180xf32>
    %507 = vector.broadcast %506 : vector<1x180xf32> to vector<12x180xf32>
    %508 = arith.mulf %504, %507 : vector<12x180xf32>
    %509 = arith.addf %492, %508 : vector<12x180xf32>
    %c1_310 = arith.constant 1 : index
    %c2_311 = arith.constant 2 : index
    %c0_312 = arith.constant 0 : index
    %510 = vector.load %arg2[%c1_310, %c2_311, %c0_312] : memref<3x25x180xf32, #tpu.memory_space<vmem>>, vector<1x1x180xf32>
    %511 = vector.shape_cast %510 : vector<1x1x180xf32> to vector<1x180xf32>
    %512 = vector.broadcast %511 : vector<1x180xf32> to vector<12x180xf32>
    %513 = arith.mulf %504, %512 : vector<12x180xf32>
    %514 = arith.addf %497, %513 : vector<12x180xf32>
    %c2_313 = arith.constant 2 : index
    %c2_314 = arith.constant 2 : index
    %c0_315 = arith.constant 0 : index
    %515 = vector.load %arg2[%c2_313, %c2_314, %c0_315] : memref<3x25x180xf32, #tpu.memory_space<vmem>>, vector<1x1x180xf32>
    %516 = vector.shape_cast %515 : vector<1x1x180xf32> to vector<1x180xf32>
    %517 = vector.broadcast %516 : vector<1x180xf32> to vector<12x180xf32>
    %518 = arith.mulf %504, %517 : vector<12x180xf32>
    %519 = arith.addf %502, %518 : vector<12x180xf32>
    %c0_316 = arith.constant 0 : index
    %c3_317 = arith.constant 3 : index
    %520 = vector.load %arg5[%c0_316, %c3_317] : memref<16x40xf32, #tpu.memory_space<vmem>>, vector<12x36xf32>
    %521 = tpu.concatenate %520, %520, %520, %520, %520 in 1 : vector<12x36xf32>, vector<12x36xf32>, vector<12x36xf32>, vector<12x36xf32>, vector<12x36xf32> -> vector<12x180xf32>
    %c0_318 = arith.constant 0 : index
    %c3_319 = arith.constant 3 : index
    %c0_320 = arith.constant 0 : index
    %522 = vector.load %arg2[%c0_318, %c3_319, %c0_320] : memref<3x25x180xf32, #tpu.memory_space<vmem>>, vector<1x1x180xf32>
    %523 = vector.shape_cast %522 : vector<1x1x180xf32> to vector<1x180xf32>
    %524 = vector.broadcast %523 : vector<1x180xf32> to vector<12x180xf32>
    %525 = arith.mulf %521, %524 : vector<12x180xf32>
    %526 = arith.addf %509, %525 : vector<12x180xf32>
    %c1_321 = arith.constant 1 : index
    %c3_322 = arith.constant 3 : index
    %c0_323 = arith.constant 0 : index
    %527 = vector.load %arg2[%c1_321, %c3_322, %c0_323] : memref<3x25x180xf32, #tpu.memory_space<vmem>>, vector<1x1x180xf32>
    %528 = vector.shape_cast %527 : vector<1x1x180xf32> to vector<1x180xf32>
    %529 = vector.broadcast %528 : vector<1x180xf32> to vector<12x180xf32>
    %530 = arith.mulf %521, %529 : vector<12x180xf32>
    %531 = arith.addf %514, %530 : vector<12x180xf32>
    %c2_324 = arith.constant 2 : index
    %c3_325 = arith.constant 3 : index
    %c0_326 = arith.constant 0 : index
    %532 = vector.load %arg2[%c2_324, %c3_325, %c0_326] : memref<3x25x180xf32, #tpu.memory_space<vmem>>, vector<1x1x180xf32>
    %533 = vector.shape_cast %532 : vector<1x1x180xf32> to vector<1x180xf32>
    %534 = vector.broadcast %533 : vector<1x180xf32> to vector<12x180xf32>
    %535 = arith.mulf %521, %534 : vector<12x180xf32>
    %536 = arith.addf %519, %535 : vector<12x180xf32>
    %c0_327 = arith.constant 0 : index
    %c4_328 = arith.constant 4 : index
    %537 = vector.load %arg5[%c0_327, %c4_328] : memref<16x40xf32, #tpu.memory_space<vmem>>, vector<12x36xf32>
    %538 = tpu.concatenate %537, %537, %537, %537, %537 in 1 : vector<12x36xf32>, vector<12x36xf32>, vector<12x36xf32>, vector<12x36xf32>, vector<12x36xf32> -> vector<12x180xf32>
    %c0_329 = arith.constant 0 : index
    %c4_330 = arith.constant 4 : index
    %c0_331 = arith.constant 0 : index
    %539 = vector.load %arg2[%c0_329, %c4_330, %c0_331] : memref<3x25x180xf32, #tpu.memory_space<vmem>>, vector<1x1x180xf32>
    %540 = vector.shape_cast %539 : vector<1x1x180xf32> to vector<1x180xf32>
    %541 = vector.broadcast %540 : vector<1x180xf32> to vector<12x180xf32>
    %542 = arith.mulf %538, %541 : vector<12x180xf32>
    %543 = arith.addf %526, %542 : vector<12x180xf32>
    %c1_332 = arith.constant 1 : index
    %c4_333 = arith.constant 4 : index
    %c0_334 = arith.constant 0 : index
    %544 = vector.load %arg2[%c1_332, %c4_333, %c0_334] : memref<3x25x180xf32, #tpu.memory_space<vmem>>, vector<1x1x180xf32>
    %545 = vector.shape_cast %544 : vector<1x1x180xf32> to vector<1x180xf32>
    %546 = vector.broadcast %545 : vector<1x180xf32> to vector<12x180xf32>
    %547 = arith.mulf %538, %546 : vector<12x180xf32>
    %548 = arith.addf %531, %547 : vector<12x180xf32>
    %c2_335 = arith.constant 2 : index
    %c4_336 = arith.constant 4 : index
    %c0_337 = arith.constant 0 : index
    %549 = vector.load %arg2[%c2_335, %c4_336, %c0_337] : memref<3x25x180xf32, #tpu.memory_space<vmem>>, vector<1x1x180xf32>
    %550 = vector.shape_cast %549 : vector<1x1x180xf32> to vector<1x180xf32>
    %551 = vector.broadcast %550 : vector<1x180xf32> to vector<12x180xf32>
    %552 = arith.mulf %538, %551 : vector<12x180xf32>
    %553 = arith.addf %536, %552 : vector<12x180xf32>
    %c1_338 = arith.constant 1 : index
    %c0_339 = arith.constant 0 : index
    %554 = vector.load %arg5[%c1_338, %c0_339] : memref<16x40xf32, #tpu.memory_space<vmem>>, vector<12x36xf32>
    %555 = tpu.concatenate %554, %554, %554, %554, %554 in 1 : vector<12x36xf32>, vector<12x36xf32>, vector<12x36xf32>, vector<12x36xf32>, vector<12x36xf32> -> vector<12x180xf32>
    %c0_340 = arith.constant 0 : index
    %c5_341 = arith.constant 5 : index
    %c0_342 = arith.constant 0 : index
    %556 = vector.load %arg2[%c0_340, %c5_341, %c0_342] : memref<3x25x180xf32, #tpu.memory_space<vmem>>, vector<1x1x180xf32>
    %557 = vector.shape_cast %556 : vector<1x1x180xf32> to vector<1x180xf32>
    %558 = vector.broadcast %557 : vector<1x180xf32> to vector<12x180xf32>
    %559 = arith.mulf %555, %558 : vector<12x180xf32>
    %560 = arith.addf %543, %559 : vector<12x180xf32>
    %c1_343 = arith.constant 1 : index
    %c5_344 = arith.constant 5 : index
    %c0_345 = arith.constant 0 : index
    %561 = vector.load %arg2[%c1_343, %c5_344, %c0_345] : memref<3x25x180xf32, #tpu.memory_space<vmem>>, vector<1x1x180xf32>
    %562 = vector.shape_cast %561 : vector<1x1x180xf32> to vector<1x180xf32>
    %563 = vector.broadcast %562 : vector<1x180xf32> to vector<12x180xf32>
    %564 = arith.mulf %555, %563 : vector<12x180xf32>
    %565 = arith.addf %548, %564 : vector<12x180xf32>
    %c2_346 = arith.constant 2 : index
    %c5_347 = arith.constant 5 : index
    %c0_348 = arith.constant 0 : index
    %566 = vector.load %arg2[%c2_346, %c5_347, %c0_348] : memref<3x25x180xf32, #tpu.memory_space<vmem>>, vector<1x1x180xf32>
    %567 = vector.shape_cast %566 : vector<1x1x180xf32> to vector<1x180xf32>
    %568 = vector.broadcast %567 : vector<1x180xf32> to vector<12x180xf32>
    %569 = arith.mulf %555, %568 : vector<12x180xf32>
    %570 = arith.addf %553, %569 : vector<12x180xf32>
    %c1_349 = arith.constant 1 : index
    %c1_350 = arith.constant 1 : index
    %571 = vector.load %arg5[%c1_349, %c1_350] : memref<16x40xf32, #tpu.memory_space<vmem>>, vector<12x36xf32>
    %572 = tpu.concatenate %571, %571, %571, %571, %571 in 1 : vector<12x36xf32>, vector<12x36xf32>, vector<12x36xf32>, vector<12x36xf32>, vector<12x36xf32> -> vector<12x180xf32>
    %c0_351 = arith.constant 0 : index
    %c6_352 = arith.constant 6 : index
    %c0_353 = arith.constant 0 : index
    %573 = vector.load %arg2[%c0_351, %c6_352, %c0_353] : memref<3x25x180xf32, #tpu.memory_space<vmem>>, vector<1x1x180xf32>
    %574 = vector.shape_cast %573 : vector<1x1x180xf32> to vector<1x180xf32>
    %575 = vector.broadcast %574 : vector<1x180xf32> to vector<12x180xf32>
    %576 = arith.mulf %572, %575 : vector<12x180xf32>
    %577 = arith.addf %560, %576 : vector<12x180xf32>
    %c1_354 = arith.constant 1 : index
    %c6_355 = arith.constant 6 : index
    %c0_356 = arith.constant 0 : index
    %578 = vector.load %arg2[%c1_354, %c6_355, %c0_356] : memref<3x25x180xf32, #tpu.memory_space<vmem>>, vector<1x1x180xf32>
    %579 = vector.shape_cast %578 : vector<1x1x180xf32> to vector<1x180xf32>
    %580 = vector.broadcast %579 : vector<1x180xf32> to vector<12x180xf32>
    %581 = arith.mulf %572, %580 : vector<12x180xf32>
    %582 = arith.addf %565, %581 : vector<12x180xf32>
    %c2_357 = arith.constant 2 : index
    %c6_358 = arith.constant 6 : index
    %c0_359 = arith.constant 0 : index
    %583 = vector.load %arg2[%c2_357, %c6_358, %c0_359] : memref<3x25x180xf32, #tpu.memory_space<vmem>>, vector<1x1x180xf32>
    %584 = vector.shape_cast %583 : vector<1x1x180xf32> to vector<1x180xf32>
    %585 = vector.broadcast %584 : vector<1x180xf32> to vector<12x180xf32>
    %586 = arith.mulf %572, %585 : vector<12x180xf32>
    %587 = arith.addf %570, %586 : vector<12x180xf32>
    %c1_360 = arith.constant 1 : index
    %c2_361 = arith.constant 2 : index
    %588 = vector.load %arg5[%c1_360, %c2_361] : memref<16x40xf32, #tpu.memory_space<vmem>>, vector<12x36xf32>
    %589 = tpu.concatenate %588, %588, %588, %588, %588 in 1 : vector<12x36xf32>, vector<12x36xf32>, vector<12x36xf32>, vector<12x36xf32>, vector<12x36xf32> -> vector<12x180xf32>
    %c0_362 = arith.constant 0 : index
    %c7_363 = arith.constant 7 : index
    %c0_364 = arith.constant 0 : index
    %590 = vector.load %arg2[%c0_362, %c7_363, %c0_364] : memref<3x25x180xf32, #tpu.memory_space<vmem>>, vector<1x1x180xf32>
    %591 = vector.shape_cast %590 : vector<1x1x180xf32> to vector<1x180xf32>
    %592 = vector.broadcast %591 : vector<1x180xf32> to vector<12x180xf32>
    %593 = arith.mulf %589, %592 : vector<12x180xf32>
    %594 = arith.addf %577, %593 : vector<12x180xf32>
    %c1_365 = arith.constant 1 : index
    %c7_366 = arith.constant 7 : index
    %c0_367 = arith.constant 0 : index
    %595 = vector.load %arg2[%c1_365, %c7_366, %c0_367] : memref<3x25x180xf32, #tpu.memory_space<vmem>>, vector<1x1x180xf32>
    %596 = vector.shape_cast %595 : vector<1x1x180xf32> to vector<1x180xf32>
    %597 = vector.broadcast %596 : vector<1x180xf32> to vector<12x180xf32>
    %598 = arith.mulf %589, %597 : vector<12x180xf32>
    %599 = arith.addf %582, %598 : vector<12x180xf32>
    %c2_368 = arith.constant 2 : index
    %c7_369 = arith.constant 7 : index
    %c0_370 = arith.constant 0 : index
    %600 = vector.load %arg2[%c2_368, %c7_369, %c0_370] : memref<3x25x180xf32, #tpu.memory_space<vmem>>, vector<1x1x180xf32>
    %601 = vector.shape_cast %600 : vector<1x1x180xf32> to vector<1x180xf32>
    %602 = vector.broadcast %601 : vector<1x180xf32> to vector<12x180xf32>
    %603 = arith.mulf %589, %602 : vector<12x180xf32>
    %604 = arith.addf %587, %603 : vector<12x180xf32>
    %c1_371 = arith.constant 1 : index
    %c3_372 = arith.constant 3 : index
    %605 = vector.load %arg5[%c1_371, %c3_372] : memref<16x40xf32, #tpu.memory_space<vmem>>, vector<12x36xf32>
    %606 = tpu.concatenate %605, %605, %605, %605, %605 in 1 : vector<12x36xf32>, vector<12x36xf32>, vector<12x36xf32>, vector<12x36xf32>, vector<12x36xf32> -> vector<12x180xf32>
    %c0_373 = arith.constant 0 : index
    %c8_374 = arith.constant 8 : index
    %c0_375 = arith.constant 0 : index
    %607 = vector.load %arg2[%c0_373, %c8_374, %c0_375] : memref<3x25x180xf32, #tpu.memory_space<vmem>>, vector<1x1x180xf32>
    %608 = vector.shape_cast %607 : vector<1x1x180xf32> to vector<1x180xf32>
    %609 = vector.broadcast %608 : vector<1x180xf32> to vector<12x180xf32>
    %610 = arith.mulf %606, %609 : vector<12x180xf32>
    %611 = arith.addf %594, %610 : vector<12x180xf32>
    %c1_376 = arith.constant 1 : index
    %c8_377 = arith.constant 8 : index
    %c0_378 = arith.constant 0 : index
    %612 = vector.load %arg2[%c1_376, %c8_377, %c0_378] : memref<3x25x180xf32, #tpu.memory_space<vmem>>, vector<1x1x180xf32>
    %613 = vector.shape_cast %612 : vector<1x1x180xf32> to vector<1x180xf32>
    %614 = vector.broadcast %613 : vector<1x180xf32> to vector<12x180xf32>
    %615 = arith.mulf %606, %614 : vector<12x180xf32>
    %616 = arith.addf %599, %615 : vector<12x180xf32>
    %c2_379 = arith.constant 2 : index
    %c8_380 = arith.constant 8 : index
    %c0_381 = arith.constant 0 : index
    %617 = vector.load %arg2[%c2_379, %c8_380, %c0_381] : memref<3x25x180xf32, #tpu.memory_space<vmem>>, vector<1x1x180xf32>
    %618 = vector.shape_cast %617 : vector<1x1x180xf32> to vector<1x180xf32>
    %619 = vector.broadcast %618 : vector<1x180xf32> to vector<12x180xf32>
    %620 = arith.mulf %606, %619 : vector<12x180xf32>
    %621 = arith.addf %604, %620 : vector<12x180xf32>
    %c1_382 = arith.constant 1 : index
    %c4_383 = arith.constant 4 : index
    %622 = vector.load %arg5[%c1_382, %c4_383] : memref<16x40xf32, #tpu.memory_space<vmem>>, vector<12x36xf32>
    %623 = tpu.concatenate %622, %622, %622, %622, %622 in 1 : vector<12x36xf32>, vector<12x36xf32>, vector<12x36xf32>, vector<12x36xf32>, vector<12x36xf32> -> vector<12x180xf32>
    %c0_384 = arith.constant 0 : index
    %c9_385 = arith.constant 9 : index
    %c0_386 = arith.constant 0 : index
    %624 = vector.load %arg2[%c0_384, %c9_385, %c0_386] : memref<3x25x180xf32, #tpu.memory_space<vmem>>, vector<1x1x180xf32>
    %625 = vector.shape_cast %624 : vector<1x1x180xf32> to vector<1x180xf32>
    %626 = vector.broadcast %625 : vector<1x180xf32> to vector<12x180xf32>
    %627 = arith.mulf %623, %626 : vector<12x180xf32>
    %628 = arith.addf %611, %627 : vector<12x180xf32>
    %c1_387 = arith.constant 1 : index
    %c9_388 = arith.constant 9 : index
    %c0_389 = arith.constant 0 : index
    %629 = vector.load %arg2[%c1_387, %c9_388, %c0_389] : memref<3x25x180xf32, #tpu.memory_space<vmem>>, vector<1x1x180xf32>
    %630 = vector.shape_cast %629 : vector<1x1x180xf32> to vector<1x180xf32>
    %631 = vector.broadcast %630 : vector<1x180xf32> to vector<12x180xf32>
    %632 = arith.mulf %623, %631 : vector<12x180xf32>
    %633 = arith.addf %616, %632 : vector<12x180xf32>
    %c2_390 = arith.constant 2 : index
    %c9_391 = arith.constant 9 : index
    %c0_392 = arith.constant 0 : index
    %634 = vector.load %arg2[%c2_390, %c9_391, %c0_392] : memref<3x25x180xf32, #tpu.memory_space<vmem>>, vector<1x1x180xf32>
    %635 = vector.shape_cast %634 : vector<1x1x180xf32> to vector<1x180xf32>
    %636 = vector.broadcast %635 : vector<1x180xf32> to vector<12x180xf32>
    %637 = arith.mulf %623, %636 : vector<12x180xf32>
    %638 = arith.addf %621, %637 : vector<12x180xf32>
    %c2_393 = arith.constant 2 : index
    %c0_394 = arith.constant 0 : index
    %639 = vector.load %arg5[%c2_393, %c0_394] : memref<16x40xf32, #tpu.memory_space<vmem>>, vector<12x36xf32>
    %640 = tpu.concatenate %639, %639, %639, %639, %639 in 1 : vector<12x36xf32>, vector<12x36xf32>, vector<12x36xf32>, vector<12x36xf32>, vector<12x36xf32> -> vector<12x180xf32>
    %c0_395 = arith.constant 0 : index
    %c10_396 = arith.constant 10 : index
    %c0_397 = arith.constant 0 : index
    %641 = vector.load %arg2[%c0_395, %c10_396, %c0_397] : memref<3x25x180xf32, #tpu.memory_space<vmem>>, vector<1x1x180xf32>
    %642 = vector.shape_cast %641 : vector<1x1x180xf32> to vector<1x180xf32>
    %643 = vector.broadcast %642 : vector<1x180xf32> to vector<12x180xf32>
    %644 = arith.mulf %640, %643 : vector<12x180xf32>
    %645 = arith.addf %628, %644 : vector<12x180xf32>
    %c1_398 = arith.constant 1 : index
    %c10_399 = arith.constant 10 : index
    %c0_400 = arith.constant 0 : index
    %646 = vector.load %arg2[%c1_398, %c10_399, %c0_400] : memref<3x25x180xf32, #tpu.memory_space<vmem>>, vector<1x1x180xf32>
    %647 = vector.shape_cast %646 : vector<1x1x180xf32> to vector<1x180xf32>
    %648 = vector.broadcast %647 : vector<1x180xf32> to vector<12x180xf32>
    %649 = arith.mulf %640, %648 : vector<12x180xf32>
    %650 = arith.addf %633, %649 : vector<12x180xf32>
    %c2_401 = arith.constant 2 : index
    %c10_402 = arith.constant 10 : index
    %c0_403 = arith.constant 0 : index
    %651 = vector.load %arg2[%c2_401, %c10_402, %c0_403] : memref<3x25x180xf32, #tpu.memory_space<vmem>>, vector<1x1x180xf32>
    %652 = vector.shape_cast %651 : vector<1x1x180xf32> to vector<1x180xf32>
    %653 = vector.broadcast %652 : vector<1x180xf32> to vector<12x180xf32>
    %654 = arith.mulf %640, %653 : vector<12x180xf32>
    %655 = arith.addf %638, %654 : vector<12x180xf32>
    %c2_404 = arith.constant 2 : index
    %c1_405 = arith.constant 1 : index
    %656 = vector.load %arg5[%c2_404, %c1_405] : memref<16x40xf32, #tpu.memory_space<vmem>>, vector<12x36xf32>
    %657 = tpu.concatenate %656, %656, %656, %656, %656 in 1 : vector<12x36xf32>, vector<12x36xf32>, vector<12x36xf32>, vector<12x36xf32>, vector<12x36xf32> -> vector<12x180xf32>
    %c0_406 = arith.constant 0 : index
    %c11_407 = arith.constant 11 : index
    %c0_408 = arith.constant 0 : index
    %658 = vector.load %arg2[%c0_406, %c11_407, %c0_408] : memref<3x25x180xf32, #tpu.memory_space<vmem>>, vector<1x1x180xf32>
    %659 = vector.shape_cast %658 : vector<1x1x180xf32> to vector<1x180xf32>
    %660 = vector.broadcast %659 : vector<1x180xf32> to vector<12x180xf32>
    %661 = arith.mulf %657, %660 : vector<12x180xf32>
    %662 = arith.addf %645, %661 : vector<12x180xf32>
    %c1_409 = arith.constant 1 : index
    %c11_410 = arith.constant 11 : index
    %c0_411 = arith.constant 0 : index
    %663 = vector.load %arg2[%c1_409, %c11_410, %c0_411] : memref<3x25x180xf32, #tpu.memory_space<vmem>>, vector<1x1x180xf32>
    %664 = vector.shape_cast %663 : vector<1x1x180xf32> to vector<1x180xf32>
    %665 = vector.broadcast %664 : vector<1x180xf32> to vector<12x180xf32>
    %666 = arith.mulf %657, %665 : vector<12x180xf32>
    %667 = arith.addf %650, %666 : vector<12x180xf32>
    %c2_412 = arith.constant 2 : index
    %c11_413 = arith.constant 11 : index
    %c0_414 = arith.constant 0 : index
    %668 = vector.load %arg2[%c2_412, %c11_413, %c0_414] : memref<3x25x180xf32, #tpu.memory_space<vmem>>, vector<1x1x180xf32>
    %669 = vector.shape_cast %668 : vector<1x1x180xf32> to vector<1x180xf32>
    %670 = vector.broadcast %669 : vector<1x180xf32> to vector<12x180xf32>
    %671 = arith.mulf %657, %670 : vector<12x180xf32>
    %672 = arith.addf %655, %671 : vector<12x180xf32>
    %c2_415 = arith.constant 2 : index
    %c2_416 = arith.constant 2 : index
    %673 = vector.load %arg5[%c2_415, %c2_416] : memref<16x40xf32, #tpu.memory_space<vmem>>, vector<12x36xf32>
    %674 = tpu.concatenate %673, %673, %673, %673, %673 in 1 : vector<12x36xf32>, vector<12x36xf32>, vector<12x36xf32>, vector<12x36xf32>, vector<12x36xf32> -> vector<12x180xf32>
    %c0_417 = arith.constant 0 : index
    %c12_418 = arith.constant 12 : index
    %c0_419 = arith.constant 0 : index
    %675 = vector.load %arg2[%c0_417, %c12_418, %c0_419] : memref<3x25x180xf32, #tpu.memory_space<vmem>>, vector<1x1x180xf32>
    %676 = vector.shape_cast %675 : vector<1x1x180xf32> to vector<1x180xf32>
    %677 = vector.broadcast %676 : vector<1x180xf32> to vector<12x180xf32>
    %678 = arith.mulf %674, %677 : vector<12x180xf32>
    %679 = arith.addf %662, %678 : vector<12x180xf32>
    %c1_420 = arith.constant 1 : index
    %c12_421 = arith.constant 12 : index
    %c0_422 = arith.constant 0 : index
    %680 = vector.load %arg2[%c1_420, %c12_421, %c0_422] : memref<3x25x180xf32, #tpu.memory_space<vmem>>, vector<1x1x180xf32>
    %681 = vector.shape_cast %680 : vector<1x1x180xf32> to vector<1x180xf32>
    %682 = vector.broadcast %681 : vector<1x180xf32> to vector<12x180xf32>
    %683 = arith.mulf %674, %682 : vector<12x180xf32>
    %684 = arith.addf %667, %683 : vector<12x180xf32>
    %c2_423 = arith.constant 2 : index
    %c12_424 = arith.constant 12 : index
    %c0_425 = arith.constant 0 : index
    %685 = vector.load %arg2[%c2_423, %c12_424, %c0_425] : memref<3x25x180xf32, #tpu.memory_space<vmem>>, vector<1x1x180xf32>
    %686 = vector.shape_cast %685 : vector<1x1x180xf32> to vector<1x180xf32>
    %687 = vector.broadcast %686 : vector<1x180xf32> to vector<12x180xf32>
    %688 = arith.mulf %674, %687 : vector<12x180xf32>
    %689 = arith.addf %672, %688 : vector<12x180xf32>
    %c2_426 = arith.constant 2 : index
    %c3_427 = arith.constant 3 : index
    %690 = vector.load %arg5[%c2_426, %c3_427] : memref<16x40xf32, #tpu.memory_space<vmem>>, vector<12x36xf32>
    %691 = tpu.concatenate %690, %690, %690, %690, %690 in 1 : vector<12x36xf32>, vector<12x36xf32>, vector<12x36xf32>, vector<12x36xf32>, vector<12x36xf32> -> vector<12x180xf32>
    %c0_428 = arith.constant 0 : index
    %c13_429 = arith.constant 13 : index
    %c0_430 = arith.constant 0 : index
    %692 = vector.load %arg2[%c0_428, %c13_429, %c0_430] : memref<3x25x180xf32, #tpu.memory_space<vmem>>, vector<1x1x180xf32>
    %693 = vector.shape_cast %692 : vector<1x1x180xf32> to vector<1x180xf32>
    %694 = vector.broadcast %693 : vector<1x180xf32> to vector<12x180xf32>
    %695 = arith.mulf %691, %694 : vector<12x180xf32>
    %696 = arith.addf %679, %695 : vector<12x180xf32>
    %c1_431 = arith.constant 1 : index
    %c13_432 = arith.constant 13 : index
    %c0_433 = arith.constant 0 : index
    %697 = vector.load %arg2[%c1_431, %c13_432, %c0_433] : memref<3x25x180xf32, #tpu.memory_space<vmem>>, vector<1x1x180xf32>
    %698 = vector.shape_cast %697 : vector<1x1x180xf32> to vector<1x180xf32>
    %699 = vector.broadcast %698 : vector<1x180xf32> to vector<12x180xf32>
    %700 = arith.mulf %691, %699 : vector<12x180xf32>
    %701 = arith.addf %684, %700 : vector<12x180xf32>
    %c2_434 = arith.constant 2 : index
    %c13_435 = arith.constant 13 : index
    %c0_436 = arith.constant 0 : index
    %702 = vector.load %arg2[%c2_434, %c13_435, %c0_436] : memref<3x25x180xf32, #tpu.memory_space<vmem>>, vector<1x1x180xf32>
    %703 = vector.shape_cast %702 : vector<1x1x180xf32> to vector<1x180xf32>
    %704 = vector.broadcast %703 : vector<1x180xf32> to vector<12x180xf32>
    %705 = arith.mulf %691, %704 : vector<12x180xf32>
    %706 = arith.addf %689, %705 : vector<12x180xf32>
    %c2_437 = arith.constant 2 : index
    %c4_438 = arith.constant 4 : index
    %707 = vector.load %arg5[%c2_437, %c4_438] : memref<16x40xf32, #tpu.memory_space<vmem>>, vector<12x36xf32>
    %708 = tpu.concatenate %707, %707, %707, %707, %707 in 1 : vector<12x36xf32>, vector<12x36xf32>, vector<12x36xf32>, vector<12x36xf32>, vector<12x36xf32> -> vector<12x180xf32>
    %c0_439 = arith.constant 0 : index
    %c14_440 = arith.constant 14 : index
    %c0_441 = arith.constant 0 : index
    %709 = vector.load %arg2[%c0_439, %c14_440, %c0_441] : memref<3x25x180xf32, #tpu.memory_space<vmem>>, vector<1x1x180xf32>
    %710 = vector.shape_cast %709 : vector<1x1x180xf32> to vector<1x180xf32>
    %711 = vector.broadcast %710 : vector<1x180xf32> to vector<12x180xf32>
    %712 = arith.mulf %708, %711 : vector<12x180xf32>
    %713 = arith.addf %696, %712 : vector<12x180xf32>
    %c1_442 = arith.constant 1 : index
    %c14_443 = arith.constant 14 : index
    %c0_444 = arith.constant 0 : index
    %714 = vector.load %arg2[%c1_442, %c14_443, %c0_444] : memref<3x25x180xf32, #tpu.memory_space<vmem>>, vector<1x1x180xf32>
    %715 = vector.shape_cast %714 : vector<1x1x180xf32> to vector<1x180xf32>
    %716 = vector.broadcast %715 : vector<1x180xf32> to vector<12x180xf32>
    %717 = arith.mulf %708, %716 : vector<12x180xf32>
    %718 = arith.addf %701, %717 : vector<12x180xf32>
    %c2_445 = arith.constant 2 : index
    %c14_446 = arith.constant 14 : index
    %c0_447 = arith.constant 0 : index
    %719 = vector.load %arg2[%c2_445, %c14_446, %c0_447] : memref<3x25x180xf32, #tpu.memory_space<vmem>>, vector<1x1x180xf32>
    %720 = vector.shape_cast %719 : vector<1x1x180xf32> to vector<1x180xf32>
    %721 = vector.broadcast %720 : vector<1x180xf32> to vector<12x180xf32>
    %722 = arith.mulf %708, %721 : vector<12x180xf32>
    %723 = arith.addf %706, %722 : vector<12x180xf32>
    %c3_448 = arith.constant 3 : index
    %c0_449 = arith.constant 0 : index
    %724 = vector.load %arg5[%c3_448, %c0_449] : memref<16x40xf32, #tpu.memory_space<vmem>>, vector<12x36xf32>
    %725 = tpu.concatenate %724, %724, %724, %724, %724 in 1 : vector<12x36xf32>, vector<12x36xf32>, vector<12x36xf32>, vector<12x36xf32>, vector<12x36xf32> -> vector<12x180xf32>
    %c0_450 = arith.constant 0 : index
    %c15_451 = arith.constant 15 : index
    %c0_452 = arith.constant 0 : index
    %726 = vector.load %arg2[%c0_450, %c15_451, %c0_452] : memref<3x25x180xf32, #tpu.memory_space<vmem>>, vector<1x1x180xf32>
    %727 = vector.shape_cast %726 : vector<1x1x180xf32> to vector<1x180xf32>
    %728 = vector.broadcast %727 : vector<1x180xf32> to vector<12x180xf32>
    %729 = arith.mulf %725, %728 : vector<12x180xf32>
    %730 = arith.addf %713, %729 : vector<12x180xf32>
    %c1_453 = arith.constant 1 : index
    %c15_454 = arith.constant 15 : index
    %c0_455 = arith.constant 0 : index
    %731 = vector.load %arg2[%c1_453, %c15_454, %c0_455] : memref<3x25x180xf32, #tpu.memory_space<vmem>>, vector<1x1x180xf32>
    %732 = vector.shape_cast %731 : vector<1x1x180xf32> to vector<1x180xf32>
    %733 = vector.broadcast %732 : vector<1x180xf32> to vector<12x180xf32>
    %734 = arith.mulf %725, %733 : vector<12x180xf32>
    %735 = arith.addf %718, %734 : vector<12x180xf32>
    %c2_456 = arith.constant 2 : index
    %c15_457 = arith.constant 15 : index
    %c0_458 = arith.constant 0 : index
    %736 = vector.load %arg2[%c2_456, %c15_457, %c0_458] : memref<3x25x180xf32, #tpu.memory_space<vmem>>, vector<1x1x180xf32>
    %737 = vector.shape_cast %736 : vector<1x1x180xf32> to vector<1x180xf32>
    %738 = vector.broadcast %737 : vector<1x180xf32> to vector<12x180xf32>
    %739 = arith.mulf %725, %738 : vector<12x180xf32>
    %740 = arith.addf %723, %739 : vector<12x180xf32>
    %c3_459 = arith.constant 3 : index
    %c1_460 = arith.constant 1 : index
    %741 = vector.load %arg5[%c3_459, %c1_460] : memref<16x40xf32, #tpu.memory_space<vmem>>, vector<12x36xf32>
    %742 = tpu.concatenate %741, %741, %741, %741, %741 in 1 : vector<12x36xf32>, vector<12x36xf32>, vector<12x36xf32>, vector<12x36xf32>, vector<12x36xf32> -> vector<12x180xf32>
    %c0_461 = arith.constant 0 : index
    %c16_462 = arith.constant 16 : index
    %c0_463 = arith.constant 0 : index
    %743 = vector.load %arg2[%c0_461, %c16_462, %c0_463] : memref<3x25x180xf32, #tpu.memory_space<vmem>>, vector<1x1x180xf32>
    %744 = vector.shape_cast %743 : vector<1x1x180xf32> to vector<1x180xf32>
    %745 = vector.broadcast %744 : vector<1x180xf32> to vector<12x180xf32>
    %746 = arith.mulf %742, %745 : vector<12x180xf32>
    %747 = arith.addf %730, %746 : vector<12x180xf32>
    %c1_464 = arith.constant 1 : index
    %c16_465 = arith.constant 16 : index
    %c0_466 = arith.constant 0 : index
    %748 = vector.load %arg2[%c1_464, %c16_465, %c0_466] : memref<3x25x180xf32, #tpu.memory_space<vmem>>, vector<1x1x180xf32>
    %749 = vector.shape_cast %748 : vector<1x1x180xf32> to vector<1x180xf32>
    %750 = vector.broadcast %749 : vector<1x180xf32> to vector<12x180xf32>
    %751 = arith.mulf %742, %750 : vector<12x180xf32>
    %752 = arith.addf %735, %751 : vector<12x180xf32>
    %c2_467 = arith.constant 2 : index
    %c16_468 = arith.constant 16 : index
    %c0_469 = arith.constant 0 : index
    %753 = vector.load %arg2[%c2_467, %c16_468, %c0_469] : memref<3x25x180xf32, #tpu.memory_space<vmem>>, vector<1x1x180xf32>
    %754 = vector.shape_cast %753 : vector<1x1x180xf32> to vector<1x180xf32>
    %755 = vector.broadcast %754 : vector<1x180xf32> to vector<12x180xf32>
    %756 = arith.mulf %742, %755 : vector<12x180xf32>
    %757 = arith.addf %740, %756 : vector<12x180xf32>
    %c3_470 = arith.constant 3 : index
    %c2_471 = arith.constant 2 : index
    %758 = vector.load %arg5[%c3_470, %c2_471] : memref<16x40xf32, #tpu.memory_space<vmem>>, vector<12x36xf32>
    %759 = tpu.concatenate %758, %758, %758, %758, %758 in 1 : vector<12x36xf32>, vector<12x36xf32>, vector<12x36xf32>, vector<12x36xf32>, vector<12x36xf32> -> vector<12x180xf32>
    %c0_472 = arith.constant 0 : index
    %c17_473 = arith.constant 17 : index
    %c0_474 = arith.constant 0 : index
    %760 = vector.load %arg2[%c0_472, %c17_473, %c0_474] : memref<3x25x180xf32, #tpu.memory_space<vmem>>, vector<1x1x180xf32>
    %761 = vector.shape_cast %760 : vector<1x1x180xf32> to vector<1x180xf32>
    %762 = vector.broadcast %761 : vector<1x180xf32> to vector<12x180xf32>
    %763 = arith.mulf %759, %762 : vector<12x180xf32>
    %764 = arith.addf %747, %763 : vector<12x180xf32>
    %c1_475 = arith.constant 1 : index
    %c17_476 = arith.constant 17 : index
    %c0_477 = arith.constant 0 : index
    %765 = vector.load %arg2[%c1_475, %c17_476, %c0_477] : memref<3x25x180xf32, #tpu.memory_space<vmem>>, vector<1x1x180xf32>
    %766 = vector.shape_cast %765 : vector<1x1x180xf32> to vector<1x180xf32>
    %767 = vector.broadcast %766 : vector<1x180xf32> to vector<12x180xf32>
    %768 = arith.mulf %759, %767 : vector<12x180xf32>
    %769 = arith.addf %752, %768 : vector<12x180xf32>
    %c2_478 = arith.constant 2 : index
    %c17_479 = arith.constant 17 : index
    %c0_480 = arith.constant 0 : index
    %770 = vector.load %arg2[%c2_478, %c17_479, %c0_480] : memref<3x25x180xf32, #tpu.memory_space<vmem>>, vector<1x1x180xf32>
    %771 = vector.shape_cast %770 : vector<1x1x180xf32> to vector<1x180xf32>
    %772 = vector.broadcast %771 : vector<1x180xf32> to vector<12x180xf32>
    %773 = arith.mulf %759, %772 : vector<12x180xf32>
    %774 = arith.addf %757, %773 : vector<12x180xf32>
    %c3_481 = arith.constant 3 : index
    %c3_482 = arith.constant 3 : index
    %775 = vector.load %arg5[%c3_481, %c3_482] : memref<16x40xf32, #tpu.memory_space<vmem>>, vector<12x36xf32>
    %776 = tpu.concatenate %775, %775, %775, %775, %775 in 1 : vector<12x36xf32>, vector<12x36xf32>, vector<12x36xf32>, vector<12x36xf32>, vector<12x36xf32> -> vector<12x180xf32>
    %c0_483 = arith.constant 0 : index
    %c18_484 = arith.constant 18 : index
    %c0_485 = arith.constant 0 : index
    %777 = vector.load %arg2[%c0_483, %c18_484, %c0_485] : memref<3x25x180xf32, #tpu.memory_space<vmem>>, vector<1x1x180xf32>
    %778 = vector.shape_cast %777 : vector<1x1x180xf32> to vector<1x180xf32>
    %779 = vector.broadcast %778 : vector<1x180xf32> to vector<12x180xf32>
    %780 = arith.mulf %776, %779 : vector<12x180xf32>
    %781 = arith.addf %764, %780 : vector<12x180xf32>
    %c1_486 = arith.constant 1 : index
    %c18_487 = arith.constant 18 : index
    %c0_488 = arith.constant 0 : index
    %782 = vector.load %arg2[%c1_486, %c18_487, %c0_488] : memref<3x25x180xf32, #tpu.memory_space<vmem>>, vector<1x1x180xf32>
    %783 = vector.shape_cast %782 : vector<1x1x180xf32> to vector<1x180xf32>
    %784 = vector.broadcast %783 : vector<1x180xf32> to vector<12x180xf32>
    %785 = arith.mulf %776, %784 : vector<12x180xf32>
    %786 = arith.addf %769, %785 : vector<12x180xf32>
    %c2_489 = arith.constant 2 : index
    %c18_490 = arith.constant 18 : index
    %c0_491 = arith.constant 0 : index
    %787 = vector.load %arg2[%c2_489, %c18_490, %c0_491] : memref<3x25x180xf32, #tpu.memory_space<vmem>>, vector<1x1x180xf32>
    %788 = vector.shape_cast %787 : vector<1x1x180xf32> to vector<1x180xf32>
    %789 = vector.broadcast %788 : vector<1x180xf32> to vector<12x180xf32>
    %790 = arith.mulf %776, %789 : vector<12x180xf32>
    %791 = arith.addf %774, %790 : vector<12x180xf32>
    %c3_492 = arith.constant 3 : index
    %c4_493 = arith.constant 4 : index
    %792 = vector.load %arg5[%c3_492, %c4_493] : memref<16x40xf32, #tpu.memory_space<vmem>>, vector<12x36xf32>
    %793 = tpu.concatenate %792, %792, %792, %792, %792 in 1 : vector<12x36xf32>, vector<12x36xf32>, vector<12x36xf32>, vector<12x36xf32>, vector<12x36xf32> -> vector<12x180xf32>
    %c0_494 = arith.constant 0 : index
    %c19_495 = arith.constant 19 : index
    %c0_496 = arith.constant 0 : index
    %794 = vector.load %arg2[%c0_494, %c19_495, %c0_496] : memref<3x25x180xf32, #tpu.memory_space<vmem>>, vector<1x1x180xf32>
    %795 = vector.shape_cast %794 : vector<1x1x180xf32> to vector<1x180xf32>
    %796 = vector.broadcast %795 : vector<1x180xf32> to vector<12x180xf32>
    %797 = arith.mulf %793, %796 : vector<12x180xf32>
    %798 = arith.addf %781, %797 : vector<12x180xf32>
    %c1_497 = arith.constant 1 : index
    %c19_498 = arith.constant 19 : index
    %c0_499 = arith.constant 0 : index
    %799 = vector.load %arg2[%c1_497, %c19_498, %c0_499] : memref<3x25x180xf32, #tpu.memory_space<vmem>>, vector<1x1x180xf32>
    %800 = vector.shape_cast %799 : vector<1x1x180xf32> to vector<1x180xf32>
    %801 = vector.broadcast %800 : vector<1x180xf32> to vector<12x180xf32>
    %802 = arith.mulf %793, %801 : vector<12x180xf32>
    %803 = arith.addf %786, %802 : vector<12x180xf32>
    %c2_500 = arith.constant 2 : index
    %c19_501 = arith.constant 19 : index
    %c0_502 = arith.constant 0 : index
    %804 = vector.load %arg2[%c2_500, %c19_501, %c0_502] : memref<3x25x180xf32, #tpu.memory_space<vmem>>, vector<1x1x180xf32>
    %805 = vector.shape_cast %804 : vector<1x1x180xf32> to vector<1x180xf32>
    %806 = vector.broadcast %805 : vector<1x180xf32> to vector<12x180xf32>
    %807 = arith.mulf %793, %806 : vector<12x180xf32>
    %808 = arith.addf %791, %807 : vector<12x180xf32>
    %c4_503 = arith.constant 4 : index
    %c0_504 = arith.constant 0 : index
    %809 = vector.load %arg5[%c4_503, %c0_504] : memref<16x40xf32, #tpu.memory_space<vmem>>, vector<12x36xf32>
    %810 = tpu.concatenate %809, %809, %809, %809, %809 in 1 : vector<12x36xf32>, vector<12x36xf32>, vector<12x36xf32>, vector<12x36xf32>, vector<12x36xf32> -> vector<12x180xf32>
    %c0_505 = arith.constant 0 : index
    %c20_506 = arith.constant 20 : index
    %c0_507 = arith.constant 0 : index
    %811 = vector.load %arg2[%c0_505, %c20_506, %c0_507] : memref<3x25x180xf32, #tpu.memory_space<vmem>>, vector<1x1x180xf32>
    %812 = vector.shape_cast %811 : vector<1x1x180xf32> to vector<1x180xf32>
    %813 = vector.broadcast %812 : vector<1x180xf32> to vector<12x180xf32>
    %814 = arith.mulf %810, %813 : vector<12x180xf32>
    %815 = arith.addf %798, %814 : vector<12x180xf32>
    %c1_508 = arith.constant 1 : index
    %c20_509 = arith.constant 20 : index
    %c0_510 = arith.constant 0 : index
    %816 = vector.load %arg2[%c1_508, %c20_509, %c0_510] : memref<3x25x180xf32, #tpu.memory_space<vmem>>, vector<1x1x180xf32>
    %817 = vector.shape_cast %816 : vector<1x1x180xf32> to vector<1x180xf32>
    %818 = vector.broadcast %817 : vector<1x180xf32> to vector<12x180xf32>
    %819 = arith.mulf %810, %818 : vector<12x180xf32>
    %820 = arith.addf %803, %819 : vector<12x180xf32>
    %c2_511 = arith.constant 2 : index
    %c20_512 = arith.constant 20 : index
    %c0_513 = arith.constant 0 : index
    %821 = vector.load %arg2[%c2_511, %c20_512, %c0_513] : memref<3x25x180xf32, #tpu.memory_space<vmem>>, vector<1x1x180xf32>
    %822 = vector.shape_cast %821 : vector<1x1x180xf32> to vector<1x180xf32>
    %823 = vector.broadcast %822 : vector<1x180xf32> to vector<12x180xf32>
    %824 = arith.mulf %810, %823 : vector<12x180xf32>
    %825 = arith.addf %808, %824 : vector<12x180xf32>
    %c4_514 = arith.constant 4 : index
    %c1_515 = arith.constant 1 : index
    %826 = vector.load %arg5[%c4_514, %c1_515] : memref<16x40xf32, #tpu.memory_space<vmem>>, vector<12x36xf32>
    %827 = tpu.concatenate %826, %826, %826, %826, %826 in 1 : vector<12x36xf32>, vector<12x36xf32>, vector<12x36xf32>, vector<12x36xf32>, vector<12x36xf32> -> vector<12x180xf32>
    %c0_516 = arith.constant 0 : index
    %c21_517 = arith.constant 21 : index
    %c0_518 = arith.constant 0 : index
    %828 = vector.load %arg2[%c0_516, %c21_517, %c0_518] : memref<3x25x180xf32, #tpu.memory_space<vmem>>, vector<1x1x180xf32>
    %829 = vector.shape_cast %828 : vector<1x1x180xf32> to vector<1x180xf32>
    %830 = vector.broadcast %829 : vector<1x180xf32> to vector<12x180xf32>
    %831 = arith.mulf %827, %830 : vector<12x180xf32>
    %832 = arith.addf %815, %831 : vector<12x180xf32>
    %c1_519 = arith.constant 1 : index
    %c21_520 = arith.constant 21 : index
    %c0_521 = arith.constant 0 : index
    %833 = vector.load %arg2[%c1_519, %c21_520, %c0_521] : memref<3x25x180xf32, #tpu.memory_space<vmem>>, vector<1x1x180xf32>
    %834 = vector.shape_cast %833 : vector<1x1x180xf32> to vector<1x180xf32>
    %835 = vector.broadcast %834 : vector<1x180xf32> to vector<12x180xf32>
    %836 = arith.mulf %827, %835 : vector<12x180xf32>
    %837 = arith.addf %820, %836 : vector<12x180xf32>
    %c2_522 = arith.constant 2 : index
    %c21_523 = arith.constant 21 : index
    %c0_524 = arith.constant 0 : index
    %838 = vector.load %arg2[%c2_522, %c21_523, %c0_524] : memref<3x25x180xf32, #tpu.memory_space<vmem>>, vector<1x1x180xf32>
    %839 = vector.shape_cast %838 : vector<1x1x180xf32> to vector<1x180xf32>
    %840 = vector.broadcast %839 : vector<1x180xf32> to vector<12x180xf32>
    %841 = arith.mulf %827, %840 : vector<12x180xf32>
    %842 = arith.addf %825, %841 : vector<12x180xf32>
    %c4_525 = arith.constant 4 : index
    %c2_526 = arith.constant 2 : index
    %843 = vector.load %arg5[%c4_525, %c2_526] : memref<16x40xf32, #tpu.memory_space<vmem>>, vector<12x36xf32>
    %844 = tpu.concatenate %843, %843, %843, %843, %843 in 1 : vector<12x36xf32>, vector<12x36xf32>, vector<12x36xf32>, vector<12x36xf32>, vector<12x36xf32> -> vector<12x180xf32>
    %c0_527 = arith.constant 0 : index
    %c22_528 = arith.constant 22 : index
    %c0_529 = arith.constant 0 : index
    %845 = vector.load %arg2[%c0_527, %c22_528, %c0_529] : memref<3x25x180xf32, #tpu.memory_space<vmem>>, vector<1x1x180xf32>
    %846 = vector.shape_cast %845 : vector<1x1x180xf32> to vector<1x180xf32>
    %847 = vector.broadcast %846 : vector<1x180xf32> to vector<12x180xf32>
    %848 = arith.mulf %844, %847 : vector<12x180xf32>
    %849 = arith.addf %832, %848 : vector<12x180xf32>
    %c1_530 = arith.constant 1 : index
    %c22_531 = arith.constant 22 : index
    %c0_532 = arith.constant 0 : index
    %850 = vector.load %arg2[%c1_530, %c22_531, %c0_532] : memref<3x25x180xf32, #tpu.memory_space<vmem>>, vector<1x1x180xf32>
    %851 = vector.shape_cast %850 : vector<1x1x180xf32> to vector<1x180xf32>
    %852 = vector.broadcast %851 : vector<1x180xf32> to vector<12x180xf32>
    %853 = arith.mulf %844, %852 : vector<12x180xf32>
    %854 = arith.addf %837, %853 : vector<12x180xf32>
    %c2_533 = arith.constant 2 : index
    %c22_534 = arith.constant 22 : index
    %c0_535 = arith.constant 0 : index
    %855 = vector.load %arg2[%c2_533, %c22_534, %c0_535] : memref<3x25x180xf32, #tpu.memory_space<vmem>>, vector<1x1x180xf32>
    %856 = vector.shape_cast %855 : vector<1x1x180xf32> to vector<1x180xf32>
    %857 = vector.broadcast %856 : vector<1x180xf32> to vector<12x180xf32>
    %858 = arith.mulf %844, %857 : vector<12x180xf32>
    %859 = arith.addf %842, %858 : vector<12x180xf32>
    %c4_536 = arith.constant 4 : index
    %c3_537 = arith.constant 3 : index
    %860 = vector.load %arg5[%c4_536, %c3_537] : memref<16x40xf32, #tpu.memory_space<vmem>>, vector<12x36xf32>
    %861 = tpu.concatenate %860, %860, %860, %860, %860 in 1 : vector<12x36xf32>, vector<12x36xf32>, vector<12x36xf32>, vector<12x36xf32>, vector<12x36xf32> -> vector<12x180xf32>
    %c0_538 = arith.constant 0 : index
    %c23_539 = arith.constant 23 : index
    %c0_540 = arith.constant 0 : index
    %862 = vector.load %arg2[%c0_538, %c23_539, %c0_540] : memref<3x25x180xf32, #tpu.memory_space<vmem>>, vector<1x1x180xf32>
    %863 = vector.shape_cast %862 : vector<1x1x180xf32> to vector<1x180xf32>
    %864 = vector.broadcast %863 : vector<1x180xf32> to vector<12x180xf32>
    %865 = arith.mulf %861, %864 : vector<12x180xf32>
    %866 = arith.addf %849, %865 : vector<12x180xf32>
    %c1_541 = arith.constant 1 : index
    %c23_542 = arith.constant 23 : index
    %c0_543 = arith.constant 0 : index
    %867 = vector.load %arg2[%c1_541, %c23_542, %c0_543] : memref<3x25x180xf32, #tpu.memory_space<vmem>>, vector<1x1x180xf32>
    %868 = vector.shape_cast %867 : vector<1x1x180xf32> to vector<1x180xf32>
    %869 = vector.broadcast %868 : vector<1x180xf32> to vector<12x180xf32>
    %870 = arith.mulf %861, %869 : vector<12x180xf32>
    %871 = arith.addf %854, %870 : vector<12x180xf32>
    %c2_544 = arith.constant 2 : index
    %c23_545 = arith.constant 23 : index
    %c0_546 = arith.constant 0 : index
    %872 = vector.load %arg2[%c2_544, %c23_545, %c0_546] : memref<3x25x180xf32, #tpu.memory_space<vmem>>, vector<1x1x180xf32>
    %873 = vector.shape_cast %872 : vector<1x1x180xf32> to vector<1x180xf32>
    %874 = vector.broadcast %873 : vector<1x180xf32> to vector<12x180xf32>
    %875 = arith.mulf %861, %874 : vector<12x180xf32>
    %876 = arith.addf %859, %875 : vector<12x180xf32>
    %c4_547 = arith.constant 4 : index
    %c4_548 = arith.constant 4 : index
    %877 = vector.load %arg5[%c4_547, %c4_548] : memref<16x40xf32, #tpu.memory_space<vmem>>, vector<12x36xf32>
    %878 = tpu.concatenate %877, %877, %877, %877, %877 in 1 : vector<12x36xf32>, vector<12x36xf32>, vector<12x36xf32>, vector<12x36xf32>, vector<12x36xf32> -> vector<12x180xf32>
    %c0_549 = arith.constant 0 : index
    %c24_550 = arith.constant 24 : index
    %c0_551 = arith.constant 0 : index
    %879 = vector.load %arg2[%c0_549, %c24_550, %c0_551] : memref<3x25x180xf32, #tpu.memory_space<vmem>>, vector<1x1x180xf32>
    %880 = vector.shape_cast %879 : vector<1x1x180xf32> to vector<1x180xf32>
    %881 = vector.broadcast %880 : vector<1x180xf32> to vector<12x180xf32>
    %882 = arith.mulf %878, %881 : vector<12x180xf32>
    %883 = arith.addf %866, %882 : vector<12x180xf32>
    %c1_552 = arith.constant 1 : index
    %c24_553 = arith.constant 24 : index
    %c0_554 = arith.constant 0 : index
    %884 = vector.load %arg2[%c1_552, %c24_553, %c0_554] : memref<3x25x180xf32, #tpu.memory_space<vmem>>, vector<1x1x180xf32>
    %885 = vector.shape_cast %884 : vector<1x1x180xf32> to vector<1x180xf32>
    %886 = vector.broadcast %885 : vector<1x180xf32> to vector<12x180xf32>
    %887 = arith.mulf %878, %886 : vector<12x180xf32>
    %888 = arith.addf %871, %887 : vector<12x180xf32>
    %c2_555 = arith.constant 2 : index
    %c24_556 = arith.constant 24 : index
    %c0_557 = arith.constant 0 : index
    %889 = vector.load %arg2[%c2_555, %c24_556, %c0_557] : memref<3x25x180xf32, #tpu.memory_space<vmem>>, vector<1x1x180xf32>
    %890 = vector.shape_cast %889 : vector<1x1x180xf32> to vector<1x180xf32>
    %891 = vector.broadcast %890 : vector<1x180xf32> to vector<12x180xf32>
    %892 = arith.mulf %878, %891 : vector<12x180xf32>
    %893 = arith.addf %876, %892 : vector<12x180xf32>
    %894 = arith.negf %883 : vector<12x180xf32>
    %895 = math.exp %894 : vector<12x180xf32>
    %cst_558 = arith.constant 1.000000e+00 : f32
    %896 = vector.broadcast %cst_558 : f32 to vector<12x180xf32>
    %897 = arith.addf %896, %895 : vector<12x180xf32>
    %898 = arith.divf %896, %897 : vector<12x180xf32>
    %c1_559 = arith.constant 1 : index
    %c0_560 = arith.constant 0 : index
    %c0_561 = arith.constant 0 : index
    %c0_562 = arith.constant 0 : index
    %899 = vector.load %arg4[%c1_559, %c0_560, %c0_561, %c0_562] : memref<2x3x12x180xf32, #tpu.memory_space<vmem>>, vector<1x1x12x180xf32>
    %900 = vector.shape_cast %899 : vector<1x1x12x180xf32> to vector<12x180xf32>
    %901 = vector.shape_cast %898 : vector<12x180xf32> to vector<1x1x12x180xf32>
    tpu.vector_store %arg4[%c1_559, %c0_560, %c0_561, %c0_562], %901 {strides = array<i32>} : memref<2x3x12x180xf32, #tpu.memory_space<vmem>>, vector<1x1x12x180xf32>,
    %902 = arith.negf %888 : vector<12x180xf32>
    %903 = math.exp %902 : vector<12x180xf32>
    %cst_563 = arith.constant 1.000000e+00 : f32
    %904 = vector.broadcast %cst_563 : f32 to vector<12x180xf32>
    %905 = arith.addf %904, %903 : vector<12x180xf32>
    %906 = arith.divf %904, %905 : vector<12x180xf32>
    %c1_564 = arith.constant 1 : index
    %c1_565 = arith.constant 1 : index
    %c0_566 = arith.constant 0 : index
    %c0_567 = arith.constant 0 : index
    %907 = vector.load %arg4[%c1_564, %c1_565, %c0_566, %c0_567] : memref<2x3x12x180xf32, #tpu.memory_space<vmem>>, vector<1x1x12x180xf32>
    %908 = vector.shape_cast %907 : vector<1x1x12x180xf32> to vector<12x180xf32>
    %909 = vector.shape_cast %906 : vector<12x180xf32> to vector<1x1x12x180xf32>
    tpu.vector_store %arg4[%c1_564, %c1_565, %c0_566, %c0_567], %909 {strides = array<i32>} : memref<2x3x12x180xf32, #tpu.memory_space<vmem>>, vector<1x1x12x180xf32>,
    %910 = arith.negf %893 : vector<12x180xf32>
    %911 = math.exp %910 : vector<12x180xf32>
    %cst_568 = arith.constant 1.000000e+00 : f32
    %912 = vector.broadcast %cst_568 : f32 to vector<12x180xf32>
    %913 = arith.addf %912, %911 : vector<12x180xf32>
    %914 = arith.divf %912, %913 : vector<12x180xf32>
    %c1_569 = arith.constant 1 : index
    %c2_570 = arith.constant 2 : index
    %c0_571 = arith.constant 0 : index
    %c0_572 = arith.constant 0 : index
    %915 = vector.load %arg4[%c1_569, %c2_570, %c0_571, %c0_572] : memref<2x3x12x180xf32, #tpu.memory_space<vmem>>, vector<1x1x12x180xf32>
    %916 = vector.shape_cast %915 : vector<1x1x12x180xf32> to vector<12x180xf32>
    %917 = vector.shape_cast %914 : vector<12x180xf32> to vector<1x1x12x180xf32>
    tpu.vector_store %arg4[%c1_569, %c2_570, %c0_571, %c0_572], %917 {strides = array<i32>} : memref<2x3x12x180xf32, #tpu.memory_space<vmem>>, vector<1x1x12x180xf32>,
    return
  }
  func.func @transform_0(%arg0: i32) -> (i32, i32, i32) {
    %c0_i32 = arith.constant 0 : i32
    %c0_i32_0 = arith.constant 0 : i32
    %c0_i32_1 = arith.constant 0 : i32
    return %arg0, %c0_i32, %c0_i32_0 : i32, i32, i32
  }
  func.func @transform_1(%arg0: i32) -> (i32, i32, i32) {
    %c0_i32 = arith.constant 0 : i32
    %c0_i32_0 = arith.constant 0 : i32
    %c0_i32_1 = arith.constant 0 : i32
    %c0_i32_2 = arith.constant 0 : i32
    return %c0_i32, %c0_i32_0, %c0_i32_1 : i32, i32, i32
  }
  func.func @transform_2(%arg0: i32) -> i32 {
    %c0_i32 = arith.constant 0 : i32
    %c0_i32_0 = arith.constant 0 : i32
    return %c0_i32 : i32
  }
  func.func @transform_3(%arg0: i32) -> (i32, i32, i32, i32) {
    %c0_i32 = arith.constant 0 : i32
    %c0_i32_0 = arith.constant 0 : i32
    %c0_i32_1 = arith.constant 0 : i32
    %c0_i32_2 = arith.constant 0 : i32
    return %arg0, %c0_i32, %c0_i32_0, %c0_i32_1 : i32, i32, i32, i32
  }
}

</mosaic_0001>

<bundles_post_ra>
// kernel: conv_transpose3d_sigmoid.1
= control target key start
LH: loop header
LB: loop body
LE: loop exit
PB: predicated region body
PF: predicated region fallthrough
CT: control target
= control target key end

     0   :  { %s10566_s0 = inlined_call_operand.vmem [shape: f32[4,8,32], index: 0, kind: input, shape index: {}]   ;;  %s10567_s1 = inlined_call_operand.vmem [shape: f32[3,25,180], index: 1, kind: input, shape index: {}]   ;;  %s10568_s2 = inlined_call_operand.vmem [shape: f32[3], index: 2, kind: input, shape index: {}]   ;;  %s10569_s3 = inlined_call_operand.vmem [shape: f32[4,3,12,180], index: 3, kind: output, shape index: {}]  }
   0x1   :  { %10822 = sst [smem:[#allocation140_spill]] %s10566_s0 }
   0x2   :  { %10823 = sst [smem:[#allocation141_spill]] %s10568_s2 }
   0x3   :  { %10824 = sst [smem:[#allocation142_spill]] %s10569_s3 }
   0x4   :  { %8 = vsyncpa [#allocation4], 0  ;;  %s5908_s12 = smov 0  }
   0x5 LB: > { %s5470_s13 = sadd.s32 4294967295, %s5859_s12   ;;  %p5472_p0 = scmp.ge.s32.totalorder %s5859_s12, 1  ;;  %s5859_s12 = sphi %s5908_s12, %s14_s12  }
   0x6   : > { %p113_p1 = scmp.lt.s32.totalorder %s5859_s12, 3  ;;  %s10825_s2 = sld [smem:[#allocation141_spill]] }
   0x7   : > { %p5923_p3 = scmp.eq.s32.totalorder %s5470_s13, 0 }
   0x8   : > { %p5919_p2 = pnand %p5472_p0, %p113_p1 }
   0xa   : > { %p5685_p4 = pneg %p5919_p2 }
   0xc   : > { %s129_s16 = sshll.u32 %s10825_s2, 4  ;;  %p5686_p5 = pnand %p5923_p3, %p5685_p4  ;;  %s130_s16 = int_to_ptr.vmem [resolvable:$true] %s129_s16 }
   0xd   : > { %s5834_s19 = scalar_lea.vmem %s130_s16, 16  ;;  %p5842_p10 = scmp.lt.s32.totalorder %s130_s16, %s130_s16 }
   0xe   : > { %p5835_p6 = scmp.ne.s32.totalorder %s130_s16, %s5834_s19  ;;  %p5836_p7 = pneg %p5686_p5 }
   0xf   : > { %p5843_p11 = scmp.lt.s32.totalorder %s5834_s19, %s5834_s19 }
  0x10   : > { %p5837_p8 = pnand %p5836_p7, %p5835_p6 }
  0x11   : > { %p5844_p12 = por %p5843_p11, %p5842_p10 }
  0x12   : > { %p5838_p9 = pneg %p5837_p8 }
  0x14   : > { %p5845_p13 = pnand %p5844_p12, %p5838_p9 }
  0x16   : > { %5848 = shalt.err (!%p5845_p13)
}
  0x17   : > { %s5861_s20 = smov [#allocation3]   ;;  %151 = sbr.rel (%p5919_p2) target bundleno = 1413 (0x585), region = 32 }
  0x18   : > { %5688 = dma.vmem_to_smem (!%p5686_p5), %s130_s16, 16, %s5861_s20, [#allocation4]  }
  0x1c   : > { %5854 = dma.done.wait (%p5923_p3), [#allocation4], 16  }
  0x1d   : > { %5856 = vsyncadd (%p5923_p3), [#allocation4], 4294967280 }
  0x1e   : > { %157 = sfence }
  0x1f   : > { %s5477_s21 = sshll.u32 %s5470_s13, 1  ;;  %vm190_vm0 = vcmask 326656   ;;  %v5862_v0 = vmov 0.0   ;;  %s10828_s0 = sld [smem:[#allocation140_spill]]  ;;  %vm198_vm1 = vcmask 293920   ;;  %vm234_vm2 = vcmask 293888  }
  0x20   : > { %p178_p0 = scmp.lt.s32.totalorder %s5477_s21, 3  ;;  %191 = vst.msk [vmem:[#allocation2] sm:$0xff] %vm190_vm0, %v5862_v0  ;;  %192 = vst.msk [vmem:[#allocation2 + $0x8] sm:$0xff] %vm190_vm0, %v5862_v0  ;;  %s10570_s26 = smov 4   ;;  %vm237_vm3 = vcmask 588800   ;;  %vm240_vm4 = vcmask 883712  }
  0x21   : > { %s10736_s27 = smov 36   ;;  %s10734_s28 = smov 72   ;;  %vm243_vm5 = vcmask 130048   ;;  %vm2749_vm6 = vcmask 424960   ;;  %vm2752_vm7 = vcmask 420864  }
  0x22   : > { %s11666_s21 = smov (!%p178_p0, %s5477_s21), 3  ;;  %s10732_s29 = smov 108  }
  0x23   : > { %s5478_s22 = sshll.u32 %s11666_s21, 3  ;;  %s10730_s30 = smov 16  }
  0x24   : > { %s10724_s4 = smov 127   ;;  %s10659_s5 = smov 35  }
  0x25   : > { %s5943_s25 = scalar_lea.vmem %s10828_s0, %s5478_s22  ;;  %s10657_s6 = smov 71  }
  0x26   : > { %v193_v1 = vld [vmem:[%s5943_s25] sm:$0xff]  ;;  %s10599_s7 = smov 107   ;;  %s10595_s8 = smov 15  }
  0x27   : > { %195 = vrot.lane.b32.xlu0 %v193_v1, %s10570_s26  ;;  %s10593_s9 = smov 126   ;;  %s10589_s10 = smov 34  }
  0x28   : > { %s10587_s11 = smov 70   ;;  %s10583_s13 = smov 106  }
  0x29   : > { %s10585_s14 = smov 14   ;;  %s10591_s15 = smov 125  }
  0x2a   : > { %s10597_s16 = smov 33   ;;  %s10603_s17 = smov 69  }
  0x2b   : > { %s10726_s18 = smov 105   ;;  %s10728_s19 = smov 13  }
  0x2c   : > { %s10668_s20 = smov 124   ;;  %s10666_s22 = smov 32  }
  0x2d   : > { %s10743_s23 = smov 68   ;;  %s10741_s24 = smov 104  }
  0x2e   : > { %s10738_s26 = smov 12   ;;  %s11344_s3 = sld [smem:[#allocation142_spill]] }
  0x2f   : > { %s11447_s0 = smov 127   ;;  %s11559_s2 = smov 105  }
  0x99   : > { %v196_v2 = vpop.permute.xlu0 %195 }
  0x9a   : > { %199 = vst.msk [vmem:[#allocation2 + $0x4] sm:$0xff] %vm198_vm1, %v196_v2 }
  0xa1   : > { %v5948_v3 = vld [vmem:[#allocation2] sm:$0xff]  ;;  %v5950_v4 = vld [vmem:[#allocation2 + $0x8] sm:$0xf] }
  0xa2   : > { %212 = vrot.lane.b32.xlu1 %v5950_v4, %s10736_s27  ;;  %210 = vrot.lane.b32.xlu0 %v5948_v3, %s10736_s27  ;;  %v6048_v5 = vld [vmem:[#allocation2 + $0x1] sm:$0xff]  ;;  %v6050_v6 = vld [vmem:[#allocation2 + $0x9] sm:$0xf] }
  0xa3   : > { %v6228_v47 = vld [vmem:[#allocation2 + $0x2] sm:$0xff]  ;;  %v6230_v48 = vld [vmem:[#allocation2 + $0xa] sm:$0xf] }
  0xa6   : > { %216 = vrot.lane.b32.xlu1 %v5948_v3, %s10734_s28  ;;  %218 = vrot.lane.b32.xlu0 %v5950_v4, %s10734_s28 }
  0xaa   : > { %222 = vrot.lane.b32.xlu1 %v5948_v3, %s10732_s29  ;;  %224 = vrot.lane.b32.xlu0 %v5950_v4, %s10732_s29 }
  0xae   : > { %228 = vrot.lane.b32.xlu1 %v5948_v3, %s10730_s30  ;;  %230 = vrot.lane.b32.xlu0 %v5950_v4, %s10730_s30 }
  0xb2   : > { %308 = vrot.lane.b32.xlu1 %v5948_v3, %s10724_s4  ;;  %310 = vrot.lane.b32.xlu0 %v5950_v4, %s10724_s4 }
  0xb6   : > { %314 = vrot.lane.b32.xlu1 %v5948_v3, %s10659_s5  ;;  %316 = vrot.lane.b32.xlu0 %v5950_v4, %s10659_s5 }
  0xba   : > { %320 = vrot.lane.b32.xlu1 %v5948_v3, %s10657_s6  ;;  %322 = vrot.lane.b32.xlu0 %v5950_v4, %s10657_s6 }
  0xbe   : > { %326 = vrot.lane.b32.xlu1 %v5948_v3, %s10599_s7  ;;  %328 = vrot.lane.b32.xlu0 %v5950_v4, %s10599_s7 }
  0xc2   : > { %332 = vrot.lane.b32.xlu1 %v5948_v3, %s10595_s8  ;;  %334 = vrot.lane.b32.xlu0 %v5950_v4, %s10595_s8 }
  0xc6   : > { %409 = vrot.lane.b32.xlu1 %v5948_v3, %s10593_s9  ;;  %411 = vrot.lane.b32.xlu0 %v5950_v4, %s10593_s9 }
  0xca   : > { %415 = vrot.lane.b32.xlu1 %v5948_v3, %s10589_s10  ;;  %417 = vrot.lane.b32.xlu0 %v5950_v4, %s10589_s10 }
  0xce   : > { %421 = vrot.lane.b32.xlu1 %v5948_v3, %s10587_s11  ;;  %423 = vrot.lane.b32.xlu0 %v5950_v4, %s10587_s11 }
  0xd2   : > { %427 = vrot.lane.b32.xlu1 %v5948_v3, %s10583_s13  ;;  %429 = vrot.lane.b32.xlu0 %v5950_v4, %s10583_s13 }
  0xd6   : > { %433 = vrot.lane.b32.xlu1 %v5948_v3, %s10585_s14  ;;  %435 = vrot.lane.b32.xlu0 %v5950_v4, %s10585_s14 }
  0xda   : > { %510 = vrot.lane.b32.xlu1 %v5948_v3, %s10591_s15  ;;  %512 = vrot.lane.b32.xlu0 %v5950_v4, %s10591_s15 }
  0xde   : > { %516 = vrot.lane.b32.xlu1 %v5948_v3, %s10597_s16  ;;  %518 = vrot.lane.b32.xlu0 %v5950_v4, %s10597_s16 }
  0xe2   : > { %522 = vrot.lane.b32.xlu1 %v5948_v3, %s10603_s17  ;;  %524 = vrot.lane.b32.xlu0 %v5950_v4, %s10603_s17 }
  0xe6   : > { %528 = vrot.lane.b32.xlu1 %v5948_v3, %s10726_s18  ;;  %530 = vrot.lane.b32.xlu0 %v5950_v4, %s10726_s18 }
  0xea   : > { %534 = vrot.lane.b32.xlu1 %v5948_v3, %s10728_s19  ;;  %536 = vrot.lane.b32.xlu0 %v5950_v4, %s10728_s19 }
  0xee   : > { %611 = vrot.lane.b32.xlu1 %v5948_v3, %s10668_s20  ;;  %613 = vrot.lane.b32.xlu0 %v5950_v4, %s10668_s20 }
  0xf2   : > { %617 = vrot.lane.b32.xlu1 %v5948_v3, %s10666_s22  ;;  %619 = vrot.lane.b32.xlu0 %v5950_v4, %s10666_s22 }
  0xf6   : > { %623 = vrot.lane.b32.xlu1 %v5948_v3, %s10743_s23  ;;  %625 = vrot.lane.b32.xlu0 %v5950_v4, %s10743_s23 }
  0xfa   : > { %629 = vrot.lane.b32.xlu1 %v5948_v3, %s10741_s24  ;;  %631 = vrot.lane.b32.xlu0 %v5950_v4, %s10741_s24 }
  0xfe   : > { %635 = vrot.lane.b32.xlu1 %v5948_v3, %s10738_s26  ;;  %637 = vrot.lane.b32.xlu0 %v5950_v4, %s10738_s26 }
 0x102   : > { %716 = vrot.lane.b32.xlu1 %v6048_v5, %s10736_s27  ;;  %718 = vrot.lane.b32.xlu0 %v6050_v6, %s10736_s27 }
 0x106   : > { %722 = vrot.lane.b32.xlu1 %v6048_v5, %s10734_s28  ;;  %724 = vrot.lane.b32.xlu0 %v6050_v6, %s10734_s28 }
 0x10a   : > { %728 = vrot.lane.b32.xlu1 %v6048_v5, %s10732_s29  ;;  %730 = vrot.lane.b32.xlu0 %v6050_v6, %s10732_s29 }
 0x10e   : > { %734 = vrot.lane.b32.xlu1 %v6048_v5, %s10730_s30  ;;  %736 = vrot.lane.b32.xlu0 %v6050_v6, %s10730_s30 }
 0x112   : > { %811 = vrot.lane.b32.xlu1 %v6048_v5, %s10724_s4  ;;  %813 = vrot.lane.b32.xlu0 %v6050_v6, %s10724_s4 }
 0x114   : > { %v6072_v7 = vpop.permute.xlu1 %212  ;;  %v6074_v8 = vpop.permute.xlu0 %210 }
 0x116   : > { %817 = vrot.lane.b32.xlu1 %v6048_v5, %s10659_s5  ;;  %819 = vrot.lane.b32.xlu0 %v6050_v6, %s10659_s5 }
 0x118   : > { %v6080_v9 = vpop.permute.xlu1 %216  ;;  %v6082_v10 = vpop.permute.xlu0 %218 }
 0x11a   : > { %823 = vrot.lane.b32.xlu1 %v6048_v5, %s10657_s6  ;;  %825 = vrot.lane.b32.xlu0 %v6050_v6, %s10657_s6 }
 0x11c   : > { %v6088_v11 = vpop.permute.xlu1 %222  ;;  %v6090_v12 = vpop.permute.xlu0 %224 }
 0x11e   : > { %829 = vrot.lane.b32.xlu1 %v6048_v5, %s10599_s7  ;;  %831 = vrot.lane.b32.xlu0 %v6050_v6, %s10599_s7 }
 0x120   : > { %v6096_v13 = vpop.permute.xlu1 %228  ;;  %v6098_v14 = vpop.permute.xlu0 %230 }
 0x122   : > { %835 = vrot.lane.b32.xlu1 %v6048_v5, %s10595_s8  ;;  %837 = vrot.lane.b32.xlu0 %v6050_v6, %s10595_s8 }
 0x124   : > { %v6104_v15 = vpop.permute.xlu1 %308  ;;  %v6106_v16 = vpop.permute.xlu0 %310 }
 0x126   : > { %912 = vrot.lane.b32.xlu1 %v6048_v5, %s10593_s9  ;;  %914 = vrot.lane.b32.xlu0 %v6050_v6, %s10593_s9 }
 0x128   : > { %v6112_v17 = vpop.permute.xlu1 %314  ;;  %v6114_v18 = vpop.permute.xlu0 %316 }
 0x12a   : > { %918 = vrot.lane.b32.xlu1 %v6048_v5, %s10589_s10  ;;  %920 = vrot.lane.b32.xlu0 %v6050_v6, %s10589_s10 }
 0x12c   : > { %v6120_v19 = vpop.permute.xlu1 %320  ;;  %v6122_v20 = vpop.permute.xlu0 %322 }
 0x12e   : > { %924 = vrot.lane.b32.xlu1 %v6048_v5, %s10587_s11  ;;  %926 = vrot.lane.b32.xlu0 %v6050_v6, %s10587_s11 }
 0x130   : > { %v6128_v21 = vpop.permute.xlu1 %326  ;;  %v6130_v22 = vpop.permute.xlu0 %328 }
 0x132   : > { %930 = vrot.lane.b32.xlu1 %v6048_v5, %s10583_s13  ;;  %932 = vrot.lane.b32.xlu0 %v6050_v6, %s10583_s13 }
 0x134   : > { %v6136_v23 = vpop.permute.xlu1 %332  ;;  %v6138_v24 = vpop.permute.xlu0 %334 }
 0x136   : > { %936 = vrot.lane.b32.xlu1 %v6048_v5, %s10585_s14  ;;  %938 = vrot.lane.b32.xlu0 %v6050_v6, %s10585_s14 }
 0x138   : > { %v6144_v25 = vpop.permute.xlu1 %409  ;;  %v6146_v26 = vpop.permute.xlu0 %411 }
 0x13a   : > { %1013 = vrot.lane.b32.xlu1 %v6048_v5, %s10591_s15  ;;  %1015 = vrot.lane.b32.xlu0 %v6050_v6, %s10591_s15 }
 0x13c   : > { %v6152_v27 = vpop.permute.xlu1 %415  ;;  %v6154_v28 = vpop.permute.xlu0 %417 }
 0x13e   : > { %1019 = vrot.lane.b32.xlu1 %v6048_v5, %s10597_s16  ;;  %1021 = vrot.lane.b32.xlu0 %v6050_v6, %s10597_s16 }
 0x140   : > { %v6160_v29 = vpop.permute.xlu1 %421  ;;  %v6162_v30 = vpop.permute.xlu0 %423 }
 0x142   : > { %1025 = vrot.lane.b32.xlu1 %v6048_v5, %s10603_s17  ;;  %1027 = vrot.lane.b32.xlu0 %v6050_v6, %s10603_s17 }
 0x144   : > { %v6168_v31 = vpop.permute.xlu1 %427  ;;  %v6170_v32 = vpop.permute.xlu0 %429 }
 0x146   : > { %1031 = vrot.lane.b32.xlu1 %v6048_v5, %s10726_s18  ;;  %1033 = vrot.lane.b32.xlu0 %v6050_v6, %s10726_s18 }
 0x148   : > { %v6176_v33 = vpop.permute.xlu1 %433  ;;  %v6178_v34 = vpop.permute.xlu0 %435 }
 0x14a   : > { %1037 = vrot.lane.b32.xlu1 %v6048_v5, %s10728_s19  ;;  %1039 = vrot.lane.b32.xlu0 %v6050_v6, %s10728_s19 }
 0x14c   : > { %v6184_v35 = vpop.permute.xlu1 %510  ;;  %v6186_v36 = vpop.permute.xlu0 %512 }
 0x14d   : > { %10829 = vst [vmem:[#allocation6_spill] sm:$0xff] %v6184_v35  ;;  %10830 = vst [vmem:[#allocation7_spill] sm:$0xff] %v6186_v36  ;;  %v235_v35 = vsel %vm234_vm2, %v5948_v3, %v6074_v8 }
 0x14e   : > { %1114 = vrot.lane.b32.xlu1 %v6048_v5, %s10668_s20  ;;  %1116 = vrot.lane.b32.xlu0 %v6050_v6, %s10668_s20  ;;  %v238_v3 = vsel %vm237_vm3, %v235_v35, %v6080_v9 }
 0x14f   : > { %v241_v9 = vsel %vm240_vm4, %v238_v3, %v6088_v11 }
 0x150   : > { %v6192_v37 = vpop.permute.xlu1 %516  ;;  %v6194_v38 = vpop.permute.xlu0 %518 }
 0x151   : > { %10831 = vst [vmem:[#allocation8_spill] sm:$0xff] %v6192_v37  ;;  %10832 = vst [vmem:[#allocation9_spill] sm:$0xff] %v6194_v38  ;;  %v5493_v38 = vld [vmem:[%s10567_s1 + $0x83] ss:$8 sm:$0x3] }
 0x152   : > { %1120 = vrot.lane.b32.xlu1 %v6048_v5, %s10666_s22  ;;  %1122 = vrot.lane.b32.xlu0 %v6050_v6, %s10666_s22 }
 0x154   : > { %v6200_v39 = vpop.permute.xlu1 %522  ;;  %v6202_v40 = vpop.permute.xlu0 %524 }
 0x155   : > { %10833 = vst [vmem:[#allocation10_spill] sm:$0xff] %v6200_v39  ;;  %10834 = vst [vmem:[#allocation11_spill] sm:$0xff] %v6202_v40  ;;  %v5495_v39 = vld [vmem:[%s10567_s1 + $0x44] ss:$8 sm:$0x3] }
 0x156   : > { %1126 = vrot.lane.b32.xlu1 %v6048_v5, %s10743_s23  ;;  %1128 = vrot.lane.b32.xlu0 %v6050_v6, %s10743_s23 }
 0x158   : > { %v6208_v41 = vpop.permute.xlu1 %528  ;;  %v6210_v42 = vpop.permute.xlu0 %530 }
 0x159   : > { %10835 = vst [vmem:[#allocation12_spill] sm:$0xff] %v6208_v41  ;;  %10836 = vst [vmem:[#allocation13_spill] sm:$0xff] %v6210_v42  ;;  %v5494_v41 = vld [vmem:[%s10567_s1 + $0x4] ss:$8 sm:$0x3] }
 0x15a   : > { %1132 = vrot.lane.b32.xlu1 %v6048_v5, %s10741_s24  ;;  %1134 = vrot.lane.b32.xlu0 %v6050_v6, %s10741_s24 }
 0x15c   : > { %v6216_v43 = vpop.permute.xlu1 %534  ;;  %v6218_v44 = vpop.permute.xlu0 %536 }
 0x15d   : > { %10837 = vst [vmem:[#allocation14_spill] sm:$0xff] %v6216_v43  ;;  %10838 = vst [vmem:[#allocation15_spill] sm:$0xff] %v6218_v44  ;;  %v5491_v44 = vld [vmem:[%s10567_s1 + $0x3] ss:$8 sm:$0x3] }
 0x15e   : > { %1138 = vrot.lane.b32.xlu1 %v6048_v5, %s10738_s26  ;;  %1140 = vrot.lane.b32.xlu0 %v6050_v6, %s10738_s26 }
 0x160   : > { %v6224_v45 = vpop.permute.xlu1 %611  ;;  %v6226_v46 = vpop.permute.xlu0 %613 }
 0x161   : > { %10839 = vst [vmem:[#allocation16_spill] sm:$0xff] %v6224_v45  ;;  %10840 = vst [vmem:[#allocation17_spill] sm:$0xff] %v6226_v46 }
 0x162   : > { %1219 = vrot.lane.b32.xlu1 %v6228_v47, %s10736_s27  ;;  %1221 = vrot.lane.b32.xlu0 %v6230_v48, %s10736_s27 }
 0x164   : > { %v6236_v49 = vpop.permute.xlu1 %617  ;;  %v6238_v50 = vpop.permute.xlu0 %619 }
 0x165   : > { %10841 = vst [vmem:[#allocation18_spill] sm:$0xff] %v6236_v49  ;;  %10842 = vst [vmem:[#allocation19_spill] sm:$0xff] %v6238_v50  ;;  %v5489_v50 = vld [vmem:[%s10567_s1 + $0x42] ss:$8 sm:$0x3] }
 0x166   : > { %1225 = vrot.lane.b32.xlu1 %v6228_v47, %s10734_s28  ;;  %1227 = vrot.lane.b32.xlu0 %v6230_v48, %s10734_s28 }
 0x168   : > { %v6244_v51 = vpop.permute.xlu1 %623  ;;  %v6246_v52 = vpop.permute.xlu0 %625 }
 0x169   : > { %10843 = vst [vmem:[#allocation20_spill] sm:$0xff] %v6244_v51  ;;  %10844 = vst [vmem:[#allocation21_spill] sm:$0xff] %v6246_v52 }
 0x16a   : > { %1231 = vrot.lane.b32.xlu1 %v6228_v47, %s10732_s29  ;;  %1233 = vrot.lane.b32.xlu0 %v6230_v48, %s10732_s29 }
 0x16c   : > { %v6252_v53 = vpop.permute.xlu1 %629  ;;  %v6254_v54 = vpop.permute.xlu0 %631 }
 0x16d   : > { %10845 = vst [vmem:[#allocation22_spill] sm:$0xff] %v6252_v53  ;;  %10846 = vst [vmem:[#allocation23_spill] sm:$0xff] %v6254_v54  ;;  %v5490_v53 = vld [vmem:[%s10567_s1 + $0x82] ss:$8 sm:$0x3] }
 0x16e   : > { %1237 = vrot.lane.b32.xlu1 %v6228_v47, %s10730_s30  ;;  %1239 = vrot.lane.b32.xlu0 %v6230_v48, %s10730_s30 }
 0x170   : > { %v6260_v55 = vpop.permute.xlu1 %635  ;;  %v6262_v56 = vpop.permute.xlu0 %637 }
 0x171   : > { %10847 = vst [vmem:[#allocation24_spill] sm:$0xff] %v6260_v55  ;;  %10848 = vst [vmem:[#allocation25_spill] sm:$0xff] %v6262_v56  ;;  %v5488_v56 = vld [vmem:[%s10567_s1 + $0x2] ss:$8 sm:$0x3] }
 0x172   : > { %1314 = vrot.lane.b32.xlu1 %v6228_v47, %s10724_s4  ;;  %1316 = vrot.lane.b32.xlu0 %v6230_v48, %s10724_s4 }
 0x174   : > { %v6268_v57 = vpop.permute.xlu1 %716  ;;  %v6270_v58 = vpop.permute.xlu0 %718 }
 0x175   : > { %10849 = vst [vmem:[#allocation26_spill] sm:$0xff] %v6268_v57  ;;  %10850 = vst [vmem:[#allocation27_spill] sm:$0xff] %v6270_v58 }
 0x176   : > { %1320 = vrot.lane.b32.xlu1 %v6228_v47, %s10659_s5  ;;  %1322 = vrot.lane.b32.xlu0 %v6230_v48, %s10659_s5 }
 0x178   : > { %v6276_v59 = vpop.permute.xlu1 %722  ;;  %v6278_v60 = vpop.permute.xlu0 %724 }
 0x179   : > { %10851 = vst [vmem:[#allocation28_spill] sm:$0xff] %v6276_v59  ;;  %10852 = vst [vmem:[#allocation29_spill] sm:$0xff] %v6278_v60  ;;  %v5485_v60 = vld [vmem:[%s10567_s1 + $0x1] ss:$8 sm:$0x3] }
 0x17a   : > { %1326 = vrot.lane.b32.xlu1 %v6228_v47, %s10657_s6  ;;  %1328 = vrot.lane.b32.xlu0 %v6230_v48, %s10657_s6 }
 0x17c   : > { %v6284_v61 = vpop.permute.xlu1 %728  ;;  %v6286_v62 = vpop.permute.xlu0 %730 }
 0x17d   : > { %10853 = vst [vmem:[#allocation30_spill] sm:$0xff] %v6284_v61  ;;  %10854 = vst [vmem:[#allocation31_spill] sm:$0xff] %v6286_v62  ;;  %v5486_v61 = vld [vmem:[%s10567_s1 + $0x41] ss:$8 sm:$0x3] }
 0x17e   : > { %1332 = vrot.lane.b32.xlu1 %v6228_v47, %s10599_s7  ;;  %1334 = vrot.lane.b32.xlu0 %v6230_v48, %s10599_s7 }
 0x180   : > { %v6292_v63 = vpop.permute.xlu1 %734  ;;  %v6294_v0 = vpop.permute.xlu0 %736 }
 0x181   : > { %10855 = vst [vmem:[#allocation32_spill] sm:$0xff] %v6292_v63  ;;  %10856 = vst [vmem:[#allocation33_spill] sm:$0xff] %v6294_v0  ;;  %v6426_v63 = vld [vmem:[#allocation2 + $0xb] sm:$0xf] }
 0x182   : > { %1338 = vrot.lane.b32.xlu1 %v6228_v47, %s10595_s8  ;;  %1340 = vrot.lane.b32.xlu0 %v6230_v48, %s10595_s8 }
 0x184   : > { %v6300_v1 = vpop.permute.xlu1 %811  ;;  %v6302_v2 = vpop.permute.xlu0 %813 }
 0x185   : > { %10857 = vst [vmem:[#allocation34_spill] sm:$0xff] %v6300_v1  ;;  %10858 = vst [vmem:[#allocation35_spill] sm:$0xff] %v6302_v2 }
 0x186   : > { %1415 = vrot.lane.b32.xlu1 %v6228_v47, %s10593_s9  ;;  %1417 = vrot.lane.b32.xlu0 %v6230_v48, %s10593_s9 }
 0x188   : > { %v6308_v5 = vpop.permute.xlu1 %817  ;;  %v6310_v6 = vpop.permute.xlu0 %819 }
 0x189   : > { %10859 = vst [vmem:[#allocation36_spill] sm:$0xff] %v6308_v5  ;;  %10860 = vst [vmem:[#allocation37_spill] sm:$0xff] %v6310_v6 }
 0x18a   : > { %1421 = vrot.lane.b32.xlu1 %v6228_v47, %s10589_s10  ;;  %1423 = vrot.lane.b32.xlu0 %v6230_v48, %s10589_s10 }
 0x18c   : > { %v6316_v0 = vpop.permute.xlu1 %823  ;;  %v6318_v1 = vpop.permute.xlu0 %825 }
 0x18d   : > { %10861 = vst [vmem:[#allocation38_spill] sm:$0xff] %v6316_v0  ;;  %10862 = vst [vmem:[#allocation39_spill] sm:$0xff] %v6318_v1 }
 0x18e   : > { %1427 = vrot.lane.b32.xlu1 %v6228_v47, %s10587_s11  ;;  %1429 = vrot.lane.b32.xlu0 %v6230_v48, %s10587_s11 }
 0x190   : > { %v6324_v2 = vpop.permute.xlu1 %829  ;;  %v6326_v5 = vpop.permute.xlu0 %831 }
 0x191   : > { %10863 = vst [vmem:[#allocation40_spill] sm:$0xff] %v6324_v2  ;;  %10864 = vst [vmem:[#allocation41_spill] sm:$0xff] %v6326_v5 }
 0x192   : > { %1433 = vrot.lane.b32.xlu1 %v6228_v47, %s10583_s13  ;;  %1435 = vrot.lane.b32.xlu0 %v6230_v48, %s10583_s13 }
 0x194   : > { %v6332_v6 = vpop.permute.xlu1 %835  ;;  %v6334_v0 = vpop.permute.xlu0 %837 }
 0x195   : > { %10865 = vst [vmem:[#allocation42_spill] sm:$0xff] %v6332_v6  ;;  %10866 = vst [vmem:[#allocation43_spill] sm:$0xff] %v6334_v0 }
 0x196   : > { %1439 = vrot.lane.b32.xlu1 %v6228_v47, %s10585_s14  ;;  %1441 = vrot.lane.b32.xlu0 %v6230_v48, %s10585_s14 }
 0x198   : > { %v6340_v1 = vpop.permute.xlu1 %912  ;;  %v6342_v2 = vpop.permute.xlu0 %914 }
 0x199   : > { %10867 = vst [vmem:[#allocation44_spill] sm:$0xff] %v6340_v1  ;;  %10868 = vst [vmem:[#allocation45_spill] sm:$0xff] %v6342_v2 }
 0x19a   : > { %1516 = vrot.lane.b32.xlu1 %v6228_v47, %s10591_s15  ;;  %1518 = vrot.lane.b32.xlu0 %v6230_v48, %s10591_s15 }
 0x19c   : > { %v6348_v5 = vpop.permute.xlu1 %918  ;;  %v6350_v6 = vpop.permute.xlu0 %920 }
 0x19d   : > { %10869 = vst [vmem:[#allocation46_spill] sm:$0xff] %v6348_v5  ;;  %10870 = vst [vmem:[#allocation47_spill] sm:$0xff] %v6350_v6 }
 0x19e   : > { %1522 = vrot.lane.b32.xlu1 %v6228_v47, %s10597_s16  ;;  %1524 = vrot.lane.b32.xlu0 %v6230_v48, %s10597_s16 }
 0x1a0   : > { %v6356_v0 = vpop.permute.xlu1 %924  ;;  %v6358_v1 = vpop.permute.xlu0 %926 }
 0x1a1   : > { %10871 = vst [vmem:[#allocation48_spill] sm:$0xff] %v6356_v0  ;;  %10872 = vst [vmem:[#allocation49_spill] sm:$0xff] %v6358_v1 }
 0x1a2   : > { %1528 = vrot.lane.b32.xlu1 %v6228_v47, %s10603_s17  ;;  %1530 = vrot.lane.b32.xlu0 %v6230_v48, %s10603_s17 }
 0x1a4   : > { %v6364_v2 = vpop.permute.xlu1 %930  ;;  %v6366_v5 = vpop.permute.xlu0 %932 }
 0x1a5   : > { %10873 = vst [vmem:[#allocation50_spill] sm:$0xff] %v6364_v2  ;;  %10874 = vst [vmem:[#allocation51_spill] sm:$0xff] %v6366_v5 }
 0x1a6   : > { %1534 = vrot.lane.b32.xlu1 %v6228_v47, %s10726_s18  ;;  %1536 = vrot.lane.b32.xlu0 %v6230_v48, %s10726_s18 }
 0x1a8   : > { %v6372_v6 = vpop.permute.xlu1 %936  ;;  %v6374_v0 = vpop.permute.xlu0 %938 }
 0x1a9   : > { %10875 = vst [vmem:[#allocation52_spill] sm:$0xff] %v6372_v6  ;;  %10876 = vst [vmem:[#allocation53_spill] sm:$0xff] %v6374_v0 }
 0x1aa   : > { %1540 = vrot.lane.b32.xlu1 %v6228_v47, %s10728_s19  ;;  %1542 = vrot.lane.b32.xlu0 %v6230_v48, %s10728_s19 }
 0x1ac   : > { %v6380_v1 = vpop.permute.xlu1 %1013  ;;  %v6382_v2 = vpop.permute.xlu0 %1015 }
 0x1ad   : > { %10877 = vst [vmem:[#allocation54_spill] sm:$0xff] %v6380_v1  ;;  %10878 = vst [vmem:[#allocation55_spill] sm:$0xff] %v6382_v2 }
 0x1ae   : > { %1617 = vrot.lane.b32.xlu1 %v6228_v47, %s10668_s20  ;;  %1619 = vrot.lane.b32.xlu0 %v6230_v48, %s10668_s20 }
 0x1b0   : > { %v6388_v5 = vpop.permute.xlu1 %1019  ;;  %v6390_v6 = vpop.permute.xlu0 %1021 }
 0x1b1   : > { %10879 = vst [vmem:[#allocation56_spill] sm:$0xff] %v6388_v5  ;;  %10880 = vst [vmem:[#allocation57_spill] sm:$0xff] %v6390_v6 }
 0x1b2   : > { %1623 = vrot.lane.b32.xlu1 %v6228_v47, %s10666_s22  ;;  %1625 = vrot.lane.b32.xlu0 %v6230_v48, %s10666_s22 }
 0x1b4   : > { %v6396_v0 = vpop.permute.xlu1 %1025  ;;  %v6398_v1 = vpop.permute.xlu0 %1027 }
 0x1b5   : > { %10881 = vst [vmem:[#allocation58_spill] sm:$0xff] %v6396_v0  ;;  %10882 = vst [vmem:[#allocation59_spill] sm:$0xff] %v6398_v1 }
 0x1b6   : > { %1629 = vrot.lane.b32.xlu1 %v6228_v47, %s10743_s23  ;;  %1631 = vrot.lane.b32.xlu0 %v6230_v48, %s10743_s23 }
 0x1b8   : > { %v6404_v2 = vpop.permute.xlu1 %1031  ;;  %v6406_v5 = vpop.permute.xlu0 %1033 }
 0x1b9   : > { %10883 = vst [vmem:[#allocation60_spill] sm:$0xff] %v6404_v2  ;;  %10884 = vst [vmem:[#allocation61_spill] sm:$0xff] %v6406_v5  ;;  %v6422_v2 = vld [vmem:[#allocation2 + $0x3] sm:$0xff] }
 0x1ba   : > { %1635 = vrot.lane.b32.xlu1 %v6228_v47, %s10741_s24  ;;  %1637 = vrot.lane.b32.xlu0 %v6230_v48, %s10741_s24 }
 0x1bc   : > { %v6412_v6 = vpop.permute.xlu1 %1037  ;;  %v6414_v0 = vpop.permute.xlu0 %1039 }
 0x1bd   : > { %10885 = vst [vmem:[#allocation62_spill] sm:$0xff] %v6412_v6  ;;  %10886 = vst [vmem:[#allocation63_spill] sm:$0xff] %v6414_v0 }
 0x1be   : > { %1641 = vrot.lane.b32.xlu1 %v6228_v47, %s10738_s26  ;;  %1643 = vrot.lane.b32.xlu0 %v6230_v48, %s10738_s26 }
 0x1c0   : > { %v6420_v1 = vpop.permute.xlu1 %1114  ;;  %v6424_v5 = vpop.permute.xlu0 %1116 }
 0x1c1   : > { %10887 = vst [vmem:[#allocation64_spill] sm:$0xff] %v6420_v1  ;;  %10888 = vst [vmem:[#allocation65_spill] sm:$0xff] %v6424_v5 }
 0x1c2   : > { %1722 = vrot.lane.b32.xlu1 %v6422_v2, %s10736_s27  ;;  %1724 = vrot.lane.b32.xlu0 %v6426_v63, %s10736_s27 }
 0x1c4   : > { %v6432_v0 = vpop.permute.xlu1 %1120  ;;  %v6434_v47 = vpop.permute.xlu0 %1122 }
 0x1c5   : > { %10889 = vst [vmem:[#allocation66_spill] sm:$0xff] %v6432_v0  ;;  %10890 = vst [vmem:[#allocation67_spill] sm:$0xff] %v6434_v47 }
 0x1c6   : > { %1728 = vrot.lane.b32.xlu1 %v6422_v2, %s10734_s28  ;;  %1730 = vrot.lane.b32.xlu0 %v6426_v63, %s10734_s28 }
 0x1c8   : > { %v6440_v48 = vpop.permute.xlu1 %1126  ;;  %v6442_v5 = vpop.permute.xlu0 %1128 }
 0x1c9   : > { %10891 = vst [vmem:[#allocation68_spill] sm:$0xff] %v6440_v48  ;;  %10892 = vst [vmem:[#allocation69_spill] sm:$0xff] %v6442_v5 }
 0x1ca   : > { %1734 = vrot.lane.b32.xlu1 %v6422_v2, %s10732_s29  ;;  %1736 = vrot.lane.b32.xlu0 %v6426_v63, %s10732_s29 }
 0x1cc   : > { %v6448_v1 = vpop.permute.xlu1 %1132  ;;  %v6450_v0 = vpop.permute.xlu0 %1134 }
 0x1cd   : > { %10893 = vst [vmem:[#allocation70_spill] sm:$0xff] %v6448_v1  ;;  %10894 = vst [vmem:[#allocation71_spill] sm:$0xff] %v6450_v0 }
 0x1ce   : > { %1740 = vrot.lane.b32.xlu1 %v6422_v2, %s10730_s30  ;;  %1742 = vrot.lane.b32.xlu0 %v6426_v63, %s10730_s30 }
 0x1d0   : > { %v6456_v47 = vpop.permute.xlu1 %1138  ;;  %v6458_v48 = vpop.permute.xlu0 %1140 }
 0x1d1   : > { %10895 = vst [vmem:[#allocation72_spill] sm:$0xff] %v6456_v47  ;;  %10896 = vst [vmem:[#allocation73_spill] sm:$0xff] %v6458_v48 }
 0x1d2   : > { %1817 = vrot.lane.b32.xlu1 %v6422_v2, %s10724_s4  ;;  %1819 = vrot.lane.b32.xlu0 %v6426_v63, %s10724_s4 }
 0x1d4   : > { %v6464_v5 = vpop.permute.xlu1 %1219  ;;  %v6466_v1 = vpop.permute.xlu0 %1221 }
 0x1d5   : > { %10897 = vst [vmem:[#allocation74_spill] sm:$0xff] %v6464_v5  ;;  %10898 = vst [vmem:[#allocation75_spill] sm:$0xff] %v6466_v1 }
 0x1d6   : > { %1823 = vrot.lane.b32.xlu1 %v6422_v2, %s10659_s5  ;;  %1825 = vrot.lane.b32.xlu0 %v6426_v63, %s10659_s5 }
 0x1d8   : > { %v6472_v0 = vpop.permute.xlu1 %1225  ;;  %v6474_v47 = vpop.permute.xlu0 %1227 }
 0x1d9   : > { %10899 = vst [vmem:[#allocation76_spill] sm:$0xff] %v6472_v0  ;;  %10900 = vst [vmem:[#allocation77_spill] sm:$0xff] %v6474_v47 }
 0x1da   : > { %1829 = vrot.lane.b32.xlu1 %v6422_v2, %s10657_s6  ;;  %1831 = vrot.lane.b32.xlu0 %v6426_v63, %s10657_s6 }
 0x1dc   : > { %v6480_v48 = vpop.permute.xlu1 %1231  ;;  %v6482_v5 = vpop.permute.xlu0 %1233 }
 0x1dd   : > { %10901 = vst [vmem:[#allocation78_spill] sm:$0xff] %v6480_v48  ;;  %10902 = vst [vmem:[#allocation79_spill] sm:$0xff] %v6482_v5 }
 0x1de   : > { %1835 = vrot.lane.b32.xlu1 %v6422_v2, %s10599_s7  ;;  %1837 = vrot.lane.b32.xlu0 %v6426_v63, %s10599_s7  ;;  %s11070_s7 = smov 106  }
 0x1e0   : > { %v6488_v1 = vpop.permute.xlu1 %1237  ;;  %v6490_v0 = vpop.permute.xlu0 %1239 }
 0x1e1   : > { %10903 = vst [vmem:[#allocation80_spill] sm:$0xff] %v6488_v1  ;;  %10904 = vst [vmem:[#allocation81_spill] sm:$0xff] %v6490_v0 }
 0x1e2   : > { %1841 = vrot.lane.b32.xlu1 %v6422_v2, %s10595_s8  ;;  %1843 = vrot.lane.b32.xlu0 %v6426_v63, %s10595_s8  ;;  %s11086_s8 = smov 125  }
 0x1e4   : > { %v6496_v47 = vpop.permute.xlu1 %1314  ;;  %v6498_v48 = vpop.permute.xlu0 %1316 }
 0x1e5   : > { %10905 = vst [vmem:[#allocation82_spill] sm:$0xff] %v6496_v47  ;;  %10906 = vst [vmem:[#allocation83_spill] sm:$0xff] %v6498_v48 }
 0x1e6   : > { %1918 = vrot.lane.b32.xlu1 %v6422_v2, %s10593_s9  ;;  %1920 = vrot.lane.b32.xlu0 %v6426_v63, %s10593_s9  ;;  %s11018_s9 = smov 107  }
 0x1e8   : > { %v6504_v5 = vpop.permute.xlu1 %1320  ;;  %v6506_v1 = vpop.permute.xlu0 %1322 }
 0x1e9   : > { %10907 = vst [vmem:[#allocation84_spill] sm:$0xff] %v6504_v5  ;;  %10908 = vst [vmem:[#allocation85_spill] sm:$0xff] %v6506_v1 }
 0x1ea   : > { %1924 = vrot.lane.b32.xlu1 %v6422_v2, %s10589_s10  ;;  %1926 = vrot.lane.b32.xlu0 %v6426_v63, %s10589_s10  ;;  %s11027_s10 = smov 15  }
 0x1ec   : > { %v6512_v0 = vpop.permute.xlu1 %1326  ;;  %v6514_v47 = vpop.permute.xlu0 %1328 }
 0x1ed   : > { %10909 = vst [vmem:[#allocation86_spill] sm:$0xff] %v6512_v0  ;;  %10910 = vst [vmem:[#allocation87_spill] sm:$0xff] %v6514_v47 }
 0x1ee   : > { %1930 = vrot.lane.b32.xlu1 %v6422_v2, %s10587_s11  ;;  %1932 = vrot.lane.b32.xlu0 %v6426_v63, %s10587_s11  ;;  %s5482_s11 = sld [smem:[#allocation3 + $0x2]] }
 0x1f0   : > { %v6520_v48 = vpop.permute.xlu1 %1332  ;;  %v6522_v5 = vpop.permute.xlu0 %1334 }
 0x1f1   : > { %10911 = vst [vmem:[#allocation88_spill] sm:$0xff] %v6520_v48  ;;  %10912 = vst [vmem:[#allocation89_spill] sm:$0xff] %v6522_v5  ;;  %v248_v5 = vlaneseq }
 0x1f2   : > { %1936 = vrot.lane.b32.xlu1 %v6422_v2, %s10583_s13  ;;  %1938 = vrot.lane.b32.xlu0 %v6426_v63, %s10583_s13  ;;  %s200_s13 = sld [smem:[#allocation3]] }
 0x1f3   : > { %v249_v6 = vshrl.u32 %v248_v5, 7  ;;  %v5483_v5 = vld [vmem:[%s10567_s1 + $0x40] ss:$8 sm:$0x3] }
 0x1f4   : > { %v6528_v1 = vpop.permute.xlu1 %1338  ;;  %v6530_v0 = vpop.permute.xlu0 %1340  ;;  %v6606_v54 = vstv %s5482_s11  ;;  %s11077_s11 = smov 14  }
 0x1f5   : > { %10913 = vst [vmem:[#allocation90_spill] sm:$0xff] %v6528_v1  ;;  %10914 = vst [vmem:[#allocation91_spill] sm:$0xff] %v6530_v0 }
 0x1f6   : > { %1942 = vrot.lane.b32.xlu1 %v6422_v2, %s10585_s14  ;;  %1944 = vrot.lane.b32.xlu0 %v6426_v63, %s10585_s14  ;;  %s5481_s14 = sld [smem:[#allocation3 + $0x1]] }
 0x1f8   : > { %v6536_v47 = vpop.permute.xlu1 %1415  ;;  %v6538_v48 = vpop.permute.xlu0 %1417 }
 0x1f9   : > { %10915 = vst [vmem:[#allocation92_spill] sm:$0xff] %v6536_v47  ;;  %10916 = vst [vmem:[#allocation93_spill] sm:$0xff] %v6538_v48 }
 0x1fa   : > { %2019 = vrot.lane.b32.xlu1 %v6422_v2, %s10591_s15  ;;  %2021 = vrot.lane.b32.xlu0 %v6426_v63, %s10591_s15  ;;  %s11100_s15 = smov 69  }
 0x1fc   : > { %v6544_v1 = vpop.permute.xlu1 %1421  ;;  %v6546_v0 = vpop.permute.xlu0 %1423  ;;  %v6604_v55 = vstv %s5481_s14  ;;  %s11167_s14 = smov 4  }
 0x1fd   : > { %10917 = vst [vmem:[#allocation94_spill] sm:$0xff] %v6544_v1  ;;  %10918 = vst [vmem:[#allocation95_spill] sm:$0xff] %v6546_v0  ;;  %v246_v1 = vld [vmem:[%s10567_s1] ss:$8 sm:$0x3]  ;;  %v6561_v0 = vsub.s32 0, %v249_v6 }
 0x1fe   : > { %2025 = vrot.lane.b32.xlu1 %v6422_v2, %s10597_s16  ;;  %2027 = vrot.lane.b32.xlu0 %v6426_v63, %s10597_s16  ;;  %s11045_s16 = smov 34  }
 0x1ff   : > { %10921 = vst [vmem:[#allocation98_spill] sm:$0xff] %v6561_v0  ;;  %v6591_v59 = vrot.slane %v246_v1, %v6561_v0  ;;  %v6594_v57 = vrot.slane %v5483_v5, %v6561_v0  ;;  %v6626_v49 = vrot.slane %v5485_v60, %v6561_v0  ;;  %v6652_v36 = vrot.slane %v5488_v56, %v6561_v0 }
 0x200   : > { %v6552_v48 = vpop.permute.xlu1 %1427  ;;  %v6554_v47 = vpop.permute.xlu0 %1429  ;;  %v6702_v8 = vrot.slane %v5493_v38, %v6561_v0 }
 0x201   : > { %10919 = vst [vmem:[#allocation96_spill] sm:$0xff] %v6552_v48  ;;  %10920 = vst [vmem:[#allocation97_spill] sm:$0xff] %v6554_v47  ;;  %v5484_v47 = vld [vmem:[%s10567_s1 + $0x80] ss:$8 sm:$0x3]  ;;  %v6571_v48 = vsub.s32 1, %v249_v6 }
 0x202   : > { %2031 = vrot.lane.b32.xlu1 %v6422_v2, %s10603_s17  ;;  %2033 = vrot.lane.b32.xlu0 %v6426_v63, %s10603_s17  ;;  %v5487_v6 = vld [vmem:[%s10567_s1 + $0x81] ss:$8 sm:$0x3]  ;;  %s11060_s17 = smov 70  }
 0x203   : > { %10922 = vst [vmem:[#allocation99_spill] sm:$0xff] %v6571_v48  ;;  %v6609_v52 = vrot.slane %v246_v1, %v6571_v48  ;;  %v6612_v46 = vrot.slane %v5483_v5, %v6571_v48  ;;  %v6623_v45 = vrot.slane %v5484_v47, %v6571_v48  ;;  %v6629_v1 = vrot.slane %v5486_v61, %v6561_v0 }
 0x204   : > { %v6573_v62 = vpop.permute.xlu1 %1433  ;;  %v6578_v58 = vpop.permute.xlu0 %1435  ;;  %v6632_v5 = vrot.slane %v5487_v6, %v6561_v0  ;;  %v6646_v42 = vrot.slane %v5486_v61, %v6571_v48  ;;  %v6649_v40 = vrot.slane %v5487_v6, %v6571_v48  ;;  %v6666_v61 = vrot.slane %v5488_v56, %v6571_v48 }
 0x205   : > { %10923 = vst [vmem:[#allocation100_spill] sm:$0xff] %v6573_v62  ;;  %10924 = vst [vmem:[#allocation101_spill] sm:$0xff] %v6578_v58  ;;  %v6588_v62 = vstv %s200_s13  ;;  %v6597_v58 = vrot.slane %v5484_v47, %v6561_v0  ;;  %v6643_v47 = vrot.slane %v5485_v60, %v6571_v48  ;;  %v6663_v60 = vrot.slane %v5490_v53, %v6561_v0  ;;  %s11036_s13 = smov 126  }
 0x206   : > { %2037 = vrot.lane.b32.xlu1 %v6422_v2, %s10726_s18  ;;  %2039 = vrot.lane.b32.xlu0 %v6426_v63, %s10726_s18  ;;  %10928 = vst [vmem:[#allocation105_spill] sm:$0xff] %v6666_v61  ;;  %v6669_v6 = vrot.slane %v5489_v50, %v6571_v48  ;;  %v6683_v56 = vrot.slane %v5490_v53, %v6571_v48  ;;  %v5497_v61 = vld [vmem:[%s10567_s1 + $0x5] ss:$8 sm:$0x3] }
 0x207   : > { %10927 = vst [vmem:[#allocation104_spill] sm:$0xff] %v6663_v60  ;;  %v6705_v53 = vrot.slane %v5491_v44, %v6571_v48  ;;  %v6721_v35 = vrot.slane %v5493_v38, %v6571_v48  ;;  %v6738_v3 = vrot.slane %v5495_v39, %v6571_v48 }
 0x208   : > { %v6620_v51 = vpop.permute.xlu1 %1439  ;;  %v6640_v43 = vpop.permute.xlu0 %1441  ;;  %10929 = vst [vmem:[#allocation106_spill] sm:$0xff] %v6669_v6  ;;  %10930 = vst [vmem:[#allocation107_spill] sm:$0xff] %v6683_v56  ;;  %v5496_v6 = vld [vmem:[%s10567_s1 + $0x84] ss:$8 sm:$0x3] }
 0x209   : > { %10925 = vst [vmem:[#allocation102_spill] sm:$0xff] %v6620_v51  ;;  %v5492_v51 = vld [vmem:[%s10567_s1 + $0x43] ss:$8 sm:$0x3]  ;;  %10926 = vst [vmem:[#allocation103_spill] sm:$0xff] %v6640_v43  ;;  %v6660_v43 = vrot.slane %v5489_v50, %v6561_v0  ;;  %v6686_v50 = vrot.slane %v5491_v44, %v6561_v0  ;;  %v6724_v44 = vrot.slane %v5494_v41, %v6561_v0 }
 0x20a   : > { %2043 = vrot.lane.b32.xlu1 %v6422_v2, %s10728_s19  ;;  %2045 = vrot.lane.b32.xlu0 %v6426_v63, %s10728_s19  ;;  %v6689_v37 = vrot.slane %v5492_v51, %v6561_v0  ;;  %10936 = vst [vmem:[#allocation113_spill] sm:$0xff] %v6721_v35  ;;  %10941 = vst [vmem:[#allocation118_spill] sm:$0xff] %v6738_v3  ;;  %v6741_v38 = vrot.slane %v5496_v6, %v6571_v48  ;;  %v5502_v3 = vld [vmem:[%s10567_s1 + $0x86] ss:$8 sm:$0x3] }
 0x20b   : > { %10931 = vst [vmem:[#allocation108_spill] sm:$0xff] %v6686_v50  ;;  %v5498_v50 = vld [vmem:[%s10567_s1 + $0x45] ss:$8 sm:$0x3]  ;;  %10937 = vst [vmem:[#allocation114_spill] sm:$0xff] %v6724_v44 }
 0x20c   : > { %10932 = vst [vmem:[#allocation109_spill] sm:$0xff] %v6689_v37  ;;  %v6697_v60 = vpop.permute.xlu1 %1516  ;;  %v6708_v37 = vrot.slane %v5492_v51, %v6571_v48  ;;  %v6716_v56 = vpop.permute.xlu0 %1518  ;;  %v6727_v51 = vrot.slane %v5495_v39, %v6561_v0  ;;  %10942 = vst [vmem:[#allocation119_spill] sm:$0xff] %v6741_v38  ;;  %v5500_v44 = vld [vmem:[%s10567_s1 + $0x6] ss:$8 sm:$0x3]  ;;  %v6755_v39 = vrot.slane %v5497_v61, %v6561_v0 }
 0x20d   : > { %10933 = vst [vmem:[#allocation110_spill] sm:$0xff] %v6697_v60  ;;  %v5499_v60 = vld [vmem:[%s10567_s1 + $0x85] ss:$8 sm:$0x3]  ;;  %10935 = vst [vmem:[#allocation112_spill] sm:$0xff] %v6716_v56  ;;  %v6735_v56 = vrot.slane %v5494_v41, %v6571_v48  ;;  %v236_v41 = vsel %vm234_vm2, %v5950_v4, %v6072_v7  ;;  %v258_v4 = vmul.f32 %v6591_v59, %v241_v9 }
 0x20e   : > { %10934 = vst [vmem:[#allocation111_spill] sm:$0xff] %v6708_v37  ;;  %10938 = vst [vmem:[#allocation115_spill] sm:$0xff] %v6727_v51  ;;  %2120 = vrot.lane.b32.xlu1 %v6422_v2, %s10668_s20  ;;  %v6732_v37 = vrot.slane %v5496_v6, %v6561_v0  ;;  %v5501_v51 = vld [vmem:[%s10567_s1 + $0x46] ss:$8 sm:$0x3]  ;;  %2122 = vrot.lane.b32.xlu0 %v6426_v63, %s10668_s20  ;;  %v6758_v6 = vrot.slane %v5498_v50, %v6561_v0 }
 0x20f   : > { %10940 = vst [vmem:[#allocation117_spill] sm:$0xff] %v6735_v56  ;;  %10943 = vst [vmem:[#allocation120_spill] sm:$0xff] %v6755_v39  ;;  %v6761_v38 = vrot.slane %v5499_v60, %v6561_v0  ;;  %v6772_v7 = vrot.slane %v5497_v61, %v6571_v48  ;;  %v6775_v39 = vrot.slane %v5498_v50, %v6571_v48 }
 0x210   : > { %10939 = vst [vmem:[#allocation116_spill] sm:$0xff] %v6732_v37  ;;  %10944 = vst [vmem:[#allocation121_spill] sm:$0xff] %v6758_v6  ;;  %v6766_v56 = vpop.permute.xlu1 %1522  ;;  %v239_v37 = vsel %vm237_vm3, %v236_v41, %v6082_v10  ;;  %v6777_v6 = vpop.permute.xlu0 %1524  ;;  %v6782_v35 = vrot.slane %v5499_v60, %v6571_v48  ;;  %v6788_v10 = vrot.slane %v5501_v51, %v6561_v0 }
 0x211   : > { %10945 = vst [vmem:[#allocation122_spill] sm:$0xff] %v6761_v38  ;;  %10946 = vst [vmem:[#allocation123_spill] sm:$0xff] %v6766_v56  ;;  %v242_v38 = vsel %vm240_vm4, %v239_v37, %v6090_v12  ;;  %v6785_v56 = vrot.slane %v5500_v44, %v6561_v0  ;;  %v244_v61 = vsel %vm243_vm5, %v6088_v11, %v6096_v13 }
 0x212   : > { %10947 = vst [vmem:[#allocation124_spill] sm:$0xff] %v6777_v6  ;;  %10949 = vst [vmem:[#allocation126_spill] sm:$0xff] %v6788_v10  ;;  %2126 = vrot.lane.b32.xlu1 %v6422_v2, %s10666_s22  ;;  %v6796_v50 = vrot.slane %v5502_v3, %v6561_v0  ;;  %v6799_v37 = vrot.slane %v5500_v44, %v6571_v48  ;;  %v6802_v60 = vrot.slane %v5501_v51, %v6571_v48 }
 0x213   : > { %10948 = vst [vmem:[#allocation125_spill] sm:$0xff] %v6785_v56  ;;  %2128 = vrot.lane.b32.xlu0 %v6426_v63, %s10666_s22  ;;  %v279_v41 = vmul.f32 %v6594_v57, %v241_v9  ;;  %v300_v6 = vmul.f32 %v6597_v58, %v241_v9  ;;  %v245_v11 = vsel %vm243_vm5, %v6090_v12, %v6098_v14 }
 0x214   : > { %10950 = vst [vmem:[#allocation127_spill] sm:$0xff] %v6796_v50  ;;  %10951 = vst [vmem:[#allocation128_spill] sm:$0xff] %v6799_v37  ;;  %v6812_v13 = vrot.slane %v5502_v3, %v6571_v48  ;;  %v6814_v50 = vpop.permute.xlu1 %1528  ;;  %v262_v44 = vadd.f32 %v258_v4, %v6588_v62  ;;  %v260_v51 = vmul.f32 %v6591_v59, %v242_v38  ;;  %v6820_v10 = vpop.permute.xlu0 %1530 }
 0x215   : > { %10952 = vst [vmem:[#allocation129_spill] sm:$0xff] %v6802_v60  ;;  %10953 = vst [vmem:[#allocation130_spill] sm:$0xff] %v6814_v50  ;;  %v281_v60 = vmul.f32 %v6594_v57, %v242_v38  ;;  %v302_v37 = vmul.f32 %v6597_v58, %v242_v38  ;;  %v259_v9 = vmul.f32 %v6609_v52, %v244_v61 }
 0x216   : > { %10954 = vst [vmem:[#allocation131_spill] sm:$0xff] %v6820_v10  ;;  %v280_v56 = vmul.f32 %v6612_v46, %v244_v61  ;;  %v301_v12 = vmul.f32 %v6623_v45, %v244_v61  ;;  %v338_v14 = vsel %vm234_vm2, %v6104_v15, %v6112_v17  ;;  %2132 = vrot.lane.b32.xlu1 %v6422_v2, %s10743_s23 }
 0x217   : > { %v261_v59 = vmul.f32 %v6609_v52, %v245_v11  ;;  %v282_v57 = vmul.f32 %v6612_v46, %v245_v11  ;;  %v303_v58 = vmul.f32 %v6623_v45, %v245_v11  ;;  %v340_v3 = vsel %vm237_vm3, %v338_v14, %v6120_v19  ;;  %2134 = vrot.lane.b32.xlu0 %v6426_v63, %s10743_s23 }
 0x218   : > { %v283_v38 = vadd.f32 %v279_v41, %v6604_v55  ;;  %v304_v4 = vadd.f32 %v300_v6, %v6606_v54  ;;  %v339_v15 = vsel %vm234_vm2, %v6106_v16, %v6114_v18  ;;  %v342_v17 = vsel %vm240_vm4, %v340_v3, %v6128_v21  ;;  %v6844_v46 = vpop.permute.xlu1 %1534  ;;  %v5503_v6 = vld [vmem:[%s10567_s1 + $0x7] ss:$8 sm:$0x3]  ;;  %v6857_v18 = vpop.permute.xlu0 %1536 }
 0x219   : > { %10955 = vst [vmem:[#allocation132_spill] sm:$0xff] %v6844_v46  ;;  %v264_v45 = vadd.f32 %v260_v51, %v6588_v62  ;;  %v285_v19 = vadd.f32 %v281_v60, %v6604_v55  ;;  %v306_v52 = vadd.f32 %v302_v37, %v6606_v54  ;;  %v341_v61 = vsel %vm237_vm3, %v339_v15, %v6122_v20  ;;  %v5504_v16 = vld [vmem:[%s10567_s1 + $0x47] ss:$8 sm:$0x3] }
 0x21a   : > { %10956 = vst [vmem:[#allocation133_spill] sm:$0xff] %v6857_v18  ;;  %v263_v41 = vadd.f32 %v259_v9, %v6588_v62  ;;  %v284_v11 = vadd.f32 %v280_v56, %v6604_v55  ;;  %v305_v60 = vadd.f32 %v301_v12, %v6606_v54  ;;  %v343_v37 = vsel %vm240_vm4, %v341_v61, %v6130_v22  ;;  %v5505_v20 = vld [vmem:[%s10567_s1 + $0x87] ss:$8 sm:$0x3] }
 0x21b   : > { %2138 = vrot.lane.b32.xlu1 %v6422_v2, %s10741_s24  ;;  %v265_v51 = vadd.f32 %v261_v59, %v6588_v62  ;;  %v286_v14 = vadd.f32 %v282_v57, %v6604_v55  ;;  %v307_v9 = vadd.f32 %v303_v58, %v6606_v54  ;;  %v359_v56 = vmul.f32 %v6626_v49, %v342_v17 }
 0x21c   : > { %2140 = vrot.lane.b32.xlu0 %v6426_v63, %s10741_s24  ;;  %v380_v12 = vmul.f32 %v6629_v1, %v342_v17  ;;  %v344_v3 = vsel %vm243_vm5, %v6128_v21, %v6136_v23  ;;  %v6880_v15 = vrot.slane %v5503_v6, %v6561_v0  ;;  %v6883_v62 = vrot.slane %v5504_v16, %v6561_v0  ;;  %v6885_v55 = vpop.permute.xlu1 %1540  ;;  %v6895_v21 = vpop.permute.xlu0 %1542 }
 0x21d   : > { %10957 = vst [vmem:[#allocation134_spill] sm:$0xff] %v6885_v55  ;;  %v401_v54 = vmul.f32 %v6632_v5, %v342_v17  ;;  %v361_v59 = vmul.f32 %v6626_v49, %v343_v37  ;;  %v345_v57 = vsel %vm243_vm5, %v6130_v22, %v6138_v24  ;;  %v6893_v58 = vrot.slane %v5505_v20, %v6561_v0 }
 0x21e   : > { %10958 = vst [vmem:[#allocation135_spill] sm:$0xff] %v6895_v21  ;;  %v382_v23 = vmul.f32 %v6629_v1, %v343_v37  ;;  %v403_v61 = vmul.f32 %v6632_v5, %v343_v37  ;;  %v6900_v18 = vrot.slane %v5503_v6, %v6571_v48  ;;  %v6903_v17 = vrot.slane %v5504_v16, %v6571_v48  ;;  %v6914_v1 = vld [vmem:[#allocation2 + $0xc] sm:$0xf]  ;;  %v6921_v37 = vld [vmem:[#allocation2 + $0x4] sm:$0xff] }
 0x21f   : > { %2144 = vrot.lane.b32.xlu1 %v6422_v2, %s10738_s26  ;;  %v363_v49 = vadd.f32 %v359_v56, %v262_v44  ;;  %v360_v22 = vmul.f32 %v6643_v47, %v344_v3  ;;  %v381_v24 = vmul.f32 %v6646_v42, %v344_v3  ;;  %v6910_v21 = vrot.slane %v5505_v20, %v6571_v48 }
 0x220   : > { %2146 = vrot.lane.b32.xlu0 %v6426_v63, %s10738_s26  ;;  %v384_v5 = vadd.f32 %v380_v12, %v283_v38  ;;  %v402_v6 = vmul.f32 %v6649_v40, %v344_v3  ;;  %v362_v16 = vmul.f32 %v6643_v47, %v345_v57  ;;  %v383_v2 = vmul.f32 %v6646_v42, %v345_v57  ;;  %v6919_v44 = vpop.permute.xlu1 %1617  ;;  %v6927_v10 = vpop.permute.xlu0 %1619 }
 0x221   : > { %10959 = vst [vmem:[#allocation136_spill] sm:$0xff] %v6919_v44  ;;  %v405_v56 = vadd.f32 %v401_v54, %v304_v4  ;;  %v365_v55 = vadd.f32 %v361_v59, %v264_v45  ;;  %v404_v20 = vmul.f32 %v6649_v40, %v345_v57  ;;  %v439_v63 = vsel %vm234_vm2, %v6144_v25, %v6152_v27  ;;  %v5506_v4 = vld [vmem:[%s10567_s1 + $0x10] ss:$8 sm:$0x3] }
 0x222   : > { %10960 = vst [vmem:[#allocation137_spill] sm:$0xff] %v6927_v10  ;;  %v386_v38 = vadd.f32 %v382_v23, %v285_v19  ;;  %v407_v12 = vadd.f32 %v403_v61, %v306_v52  ;;  %v440_v42 = vsel %vm234_vm2, %v6146_v26, %v6154_v28  ;;  %v441_v47 = vsel %vm237_vm3, %v439_v63, %v6160_v29  ;;  %v5507_v40 = vld [vmem:[%s10567_s1 + $0x50] ss:$8 sm:$0x3] }
 0x223   : > { %2225 = vrot.lane.b32.xlu1 %v6921_v37, %s10736_s27  ;;  %v364_v25 = vadd.f32 %v360_v22, %v263_v41  ;;  %v385_v27 = vadd.f32 %v381_v24, %v284_v11  ;;  %v442_v45 = vsel %vm237_vm3, %v440_v42, %v6162_v30  ;;  %v443_v26 = vsel %vm240_vm4, %v441_v47, %v6168_v31  ;;  %v5508_v28 = vld [vmem:[%s10567_s1 + $0x90] ss:$8 sm:$0x3]  ;;  %v10964_v24 = vld [vmem:[#allocation105_spill] sm:$0xff] }
 0x224   : > { %2227 = vrot.lane.b32.xlu0 %v6914_v1, %s10736_s27  ;;  %v406_v29 = vadd.f32 %v402_v6, %v305_v60  ;;  %v366_v19 = vadd.f32 %v362_v16, %v265_v51  ;;  %v387_v52 = vadd.f32 %v383_v2, %v286_v14  ;;  %v444_v41 = vsel %vm240_vm4, %v442_v45, %v6170_v32  ;;  %v6953_v11 = vpop.permute.xlu1 %1623  ;;  %v6964_v57 = vpop.permute.xlu0 %1625  ;;  %v10967_v63 = vld [vmem:[#allocation107_spill] sm:$0xff] }
 0x225   : > { %10961 = vst [vmem:[#allocation138_spill] sm:$0xff] %v6953_v11  ;;  %v408_v3 = vadd.f32 %v404_v20, %v307_v9  ;;  %v445_v30 = vsel %vm243_vm5, %v6168_v31, %v6176_v33  ;;  %v6959_v54 = vrot.slane %v5506_v4, %v6561_v0  ;;  %v6962_v59 = vrot.slane %v5507_v40, %v6561_v0  ;;  %v10963_v31 = vld [vmem:[#allocation104_spill] sm:$0xff]  ;;  %v10994_v11 = vld [vmem:[#allocation17_spill] sm:$0xff] }
 0x226   : > { %10962 = vst [vmem:[#allocation139_spill] sm:$0xff] %v6964_v57  ;;  %v460_v60 = vmul.f32 %v6652_v36, %v443_v26  ;;  %v481_v51 = vmul.f32 %v6660_v43, %v443_v26  ;;  %v446_v14 = vsel %vm243_vm5, %v6170_v32, %v6178_v34  ;;  %v6972_v9 = vrot.slane %v5508_v28, %v6561_v0 }
 0x227   : > { %2231 = vrot.lane.b32.xlu1 %v6921_v37, %s10734_s28  ;;  %v502_v33 = vmul.f32 %v10963_v31, %v443_v26  ;;  %v462_v23 = vmul.f32 %v6652_v36, %v444_v41  ;;  %v6979_v61 = vrot.slane %v5506_v4, %v6571_v48  ;;  %v6982_v22 = vrot.slane %v5507_v40, %v6571_v48  ;;  %v10966_v36 = vld [vmem:[#allocation106_spill] sm:$0xff]  ;;  %v10968_v4 = vld [vmem:[#allocation8_spill] sm:$0xff] }
 0x228   : > { %2233 = vrot.lane.b32.xlu0 %v6914_v1, %s10734_s28  ;;  %v483_v32 = vmul.f32 %v6660_v43, %v444_v41  ;;  %v504_v34 = vmul.f32 %v10963_v31, %v444_v41  ;;  %v461_v6 = vmul.f32 %v10964_v24, %v445_v30  ;;  %v6990_v16 = vrot.slane %v5508_v28, %v6571_v48  ;;  %v6992_v2 = vpop.permute.xlu1 %1629  ;;  %v10969_v40 = vld [vmem:[#allocation6_spill] sm:$0xff]  ;;  %v7000_v43 = vpop.permute.xlu0 %1631 }
 0x229   : > { %10965 = vst [vmem:[#allocation104_spill] sm:$0xff] %v6992_v2  ;;  %v482_v20 = vmul.f32 %v10966_v36, %v445_v30  ;;  %v503_v42 = vmul.f32 %v10967_v63, %v445_v30  ;;  %v463_v47 = vmul.f32 %v10964_v24, %v446_v14  ;;  %v540_v45 = vsel %vm234_vm2, %v10969_v40, %v10968_v4  ;;  %v10971_v28 = vld [vmem:[#allocation10_spill] sm:$0xff]  ;;  %v10972_v2 = vld [vmem:[#allocation12_spill] sm:$0xff]  ;;  %v10979_v40 = vld [vmem:[#allocation109_spill] sm:$0xff] }
 0x22a   : > { %10970 = vst [vmem:[#allocation105_spill] sm:$0xff] %v7000_v43  ;;  %v464_v26 = vadd.f32 %v460_v60, %v363_v49  ;;  %v485_v41 = vadd.f32 %v481_v51, %v384_v5  ;;  %v484_v31 = vmul.f32 %v10966_v36, %v446_v14  ;;  %v542_v10 = vsel %vm237_vm3, %v540_v45, %v10971_v28  ;;  %v10973_v51 = vld [vmem:[#allocation9_spill] sm:$0xff]  ;;  %v10974_v36 = vld [vmem:[#allocation7_spill] sm:$0xff]  ;;  %v10987_v43 = vld [vmem:[#allocation16_spill] sm:$0xff] }
 0x22b   : > { %2237 = vrot.lane.b32.xlu1 %v6921_v37, %s10732_s29  ;;  %v506_v57 = vadd.f32 %v502_v33, %v405_v56  ;;  %v466_v30 = vadd.f32 %v462_v23, %v365_v55  ;;  %v505_v24 = vmul.f32 %v10967_v63, %v446_v14  ;;  %v544_v44 = vsel %vm240_vm4, %v542_v10, %v10972_v2  ;;  %v5509_v56 = vld [vmem:[%s10567_s1 + $0x11] ss:$8 sm:$0x3]  ;;  %v10980_v28 = vld [vmem:[#allocation13_spill] sm:$0xff] }
 0x22c   : > { %2239 = vrot.lane.b32.xlu0 %v6914_v1, %s10732_s29  ;;  %v487_v49 = vadd.f32 %v483_v32, %v386_v38  ;;  %v508_v5 = vadd.f32 %v504_v34, %v407_v12  ;;  %v465_v60 = vadd.f32 %v461_v6, %v364_v25  ;;  %v541_v4 = vsel %vm234_vm2, %v10974_v36, %v10973_v51  ;;  %v5510_v55 = vld [vmem:[%s10567_s1 + $0x51] ss:$8 sm:$0x3]  ;;  %v7021_v14 = vpop.permute.xlu1 %1635  ;;  %v7028_v32 = vpop.permute.xlu0 %1637  ;;  %v10978_v6 = vld [vmem:[#allocation108_spill] sm:$0xff] }
 0x22d   : > { %10975 = vst [vmem:[#allocation106_spill] sm:$0xff] %v7021_v14  ;;  %v486_v10 = vadd.f32 %v482_v20, %v385_v27  ;;  %v507_v33 = vadd.f32 %v503_v42, %v406_v29  ;;  %v467_v23 = vadd.f32 %v463_v47, %v366_v19  ;;  %v10976_v38 = vld [vmem:[#allocation11_spill] sm:$0xff]  ;;  %10977 = vst [vmem:[#allocation107_spill] sm:$0xff] %v7028_v32  ;;  %v10986_v32 = vld [vmem:[#allocation18_spill] sm:$0xff] }
 0x22e   : > { %v543_v12 = vsel %vm237_vm3, %v541_v4, %v10976_v38  ;;  %v5511_v25 = vld [vmem:[%s10567_s1 + $0x91] ss:$8 sm:$0x3]  ;;  %v488_v34 = vadd.f32 %v484_v31, %v387_v52  ;;  %v561_v63 = vmul.f32 %v10978_v6, %v544_v44  ;;  %v582_v45 = vmul.f32 %v10979_v40, %v544_v44 }
 0x22f   : > { %v545_v51 = vsel %vm240_vm4, %v543_v12, %v10980_v28  ;;  %2243 = vrot.lane.b32.xlu1 %v6921_v37, %s10730_s30  ;;  %v509_v27 = vadd.f32 %v505_v24, %v408_v3  ;;  %v603_v29 = vmul.f32 %v6702_v8, %v544_v44  ;;  %v7038_v19 = vrot.slane %v5509_v56, %v6561_v0  ;;  %v10981_v52 = vld [vmem:[#allocation14_spill] sm:$0xff]  ;;  %v10983_v4 = vld [vmem:[#allocation15_spill] sm:$0xff] }
 0x230   : > { %v7041_v20 = vrot.slane %v5510_v55, %v6561_v0  ;;  %2245 = vrot.lane.b32.xlu0 %v6914_v1, %s10730_s30  ;;  %v546_v42 = vsel %vm243_vm5, %v10972_v2, %v10981_v52  ;;  %v7049_v47 = vrot.slane %v5511_v25, %v6561_v0  ;;  %v7052_v3 = vrot.slane %v5509_v56, %v6571_v48  ;;  %v7057_v31 = vpop.permute.xlu1 %1641  ;;  %v7067_v12 = vpop.permute.xlu0 %1643 }
 0x231   : > { %v7055_v44 = vrot.slane %v5510_v55, %v6571_v48  ;;  %10982 = vst [vmem:[#allocation8_spill] sm:$0xff] %v7057_v31  ;;  %v563_v24 = vmul.f32 %v10978_v6, %v545_v51  ;;  %v584_v36 = vmul.f32 %v10979_v40, %v545_v51  ;;  %v547_v38 = vsel %vm243_vm5, %v10980_v28, %v10983_v4  ;;  %v10988_v28 = vld [vmem:[#allocation111_spill] sm:$0xff] }
 0x232   : > { %v7065_v2 = vrot.slane %v5511_v25, %v6571_v48  ;;  %10985 = vst [vmem:[#allocation10_spill] sm:$0xff] %v7067_v12  ;;  %v565_v56 = vadd.f32 %v561_v63, %v464_v26  ;;  %v586_v52 = vadd.f32 %v582_v45, %v485_v41  ;;  %v605_v55 = vmul.f32 %v6702_v8, %v545_v51  ;;  %v10989_v25 = vld [vmem:[#allocation20_spill] sm:$0xff]  ;;  %v5512_v26 = vld [vmem:[%s10567_s1 + $0x12] ss:$8 sm:$0x3] }
 0x233   : > { %v641_v31 = vsel %vm234_vm2, %v10987_v43, %v10986_v32  ;;  %2320 = vrot.lane.b32.xlu1 %v6921_v37, %s10724_s4  ;;  %v607_v6 = vadd.f32 %v603_v29, %v506_v57  ;;  %v562_v40 = vmul.f32 %v6705_v53, %v546_v42  ;;  %v583_v4 = vmul.f32 %v10988_v28, %v546_v42  ;;  %v5513_v8 = vld [vmem:[%s10567_s1 + $0x52] ss:$8 sm:$0x3]  ;;  %v10990_v43 = vld [vmem:[#allocation113_spill] sm:$0xff] }
 0x234   : > { %10984 = vst [vmem:[#allocation6_spill] sm:$0xff] %v7065_v2  ;;  %v643_v14 = vsel %vm237_vm3, %v641_v31, %v10989_v25  ;;  %2322 = vrot.lane.b32.xlu0 %v6914_v1, %s10724_s4  ;;  %v604_v57 = vmul.f32 %v10990_v43, %v546_v42  ;;  %v564_v41 = vmul.f32 %v6705_v53, %v547_v38  ;;  %v10991_v63 = vld [vmem:[#allocation22_spill] sm:$0xff]  ;;  %v7092_v51 = vpop.permute.xlu1 %1722  ;;  %v10993_v12 = vld [vmem:[#allocation19_spill] sm:$0xff]  ;;  %v7098_v50 = vpop.permute.xlu0 %1724  ;;  %v10996_v2 = vld [vmem:[#allocation21_spill] sm:$0xff] }
 0x235   : > { %v585_v32 = vmul.f32 %v10988_v28, %v547_v38  ;;  %v645_v45 = vsel %vm240_vm4, %v643_v14, %v10991_v63  ;;  %10992 = vst [vmem:[#allocation12_spill] sm:$0xff] %v7092_v51  ;;  %v567_v29 = vadd.f32 %v563_v24, %v466_v30  ;;  %v588_v31 = vadd.f32 %v584_v36, %v487_v49  ;;  %v5514_v30 = vld [vmem:[%s10567_s1 + $0x92] ss:$8 sm:$0x3] }
 0x236   : > { %v606_v25 = vmul.f32 %v10990_v43, %v547_v38  ;;  %v642_v46 = vsel %vm234_vm2, %v10994_v11, %v10993_v12  ;;  %10995 = vst [vmem:[#allocation9_spill] sm:$0xff] %v7098_v50  ;;  %v609_v42 = vadd.f32 %v605_v55, %v508_v5  ;;  %v7103_v28 = vrot.slane %v5512_v26, %v6561_v0  ;;  %v10999_v24 = vld [vmem:[#allocation114_spill] sm:$0xff]  ;;  %v11000_v36 = vld [vmem:[#allocation23_spill] sm:$0xff] }
 0x237   : > { %v644_v53 = vsel %vm237_vm3, %v642_v46, %v10996_v2  ;;  %v7106_v14 = vrot.slane %v5513_v8, %v6561_v0  ;;  %2326 = vrot.lane.b32.xlu1 %v6921_v37, %s10659_s5  ;;  %v566_v11 = vadd.f32 %v562_v40, %v465_v60  ;;  %v587_v49 = vadd.f32 %v583_v4, %v486_v10  ;;  %v11001_v55 = vld [vmem:[#allocation115_spill] sm:$0xff]  ;;  %v11004_v60 = vld [vmem:[#allocation24_spill] sm:$0xff] }
 0x238   : > { %10997 = vst [vmem:[#allocation7_spill] sm:$0xff] %v7103_v28  ;;  %v662_v5 = vmul.f32 %v10999_v24, %v645_v45  ;;  %v646_v46 = vsel %vm240_vm4, %v644_v53, %v11000_v36  ;;  %2328 = vrot.lane.b32.xlu0 %v6914_v1, %s10659_s5  ;;  %v608_v38 = vadd.f32 %v604_v57, %v507_v33  ;;  %v7119_v50 = vpop.permute.xlu1 %1728  ;;  %v7128_v4 = vpop.permute.xlu0 %1730  ;;  %s11093_s5 = smov 33  }
 0x239   : > { %10998 = vst [vmem:[#allocation11_spill] sm:$0xff] %v7106_v14  ;;  %v568_v2 = vadd.f32 %v564_v41, %v467_v23  ;;  %v589_v12 = vadd.f32 %v585_v32, %v488_v34  ;;  %v683_v43 = vmul.f32 %v11001_v55, %v645_v45  ;;  %11002 = vst [vmem:[#allocation108_spill] sm:$0xff] %v7119_v50  ;;  %v11003_v14 = vld [vmem:[#allocation116_spill] sm:$0xff]  ;;  %v11006_v23 = vld [vmem:[#allocation25_spill] sm:$0xff] }
 0x23a   : > { %v610_v51 = vadd.f32 %v606_v25, %v509_v27  ;;  %v704_v28 = vmul.f32 %v11003_v14, %v645_v45  ;;  %v647_v10 = vsel %vm243_vm5, %v10991_v63, %v11004_v60  ;;  %v7126_v40 = vrot.slane %v5514_v30, %v6561_v0  ;;  %11005 = vst [vmem:[#allocation109_spill] sm:$0xff] %v7128_v4  ;;  %v11012_v60 = vld [vmem:[#allocation26_spill] sm:$0xff] }
 0x23b   : > { %v664_v33 = vmul.f32 %v10999_v24, %v646_v46  ;;  %v648_v34 = vsel %vm243_vm5, %v11000_v36, %v11006_v23  ;;  %v7135_v57 = vrot.slane %v5512_v26, %v6571_v48  ;;  %v7138_v27 = vrot.slane %v5513_v8, %v6571_v48  ;;  %2332 = vrot.lane.b32.xlu1 %v6921_v37, %s10657_s6  ;;  %v11010_v26 = vld [vmem:[#allocation117_spill] sm:$0xff]  ;;  %v11011_v24 = vld [vmem:[#allocation118_spill] sm:$0xff] }
 0x23c   : > { %v666_v41 = vadd.f32 %v662_v5, %v565_v56  ;;  %v685_v32 = vmul.f32 %v11001_v55, %v646_v46  ;;  %v706_v63 = vmul.f32 %v11003_v14, %v646_v46  ;;  %v7145_v45 = vrot.slane %v5514_v30, %v6571_v48  ;;  %2334 = vrot.lane.b32.xlu0 %v6914_v1, %s10657_s6  ;;  %v5822_v36 = vld [vmem:[#allocation2 + $0x1] sm:$0xff]  ;;  %v5515_v56 = vld [vmem:[%s10567_s1 + $0x13] ss:$8 sm:$0x3]  ;;  %v7156_v14 = vpop.permute.xlu1 %1734  ;;  %v7165_v50 = vpop.permute.xlu0 %1736  ;;  %s5680_s6 = smul.u32 96, %s11666_s21  ;;  %s11345_s21 = smov 35  }
 0x23d   : > { %11007 = vst [vmem:[#allocation13_spill] sm:$0xff] %v7135_v57  ;;  %11008 = vst [vmem:[#allocation14_spill] sm:$0xff] %v7138_v27  ;;  %v687_v25 = vadd.f32 %v683_v43, %v586_v52  ;;  %v663_v53 = vmul.f32 %v11010_v26, %v647_v10  ;;  %v684_v8 = vmul.f32 %v11011_v24, %v647_v10  ;;  %v11014_v5 = vld [vmem:[#allocation119_spill] sm:$0xff]  ;;  %v11015_v52 = vld [vmem:[#allocation28_spill] sm:$0xff] }
 0x23e   : > { %11009 = vst [vmem:[#allocation15_spill] sm:$0xff] %v7145_v45  ;;  %v740_v23 = vsel %vm234_vm2, %v5822_v36, %v11012_v60  ;;  %11013 = vst [vmem:[#allocation18_spill] sm:$0xff] %v7156_v14  ;;  %v708_v30 = vadd.f32 %v704_v28, %v607_v6  ;;  %v705_v46 = vmul.f32 %v11014_v5, %v647_v10  ;;  %v5516_v4 = vld [vmem:[%s10567_s1 + $0x53] ss:$8 sm:$0x3] }
 0x23f   : > { %v665_v55 = vmul.f32 %v11010_v26, %v648_v34  ;;  %v742_v43 = vsel %vm237_vm3, %v740_v23, %v11015_v52  ;;  %11016 = vst [vmem:[#allocation16_spill] sm:$0xff] %v7165_v50  ;;  %v668_v36 = vadd.f32 %v664_v33, %v567_v29  ;;  %v686_v60 = vmul.f32 %v11011_v24, %v648_v34  ;;  %v11017_v14 = vld [vmem:[#allocation30_spill] sm:$0xff]  ;;  %v5823_v26 = vld [vmem:[#allocation2 + $0x9] sm:$0xf]  ;;  %v11019_v23 = vld [vmem:[#allocation27_spill] sm:$0xff] }
 0x240   : > { %v707_v45 = vmul.f32 %v11014_v5, %v648_v34  ;;  %v744_v6 = vsel %vm240_vm4, %v742_v43, %v11017_v14  ;;  %2338 = vrot.lane.b32.xlu1 %v6921_v37, %s11018_s9  ;;  %v689_v28 = vadd.f32 %v685_v32, %v588_v31  ;;  %v710_v10 = vadd.f32 %v706_v63, %v609_v42  ;;  %v5517_v29 = vld [vmem:[%s10567_s1 + $0x93] ss:$8 sm:$0x3]  ;;  %v11021_v24 = vld [vmem:[#allocation29_spill] sm:$0xff]  ;;  %v7188_v32 = vpop.permute.xlu1 %1740  ;;  %v11023_v43 = vld [vmem:[#allocation120_spill] sm:$0xff] }
 0x241   : > { %v741_v52 = vsel %vm234_vm2, %v5823_v26, %v11019_v23  ;;  %v7176_v27 = vrot.slane %v5515_v56, %v6561_v0  ;;  %2340 = vrot.lane.b32.xlu0 %v6914_v1, %s11018_s9  ;;  %v667_v33 = vadd.f32 %v663_v53, %v566_v11  ;;  %v688_v34 = vadd.f32 %v684_v8, %v587_v49  ;;  %v11024_v23 = vld [vmem:[#allocation31_spill] sm:$0xff]  ;;  %v11026_v49 = vld [vmem:[#allocation32_spill] sm:$0xff] }
 0x242   : > { %v743_v31 = vsel %vm237_vm3, %v741_v52, %v11021_v24  ;;  %v7186_v42 = vrot.slane %v5516_v4, %v6561_v0  ;;  %11022 = vst [vmem:[#allocation20_spill] sm:$0xff] %v7188_v32  ;;  %v709_v63 = vadd.f32 %v705_v46, %v608_v38  ;;  %v669_v5 = vadd.f32 %v665_v55, %v568_v2  ;;  %v11028_v38 = vld [vmem:[#allocation121_spill] sm:$0xff]  ;;  %v11029_v46 = vld [vmem:[#allocation122_spill] sm:$0xff] }
 0x243   : > { %11020 = vst [vmem:[#allocation111_spill] sm:$0xff] %v7176_v27  ;;  %v761_v26 = vmul.f32 %v11023_v43, %v744_v6  ;;  %v745_v50 = vsel %vm240_vm4, %v743_v31, %v11024_v23  ;;  %v7193_v27 = vpop.permute.xlu0 %1742  ;;  %v690_v57 = vadd.f32 %v686_v60, %v589_v12  ;;  %v711_v11 = vadd.f32 %v707_v45, %v610_v51  ;;  %v11030_v52 = vld [vmem:[#allocation33_spill] sm:$0xff] }
 0x244   : > { %11025 = vst [vmem:[#allocation113_spill] sm:$0xff] %v7193_v27  ;;  %v746_v53 = vsel %vm243_vm5, %v11017_v14, %v11026_v49  ;;  %v7199_v8 = vrot.slane %v5517_v29, %v6561_v0  ;;  %2344 = vrot.lane.b32.xlu1 %v6921_v37, %s11027_s10  ;;  %v782_v2 = vmul.f32 %v11028_v38, %v744_v6  ;;  %v11034_v27 = vld [vmem:[#allocation36_spill] sm:$0xff] }
 0x245   : > { %v803_v55 = vmul.f32 %v11029_v46, %v744_v6  ;;  %v747_v24 = vsel %vm243_vm5, %v11024_v23, %v11030_v52  ;;  %v7209_v51 = vrot.slane %v5515_v56, %v6571_v48  ;;  %2346 = vrot.lane.b32.xlu0 %v6914_v1, %s11027_s10  ;;  %v763_v12 = vmul.f32 %v11023_v43, %v745_v50  ;;  %v7221_v6 = vpop.permute.xlu1 %1817 }
 0x246   : > { %v784_v45 = vmul.f32 %v11028_v38, %v745_v50  ;;  %v7216_v14 = vrot.slane %v5516_v4, %v6571_v48  ;;  %v7219_v60 = vrot.slane %v5517_v29, %v6571_v48  ;;  %11032 = vst [vmem:[#allocation19_spill] sm:$0xff] %v7221_v6  ;;  %v765_v31 = vadd.f32 %v761_v26, %v666_v41  ;;  %v11035_v29 = vld [vmem:[#allocation34_spill] sm:$0xff]  ;;  %v11039_v6 = vld [vmem:[#allocation35_spill] sm:$0xff] }
 0x247   : > { %v805_v23 = vmul.f32 %v11029_v46, %v745_v50  ;;  %v762_v56 = vmul.f32 %v6772_v7, %v746_v53  ;;  %v783_v49 = vmul.f32 %v6775_v39, %v746_v53  ;;  %v7226_v52 = vpop.permute.xlu0 %1819  ;;  %v804_v43 = vmul.f32 %v6782_v35, %v746_v53  ;;  %v11037_v46 = vld [vmem:[#allocation38_spill] sm:$0xff] }
 0x248   : > { %11031 = vst [vmem:[#allocation22_spill] sm:$0xff] %v7219_v60  ;;  %11033 = vst [vmem:[#allocation17_spill] sm:$0xff] %v7226_v52  ;;  %v764_v38 = vmul.f32 %v6772_v7, %v747_v24  ;;  %v785_v4 = vmul.f32 %v6775_v39, %v747_v24  ;;  %v841_v32 = vsel %vm234_vm2, %v11035_v29, %v11034_v27  ;;  %2421 = vrot.lane.b32.xlu1 %v6921_v37, %s11036_s13  ;;  %v11038_v39 = vld [vmem:[#allocation37_spill] sm:$0xff]  ;;  %v11040_v27 = vld [vmem:[#allocation40_spill] sm:$0xff] }
 0x249   : > { %v786_v50 = vadd.f32 %v782_v2, %v687_v25  ;;  %v807_v41 = vadd.f32 %v803_v55, %v708_v30  ;;  %v806_v26 = vmul.f32 %v6782_v35, %v747_v24  ;;  %v843_v52 = vsel %vm237_vm3, %v841_v32, %v11037_v46  ;;  %2423 = vrot.lane.b32.xlu0 %v6914_v1, %s11036_s13  ;;  %v5518_v25 = vld [vmem:[%s10567_s1 + $0x14] ss:$8 sm:$0x3]  ;;  %v7249_v35 = vpop.permute.xlu1 %1823  ;;  %v11044_v46 = vld [vmem:[#allocation41_spill] sm:$0xff] }
 0x24a   : > { %v767_v7 = vadd.f32 %v763_v12, %v668_v36  ;;  %v788_v53 = vadd.f32 %v784_v45, %v689_v28  ;;  %v842_v60 = vsel %vm234_vm2, %v11039_v6, %v11038_v39  ;;  %v845_v29 = vsel %vm240_vm4, %v843_v52, %v11040_v27  ;;  %11041 = vst [vmem:[#allocation21_spill] sm:$0xff] %v7249_v35  ;;  %v11042_v55 = vld [vmem:[#allocation39_spill] sm:$0xff]  ;;  %v11057_v35 = vld [vmem:[#allocation128_spill] sm:$0xff] }
 0x24b   : > { %v809_v30 = vadd.f32 %v805_v23, %v710_v10  ;;  %v766_v32 = vadd.f32 %v762_v56, %v667_v33  ;;  %v787_v2 = vadd.f32 %v783_v49, %v688_v34  ;;  %v844_v36 = vsel %vm237_vm3, %v842_v60, %v11042_v55  ;;  %v5519_v28 = vld [vmem:[%s10567_s1 + $0x54] ss:$8 sm:$0x3]  ;;  %v7259_v12 = vpop.permute.xlu0 %1825  ;;  %v11046_v34 = vld [vmem:[#allocation125_spill] sm:$0xff] }
 0x24c   : > { %v5520_v24 = vld [vmem:[%s10567_s1 + $0x94] ss:$8 sm:$0x3]  ;;  %11043 = vst [vmem:[#allocation114_spill] sm:$0xff] %v7259_v12  ;;  %v808_v45 = vadd.f32 %v804_v43, %v709_v63  ;;  %v768_v6 = vadd.f32 %v764_v38, %v669_v5  ;;  %v789_v52 = vadd.f32 %v785_v4, %v690_v57  ;;  %v846_v10 = vsel %vm240_vm4, %v844_v36, %v11044_v46 }
 0x24d   : > { %2427 = vrot.lane.b32.xlu1 %v6921_v37, %s11045_s16  ;;  %v810_v33 = vadd.f32 %v806_v26, %v711_v11  ;;  %v862_v60 = vmul.f32 %v11046_v34, %v845_v29  ;;  %v11047_v23 = vld [vmem:[#allocation126_spill] sm:$0xff]  ;;  %2429 = vrot.lane.b32.xlu0 %v6914_v1, %s11045_s16  ;;  %v7273_v57 = vrot.slane %v5518_v25, %v6561_v0  ;;  %v7284_v43 = vpop.permute.xlu1 %1829  ;;  %v11054_v38 = vld [vmem:[#allocation127_spill] sm:$0xff] }
 0x24e   : > { %v883_v56 = vmul.f32 %v11047_v23, %v845_v29  ;;  %v11048_v49 = vld [vmem:[#allocation42_spill] sm:$0xff]  ;;  %v7276_v63 = vrot.slane %v5519_v28, %v6561_v0  ;;  %v7279_v5 = vrot.slane %v5520_v24, %v6561_v0  ;;  %v7282_v11 = vrot.slane %v5518_v25, %v6571_v48  ;;  %11053 = vst [vmem:[#allocation25_spill] sm:$0xff] %v7284_v43  ;;  %v11055_v55 = vld [vmem:[#allocation43_spill] sm:$0xff] }
 0x24f   : > { %v847_v39 = vsel %vm243_vm5, %v11040_v27, %v11048_v49  ;;  %11049 = vst [vmem:[#allocation23_spill] sm:$0xff] %v7273_v57  ;;  %v904_v4 = vmul.f32 %v11054_v38, %v845_v29  ;;  %v864_v26 = vmul.f32 %v11046_v34, %v846_v10  ;;  %v885_v27 = vmul.f32 %v11047_v23, %v846_v10  ;;  %v7292_v49 = vpop.permute.xlu0 %1831  ;;  %v11061_v23 = vld [vmem:[#allocation129_spill] sm:$0xff] }
 0x250   : > { %11050 = vst [vmem:[#allocation115_spill] sm:$0xff] %v7276_v63  ;;  %11051 = vst [vmem:[#allocation116_spill] sm:$0xff] %v7279_v5  ;;  %v848_v36 = vsel %vm243_vm5, %v11044_v46, %v11055_v55  ;;  %v906_v12 = vmul.f32 %v11054_v38, %v846_v10  ;;  %v863_v5 = vmul.f32 %v11057_v35, %v847_v39  ;;  %v11063_v55 = vld [vmem:[#allocation44_spill] sm:$0xff]  ;;  %v11068_v63 = vld [vmem:[#allocation45_spill] sm:$0xff] }
 0x251   : > { %11052 = vst [vmem:[#allocation24_spill] sm:$0xff] %v7282_v11  ;;  %11056 = vst [vmem:[#allocation117_spill] sm:$0xff] %v7292_v49  ;;  %v7297_v25 = vrot.slane %v5519_v28, %v6571_v48  ;;  %v7300_v43 = vrot.slane %v5520_v24, %v6571_v48  ;;  %2433 = vrot.lane.b32.xlu1 %v6921_v37, %s11060_s17  ;;  %v866_v29 = vadd.f32 %v862_v60, %v765_v31  ;;  %v11062_v24 = vld [vmem:[#allocation46_spill] sm:$0xff] }
 0x252   : > { %v887_v34 = vadd.f32 %v883_v56, %v786_v50  ;;  %v884_v11 = vmul.f32 %v11061_v23, %v847_v39  ;;  %v905_v46 = vmul.f32 %v6812_v13, %v847_v39  ;;  %2435 = vrot.lane.b32.xlu0 %v6914_v1, %s11060_s17  ;;  %v865_v10 = vmul.f32 %v11057_v35, %v848_v36  ;;  %v5521_v31 = vld [vmem:[%s10567_s1 + $0x15] ss:$8 sm:$0x3]  ;;  %v7317_v50 = vpop.permute.xlu1 %1835 }
 0x253   : > { %11058 = vst [vmem:[#allocation118_spill] sm:$0xff] %v7297_v25  ;;  %11059 = vst [vmem:[#allocation26_spill] sm:$0xff] %v7300_v43  ;;  %v886_v28 = vmul.f32 %v11061_v23, %v848_v36  ;;  %v907_v38 = vmul.f32 %v6812_v13, %v848_v36  ;;  %v942_v49 = vsel %vm234_vm2, %v11063_v55, %v11062_v24  ;;  %v11065_v43 = vld [vmem:[#allocation48_spill] sm:$0xff]  ;;  %v7321_v25 = vpop.permute.xlu0 %1837  ;;  %v11067_v36 = vld [vmem:[#allocation47_spill] sm:$0xff] }
 0x254   : > { %11064 = vst [vmem:[#allocation119_spill] sm:$0xff] %v7317_v50  ;;  %v908_v60 = vadd.f32 %v904_v4, %v807_v41  ;;  %v868_v56 = vadd.f32 %v864_v26, %v767_v7  ;;  %v889_v39 = vadd.f32 %v885_v27, %v788_v53  ;;  %v944_v35 = vsel %vm237_vm3, %v942_v49, %v11065_v43  ;;  %v11069_v55 = vld [vmem:[#allocation50_spill] sm:$0xff]  ;;  %v11071_v43 = vld [vmem:[#allocation49_spill] sm:$0xff]  ;;  %v11072_v26 = vld [vmem:[#allocation51_spill] sm:$0xff] }
 0x255   : > { %11066 = vst [vmem:[#allocation28_spill] sm:$0xff] %v7321_v25  ;;  %v910_v23 = vadd.f32 %v906_v12, %v809_v30  ;;  %v867_v13 = vadd.f32 %v863_v5, %v766_v32  ;;  %v943_v24 = vsel %vm234_vm2, %v11068_v63, %v11067_v36  ;;  %v946_v57 = vsel %vm240_vm4, %v944_v35, %v11069_v55  ;;  %v5522_v41 = vld [vmem:[%s10567_s1 + $0x55] ss:$8 sm:$0x3]  ;;  %v11074_v49 = vld [vmem:[#allocation52_spill] sm:$0xff] }
 0x256   : > { %2439 = vrot.lane.b32.xlu1 %v6921_v37, %s11070_s7  ;;  %v888_v7 = vadd.f32 %v884_v11, %v787_v2  ;;  %v909_v53 = vadd.f32 %v905_v46, %v808_v45  ;;  %v945_v30 = vsel %vm237_vm3, %v943_v24, %v11071_v43  ;;  %v7336_v32 = vrot.slane %v5521_v31, %v6561_v0  ;;  %v5523_v12 = vld [vmem:[%s10567_s1 + $0x95] ss:$8 sm:$0x3]  ;;  %v7345_v45 = vpop.permute.xlu1 %1841  ;;  %v11078_v24 = vld [vmem:[#allocation53_spill] sm:$0xff] }
 0x257   : > { %2441 = vrot.lane.b32.xlu0 %v6914_v1, %s11070_s7  ;;  %v869_v63 = vadd.f32 %v865_v10, %v768_v6  ;;  %v890_v5 = vadd.f32 %v886_v28, %v789_v52  ;;  %v911_v4 = vadd.f32 %v907_v38, %v810_v33  ;;  %v947_v2 = vsel %vm240_vm4, %v945_v30, %v11072_v26  ;;  %v7355_v36 = vpop.permute.xlu0 %1843  ;;  %v11080_v30 = vld [vmem:[#allocation56_spill] sm:$0xff] }
 0x258   : > { %11073 = vst [vmem:[#allocation30_spill] sm:$0xff] %v7345_v45  ;;  %v963_v11 = vmul.f32 %v6880_v15, %v946_v57  ;;  %v984_v27 = vmul.f32 %v6883_v62, %v946_v57  ;;  %v948_v46 = vsel %vm243_vm5, %v11069_v55, %v11074_v49  ;;  %v7353_v35 = vrot.slane %v5522_v41, %v6561_v0 }
 0x259   : > { %11075 = vst [vmem:[#allocation27_spill] sm:$0xff] %v7355_v36  ;;  %v1005_v6 = vmul.f32 %v6893_v58, %v946_v57  ;;  %v7359_v52 = vrot.slane %v5523_v12, %v6561_v0  ;;  %v7362_v33 = vrot.slane %v5521_v31, %v6571_v48  ;;  %v7365_v10 = vrot.slane %v5522_v41, %v6571_v48 }
 0x25a   : > { %2445 = vrot.lane.b32.xlu1 %v6921_v37, %s11077_s11  ;;  %v965_v28 = vmul.f32 %v6880_v15, %v947_v2  ;;  %v986_v38 = vmul.f32 %v6883_v62, %v947_v2  ;;  %v949_v57 = vsel %vm243_vm5, %v11072_v26, %v11078_v24  ;;  %v7375_v55 = vrot.slane %v5523_v12, %v6571_v48  ;;  %v11081_v15 = vld [vmem:[#allocation54_spill] sm:$0xff]  ;;  %v7385_v49 = vpop.permute.xlu1 %1918 }
 0x25b   : > { %11076 = vst [vmem:[#allocation29_spill] sm:$0xff] %v7365_v10  ;;  %2447 = vrot.lane.b32.xlu0 %v6914_v1, %s11077_s11  ;;  %v1007_v31 = vmul.f32 %v6893_v58, %v947_v2  ;;  %v964_v41 = vmul.f32 %v6900_v18, %v948_v46  ;;  %v985_v43 = vmul.f32 %v6903_v17, %v948_v46  ;;  %11082 = vst [vmem:[#allocation31_spill] sm:$0xff] %v7385_v49  ;;  %v11083_v24 = vld [vmem:[#allocation58_spill] sm:$0xff]  ;;  %v7390_v25 = vpop.permute.xlu0 %1920 }
 0x25c   : > { %11079 = vst [vmem:[#allocation120_spill] sm:$0xff] %v7375_v55  ;;  %v1043_v62 = vsel %vm234_vm2, %v11081_v15, %v11080_v30  ;;  %v967_v36 = vadd.f32 %v963_v11, %v866_v29  ;;  %v988_v26 = vadd.f32 %v984_v27, %v887_v34  ;;  %v1006_v12 = vmul.f32 %v6910_v21, %v948_v46  ;;  %v11085_v55 = vld [vmem:[#allocation60_spill] sm:$0xff]  ;;  %v5524_v29 = vld [vmem:[%s10567_s1 + $0x16] ss:$8 sm:$0x3]  ;;  %v11087_v46 = vld [vmem:[#allocation57_spill] sm:$0xff] }
 0x25d   : > { %v1045_v45 = vsel %vm237_vm3, %v1043_v62, %v11083_v24  ;;  %11084 = vst [vmem:[#allocation32_spill] sm:$0xff] %v7390_v25  ;;  %v1009_v58 = vadd.f32 %v1005_v6, %v908_v60  ;;  %v966_v2 = vmul.f32 %v6900_v18, %v949_v57  ;;  %v987_v50 = vmul.f32 %v6903_v17, %v949_v57  ;;  %v11088_v60 = vld [vmem:[#allocation55_spill] sm:$0xff]  ;;  %v11099_v25 = vld [vmem:[#allocation64_spill] sm:$0xff] }
 0x25e   : > { %v1047_v10 = vsel %vm240_vm4, %v1045_v45, %v11085_v55  ;;  %2522 = vrot.lane.b32.xlu1 %v6921_v37, %s11086_s8  ;;  %v969_v34 = vadd.f32 %v965_v28, %v868_v56  ;;  %v990_v11 = vadd.f32 %v986_v38, %v889_v39  ;;  %v1008_v27 = vmul.f32 %v6910_v21, %v949_v57  ;;  %v11089_v30 = vld [vmem:[#allocation59_spill] sm:$0xff]  ;;  %v7415_v39 = vpop.permute.xlu1 %1924  ;;  %v11091_v57 = vld [vmem:[#allocation61_spill] sm:$0xff] }
 0x25f   : > { %v1044_v18 = vsel %vm234_vm2, %v11088_v60, %v11087_v46  ;;  %2524 = vrot.lane.b32.xlu0 %v6914_v1, %s11086_s8  ;;  %v1011_v17 = vadd.f32 %v1007_v31, %v910_v23  ;;  %v968_v45 = vadd.f32 %v964_v41, %v867_v13  ;;  %v989_v6 = vadd.f32 %v985_v43, %v888_v7  ;;  %v5525_v56 = vld [vmem:[%s10567_s1 + $0x56] ss:$8 sm:$0x3]  ;;  %v7423_v7 = vpop.permute.xlu0 %1926 }
 0x260   : > { %v1046_v15 = vsel %vm237_vm3, %v1044_v18, %v11089_v30  ;;  %v5526_v21 = vld [vmem:[%s10567_s1 + $0x96] ss:$8 sm:$0x3]  ;;  %11090 = vst [vmem:[#allocation121_spill] sm:$0xff] %v7415_v39  ;;  %v1010_v28 = vadd.f32 %v1006_v12, %v909_v53  ;;  %v1064_v38 = vmul.f32 %v6959_v54, %v1047_v10  ;;  %v7421_v13 = vrot.slane %v5524_v29, %v6561_v0 }
 0x261   : > { %v1048_v23 = vsel %vm240_vm4, %v1046_v15, %v11091_v57  ;;  %11092 = vst [vmem:[#allocation122_spill] sm:$0xff] %v7423_v7  ;;  %v970_v31 = vadd.f32 %v966_v2, %v869_v63  ;;  %v991_v41 = vadd.f32 %v987_v50, %v890_v5  ;;  %v1085_v43 = vmul.f32 %v6962_v59, %v1047_v10  ;;  %v11094_v12 = vld [vmem:[#allocation62_spill] sm:$0xff]  ;;  %v11096_v18 = vld [vmem:[#allocation63_spill] sm:$0xff] }
 0x262   : > { %v1106_v62 = vmul.f32 %v6972_v9, %v1047_v10  ;;  %2528 = vrot.lane.b32.xlu1 %v6921_v37, %s11093_s5  ;;  %v1012_v53 = vadd.f32 %v1008_v27, %v911_v4  ;;  %v1049_v24 = vsel %vm243_vm5, %v11085_v55, %v11094_v12  ;;  %v7433_v46 = vrot.slane %v5525_v56, %v6561_v0  ;;  %v5527_v10 = vld [vmem:[%s10567_s1 + $0x17] ss:$8 sm:$0x3]  ;;  %v7453_v55 = vpop.permute.xlu1 %1930 }
 0x263   : > { %v7436_v60 = vrot.slane %v5526_v21, %v6561_v0  ;;  %2530 = vrot.lane.b32.xlu0 %v6914_v1, %s11093_s5  ;;  %v1066_v50 = vmul.f32 %v6959_v54, %v1048_v23  ;;  %v7442_v63 = vrot.slane %v5524_v29, %v6571_v48  ;;  %v7445_v5 = vrot.slane %v5525_v56, %v6571_v48  ;;  %v7460_v30 = vpop.permute.xlu0 %1932  ;;  %v11098_v12 = vld [vmem:[#allocation66_spill] sm:$0xff] }
 0x264   : > { %v7448_v4 = vrot.slane %v5526_v21, %v6571_v48  ;;  %11095 = vst [vmem:[#allocation33_spill] sm:$0xff] %v7453_v55  ;;  %v1068_v2 = vadd.f32 %v1064_v38, %v967_v36  ;;  %v1087_v27 = vmul.f32 %v6962_v59, %v1048_v23  ;;  %v1108_v54 = vmul.f32 %v6972_v9, %v1048_v23  ;;  %v11101_v36 = vld [vmem:[#allocation68_spill] sm:$0xff]  ;;  %v11102_v23 = vld [vmem:[#allocation67_spill] sm:$0xff]  ;;  %v11106_v55 = vld [vmem:[#allocation69_spill] sm:$0xff] }
 0x265   : > { %v1050_v29 = vsel %vm243_vm5, %v11091_v57, %v11096_v18  ;;  %11097 = vst [vmem:[#allocation36_spill] sm:$0xff] %v7460_v30  ;;  %v1089_v15 = vadd.f32 %v1085_v43, %v988_v26  ;;  %v1110_v56 = vadd.f32 %v1106_v62, %v1009_v58  ;;  %v1065_v21 = vmul.f32 %v6979_v61, %v1049_v24  ;;  %v5528_v26 = vld [vmem:[%s10567_s1 + $0x57] ss:$8 sm:$0x3]  ;;  %v11103_v43 = vld [vmem:[#allocation65_spill] sm:$0xff] }
 0x266   : > { %v1144_v7 = vsel %vm234_vm2, %v11099_v25, %v11098_v12  ;;  %2534 = vrot.lane.b32.xlu1 %v6921_v37, %s11100_s15  ;;  %v1086_v59 = vmul.f32 %v6982_v22, %v1049_v24  ;;  %v1107_v9 = vmul.f32 %v6990_v16, %v1049_v24  ;;  %v7473_v57 = vrot.slane %v5527_v10, %v6561_v0  ;;  %v11104_v24 = vld [vmem:[#allocation70_spill] sm:$0xff]  ;;  %v7487_v18 = vpop.permute.xlu1 %1936 }
 0x267   : > { %v1146_v38 = vsel %vm237_vm3, %v1144_v7, %v11101_v36  ;;  %2536 = vrot.lane.b32.xlu0 %v6914_v1, %s11100_s15  ;;  %v1067_v25 = vmul.f32 %v6979_v61, %v1050_v29  ;;  %v1088_v58 = vmul.f32 %v6982_v22, %v1050_v29  ;;  %v1145_v62 = vsel %vm234_vm2, %v11103_v43, %v11102_v23  ;;  %v5529_v61 = vld [vmem:[%s10567_s1 + $0x97] ss:$8 sm:$0x3]  ;;  %v7495_v22 = vpop.permute.xlu0 %1938 }
 0x268   : > { %v1148_v7 = vsel %vm240_vm4, %v1146_v38, %v11104_v24  ;;  %11105 = vst [vmem:[#allocation34_spill] sm:$0xff] %v7487_v18  ;;  %v1070_v12 = vadd.f32 %v1066_v50, %v969_v34  ;;  %v1091_v36 = vadd.f32 %v1087_v27, %v990_v11  ;;  %v1109_v30 = vmul.f32 %v6990_v16, %v1050_v29  ;;  %v11108_v43 = vld [vmem:[#allocation71_spill] sm:$0xff]  ;;  %v11110_v29 = vld [vmem:[#allocation72_spill] sm:$0xff] }
 0x269   : > { %v1147_v49 = vsel %vm237_vm3, %v1145_v62, %v11106_v55  ;;  %11107 = vst [vmem:[#allocation38_spill] sm:$0xff] %v7495_v22  ;;  %v1112_v39 = vadd.f32 %v1108_v54, %v1011_v17  ;;  %v1069_v23 = vadd.f32 %v1065_v21, %v968_v45  ;;  %v7500_v18 = vrot.slane %v5528_v26, %v6561_v0 }
 0x26a   : > { %v1149_v38 = vsel %vm240_vm4, %v1147_v49, %v11108_v43  ;;  %2540 = vrot.lane.b32.xlu1 %v6921_v37, %s10726_s18  ;;  %v1090_v16 = vadd.f32 %v1086_v59, %v989_v6  ;;  %v1165_v34 = vmul.f32 %v7038_v19, %v1148_v7  ;;  %v1186_v11 = vmul.f32 %v7041_v20, %v1148_v7  ;;  %v7512_v27 = vpop.permute.xlu1 %1942 }
 0x26b   : > { %v1207_v50 = vmul.f32 %v7049_v47, %v1148_v7  ;;  %2542 = vrot.lane.b32.xlu0 %v6914_v1, %s10726_s18  ;;  %v1111_v17 = vadd.f32 %v1107_v9, %v1010_v28  ;;  %v1071_v45 = vadd.f32 %v1067_v25, %v970_v31  ;;  %v1092_v55 = vadd.f32 %v1088_v58, %v991_v41  ;;  %v7521_v62 = vpop.permute.xlu0 %1944  ;;  %v11112_v31 = vld [vmem:[#allocation73_spill] sm:$0xff] }
 0x26c   : > { %v7510_v49 = vrot.slane %v5529_v61, %v6561_v0  ;;  %11109 = vst [vmem:[#allocation37_spill] sm:$0xff] %v7512_v27  ;;  %v1113_v54 = vadd.f32 %v1109_v30, %v1012_v53  ;;  %v1167_v6 = vmul.f32 %v7038_v19, %v1149_v38  ;;  %v1150_v21 = vsel %vm243_vm5, %v11104_v24, %v11110_v29  ;;  %v5530_v53 = vld [vmem:[%s10567_s1 + $0x20] ss:$8 sm:$0x3]  ;;  %v11113_v24 = vld [vmem:[#allocation6_spill] sm:$0xff] }
 0x26d   : > { %v7519_v59 = vrot.slane %v5527_v10, %v6571_v48  ;;  %11111 = vst [vmem:[#allocation35_spill] sm:$0xff] %v7521_v62  ;;  %v1188_v28 = vmul.f32 %v7041_v20, %v1149_v38  ;;  %v1151_v41 = vsel %vm243_vm5, %v11108_v43, %v11112_v31  ;;  %v7528_v9 = vrot.slane %v5528_v26, %v6571_v48  ;;  %v11114_v43 = vld [vmem:[#allocation74_spill] sm:$0xff] }
 0x26e   : > { %v7531_v19 = vrot.slane %v5529_v61, %v6571_v48  ;;  %2546 = vrot.lane.b32.xlu1 %v6921_v37, %s10728_s19  ;;  %v1169_v10 = vadd.f32 %v1165_v34, %v1068_v2  ;;  %v1190_v30 = vadd.f32 %v1186_v11, %v1089_v15  ;;  %v7538_v20 = vadd.f32 %v1207_v50, %v1110_v56  ;;  %v5824_v61 = vld [vmem:[#allocation2 + $0x2] sm:$0xff]  ;;  %v7551_v15 = vpop.permute.xlu1 %2019 }
 0x26f   : > { %v1209_v25 = vmul.f32 %v7049_v47, %v1149_v38  ;;  %2548 = vrot.lane.b32.xlu0 %v6914_v1, %s10728_s19  ;;  %v1166_v26 = vmul.f32 %v7052_v3, %v1150_v21  ;;  %v1187_v58 = vmul.f32 %v7055_v44, %v1150_v21  ;;  %v1208_v7 = vmul.f32 %v11113_v24, %v1150_v21  ;;  %v5531_v2 = vld [vmem:[%s10567_s1 + $0x60] ss:$8 sm:$0x3]  ;;  %v7559_v50 = vpop.permute.xlu0 %2021 }
 0x270   : > { %v1243_v29 = vsel %vm234_vm2, %v5824_v61, %v11114_v43  ;;  %11115 = vst [vmem:[#allocation40_spill] sm:$0xff] %v7551_v15  ;;  %v1171_v47 = vadd.f32 %v1167_v6, %v1070_v12  ;;  %v1168_v56 = vmul.f32 %v7052_v3, %v1151_v41  ;;  %v11116_v38 = vld [vmem:[#allocation76_spill] sm:$0xff]  ;;  %v7557_v11 = vrot.slane %v5530_v53, %v6561_v0  ;;  %v5825_v61 = vld [vmem:[#allocation2 + $0xa] sm:$0xf]  ;;  %v11118_v43 = vld [vmem:[#allocation75_spill] sm:$0xff] }
 0x271   : > { %v1245_v34 = vsel %vm237_vm3, %v1243_v29, %v11116_v38  ;;  %11117 = vst [vmem:[#allocation39_spill] sm:$0xff] %v7559_v50  ;;  %v1189_v21 = vmul.f32 %v7055_v44, %v1151_v41  ;;  %v1210_v31 = vmul.f32 %v11113_v24, %v1151_v41  ;;  %v1244_v62 = vsel %vm234_vm2, %v5825_v61, %v11118_v43  ;;  %v11119_v15 = vld [vmem:[#allocation78_spill] sm:$0xff]  ;;  %v5532_v3 = vld [vmem:[%s10567_s1 + $0xa0] ss:$8 sm:$0x3]  ;;  %v11121_v43 = vld [vmem:[#allocation79_spill] sm:$0xff] }
 0x272   : > { %v1247_v12 = vsel %vm240_vm4, %v1245_v34, %v11119_v15  ;;  %2623 = vrot.lane.b32.xlu1 %v6921_v37, %s10668_s20  ;;  %v1192_v6 = vadd.f32 %v1188_v28, %v1091_v36  ;;  %v1213_v29 = vadd.f32 %v1209_v25, %v1112_v39  ;;  %v11120_v38 = vld [vmem:[#allocation77_spill] sm:$0xff]  ;;  %v7575_v41 = vrot.slane %v5531_v2, %v6561_v0  ;;  %v7581_v27 = vpop.permute.xlu1 %2025  ;;  %v11123_v36 = vld [vmem:[#allocation7_spill] sm:$0xff]  ;;  %v11124_v28 = vld [vmem:[#allocation80_spill] sm:$0xff] }
 0x273   : > { %v1246_v44 = vsel %vm237_vm3, %v1244_v62, %v11120_v38  ;;  %2625 = vrot.lane.b32.xlu0 %v6914_v1, %s10668_s20  ;;  %v1170_v24 = vadd.f32 %v1166_v26, %v1069_v23  ;;  %v1191_v34 = vadd.f32 %v1187_v58, %v1090_v16  ;;  %v1212_v61 = vadd.f32 %v1208_v7, %v1111_v17  ;;  %v7590_v38 = vpop.permute.xlu0 %2027  ;;  %v11126_v17 = vld [vmem:[#allocation11_spill] sm:$0xff]  ;;  %s8399_s20 = scalar_lea.vmem %s11344_s3, %s5680_s6  ;;  %s11347_s6 = smov 124  }
 0x274   : > { %v1248_v50 = vsel %vm240_vm4, %v1246_v44, %v11121_v43  ;;  %11122 = vst [vmem:[#allocation41_spill] sm:$0xff] %v7581_v27  ;;  %v1172_v22 = vadd.f32 %v1168_v56, %v1071_v45  ;;  %v1264_v39 = vmul.f32 %v11123_v36, %v1247_v12  ;;  %v1249_v62 = vsel %vm243_vm5, %v11119_v15, %v11124_v28  ;;  %v11128_v15 = vld [vmem:[#allocation81_spill] sm:$0xff]  ;;  %v11133_v28 = vld [vmem:[#allocation14_spill] sm:$0xff]  ;;  %s11570_s3 = smov 13  }
 0x275   : > { %v7588_v25 = vrot.slane %v5532_v3, %v6561_v0  ;;  %11125 = vst [vmem:[#allocation125_spill] sm:$0xff] %v7590_v38  ;;  %v1193_v23 = vadd.f32 %v1189_v21, %v1092_v55  ;;  %v1214_v16 = vadd.f32 %v1210_v31, %v1113_v54  ;;  %v1285_v26 = vmul.f32 %v11126_v17, %v1247_v12  ;;  %v11135_v38 = vld [vmem:[#allocation84_spill] sm:$0xff]  ;;  %v11136_v27 = vld [vmem:[#allocation82_spill] sm:$0xff] }
 0x276   : > { %v7594_v58 = vrot.slane %v5530_v53, %v6571_v48  ;;  %2629 = vrot.lane.b32.xlu1 %v6921_v37, %s10666_s22  ;;  %v1306_v45 = vmul.f32 %v7126_v40, %v1247_v12  ;;  %v1266_v7 = vmul.f32 %v11123_v36, %v1248_v50  ;;  %v1250_v56 = vsel %vm243_vm5, %v11121_v43, %v11128_v15  ;;  %v11130_v53 = vld [vmem:[#allocation13_spill] sm:$0xff]  ;;  %v7614_v12 = vpop.permute.xlu1 %2031  ;;  %v11134_v15 = vld [vmem:[#allocation15_spill] sm:$0xff] }
 0x277   : > { %v7604_v44 = vrot.slane %v5531_v2, %v6571_v48  ;;  %2631 = vrot.lane.b32.xlu0 %v6914_v1, %s10666_s22  ;;  %v1287_v55 = vmul.f32 %v11126_v17, %v1248_v50  ;;  %v1308_v54 = vmul.f32 %v7126_v40, %v1248_v50  ;;  %v1265_v21 = vmul.f32 %v11130_v53, %v1249_v62  ;;  %s11346_s22 = smov 71  }
 0x278   : > { %11127 = vst [vmem:[#allocation126_spill] sm:$0xff] %v7594_v58  ;;  %v7612_v31 = vrot.slane %v5532_v3, %v6571_v48  ;;  %11132 = vst [vmem:[#allocation43_spill] sm:$0xff] %v7614_v12  ;;  %v1268_v36 = vadd.f32 %v1264_v39, %v1169_v10  ;;  %v1286_v43 = vmul.f32 %v11133_v28, %v1249_v62  ;;  %v7621_v58 = vpop.permute.xlu0 %2033  ;;  %v11138_v3 = vld [vmem:[#allocation86_spill] sm:$0xff]  ;;  %v5533_v10 = vld [vmem:[%s10567_s1 + $0x21] ss:$8 sm:$0x3] }
 0x279   : > { %11129 = vst [vmem:[#allocation42_spill] sm:$0xff] %v7604_v44  ;;  %v1307_v2 = vmul.f32 %v11134_v15, %v1249_v62  ;;  %v1344_v44 = vsel %vm234_vm2, %v11136_v27, %v11135_v38  ;;  %11137 = vst [vmem:[#allocation128_spill] sm:$0xff] %v7621_v58  ;;  %v1289_v17 = vadd.f32 %v1285_v26, %v1190_v30  ;;  %v11139_v30 = vld [vmem:[#allocation88_spill] sm:$0xff] }
 0x27a   : > { %11131 = vst [vmem:[#allocation127_spill] sm:$0xff] %v7612_v31  ;;  %v1267_v40 = vmul.f32 %v11130_v53, %v1250_v56  ;;  %v1288_v50 = vmul.f32 %v11133_v28, %v1250_v56  ;;  %v1346_v31 = vsel %vm237_vm3, %v1344_v44, %v11138_v3  ;;  %2635 = vrot.lane.b32.xlu1 %v6921_v37, %s10743_s23  ;;  %v11140_v28 = vld [vmem:[#allocation85_spill] sm:$0xff]  ;;  %v11141_v3 = vld [vmem:[#allocation83_spill] sm:$0xff]  ;;  %v11162_v12 = vld [vmem:[#allocation100_spill] sm:$0xff] }
 0x27b   : > { %v1310_v39 = vadd.f32 %v1306_v45, %v7538_v20  ;;  %v1270_v27 = vadd.f32 %v1266_v7, %v1171_v47  ;;  %v1309_v62 = vmul.f32 %v11134_v15, %v1250_v56  ;;  %v1348_v38 = vsel %vm240_vm4, %v1346_v31, %v11139_v30  ;;  %2637 = vrot.lane.b32.xlu0 %v6914_v1, %s10743_s23  ;;  %v5534_v20 = vld [vmem:[%s10567_s1 + $0x61] ss:$8 sm:$0x3]  ;;  %v7647_v45 = vpop.permute.xlu1 %2037  ;;  %v11143_v31 = vld [vmem:[#allocation87_spill] sm:$0xff] }
 0x27c   : > { %v1291_v26 = vadd.f32 %v1287_v55, %v1192_v6  ;;  %v1312_v44 = vadd.f32 %v1308_v54, %v1213_v29  ;;  %v1269_v53 = vadd.f32 %v1265_v21, %v1170_v24  ;;  %v1345_v58 = vsel %vm234_vm2, %v11141_v3, %v11140_v28  ;;  %v5535_v47 = vld [vmem:[%s10567_s1 + $0xa1] ss:$8 sm:$0x3]  ;;  %11142 = vst [vmem:[#allocation129_spill] sm:$0xff] %v7647_v45  ;;  %v7654_v24 = vpop.permute.xlu0 %2039  ;;  %v11145_v21 = vld [vmem:[#allocation111_spill] sm:$0xff] }
 0x27d   : > { %v1290_v7 = vadd.f32 %v1286_v43, %v1191_v34  ;;  %v1311_v56 = vadd.f32 %v1307_v2, %v1212_v61  ;;  %v1347_v6 = vsel %vm237_vm3, %v1345_v58, %v11143_v31  ;;  %v7652_v29 = vrot.slane %v5533_v10, %v6561_v0  ;;  %11144 = vst [vmem:[#allocation46_spill] sm:$0xff] %v7654_v24  ;;  %v11146_v28 = vld [vmem:[#allocation89_spill] sm:$0xff]  ;;  %v11147_v61 = vld [vmem:[#allocation90_spill] sm:$0xff] }
 0x27e   : > { %v1271_v55 = vadd.f32 %v1267_v40, %v1172_v22  ;;  %v1292_v54 = vadd.f32 %v1288_v50, %v1193_v23  ;;  %v1365_v15 = vmul.f32 %v11145_v21, %v1348_v38  ;;  %v1349_v3 = vsel %vm240_vm4, %v1347_v6, %v11146_v28  ;;  %2641 = vrot.lane.b32.xlu1 %v6921_v37, %s10741_s24  ;;  %v11149_v22 = vld [vmem:[#allocation91_spill] sm:$0xff] }
 0x27f   : > { %v1313_v34 = vadd.f32 %v1309_v62, %v1214_v16  ;;  %v1350_v58 = vsel %vm243_vm5, %v11139_v30, %v11147_v61  ;;  %v7665_v43 = vrot.slane %v5534_v20, %v6561_v0  ;;  %v7668_v2 = vrot.slane %v5535_v47, %v6561_v0  ;;  %2643 = vrot.lane.b32.xlu0 %v6914_v1, %s10741_s24  ;;  %v7684_v62 = vpop.permute.xlu1 %2043 }
 0x280   : > { %v1351_v23 = vsel %vm243_vm5, %v11146_v28, %v11149_v22  ;;  %v7676_v16 = vrot.slane %v5533_v10, %v6571_v48  ;;  %v7679_v40 = vrot.slane %v5534_v20, %v6571_v48  ;;  %v7682_v50 = vrot.slane %v5535_v47, %v6571_v48  ;;  %11153 = vst [vmem:[#allocation50_spill] sm:$0xff] %v7684_v62  ;;  %v7690_v28 = vpop.permute.xlu0 %2045  ;;  %v11155_v22 = vld [vmem:[#allocation94_spill] sm:$0xff]  ;;  %v11156_v47 = vld [vmem:[#allocation92_spill] sm:$0xff]  ;;  %v5577_v62 = vld [vmem:[%s5943_s25 + $0x8] sm:$0xff]  ;;  %s2819_s25 = sld [smem:[#allocation3]] }
 0x281   : > { %11148 = vst [vmem:[#allocation44_spill] sm:$0xff] %v7668_v2  ;;  %v1386_v30 = vmul.f32 %v7186_v42, %v1348_v38  ;;  %v1407_v1 = vmul.f32 %v7199_v8, %v1348_v38  ;;  %v1367_v31 = vmul.f32 %v11145_v21, %v1349_v3  ;;  %v1388_v6 = vmul.f32 %v7186_v42, %v1349_v3  ;;  %v11157_v21 = vld [vmem:[#allocation22_spill] sm:$0xff] }
 0x282   : > { %11150 = vst [vmem:[#allocation48_spill] sm:$0xff] %v7676_v16  ;;  %11151 = vst [vmem:[#allocation47_spill] sm:$0xff] %v7679_v40  ;;  %v1369_v10 = vadd.f32 %v1365_v15, %v1268_v36  ;;  %v1409_v61 = vmul.f32 %v7199_v8, %v1349_v3  ;;  %v1366_v20 = vmul.f32 %v7209_v51, %v1350_v58  ;;  %2647 = vrot.lane.b32.xlu1 %v6921_v37, %s10738_s26  ;;  %v7705_v8 = vld [vmem:[#allocation2 + $0xc] sm:$0xf]  ;;  %v11160_v37 = vld [vmem:[#allocation95_spill] sm:$0xff] }
 0x283   : > { %11152 = vst [vmem:[#allocation45_spill] sm:$0xff] %v7682_v50  ;;  %11154 = vst [vmem:[#allocation49_spill] sm:$0xff] %v7690_v28  ;;  %v1445_v24 = vsel %vm234_vm2, %v11156_v47, %v11155_v22  ;;  %v1387_v38 = vmul.f32 %v7216_v14, %v1350_v58  ;;  %v1408_v45 = vmul.f32 %v11157_v21, %v1350_v58  ;;  %v11158_v28 = vld [vmem:[#allocation96_spill] sm:$0xff]  ;;  %2649 = vrot.lane.b32.xlu0 %v7705_v8, %s10738_s26  ;;  %v11161_v22 = vld [vmem:[#allocation93_spill] sm:$0xff] }
 0x284   : > { %v1368_v42 = vmul.f32 %v7209_v51, %v1351_v23  ;;  %v1447_v36 = vsel %vm237_vm3, %v1445_v24, %v11158_v28  ;;  %11159 = vst [vmem:[#allocation51_spill] sm:$0xff] %v7705_v8  ;;  %v1389_v15 = vmul.f32 %v7216_v14, %v1351_v23  ;;  %v1410_v3 = vmul.f32 %v11157_v21, %v1351_v23  ;;  %v5536_v51 = vld [vmem:[%s10567_s1 + $0x22] ss:$8 sm:$0x3]  ;;  %v7719_v24 = vpop.permute.xlu1 %2120  ;;  %v7726_v21 = vpop.permute.xlu0 %2122 }
 0x285   : > { %v1446_v47 = vsel %vm234_vm2, %v11161_v22, %v11160_v37  ;;  %v1449_v58 = vsel %vm240_vm4, %v1447_v36, %v11162_v12  ;;  %11163 = vst [vmem:[#allocation52_spill] sm:$0xff] %v7719_v24  ;;  %v1390_v28 = vadd.f32 %v1386_v30, %v1289_v17  ;;  %v1411_v50 = vadd.f32 %v1407_v1, %v1310_v39  ;;  %v11164_v40 = vld [vmem:[#allocation97_spill] sm:$0xff] }
 0x286   : > { %v1371_v8 = vadd.f32 %v1367_v31, %v1270_v27  ;;  %v1448_v14 = vsel %vm237_vm3, %v1446_v47, %v11164_v40  ;;  %v5537_v23 = vld [vmem:[%s10567_s1 + $0x62] ss:$8 sm:$0x3]  ;;  %11165 = vst [vmem:[#allocation53_spill] sm:$0xff] %v7726_v21  ;;  %v1392_v37 = vadd.f32 %v1388_v6, %v1291_v26  ;;  %v1413_v36 = vadd.f32 %v1409_v61, %v1312_v44  ;;  %v11168_v27 = vld [vmem:[#allocation23_spill] sm:$0xff]  ;;  %v11178_v21 = vld [vmem:[#allocation118_spill] sm:$0xff] }
 0x287   : > { %v1370_v22 = vadd.f32 %v1366_v20, %v1269_v53  ;;  %v11166_v16 = vld [vmem:[#allocation101_spill] sm:$0xff]  ;;  %2815 = vrot.lane.b32.xlu1 %v5577_v62, %s11167_s14  ;;  %v1391_v17 = vadd.f32 %v1387_v38, %v1290_v7  ;;  %v1412_v39 = vadd.f32 %v1408_v45, %v1311_v56  ;;  %v1466_v30 = vmul.f32 %v11168_v27, %v1449_v58  ;;  %v11170_v62 = vld [vmem:[#allocation115_spill] sm:$0xff]  ;;  %v11171_v45 = vld [vmem:[#allocation116_spill] sm:$0xff]  ;;  %s11348_s14 = smov 32  }
 0x288   : > { %v1450_v2 = vsel %vm240_vm4, %v1448_v14, %v11166_v16  ;;  %v7733_v40 = vrot.slane %v5536_v51, %v6561_v0  ;;  %v5538_v1 = vld [vmem:[%s10567_s1 + $0xa2] ss:$8 sm:$0x3]  ;;  %v1372_v31 = vadd.f32 %v1368_v42, %v1271_v55  ;;  %v1393_v26 = vadd.f32 %v1389_v15, %v1292_v54  ;;  %v7741_v6 = vpop.permute.xlu1 %2126  ;;  %v11172_v20 = vld [vmem:[#allocation102_spill] sm:$0xff]  ;;  %v7749_v47 = vpop.permute.xlu0 %2128 }
 0x289   : > { %v1414_v44 = vadd.f32 %v1410_v3, %v1313_v34  ;;  %v7739_v53 = vrot.slane %v5537_v23, %v6561_v0  ;;  %11169 = vst [vmem:[#allocation56_spill] sm:$0xff] %v7741_v6  ;;  %v1487_v7 = vmul.f32 %v11170_v62, %v1449_v58  ;;  %v1508_v56 = vmul.f32 %v11171_v45, %v1449_v58  ;;  %v11181_v6 = vld [vmem:[#allocation110_spill] sm:$0xff] }
 0x28a   : > { %v1468_v61 = vmul.f32 %v11168_v27, %v1450_v2  ;;  %v1451_v38 = vsel %vm243_vm5, %v11162_v12, %v11172_v20  ;;  %11173 = vst [vmem:[#allocation54_spill] sm:$0xff] %v7749_v47  ;;  %v7752_v55 = vrot.slane %v5538_v1, %v6561_v0  ;;  %v7755_v54 = vrot.slane %v5536_v51, %v6571_v48  ;;  %v11176_v12 = vld [vmem:[#allocation103_spill] sm:$0xff]  ;;  %v11177_v27 = vld [vmem:[#allocation24_spill] sm:$0xff]  ;;  %v11179_v47 = vld [vmem:[#allocation26_spill] sm:$0xff] }
 0x28b   : > { %v7758_v34 = vrot.slane %v5537_v23, %v6571_v48  ;;  %v7761_v42 = vrot.slane %v5538_v1, %v6571_v48  ;;  %v1470_v15 = vadd.f32 %v1466_v30, %v1369_v10  ;;  %v1489_v3 = vmul.f32 %v11170_v62, %v1450_v2  ;;  %v11180_v23 = vld [vmem:[#allocation123_spill] sm:$0xff] }
 0x28c   : > { %v1510_v58 = vmul.f32 %v11171_v45, %v1450_v2  ;;  %v1452_v14 = vsel %vm243_vm5, %v11166_v16, %v11176_v12  ;;  %v1467_v20 = vmul.f32 %v11177_v27, %v1451_v38  ;;  %v1488_v51 = vmul.f32 %v11178_v21, %v1451_v38  ;;  %v5539_v2 = vld [vmem:[%s10567_s1 + $0x23] ss:$8 sm:$0x3]  ;;  %v11183_v16 = vld [vmem:[#allocation130_spill] sm:$0xff]  ;;  %v7781_v12 = vpop.permute.xlu0 %2134 }
 0x28d   : > { %11174 = vst [vmem:[#allocation58_spill] sm:$0xff] %v7758_v34  ;;  %11175 = vst [vmem:[#allocation60_spill] sm:$0xff] %v7761_v42  ;;  %v1509_v24 = vmul.f32 %v11179_v47, %v1451_v38  ;;  %v1546_v1 = vsel %vm234_vm2, %v11181_v6, %v11180_v23  ;;  %v7774_v42 = vpop.permute.xlu1 %2132  ;;  %v1491_v10 = vadd.f32 %v1487_v7, %v1390_v28  ;;  %v11185_v23 = vld [vmem:[#allocation132_spill] sm:$0xff] }
 0x28e   : > { %11182 = vst [vmem:[#allocation57_spill] sm:$0xff] %v7774_v42  ;;  %v1512_v30 = vadd.f32 %v1508_v56, %v1411_v50  ;;  %v1472_v62 = vadd.f32 %v1468_v61, %v1371_v8  ;;  %v1548_v45 = vsel %vm237_vm3, %v1546_v1, %v11183_v16  ;;  %11184 = vst [vmem:[#allocation55_spill] sm:$0xff] %v7781_v12  ;;  %v5540_v28 = vld [vmem:[%s10567_s1 + $0x63] ss:$8 sm:$0x3] }
 0x28f   : > { %v1469_v38 = vmul.f32 %v11177_v27, %v1452_v14  ;;  %v1490_v34 = vmul.f32 %v11178_v21, %v1452_v14  ;;  %v1511_v6 = vmul.f32 %v11179_v47, %v1452_v14  ;;  %v1550_v42 = vsel %vm240_vm4, %v1548_v45, %v11185_v23  ;;  %v11186_v7 = vld [vmem:[#allocation124_spill] sm:$0xff]  ;;  %v11189_v47 = vld [vmem:[#allocation131_spill] sm:$0xff] }
 0x290   : > { %v1493_v50 = vadd.f32 %v1489_v3, %v1392_v37  ;;  %v1514_v8 = vadd.f32 %v1510_v58, %v1413_v36  ;;  %v11187_v56 = vld [vmem:[#allocation112_spill] sm:$0xff]  ;;  %v7795_v1 = vrot.slane %v5539_v2, %v6561_v0  ;;  %v1471_v27 = vadd.f32 %v1467_v20, %v1370_v22  ;;  %v11191_v3 = vld [vmem:[#allocation133_spill] sm:$0xff] }
 0x291   : > { %v1547_v61 = vsel %vm234_vm2, %v11187_v56, %v11186_v7  ;;  %v1492_v21 = vadd.f32 %v1488_v51, %v1391_v17  ;;  %v1513_v16 = vadd.f32 %v1509_v24, %v1412_v39  ;;  %v5541_v45 = vld [vmem:[%s10567_s1 + $0xa3] ss:$8 sm:$0x3]  ;;  %v7802_v12 = vpop.permute.xlu1 %2138  ;;  %v1567_v37 = vmul.f32 %v7336_v32, %v1550_v42  ;;  %v7811_v24 = vpop.permute.xlu0 %2140  ;;  %v5542_v7 = vld [vmem:[%s10567_s1 + $0x24] ss:$8 sm:$0x3] }
 0x292   : > { %11188 = vst [vmem:[#allocation59_spill] sm:$0xff] %v7795_v1  ;;  %v1549_v14 = vsel %vm237_vm3, %v1547_v61, %v11189_v47  ;;  %11190 = vst [vmem:[#allocation61_spill] sm:$0xff] %v7802_v12  ;;  %v1588_v36 = vmul.f32 %v7353_v35, %v1550_v42  ;;  %v7809_v22 = vrot.slane %v5540_v28, %v6561_v0  ;;  %v11194_v56 = vld [vmem:[#allocation134_spill] sm:$0xff] }
 0x293   : > { %v1551_v58 = vsel %vm240_vm4, %v1549_v14, %v11191_v3  ;;  %11193 = vst [vmem:[#allocation63_spill] sm:$0xff] %v7811_v24  ;;  %v1473_v17 = vadd.f32 %v1469_v38, %v1372_v31  ;;  %v1494_v39 = vadd.f32 %v1490_v34, %v1393_v26  ;;  %v1515_v20 = vadd.f32 %v1511_v6, %v1414_v44  ;;  %v11198_v34 = vld [vmem:[#allocation135_spill] sm:$0xff] }
 0x294   : > { %11192 = vst [vmem:[#allocation62_spill] sm:$0xff] %v7809_v22  ;;  %v1609_v51 = vmul.f32 %v7359_v52, %v1550_v42  ;;  %v1552_v61 = vsel %vm243_vm5, %v11185_v23, %v11194_v56  ;;  %v7821_v47 = vrot.slane %v5541_v45, %v6561_v0  ;;  %v7824_v14 = vrot.slane %v5539_v2, %v6571_v48  ;;  %v5543_v2 = vld [vmem:[%s10567_s1 + $0x64] ss:$8 sm:$0x3] }
 0x295   : > { %v7827_v31 = vrot.slane %v5540_v28, %v6571_v48  ;;  %v1569_v26 = vmul.f32 %v7336_v32, %v1551_v58  ;;  %v1590_v44 = vmul.f32 %v7353_v35, %v1551_v58  ;;  %v1553_v42 = vsel %vm243_vm5, %v11191_v3, %v11198_v34  ;;  %v7837_v6 = vpop.permute.xlu1 %2144  ;;  %v7843_v32 = vpop.permute.xlu0 %2146  ;;  %v11206_v22 = vld [vmem:[#allocation120_spill] sm:$0xff] }
 0x296   : > { %11195 = vst [vmem:[#allocation66_spill] sm:$0xff] %v7821_v47  ;;  %11196 = vst [vmem:[#allocation64_spill] sm:$0xff] %v7824_v14  ;;  %v7835_v38 = vrot.slane %v5541_v45, %v6571_v48  ;;  %v1571_v23 = vadd.f32 %v1567_v37, %v1470_v15  ;;  %v1592_v28 = vadd.f32 %v1588_v36, %v1491_v10  ;;  %v11203_v45 = vld [vmem:[#allocation29_spill] sm:$0xff]  ;;  %v11205_v14 = vld [vmem:[#allocation136_spill] sm:$0xff] }
 0x297   : > { %11197 = vst [vmem:[#allocation68_spill] sm:$0xff] %v7827_v31  ;;  %11200 = vst [vmem:[#allocation65_spill] sm:$0xff] %v7837_v6  ;;  %v1611_v56 = vmul.f32 %v7359_v52, %v1551_v58  ;;  %v7846_v35 = vrot.slane %v5542_v7, %v6561_v0  ;;  %v1613_v31 = vadd.f32 %v1609_v51, %v1512_v30  ;;  %v11207_v10 = vld [vmem:[#allocation104_spill] sm:$0xff]  ;;  %v11209_v51 = vld [vmem:[#allocation139_spill] sm:$0xff] }
 0x298   : > { %11199 = vst [vmem:[#allocation67_spill] sm:$0xff] %v7835_v38  ;;  %11201 = vst [vmem:[#allocation70_spill] sm:$0xff] %v7843_v32  ;;  %v1568_v3 = vmul.f32 %v7362_v33, %v1552_v61  ;;  %v1589_v34 = vmul.f32 %v11203_v45, %v1552_v61  ;;  %v11204_v38 = vld [vmem:[#allocation138_spill] sm:$0xff]  ;;  %v1610_v1 = vmul.f32 %v11206_v22, %v1552_v61  ;;  %v5544_v30 = vld [vmem:[%s10567_s1 + $0xa4] ss:$8 sm:$0x3] }
 0x299   : > { %11202 = vst [vmem:[#allocation69_spill] sm:$0xff] %v7846_v35  ;;  %v1647_v47 = vsel %vm234_vm2, %v11205_v14, %v11204_v38  ;;  %v1570_v15 = vmul.f32 %v7362_v33, %v1553_v42  ;;  %v7858_v37 = vrot.slane %v5543_v2, %v6561_v0  ;;  %v1591_v36 = vmul.f32 %v11203_v45, %v1553_v42  ;;  %v11210_v14 = vld [vmem:[#allocation137_spill] sm:$0xff]  ;;  %v11211_v38 = vld [vmem:[#allocation106_spill] sm:$0xff]  ;;  %v7870_v35 = vpop.permute.xlu1 %2225  ;;  %v7874_v24 = vpop.permute.xlu0 %2227 }
 0x29a   : > { %v1649_v52 = vsel %vm237_vm3, %v1647_v47, %v11207_v10  ;;  %v1612_v58 = vmul.f32 %v11206_v22, %v1553_v42  ;;  %v1648_v61 = vsel %vm234_vm2, %v11210_v14, %v11209_v51  ;;  %11212 = vst [vmem:[#allocation72_spill] sm:$0xff] %v7870_v35  ;;  %v1573_v47 = vadd.f32 %v1569_v26, %v1472_v62  ;;  %v11213_v32 = vld [vmem:[#allocation105_spill] sm:$0xff]  ;;  %v11214_v22 = vld [vmem:[#allocation107_spill] sm:$0xff] }
 0x29b   : > { %11208 = vst [vmem:[#allocation71_spill] sm:$0xff] %v7858_v37  ;;  %v1651_v33 = vsel %vm240_vm4, %v1649_v52, %v11211_v38  ;;  %v1594_v10 = vadd.f32 %v1590_v44, %v1493_v50  ;;  %v1615_v37 = vadd.f32 %v1611_v56, %v1514_v8  ;;  %v1650_v6 = vsel %vm237_vm3, %v1648_v61, %v11213_v32  ;;  %v5545_v50 = vld [vmem:[%s10567_s1 + $0x25] ss:$8 sm:$0x3] }
 0x29c   : > { %v1572_v45 = vadd.f32 %v1568_v3, %v1471_v27  ;;  %v1593_v12 = vadd.f32 %v1589_v34, %v1492_v21  ;;  %v1652_v42 = vsel %vm240_vm4, %v1650_v6, %v11214_v22  ;;  %v7879_v51 = vrot.slane %v5544_v30, %v6561_v0  ;;  %v11215_v21 = vld [vmem:[#allocation8_spill] sm:$0xff]  ;;  %v11219_v3 = vld [vmem:[#allocation10_spill] sm:$0xff] }
 0x29d   : > { %v1614_v14 = vadd.f32 %v1610_v1, %v1513_v16  ;;  %v1574_v52 = vadd.f32 %v1570_v15, %v1473_v17  ;;  %v1668_v35 = vmul.f32 %v7421_v13, %v1651_v33  ;;  %v1689_v62 = vmul.f32 %v7433_v46, %v1651_v33  ;;  %v7890_v6 = vpop.permute.xlu1 %2231  ;;  %v7893_v16 = vpop.permute.xlu0 %2233 }
 0x29e   : > { %v1595_v8 = vadd.f32 %v1591_v36, %v1494_v39  ;;  %v1616_v26 = vadd.f32 %v1612_v58, %v1515_v20  ;;  %v1710_v27 = vmul.f32 %v7436_v60, %v1651_v33  ;;  %v1653_v44 = vsel %vm243_vm5, %v11211_v38, %v11215_v21  ;;  %v5827_v36 = vld [vmem:[#allocation2 + $0x3] sm:$0xff] }
 0x29f   : > { %v1670_v1 = vmul.f32 %v7421_v13, %v1652_v42  ;;  %v7896_v17 = vrot.slane %v5542_v7, %v6571_v48  ;;  %v7899_v56 = vrot.slane %v5543_v2, %v6571_v48  ;;  %v7902_v39 = vrot.slane %v5544_v30, %v6571_v48  ;;  %v5546_v7 = vld [vmem:[%s10567_s1 + $0x65] ss:$8 sm:$0x3] }
 0x2a0   : > { %v1691_v20 = vmul.f32 %v7433_v46, %v1652_v42  ;;  %v1712_v32 = vmul.f32 %v7436_v60, %v1652_v42  ;;  %v1654_v34 = vsel %vm243_vm5, %v11214_v22, %v11219_v3  ;;  %v7910_v13 = vrot.slane %v5545_v50, %v6561_v0  ;;  %v11221_v58 = vld [vmem:[#allocation12_spill] sm:$0xff] }
 0x2a1   : > { %11216 = vst [vmem:[#allocation73_spill] sm:$0xff] %v7896_v17  ;;  %11217 = vst [vmem:[#allocation6_spill] sm:$0xff] %v7899_v56  ;;  %v1672_v2 = vadd.f32 %v1668_v35, %v1571_v23  ;;  %v1693_v15 = vadd.f32 %v1689_v62, %v1592_v28  ;;  %v1669_v30 = vmul.f32 %v7442_v63, %v1653_v44  ;;  %v11222_v33 = vld [vmem:[#allocation108_spill] sm:$0xff]  ;;  %v7922_v42 = vpop.permute.xlu1 %2237  ;;  %v11223_v62 = vld [vmem:[#allocation18_spill] sm:$0xff] }
 0x2a2   : > { %11218 = vst [vmem:[#allocation74_spill] sm:$0xff] %v7902_v39  ;;  %11220 = vst [vmem:[#allocation76_spill] sm:$0xff] %v7910_v13  ;;  %v1746_v46 = vsel %vm234_vm2, %v5827_v36, %v11221_v58  ;;  %v1714_v60 = vadd.f32 %v1710_v27, %v1613_v31  ;;  %v1690_v61 = vmul.f32 %v7445_v5, %v1653_v44  ;;  %v5547_v23 = vld [vmem:[%s10567_s1 + $0xa5] ss:$8 sm:$0x3]  ;;  %v7931_v27 = vpop.permute.xlu0 %2239 }
 0x2a3   : > { %v1711_v38 = vmul.f32 %v7448_v4, %v1653_v44  ;;  %v1748_v22 = vsel %vm237_vm3, %v1746_v46, %v11222_v33  ;;  %v1671_v28 = vmul.f32 %v7442_v63, %v1654_v34  ;;  %v1692_v35 = vmul.f32 %v7445_v5, %v1654_v34  ;;  %v5828_v58 = vld [vmem:[#allocation2 + $0xb] sm:$0xf] }
 0x2a4   : > { %v1750_v31 = vsel %vm240_vm4, %v1748_v22, %v11223_v62  ;;  %v7934_v21 = vrot.slane %v5546_v7, %v6561_v0  ;;  %v1674_v44 = vadd.f32 %v1670_v1, %v1573_v47  ;;  %v1695_v3 = vadd.f32 %v1691_v20, %v1594_v10  ;;  %v11225_v46 = vld [vmem:[#allocation9_spill] sm:$0xff]  ;;  %v11227_v47 = vld [vmem:[#allocation16_spill] sm:$0xff] }
 0x2a5   : > { %v1713_v36 = vmul.f32 %v7448_v4, %v1654_v34  ;;  %v1747_v33 = vsel %vm234_vm2, %v5828_v58, %v11225_v46  ;;  %v1716_v13 = vadd.f32 %v1712_v32, %v1615_v37  ;;  %v1673_v63 = vadd.f32 %v1669_v30, %v1572_v45  ;;  %v11226_v39 = vld [vmem:[#allocation109_spill] sm:$0xff]  ;;  %v7947_v4 = vpop.permute.xlu1 %2243  ;;  %v11228_v45 = vld [vmem:[#allocation20_spill] sm:$0xff] }
 0x2a6   : > { %11224 = vst [vmem:[#allocation75_spill] sm:$0xff] %v7934_v21  ;;  %v1749_v5 = vsel %vm237_vm3, %v1747_v33, %v11226_v39  ;;  %v7942_v22 = vrot.slane %v5547_v23, %v6561_v0  ;;  %v1694_v56 = vadd.f32 %v1690_v61, %v1593_v12  ;;  %v1715_v17 = vadd.f32 %v1711_v38, %v1614_v14  ;;  %v7953_v32 = vpop.permute.xlu0 %2245  ;;  %v11231_v38 = vld [vmem:[#allocation113_spill] sm:$0xff] }
 0x2a7   : > { %v1767_v21 = vmul.f32 %v7473_v57, %v1750_v31  ;;  %v1751_v10 = vsel %vm240_vm4, %v1749_v5, %v11227_v47  ;;  %v1675_v1 = vadd.f32 %v1671_v28, %v1574_v52  ;;  %v1696_v20 = vadd.f32 %v1692_v35, %v1595_v8  ;;  %v11234_v58 = vld [vmem:[#allocation25_spill] sm:$0xff] }
 0x2a8   : > { %v1788_v37 = vmul.f32 %v7500_v18, %v1750_v31  ;;  %v1752_v39 = vsel %vm243_vm5, %v11223_v62, %v11228_v45  ;;  %v1717_v34 = vadd.f32 %v1713_v36, %v1616_v26  ;;  %v7956_v12 = vrot.slane %v5545_v50, %v6571_v48  ;;  %v11233_v62 = vld [vmem:[#allocation19_spill] sm:$0xff] }
 0x2a9   : > { %v7959_v14 = vrot.slane %v5546_v7, %v6571_v48  ;;  %v7962_v30 = vrot.slane %v5547_v23, %v6571_v48  ;;  %v1809_v52 = vmul.f32 %v7510_v49, %v1750_v31  ;;  %v1769_v8 = vmul.f32 %v7473_v57, %v1751_v10  ;;  %v11232_v7 = vld [vmem:[#allocation21_spill] sm:$0xff]  ;;  %v7975_v36 = vpop.permute.xlu1 %2320 }
 0x2aa   : > { %v1790_v61 = vmul.f32 %v7500_v18, %v1751_v10  ;;  %v1753_v28 = vsel %vm243_vm5, %v11227_v47, %v11231_v38  ;;  %v1771_v26 = vadd.f32 %v1767_v21, %v1672_v2  ;;  %v1811_v50 = vmul.f32 %v7510_v49, %v1751_v10  ;;  %v7981_v33 = vpop.permute.xlu0 %2322  ;;  %v5548_v49 = vld [vmem:[%s10567_s1 + $0x26] ss:$8 sm:$0x3] }
 0x2ab   : > { %11229 = vst [vmem:[#allocation78_spill] sm:$0xff] %v7959_v14  ;;  %11230 = vst [vmem:[#allocation77_spill] sm:$0xff] %v7962_v30  ;;  %v1768_v35 = vmul.f32 %v7519_v59, %v1752_v39  ;;  %v1847_v23 = vsel %vm234_vm2, %v11233_v62, %v11232_v7  ;;  %v1792_v31 = vadd.f32 %v1788_v37, %v1693_v15  ;;  %v11235_v15 = vld [vmem:[#allocation119_spill] sm:$0xff]  ;;  %v11237_v38 = vld [vmem:[#allocation17_spill] sm:$0xff] }
 0x2ac   : > { %v1789_v57 = vmul.f32 %v7528_v9, %v1752_v39  ;;  %v1810_v18 = vmul.f32 %v7531_v19, %v1752_v39  ;;  %v1849_v46 = vsel %vm237_vm3, %v1847_v23, %v11234_v58  ;;  %v1770_v2 = vmul.f32 %v7519_v59, %v1753_v28  ;;  %v11236_v39 = vld [vmem:[#allocation114_spill] sm:$0xff]  ;;  %v5549_v62 = vld [vmem:[%s10567_s1 + $0x66] ss:$8 sm:$0x3]  ;;  %v11273_v14 = vld [vmem:[#allocation43_spill] sm:$0xff] }
 0x2ad   : > { %v1791_v21 = vmul.f32 %v7528_v9, %v1753_v28  ;;  %v1812_v5 = vmul.f32 %v7531_v19, %v1753_v28  ;;  %v1851_v47 = vsel %vm240_vm4, %v1849_v46, %v11235_v15  ;;  %v1813_v10 = vadd.f32 %v1809_v52, %v1714_v60  ;;  %v11238_v58 = vld [vmem:[#allocation117_spill] sm:$0xff]  ;;  %v7999_v19 = vpop.permute.xlu1 %2326 }
 0x2ae   : > { %v1773_v37 = vadd.f32 %v1769_v8, %v1674_v44  ;;  %v1794_v45 = vadd.f32 %v1790_v61, %v1695_v3  ;;  %v1848_v7 = vsel %vm234_vm2, %v11237_v38, %v11236_v39  ;;  %v1815_v23 = vadd.f32 %v1811_v50, %v1716_v13  ;;  %v5550_v60 = vld [vmem:[%s10567_s1 + $0xa6] ss:$8 sm:$0x3] }
 0x2af   : > { %v1772_v59 = vadd.f32 %v1768_v35, %v1673_v63  ;;  %v1850_v9 = vsel %vm237_vm3, %v1848_v7, %v11238_v58  ;;  %v8002_v28 = vrot.slane %v5548_v49, %v6561_v0  ;;  %v1793_v44 = vadd.f32 %v1789_v57, %v1694_v56  ;;  %v11240_v8 = vld [vmem:[#allocation28_spill] sm:$0xff]  ;;  %v8010_v63 = vpop.permute.xlu0 %2328  ;;  %v11242_v7 = vld [vmem:[#allocation30_spill] sm:$0xff] }
 0x2b0   : > { %v1814_v3 = vadd.f32 %v1810_v18, %v1715_v17  ;;  %v1868_v52 = vmul.f32 %v7557_v11, %v1851_v47  ;;  %v1852_v13 = vsel %vm240_vm4, %v1850_v9, %v11240_v8  ;;  %v1774_v61 = vadd.f32 %v1770_v2, %v1675_v1  ;;  %v11244_v18 = vld [vmem:[#allocation27_spill] sm:$0xff]  ;;  %v11248_v58 = vld [vmem:[#allocation126_spill] sm:$0xff] }
 0x2b1   : > { %11239 = vst [vmem:[#allocation79_spill] sm:$0xff] %v8002_v28  ;;  %v1795_v50 = vadd.f32 %v1791_v21, %v1696_v20  ;;  %v1816_v35 = vadd.f32 %v1812_v5, %v1717_v34  ;;  %v8013_v46 = vrot.slane %v5549_v62, %v6561_v0  ;;  %v1889_v39 = vmul.f32 %v7575_v41, %v1851_v47  ;;  %v8027_v20 = vpop.permute.xlu1 %2332 }
 0x2b2   : > { %v1910_v38 = vmul.f32 %v7588_v25, %v1851_v47  ;;  %v1853_v17 = vsel %vm243_vm5, %v11235_v15, %v11242_v7  ;;  %v8021_v56 = vrot.slane %v5550_v60, %v6561_v0  ;;  %v1870_v57 = vmul.f32 %v7557_v11, %v1852_v13 }
 0x2b3   : > { %11241 = vst [vmem:[#allocation7_spill] sm:$0xff] %v8013_v46  ;;  %v1854_v1 = vsel %vm243_vm5, %v11240_v8, %v11244_v18  ;;  %v8030_v34 = vrot.slane %v5548_v49, %v6571_v48  ;;  %v8033_v2 = vrot.slane %v5549_v62, %v6571_v48  ;;  %v1872_v21 = vadd.f32 %v1868_v52, %v1771_v26  ;;  %v8037_v47 = vpop.permute.xlu0 %2334  ;;  %v11249_v8 = vld [vmem:[#allocation42_spill] sm:$0xff]  ;;  %v11250_v18 = vld [vmem:[#allocation127_spill] sm:$0xff] }
 0x2b4   : > { %11243 = vst [vmem:[#allocation80_spill] sm:$0xff] %v8021_v56  ;;  %v1891_v5 = vmul.f32 %v7575_v41, %v1852_v13  ;;  %v1912_v15 = vmul.f32 %v7588_v25, %v1852_v13  ;;  %v8040_v11 = vrot.slane %v5550_v60, %v6571_v48  ;;  %v1869_v9 = vmul.f32 %v11248_v58, %v1853_v17  ;;  %v11252_v56 = vld [vmem:[#allocation31_spill] sm:$0xff]  ;;  %v5551_v41 = vld [vmem:[%s10567_s1 + $0x27] ss:$8 sm:$0x3]  ;;  %v11254_v46 = vld [vmem:[#allocation34_spill] sm:$0xff] }
 0x2b5   : > { %11245 = vst [vmem:[#allocation11_spill] sm:$0xff] %v8030_v34  ;;  %11246 = vst [vmem:[#allocation81_spill] sm:$0xff] %v8033_v2  ;;  %v1890_v7 = vmul.f32 %v11249_v8, %v1853_v17  ;;  %v1911_v49 = vmul.f32 %v11250_v18, %v1853_v17  ;;  %v11251_v34 = vld [vmem:[#allocation121_spill] sm:$0xff]  ;;  %v1893_v25 = vadd.f32 %v1889_v39, %v1792_v31 }
 0x2b6   : > { %11247 = vst [vmem:[#allocation13_spill] sm:$0xff] %v8040_v11  ;;  %v1948_v62 = vsel %vm234_vm2, %v11252_v56, %v11251_v34  ;;  %v1914_v26 = vadd.f32 %v1910_v38, %v1813_v10  ;;  %v1871_v52 = vmul.f32 %v11248_v58, %v1854_v1  ;;  %v11253_v60 = vld [vmem:[#allocation33_spill] sm:$0xff]  ;;  %v1874_v11 = vadd.f32 %v1870_v57, %v1773_v37  ;;  %v8058_v56 = vpop.permute.xlu1 %2338  ;;  %v11255_v38 = vld [vmem:[#allocation122_spill] sm:$0xff]  ;;  %v11256_v34 = vld [vmem:[#allocation32_spill] sm:$0xff] }
 0x2b7   : > { %v1950_v13 = vsel %vm237_vm3, %v1948_v62, %v11253_v60  ;;  %v1892_v2 = vmul.f32 %v11249_v8, %v1854_v1  ;;  %v1913_v17 = vmul.f32 %v11250_v18, %v1854_v1  ;;  %v5552_v31 = vld [vmem:[%s10567_s1 + $0x67] ss:$8 sm:$0x3]  ;;  %v1895_v10 = vadd.f32 %v1891_v5, %v1794_v45  ;;  %v8066_v37 = vpop.permute.xlu0 %2340 }
 0x2b8   : > { %v1952_v28 = vsel %vm240_vm4, %v1950_v13, %v11254_v46  ;;  %v1916_v39 = vadd.f32 %v1912_v15, %v1815_v23  ;;  %v1949_v58 = vsel %vm234_vm2, %v11256_v34, %v11255_v38  ;;  %v8069_v57 = vrot.slane %v5551_v41, %v6561_v0  ;;  %v11258_v62 = vld [vmem:[#allocation36_spill] sm:$0xff]  ;;  %v11259_v15 = vld [vmem:[#allocation38_spill] sm:$0xff] }
 0x2b9   : > { %v1873_v1 = vadd.f32 %v1869_v9, %v1772_v59  ;;  %v1894_v8 = vadd.f32 %v1890_v7, %v1793_v44  ;;  %v1915_v18 = vadd.f32 %v1911_v49, %v1814_v3  ;;  %v1951_v60 = vsel %vm237_vm3, %v1949_v58, %v11258_v62  ;;  %v5553_v45 = vld [vmem:[%s10567_s1 + $0xa7] ss:$8 sm:$0x3] }
 0x2ba   : > { %11257 = vst [vmem:[#allocation14_spill] sm:$0xff] %v8069_v57  ;;  %v1875_v23 = vadd.f32 %v1871_v52, %v1774_v61  ;;  %v1969_v5 = vmul.f32 %v7652_v29, %v1952_v28  ;;  %v1953_v13 = vsel %vm240_vm4, %v1951_v60, %v11259_v15  ;;  %v8080_v38 = vrot.slane %v5552_v31, %v6561_v0  ;;  %v11261_v3 = vld [vmem:[#allocation37_spill] sm:$0xff]  ;;  %v8086_v7 = vpop.permute.xlu1 %2344  ;;  %v11262_v49 = vld [vmem:[#allocation44_spill] sm:$0xff] }
 0x2bb   : > { %v1896_v34 = vadd.f32 %v1892_v2, %v1795_v50  ;;  %v1917_v59 = vadd.f32 %v1913_v17, %v1816_v35  ;;  %v1990_v44 = vmul.f32 %v7665_v43, %v1952_v28  ;;  %v1954_v9 = vsel %vm243_vm5, %v11254_v46, %v11261_v3  ;;  %v8089_v52 = vpop.permute.xlu0 %2346  ;;  %v11266_v46 = vld [vmem:[#allocation35_spill] sm:$0xff] }
 0x2bc   : > { %11260 = vst [vmem:[#allocation15_spill] sm:$0xff] %v8080_v38  ;;  %v2011_v61 = vmul.f32 %v11262_v49, %v1952_v28  ;;  %v8092_v58 = vrot.slane %v5553_v45, %v6561_v0  ;;  %v8095_v62 = vrot.slane %v5551_v41, %v6571_v48  ;;  %v8098_v50 = vrot.slane %v5552_v31, %v6571_v48  ;;  %v11270_v38 = vld [vmem:[#allocation40_spill] sm:$0xff] }
 0x2bd   : > { %v1971_v35 = vmul.f32 %v7652_v29, %v1953_v13  ;;  %v1992_v2 = vmul.f32 %v7665_v43, %v1953_v13  ;;  %v1955_v17 = vsel %vm243_vm5, %v11259_v15, %v11266_v46  ;;  %v8106_v28 = vrot.slane %v5553_v45, %v6571_v48  ;;  %v11271_v29 = vld [vmem:[#allocation47_spill] sm:$0xff]  ;;  %v11272_v43 = vld [vmem:[#allocation45_spill] sm:$0xff] }
 0x2be   : > { %11263 = vst [vmem:[#allocation84_spill] sm:$0xff] %v8092_v58  ;;  %11264 = vst [vmem:[#allocation82_spill] sm:$0xff] %v8095_v62  ;;  %v1973_v60 = vadd.f32 %v1969_v5, %v1872_v21  ;;  %v2013_v3 = vmul.f32 %v11262_v49, %v1953_v13  ;;  %v11268_v58 = vld [vmem:[#allocation48_spill] sm:$0xff]  ;;  %v11269_v62 = vld [vmem:[#allocation41_spill] sm:$0xff]  ;;  %v1991_v57 = vmul.f32 %v11271_v29, %v1954_v9  ;;  %v8117_v46 = vpop.permute.xlu1 %2421 }
 0x2bf   : > { %11265 = vst [vmem:[#allocation86_spill] sm:$0xff] %v8098_v50  ;;  %11267 = vst [vmem:[#allocation88_spill] sm:$0xff] %v8106_v28  ;;  %v1970_v41 = vmul.f32 %v11268_v58, %v1954_v9  ;;  %v2049_v31 = vsel %vm234_vm2, %v11270_v38, %v11269_v62  ;;  %v1994_v50 = vadd.f32 %v1990_v44, %v1893_v25  ;;  %v5554_v21 = vld [vmem:[%s10567_s1 + $0x30] ss:$8 sm:$0x3]  ;;  %v11275_v38 = vld [vmem:[#allocation129_spill] sm:$0xff]  ;;  %v8126_v44 = vpop.permute.xlu0 %2423 }
 0x2c0   : > { %v2012_v30 = vmul.f32 %v11272_v43, %v1954_v9  ;;  %v2051_v15 = vsel %vm237_vm3, %v2049_v31, %v11273_v14  ;;  %11274 = vst [vmem:[#allocation85_spill] sm:$0xff] %v8117_v46  ;;  %v2015_v45 = vadd.f32 %v2011_v61, %v1914_v26  ;;  %v1972_v5 = vmul.f32 %v11268_v58, %v1955_v17  ;;  %v11276_v62 = vld [vmem:[#allocation125_spill] sm:$0xff]  ;;  %v11277_v31 = vld [vmem:[#allocation39_spill] sm:$0xff] }
 0x2c1   : > { %v1993_v13 = vmul.f32 %v11271_v29, %v1955_v17  ;;  %v2053_v25 = vsel %vm240_vm4, %v2051_v15, %v11275_v38  ;;  %v1975_v9 = vadd.f32 %v1971_v35, %v1874_v11  ;;  %v1996_v49 = vadd.f32 %v1992_v2, %v1895_v10  ;;  %v5555_v26 = vld [vmem:[%s10567_s1 + $0x70] ss:$8 sm:$0x3]  ;;  %v11278_v29 = vld [vmem:[#allocation128_spill] sm:$0xff] }
 0x2c2   : > { %v2014_v14 = vmul.f32 %v11272_v43, %v1955_v17  ;;  %v2050_v28 = vsel %vm234_vm2, %v11277_v31, %v11276_v62  ;;  %v2017_v61 = vadd.f32 %v2013_v3, %v1916_v39  ;;  %v1974_v58 = vadd.f32 %v1970_v41, %v1873_v1  ;;  %v5556_v11 = vld [vmem:[%s10567_s1 + $0xb0] ss:$8 sm:$0x3]  ;;  %v8146_v62 = vpop.permute.xlu1 %2427 }
 0x2c3   : > { %v2052_v46 = vsel %vm237_vm3, %v2050_v28, %v11278_v29  ;;  %v8138_v15 = vrot.slane %v5554_v21, %v6561_v0  ;;  %v1995_v10 = vadd.f32 %v1991_v57, %v1894_v8  ;;  %v2016_v35 = vadd.f32 %v2012_v30, %v1915_v18  ;;  %v11280_v17 = vld [vmem:[#allocation46_spill] sm:$0xff]  ;;  %v8149_v3 = vpop.permute.xlu0 %2429 }
 0x2c4   : > { %v2070_v2 = vmul.f32 %v7733_v40, %v2053_v25  ;;  %v2054_v43 = vsel %vm240_vm4, %v2052_v46, %v11280_v17  ;;  %v1976_v39 = vadd.f32 %v1972_v5, %v1875_v23  ;;  %v1997_v1 = vadd.f32 %v1993_v13, %v1896_v34  ;;  %v11282_v30 = vld [vmem:[#allocation50_spill] sm:$0xff] }
 0x2c5   : > { %11279 = vst [vmem:[#allocation83_spill] sm:$0xff] %v8138_v15  ;;  %v2091_v28 = vmul.f32 %v7739_v53, %v2053_v25  ;;  %v8152_v41 = vrot.slane %v5555_v26, %v6561_v0  ;;  %v2018_v31 = vadd.f32 %v2014_v14, %v1917_v59  ;;  %v2112_v57 = vmul.f32 %v7752_v55, %v2053_v25 }
 0x2c6   : > { %v2055_v8 = vsel %vm243_vm5, %v11275_v38, %v11282_v30  ;;  %v8159_v18 = vrot.slane %v5556_v11, %v6561_v0  ;;  %v2072_v23 = vmul.f32 %v7733_v40, %v2054_v43  ;;  %v8163_v34 = vrot.slane %v5554_v21, %v6571_v48  ;;  %v11287_v38 = vld [vmem:[#allocation49_spill] sm:$0xff]  ;;  %v8176_v29 = vpop.permute.xlu1 %2433  ;;  %v11289_v30 = vld [vmem:[#allocation58_spill] sm:$0xff]  ;;  %v11290_v0 = vld [vmem:[#allocation56_spill] sm:$0xff] }
 0x2c7   : > { %11281 = vst [vmem:[#allocation87_spill] sm:$0xff] %v8152_v41  ;;  %v8166_v46 = vrot.slane %v5555_v26, %v6571_v48  ;;  %v8169_v5 = vrot.slane %v5556_v11, %v6571_v48  ;;  %v2074_v59 = vadd.f32 %v2070_v2, %v1973_v60  ;;  %v2093_v13 = vmul.f32 %v7739_v53, %v2054_v43  ;;  %v8183_v60 = vpop.permute.xlu0 %2435  ;;  %v11292_v2 = vld [vmem:[#allocation60_spill] sm:$0xff]  ;;  %v11294_v48 = vld [vmem:[#allocation53_spill] sm:$0xff]  ;;  %v11298_v41 = vld [vmem:[#allocation63_spill] sm:$0xff] }
 0x2c8   : > { %11283 = vst [vmem:[#allocation111_spill] sm:$0xff] %v8159_v18  ;;  %11284 = vst [vmem:[#allocation89_spill] sm:$0xff] %v8163_v34  ;;  %v2114_v25 = vmul.f32 %v7752_v55, %v2054_v43  ;;  %v2056_v14 = vsel %vm243_vm5, %v11280_v17, %v11287_v38  ;;  %v2095_v40 = vadd.f32 %v2091_v28, %v1994_v50  ;;  %v11293_v43 = vld [vmem:[#allocation54_spill] sm:$0xff]  ;;  %v11295_v38 = vld [vmem:[#allocation57_spill] sm:$0xff] }
 0x2c9   : > { %11285 = vst [vmem:[#allocation90_spill] sm:$0xff] %v8166_v46  ;;  %11286 = vst [vmem:[#allocation91_spill] sm:$0xff] %v8169_v5  ;;  %v2071_v21 = vmul.f32 %v7755_v54, %v2055_v8  ;;  %v2092_v26 = vmul.f32 %v11289_v30, %v2055_v8  ;;  %v11291_v46 = vld [vmem:[#allocation52_spill] sm:$0xff]  ;;  %v2116_v53 = vadd.f32 %v2112_v57, %v2015_v45  ;;  %v11296_v34 = vld [vmem:[#allocation55_spill] sm:$0xff] }
 0x2ca   : > { %11288 = vst [vmem:[#allocation94_spill] sm:$0xff] %v8176_v29  ;;  %v2150_v11 = vsel %vm234_vm2, %v11291_v46, %v11290_v0  ;;  %v2113_v55 = vmul.f32 %v11292_v2, %v2055_v8  ;;  %v2151_v17 = vsel %vm234_vm2, %v11294_v48, %v11293_v43  ;;  %v2073_v28 = vmul.f32 %v7755_v54, %v2056_v14  ;;  %v11297_v0 = vld [vmem:[#allocation61_spill] sm:$0xff]  ;;  %v8199_v48 = vpop.permute.xlu1 %2439 }
 0x2cb   : > { %v2152_v50 = vsel %vm237_vm3, %v2150_v11, %v11295_v38  ;;  %v2094_v5 = vmul.f32 %v11289_v30, %v2056_v14  ;;  %v2153_v18 = vsel %vm237_vm3, %v2151_v17, %v11296_v34  ;;  %v2076_v45 = vadd.f32 %v2072_v23, %v1975_v9  ;;  %11299 = vst [vmem:[#allocation92_spill] sm:$0xff] %v8199_v48  ;;  %v11300_v38 = vld [vmem:[#allocation65_spill] sm:$0xff]  ;;  %v8205_v34 = vpop.permute.xlu0 %2441  ;;  %v11304_v23 = vld [vmem:[#allocation51_spill] sm:$0xff] }
 0x2cc   : > { %v2154_v46 = vsel %vm240_vm4, %v2152_v50, %v11297_v0  ;;  %v2097_v57 = vadd.f32 %v2093_v13, %v1996_v49  ;;  %v2118_v8 = vadd.f32 %v2114_v25, %v2017_v61  ;;  %v2155_v15 = vsel %vm240_vm4, %v2153_v18, %v11298_v41  ;;  %11301 = vst [vmem:[#allocation22_spill] sm:$0xff] %v8205_v34  ;;  %v11302_v50 = vld [vmem:[#allocation59_spill] sm:$0xff]  ;;  %v11303_v49 = vld [vmem:[#allocation62_spill] sm:$0xff]  ;;  %v11309_v34 = vld [vmem:[#allocation68_spill] sm:$0xff] }
 0x2cd   : > { %v2075_v43 = vadd.f32 %v2071_v21, %v1974_v58  ;;  %v2096_v11 = vadd.f32 %v2092_v26, %v1995_v10  ;;  %v2115_v54 = vmul.f32 %v11292_v2, %v2056_v14  ;;  %v2156_v30 = vsel %vm243_vm5, %v11297_v0, %v11300_v38  ;;  %v11305_v10 = vld [vmem:[#allocation66_spill] sm:$0xff]  ;;  %v11306_v2 = vld [vmem:[#allocation64_spill] sm:$0xff] }
 0x2ce   : > { %v2117_v17 = vadd.f32 %v2113_v55, %v2016_v35  ;;  %v2171_v9 = vmul.f32 %v11302_v50, %v2154_v46  ;;  %v2192_v61 = vmul.f32 %v11303_v49, %v2154_v46  ;;  %v2250_v18 = vsel %vm234_vm2, %v11304_v23, %v7874_v24  ;;  %v11307_v55 = vld [vmem:[#allocation70_spill] sm:$0xff]  ;;  %v8220_v38 = vpop.permute.xlu1 %2445 }
 0x2cf   : > { %v2077_v13 = vadd.f32 %v2073_v28, %v1976_v39  ;;  %v2098_v58 = vadd.f32 %v2094_v5, %v1997_v1  ;;  %v2213_v25 = vmul.f32 %v11305_v10, %v2154_v46  ;;  %v2173_v14 = vmul.f32 %v11302_v50, %v2155_v15  ;;  %11308 = vst [vmem:[#allocation96_spill] sm:$0xff] %v8220_v38  ;;  %v11310_v39 = vld [vmem:[#allocation67_spill] sm:$0xff]  ;;  %v5829_v5 = vld [vmem:[#allocation2 + $0x4] sm:$0xff] }
 0x2d0   : > { %v2194_v21 = vmul.f32 %v11303_v49, %v2155_v15  ;;  %v2215_v26 = vmul.f32 %v11305_v10, %v2155_v15  ;;  %v2172_v35 = vmul.f32 %v11306_v2, %v2156_v30  ;;  %v2157_v0 = vsel %vm243_vm5, %v11298_v41, %v11307_v55  ;;  %v11311_v28 = vld [vmem:[#allocation72_spill] sm:$0xff]  ;;  %v8228_v15 = vpop.permute.xlu0 %2447 }
 0x2d1   : > { %v2193_v24 = vmul.f32 %v11309_v34, %v2156_v30  ;;  %v2214_v1 = vmul.f32 %v11310_v39, %v2156_v30  ;;  %v2249_v46 = vsel %vm234_vm2, %v5829_v5, %v11311_v28  ;;  %v2252_v50 = vsel %vm237_vm3, %v2250_v18, %v7893_v16 }
 0x2d2   : > { %v2119_v49 = vadd.f32 %v2115_v54, %v2018_v31  ;;  %v2175_v23 = vadd.f32 %v2171_v9, %v2074_v59  ;;  %v2196_v10 = vadd.f32 %v2192_v61, %v2095_v40  ;;  %v2251_v41 = vsel %vm237_vm3, %v2249_v46, %v7890_v6  ;;  %v8238_v31 = vpop.permute.xlu1 %2522  ;;  %v11312_v9 = vld [vmem:[#allocation69_spill] sm:$0xff]  ;;  %v11313_v61 = vld [vmem:[#allocation71_spill] sm:$0xff] }
 0x2d3   : > { %v2217_v55 = vadd.f32 %v2213_v25, %v2116_v53  ;;  %v2174_v38 = vmul.f32 %v11306_v2, %v2157_v0  ;;  %v2195_v30 = vmul.f32 %v11309_v34, %v2157_v0  ;;  %v2253_v48 = vsel %vm240_vm4, %v2251_v41, %v7922_v42 }
 0x2d4   : > { %v2177_v5 = vadd.f32 %v2173_v14, %v2076_v45  ;;  %v2198_v28 = vadd.f32 %v2194_v21, %v2097_v57  ;;  %v2219_v29 = vadd.f32 %v2215_v26, %v2118_v8  ;;  %v2254_v16 = vsel %vm240_vm4, %v2252_v50, %v7931_v27  ;;  %v8241_v53 = vpop.permute.xlu0 %2524 }
 0x2d5   : > { %v2176_v59 = vadd.f32 %v2172_v35, %v2075_v43  ;;  %v2197_v40 = vadd.f32 %v2193_v24, %v2096_v11  ;;  %v2218_v54 = vadd.f32 %v2214_v1, %v2117_v17  ;;  %v2216_v6 = vmul.f32 %v11310_v39, %v2157_v0 }
 0x2d6   : > { %v2270_v34 = vmul.f32 %v11312_v9, %v2253_v48  ;;  %v2291_v18 = vmul.f32 %v11313_v61, %v2253_v48  ;;  %v2255_v45 = vsel %vm243_vm5, %v7922_v42, %v7947_v4  ;;  %v2351_v57 = vsel %vm234_vm2, %v7981_v33, %v8010_v63  ;;  %v8261_v4 = vpop.permute.xlu1 %2528  ;;  %v11314_v33 = vld [vmem:[#allocation73_spill] sm:$0xff] }
 0x2d7   : > { %v2178_v8 = vadd.f32 %v2174_v38, %v2077_v13  ;;  %v2199_v43 = vadd.f32 %v2195_v30, %v2098_v58  ;;  %v2312_v11 = vmul.f32 %v7879_v51, %v2253_v48  ;;  %v2272_v17 = vmul.f32 %v11312_v9, %v2254_v16  ;;  %v11315_v13 = vld [vmem:[#allocation6_spill] sm:$0xff]  ;;  %v11318_v30 = vld [vmem:[#allocation75_spill] sm:$0xff] }
 0x2d8   : > { %v2293_v25 = vmul.f32 %v11313_v61, %v2254_v16  ;;  %v2314_v14 = vmul.f32 %v7879_v51, %v2254_v16  ;;  %v2256_v21 = vsel %vm243_vm5, %v7931_v27, %v7953_v32  ;;  %v2350_v42 = vsel %vm234_vm2, %v7975_v36, %v7999_v19  ;;  %v2531_v26 = vpop.permute.xlu0 %2530  ;;  %v11316_v19 = vld [vmem:[#allocation74_spill] sm:$0xff] }
 0x2d9   : > { %v2271_v63 = vmul.f32 %v11314_v33, %v2255_v45  ;;  %v2292_v48 = vmul.f32 %v11315_v13, %v2255_v45  ;;  %v2352_v58 = vsel %vm237_vm3, %v2350_v42, %v8027_v20  ;;  %v2353_v51 = vsel %vm237_vm3, %v2351_v57, %v8037_v47 }
 0x2da   : > { %v2220_v2 = vadd.f32 %v2216_v6, %v2119_v49  ;;  %v2274_v35 = vadd.f32 %v2270_v34, %v2175_v23  ;;  %v2295_v27 = vadd.f32 %v2291_v18, %v2196_v10  ;;  %v2354_v32 = vsel %vm240_vm4, %v2352_v58, %v8058_v56  ;;  %v2535_v46 = vpop.permute.xlu1 %2534  ;;  %v11317_v10 = vld [vmem:[#allocation76_spill] sm:$0xff] }
 0x2db   : > { %v2316_v36 = vadd.f32 %v2312_v11, %v2217_v55  ;;  %v2313_v0 = vmul.f32 %v11316_v19, %v2255_v45  ;;  %v2273_v38 = vmul.f32 %v11314_v33, %v2256_v21  ;;  %v2294_v24 = vmul.f32 %v11315_v13, %v2256_v21  ;;  %v11323_v33 = vld [vmem:[#allocation92_spill] sm:$0xff] }
 0x2dc   : > { %v2276_v39 = vadd.f32 %v2272_v17, %v2177_v5  ;;  %v2297_v1 = vadd.f32 %v2293_v25, %v2198_v28  ;;  %v2315_v20 = vmul.f32 %v11316_v19, %v2256_v21  ;;  %v2355_v47 = vsel %vm240_vm4, %v2353_v51, %v8066_v37  ;;  %v2537_v55 = vpop.permute.xlu0 %2536  ;;  %v11321_v25 = vld [vmem:[#allocation94_spill] sm:$0xff] }
 0x2dd   : > { %v2318_v50 = vadd.f32 %v2314_v14, %v2219_v29  ;;  %v2275_v49 = vadd.f32 %v2271_v63, %v2176_v59  ;;  %v2296_v23 = vadd.f32 %v2292_v48, %v2197_v40  ;;  %v2371_v41 = vmul.f32 %v11317_v10, %v2354_v32 }
 0x2de   : > { %v2392_v16 = vmul.f32 %v11318_v30, %v2354_v32  ;;  %v2413_v6 = vmul.f32 %v7942_v22, %v2354_v32  ;;  %v2356_v5 = vsel %vm243_vm5, %v8058_v56, %v8086_v7  ;;  %v2452_v28 = vsel %vm234_vm2, %v8126_v44, %v8149_v3  ;;  %v2541_v57 = vpop.permute.xlu1 %2540  ;;  %v11319_v7 = vld [vmem:[#allocation78_spill] sm:$0xff]  ;;  %v11320_v44 = vld [vmem:[#allocation85_spill] sm:$0xff] }
 0x2df   : > { %v2317_v9 = vadd.f32 %v2313_v0, %v2218_v54  ;;  %v2277_v34 = vadd.f32 %v2273_v38, %v2178_v8  ;;  %v2298_v29 = vadd.f32 %v2294_v24, %v2199_v43  ;;  %v2373_v59 = vmul.f32 %v11317_v10, %v2355_v47  ;;  %v11326_v0 = vld [vmem:[#allocation7_spill] sm:$0xff]  ;;  %v11327_v24 = vld [vmem:[#allocation80_spill] sm:$0xff] }
 0x2e0   : > { %v2319_v40 = vadd.f32 %v2315_v20, %v2220_v2  ;;  %v2394_v61 = vmul.f32 %v11318_v30, %v2355_v47  ;;  %v2415_v18 = vmul.f32 %v7942_v22, %v2355_v47  ;;  %v2357_v45 = vsel %vm243_vm5, %v8066_v37, %v8089_v52  ;;  %v2543_v8 = vpop.permute.xlu0 %2542  ;;  %v11322_v52 = vld [vmem:[#allocation77_spill] sm:$0xff] }
 0x2e1   : > { %v2372_v56 = vmul.f32 %v7956_v12, %v2356_v5  ;;  %v2393_v11 = vmul.f32 %v11319_v7, %v2356_v5  ;;  %v2451_v3 = vsel %vm234_vm2, %v11320_v44, %v8146_v62  ;;  %v2454_v54 = vsel %vm237_vm3, %v2452_v28, %v8183_v60  ;;  %v11324_v60 = vld [vmem:[#allocation22_spill] sm:$0xff] }
 0x2e2   : > { %v2375_v43 = vadd.f32 %v2371_v41, %v2274_v35  ;;  %v2396_v17 = vadd.f32 %v2392_v16, %v2295_v27  ;;  %v2417_v22 = vadd.f32 %v2413_v6, %v2316_v36  ;;  %v2453_v14 = vsel %vm237_vm3, %v2451_v3, %v11321_v25  ;;  %v2547_v51 = vpop.permute.xlu1 %2546 }
 0x2e3   : > { %v2377_v37 = vadd.f32 %v2373_v59, %v2276_v39  ;;  %v2414_v21 = vmul.f32 %v11322_v52, %v2356_v5  ;;  %v2374_v42 = vmul.f32 %v7956_v12, %v2357_v45  ;;  %v2455_v63 = vsel %vm240_vm4, %v2453_v14, %v11323_v33  ;;  %v11325_v12 = vld [vmem:[#allocation79_spill] sm:$0xff] }
 0x2e4   : > { %v2398_v13 = vadd.f32 %v2394_v61, %v2297_v1  ;;  %v2419_v62 = vadd.f32 %v2415_v18, %v2318_v50  ;;  %v2395_v48 = vmul.f32 %v11319_v7, %v2357_v45  ;;  %v2456_v58 = vsel %vm240_vm4, %v2454_v54, %v11324_v60  ;;  %v2549_v36 = vpop.permute.xlu0 %2548  ;;  %v11328_v1 = vld [vmem:[#allocation96_spill] sm:$0xff]  ;;  %v11329_v5 = vld [vmem:[#allocation11_spill] sm:$0xff]  ;;  %v11331_v7 = vld [vmem:[#allocation13_spill] sm:$0xff] }
 0x2e5   : > { %v2376_v2 = vadd.f32 %v2372_v56, %v2275_v49  ;;  %v2397_v35 = vadd.f32 %v2393_v11, %v2296_v23  ;;  %v2416_v27 = vmul.f32 %v11322_v52, %v2357_v45  ;;  %v2553_v32 = vsel %vm234_vm2, %v8241_v53, %v2531_v26  ;;  %v11333_v14 = vld [vmem:[#allocation15_spill] sm:$0xff] }
 0x2e6   : > { %v2472_v19 = vmul.f32 %v11325_v12, %v2455_v63  ;;  %v2493_v38 = vmul.f32 %v11326_v0, %v2455_v63  ;;  %v2514_v39 = vmul.f32 %v11327_v24, %v2455_v63  ;;  %v2457_v20 = vsel %vm243_vm5, %v11323_v33, %v11328_v1  ;;  %v2624_v30 = vpop.permute.xlu1 %2623 }
 0x2e7   : > { %v2418_v47 = vadd.f32 %v2414_v21, %v2317_v9  ;;  %v2378_v50 = vadd.f32 %v2374_v42, %v2277_v34  ;;  %v2474_v49 = vmul.f32 %v11325_v12, %v2456_v58  ;;  %v2495_v23 = vmul.f32 %v11326_v0, %v2456_v58  ;;  %v11334_v21 = vld [vmem:[#allocation84_spill] sm:$0xff]  ;;  %v11336_v12 = vld [vmem:[#allocation86_spill] sm:$0xff] }
 0x2e8   : > { %v2516_v10 = vmul.f32 %v11327_v24, %v2456_v58  ;;  %v2458_v53 = vsel %vm243_vm5, %v11324_v60, %v8228_v15  ;;  %v2552_v26 = vsel %vm234_vm2, %v8238_v31, %v8261_v4  ;;  %v2555_v41 = vsel %vm237_vm3, %v2553_v32, %v2537_v55  ;;  %v2626_v34 = vpop.permute.xlu0 %2625  ;;  %v11330_v15 = vld [vmem:[#allocation81_spill] sm:$0xff]  ;;  %v11337_v0 = vld [vmem:[#allocation88_spill] sm:$0xff] }
 0x2e9   : > { %v2399_v16 = vadd.f32 %v2395_v48, %v2298_v29  ;;  %v2420_v6 = vadd.f32 %v2416_v27, %v2319_v40  ;;  %v2473_v28 = vmul.f32 %v11329_v5, %v2457_v20  ;;  %v2554_v9 = vsel %vm237_vm3, %v2552_v26, %v2535_v46 }
 0x2ea   : > { %v2476_v59 = vadd.f32 %v2472_v19, %v2375_v43  ;;  %v2497_v61 = vadd.f32 %v2493_v38, %v2396_v17  ;;  %v2518_v18 = vadd.f32 %v2514_v39, %v2417_v22  ;;  %v2556_v45 = vsel %vm240_vm4, %v2554_v9, %v2541_v57  ;;  %v2630_v46 = vpop.permute.xlu1 %2629  ;;  %v11332_v43 = vld [vmem:[#allocation14_spill] sm:$0xff] }
 0x2eb   : > { %v2494_v56 = vmul.f32 %v11330_v15, %v2457_v20  ;;  %v2515_v11 = vmul.f32 %v11331_v7, %v2457_v20  ;;  %v2475_v31 = vmul.f32 %v11329_v5, %v2458_v53  ;;  %v2557_v4 = vsel %vm240_vm4, %v2555_v41, %v2543_v8 }
 0x2ec   : > { %v2478_v55 = vadd.f32 %v2474_v49, %v2377_v37  ;;  %v2499_v29 = vadd.f32 %v2495_v23, %v2398_v13  ;;  %v2520_v40 = vadd.f32 %v2516_v10, %v2419_v62  ;;  %v2496_v44 = vmul.f32 %v11330_v15, %v2458_v53  ;;  %v2632_v25 = vpop.permute.xlu0 %2631 }
 0x2ed   : > { %v2477_v3 = vadd.f32 %v2473_v28, %v2376_v2  ;;  %v2517_v54 = vmul.f32 %v11331_v7, %v2458_v53  ;;  %v2573_v17 = vmul.f32 %v11332_v43, %v2556_v45  ;;  %v2558_v22 = vsel %vm243_vm5, %v2541_v57, %v2547_v51  ;;  %v11335_v2 = vld [vmem:[#allocation82_spill] sm:$0xff] }
 0x2ee   : > { %v2594_v52 = vmul.f32 %v11333_v14, %v2556_v45  ;;  %v2615_v42 = vmul.f32 %v11334_v21, %v2556_v45  ;;  %v2575_v33 = vmul.f32 %v11332_v43, %v2557_v4  ;;  %v2559_v37 = vsel %vm243_vm5, %v2543_v8, %v2549_v36  ;;  %v2636_v51 = vpop.permute.xlu1 %2635 }
 0x2ef   : > { %v2498_v63 = vadd.f32 %v2494_v56, %v2397_v35  ;;  %v2519_v13 = vadd.f32 %v2515_v11, %v2418_v47  ;;  %v2479_v62 = vadd.f32 %v2475_v31, %v2378_v50  ;;  %v2596_v48 = vmul.f32 %v11333_v14, %v2557_v4 }
 0x2f0   : > { %v2500_v60 = vadd.f32 %v2496_v44, %v2399_v16  ;;  %v2617_v58 = vmul.f32 %v11334_v21, %v2557_v4  ;;  %v2574_v27 = vmul.f32 %v11335_v2, %v2558_v22  ;;  %v2654_v57 = vsel %vm234_vm2, %v2626_v34, %v2632_v25  ;;  %v2638_v35 = vpop.permute.xlu0 %2637  ;;  %v11338_v34 = vld [vmem:[#allocation83_spill] sm:$0xff] }
 0x2f1   : > { %v2521_v32 = vadd.f32 %v2517_v54, %v2420_v6  ;;  %v2595_v19 = vmul.f32 %v11336_v12, %v2558_v22  ;;  %v2616_v38 = vmul.f32 %v11337_v0, %v2558_v22  ;;  %v2576_v8 = vmul.f32 %v11335_v2, %v2559_v37 }
 0x2f2   : > { %v2577_v36 = vadd.f32 %v2573_v17, %v2476_v59  ;;  %v2598_v24 = vadd.f32 %v2594_v52, %v2497_v61  ;;  %v2619_v39 = vadd.f32 %v2615_v42, %v2518_v18  ;;  %v2579_v1 = vadd.f32 %v2575_v33, %v2478_v55  ;;  %v2642_v41 = vpop.permute.xlu1 %2641  ;;  %v11339_v61 = vld [vmem:[#allocation87_spill] sm:$0xff]  ;;  %v11341_v52 = vld [vmem:[#allocation89_spill] sm:$0xff] }
 0x2f3   : > { %v2600_v20 = vadd.f32 %v2596_v48, %v2499_v29  ;;  %v2597_v47 = vmul.f32 %v11336_v12, %v2559_v37  ;;  %v2653_v50 = vsel %vm234_vm2, %v2624_v30, %v2630_v46  ;;  %v2656_v49 = vsel %vm237_vm3, %v2654_v57, %v2638_v35  ;;  %v11340_v30 = vld [vmem:[#allocation111_spill] sm:$0xff] }
 0x2f4   : > { %v2621_v23 = vadd.f32 %v2617_v58, %v2520_v40  ;;  %v2578_v10 = vadd.f32 %v2574_v27, %v2477_v3  ;;  %v2618_v53 = vmul.f32 %v11337_v0, %v2559_v37  ;;  %v2655_v26 = vsel %vm237_vm3, %v2653_v50, %v2636_v51  ;;  %v2644_v9 = vpop.permute.xlu0 %2643  ;;  %v11343_v48 = vld [vmem:[#allocation91_spill] sm:$0xff] }
 0x2f5   : > { %v2599_v16 = vadd.f32 %v2595_v19, %v2498_v63  ;;  %v2620_v6 = vadd.f32 %v2616_v38, %v2519_v13  ;;  %v2580_v5 = vadd.f32 %v2576_v8, %v2479_v62  ;;  %v2657_v28 = vsel %vm240_vm4, %v2655_v26, %v2642_v41  ;;  %v11342_v63 = vld [vmem:[#allocation90_spill] sm:$0xff] }
 0x2f6   : > { %v2674_v59 = vmul.f32 %v11338_v34, %v2657_v28  ;;  %v2695_v18 = vmul.f32 %v11339_v61, %v2657_v28  ;;  %v2716_v45 = vmul.f32 %v11340_v30, %v2657_v28  ;;  %v2658_v15 = vsel %vm240_vm4, %v2656_v49, %v2644_v9  ;;  %v2648_v44 = vpop.permute.xlu1 %2647 }
 0x2f7   : > { %v2601_v56 = vadd.f32 %v2597_v47, %v2500_v60  ;;  %v2676_v7 = vmul.f32 %v11338_v34, %v2658_v15  ;;  %v2697_v11 = vmul.f32 %v11339_v61, %v2658_v15  ;;  %v2718_v31 = vmul.f32 %v11340_v30, %v2658_v15 }
 0x2f8   : > { %v2622_v4 = vadd.f32 %v2618_v53, %v2521_v32  ;;  %v2678_v55 = vadd.f32 %v2674_v59, %v2577_v36  ;;  %v2699_v29 = vadd.f32 %v2695_v18, %v2598_v24  ;;  %v2720_v40 = vadd.f32 %v2716_v45, %v2619_v39  ;;  %v2650_v17 = vpop.permute.xlu0 %2649 }
 0x2f9   : > { %v2680_v46 = vadd.f32 %v2676_v7, %v2579_v1  ;;  %v2701_v3 = vadd.f32 %v2697_v11, %v2600_v20  ;;  %v2722_v54 = vadd.f32 %v2718_v31, %v2621_v23  ;;  %v2659_v43 = vsel %vm243_vm5, %v2642_v41, %v2648_v44 }
 0x2fa   : > { %v5557_v22 = vmul.f32 -1.442695, %v2678_v55  ;;  %v5561_v25 = vmul.f32 -1.442695, %v2699_v29  ;;  %v5569_v14 = vmul.f32 -1.442695, %v2720_v40  ;;  %v2675_v21 = vmul.f32 %v11341_v52, %v2659_v43  ;;  %v2816_v2 = vpop.permute.xlu1 %2815 }
 0x2fb   : > { %v5559_v42 = vmul.f32 -1.442695, %v2680_v46  ;;  %v5563_v33 = vmul.f32 -1.442695, %v2701_v3  ;;  %v5571_v37 = vmul.f32 -1.442695, %v2722_v54  ;;  %v2696_v13 = vmul.f32 %v11342_v63, %v2659_v43 }
 0x2fc   : > { %5726 = vpow2.f32 %v5557_v22  ;;  %v2679_v62 = vadd.f32 %v2675_v21, %v2578_v10  ;;  %v2717_v60 = vmul.f32 %v11343_v48, %v2659_v43  ;;  %v2660_v58 = vsel %vm243_vm5, %v2644_v9, %v2650_v17  ;;  %2818 = vst.msk [vmem:[#allocation2 + $0x4] sm:$0xff] %vm198_vm1, %v2816_v2 }
 0x2fd   : > { %5728 = vpow2.f32 %v5561_v25  ;;  %v2700_v27 = vadd.f32 %v2696_v13, %v2599_v16  ;;  %v2677_v57 = vmul.f32 %v11341_v52, %v2660_v58  ;;  %v2698_v51 = vmul.f32 %v11342_v63, %v2660_v58 }
 0x2fe   : > { %5730 = vpow2.f32 %v5569_v14  ;;  %v2721_v32 = vadd.f32 %v2717_v60, %v2620_v6  ;;  %v5558_v12 = vmul.f32 -1.442695, %v2679_v62  ;;  %v2719_v19 = vmul.f32 %v11343_v48, %v2660_v58 }
 0x2ff   : > { %5732 = vpow2.f32 %v5559_v42  ;;  %v5562_v0 = vmul.f32 -1.442695, %v2700_v27  ;;  %v2681_v38 = vadd.f32 %v2677_v57, %v2580_v5  ;;  %v2702_v8 = vadd.f32 %v2698_v51, %v2601_v56 }
 0x300   : > { %5734 = vpow2.f32 %v5563_v33  ;;  %v5570_v35 = vmul.f32 -1.442695, %v2721_v32  ;;  %v2723_v36 = vadd.f32 %v2719_v19, %v2622_v4 }
 0x301   : > { %5736 = vpow2.f32 %v5571_v37  ;;  %v5560_v24 = vmul.f32 -1.442695, %v2681_v38  ;;  %v5564_v39 = vmul.f32 -1.442695, %v2702_v8 }
 0x302   : > { %5738 = vpow2.f32 %v5558_v12  ;;  %v5572_v1 = vmul.f32 -1.442695, %v2723_v36 }
 0x303   : > { %5740 = vpow2.f32 %v5562_v0  ;;  %v8371_v20 = vld [vmem:[#allocation2] sm:$0xff]  ;;  %v8373_v47 = vld [vmem:[#allocation2 + $0x8] sm:$0xf] }
 0x304   : > { %5742 = vpow2.f32 %v5570_v35  ;;  %2831 = vrot.lane.b32.xlu1 %v8373_v47, %s10736_s27  ;;  %2829 = vrot.lane.b32.xlu0 %v8371_v20, %s10736_s27  ;;  %v8495_v52 = vld [vmem:[#allocation2 + $0x1] sm:$0xff]  ;;  %v8497_v21 = vld [vmem:[#allocation2 + $0x9] sm:$0xf] }
 0x305   : > { %5744 = vpow2.f32 %v5560_v24  ;;  %11349 = vst [vmem:[#allocation95_spill] sm:$0xff] %v8495_v52  ;;  %11350 = vst [vmem:[#allocation93_spill] sm:$0xff] %v8497_v21 }
 0x306   : > { %5746 = vpow2.f32 %v5564_v39 }
 0x307   : > { %5748 = vpow2.f32 %v5572_v1 }
 0x308   : > { %2837 = vrot.lane.b32.xlu1 %v8373_v47, %s10734_s28  ;;  %2835 = vrot.lane.b32.xlu0 %v8371_v20, %s10734_s28 }
 0x309   : > { %v5727_v50 = vpop.eup %5726 }
 0x30a   : > { %v5729_v49 = vpop.eup %5728  ;;  %v2736_v23 = vadd.f32 1.0, %v5727_v50 }
 0x30b   : > { %v5731_v10 = vpop.eup %5730  ;;  %v2766_v53 = vadd.f32 1.0, %v5729_v49 }
 0x30c   : > { %v5733_v26 = vpop.eup %5732  ;;  %5750 = vrcp.f32 %v2736_v23  ;;  %v2795_v41 = vadd.f32 1.0, %v5731_v10  ;;  %2843 = vrot.lane.b32.xlu1 %v8373_v47, %s10732_s29  ;;  %2841 = vrot.lane.b32.xlu0 %v8371_v20, %s10732_s29 }
 0x30d   : > { %v5735_v16 = vpop.eup %5734  ;;  %5752 = vrcp.f32 %v2766_v53  ;;  %v2738_v6 = vadd.f32 1.0, %v5733_v26 }
 0x30e   : > { %v5737_v5 = vpop.eup %5736  ;;  %5754 = vrcp.f32 %v2795_v41  ;;  %v2768_v28 = vadd.f32 1.0, %v5735_v16 }
 0x30f   : > { %v5739_v9 = vpop.eup %5738  ;;  %5756 = vrcp.f32 %v2738_v6  ;;  %v2797_v34 = vadd.f32 1.0, %v5737_v5 }
 0x310   : > { %v5741_v59 = vpop.eup %5740  ;;  %5758 = vrcp.f32 %v2768_v28  ;;  %v2737_v61 = vadd.f32 1.0, %v5739_v9  ;;  %2849 = vrot.lane.b32.xlu1 %v8373_v47, %s10730_s30  ;;  %2847 = vrot.lane.b32.xlu0 %v8371_v20, %s10730_s30 }
 0x311   : > { %v5743_v18 = vpop.eup %5742  ;;  %5760 = vrcp.f32 %v2797_v34  ;;  %v2767_v30 = vadd.f32 1.0, %v5741_v59 }
 0x312   : > { %v5745_v45 = vpop.eup %5744  ;;  %5762 = vrcp.f32 %v2737_v61  ;;  %v2796_v15 = vadd.f32 1.0, %v5743_v18 }
 0x313   : > { %v5747_v56 = vpop.eup %5746  ;;  %5764 = vrcp.f32 %v2767_v30  ;;  %v2739_v7 = vadd.f32 1.0, %v5745_v45  ;;  %v8675_v30 = vld [vmem:[#allocation2 + $0xa] sm:$0xf]  ;;  %v8677_v45 = vld [vmem:[#allocation2 + $0x2] sm:$0xff] }
 0x314   : > { %v5749_v11 = vpop.eup %5748  ;;  %5766 = vrcp.f32 %v2796_v15  ;;  %v2769_v31 = vadd.f32 1.0, %v5747_v56  ;;  %2923 = vrot.lane.b32.xlu1 %v8373_v47, %s10724_s4  ;;  %2921 = vrot.lane.b32.xlu0 %v8371_v20, %s10724_s4 }
 0x315   : > { %5768 = vrcp.f32 %v2739_v7  ;;  %v2798_v4 = vadd.f32 1.0, %v5749_v11 }
 0x316   : > { %5770 = vrcp.f32 %v2769_v31 }
 0x317   : > { %5772 = vrcp.f32 %v2798_v4 }
 0x318   : > { %2929 = vrot.lane.b32.xlu1 %v8373_v47, %s11345_s21  ;;  %2927 = vrot.lane.b32.xlu0 %v8371_v20, %s11345_s21 }
 0x319   : > { %v5751_v55 = vpop.eup %5750 }
 0x31a   : > { %v5753_v29 = vpop.eup %5752  ;;  %2748 = vst [vmem:[%s8399_s20] sm:$0xff] %v5751_v55 }
 0x31b   : > { %v5755_v40 = vpop.eup %5754  ;;  %5565 = vst [vmem:[%s8399_s20 + $0x20] sm:$0xff] %v5753_v29 }
 0x31c   : > { %v5757_v44 = vpop.eup %5756  ;;  %5573 = vst [vmem:[%s8399_s20 + $0x40] sm:$0xff] %v5755_v40  ;;  %2935 = vrot.lane.b32.xlu1 %v8373_v47, %s11346_s22  ;;  %2933 = vrot.lane.b32.xlu0 %v8371_v20, %s11346_s22 }
 0x31d   : > { %v5759_v46 = vpop.eup %5758  ;;  %2751 = vst [vmem:[%s8399_s20 + $0x10] sm:$0xf] %v5757_v44 }
 0x31e   : > { %v5761_v3 = vpop.eup %5760  ;;  %5567 = vst [vmem:[%s8399_s20 + $0x30] sm:$0xf] %v5759_v46 }
 0x31f   : > { %v5763_v54 = vpop.eup %5762  ;;  %5575 = vst [vmem:[%s8399_s20 + $0x50] sm:$0xf] %v5761_v3 }
 0x320   : > { %v5765_v43 = vpop.eup %5764  ;;  %2750 = vst.msk [vmem:[%s8399_s20 + $0x8] sm:$0xff] %vm2749_vm6, %v5763_v54  ;;  %2941 = vrot.lane.b32.xlu1 %v8373_v47, %s11018_s9  ;;  %2939 = vrot.lane.b32.xlu0 %v8371_v20, %s11018_s9 }
 0x321   : > { %v5767_v17 = vpop.eup %5766  ;;  %5566 = vst.msk [vmem:[%s8399_s20 + $0x28] sm:$0xff] %vm2749_vm6, %v5765_v43 }
 0x322   : > { %v5769_v22 = vpop.eup %5768  ;;  %5574 = vst.msk [vmem:[%s8399_s20 + $0x48] sm:$0xff] %vm2749_vm6, %v5767_v17 }
 0x323   : > { %v5771_v25 = vpop.eup %5770  ;;  %2753 = vst.msk [vmem:[%s8399_s20 + $0x18] sm:$0xf] %vm2752_vm7, %v5769_v22 }
 0x324   : > { %v5773_v14 = vpop.eup %5772  ;;  %5568 = vst.msk [vmem:[%s8399_s20 + $0x38] sm:$0xf] %vm2752_vm7, %v5771_v25  ;;  %2947 = vrot.lane.b32.xlu1 %v8373_v47, %s11027_s10  ;;  %2945 = vrot.lane.b32.xlu0 %v8371_v20, %s11027_s10 }
 0x325   : > { %5576 = vst.msk [vmem:[%s8399_s20 + $0x58] sm:$0xf] %vm2752_vm7, %v5773_v14 }
 0x328   : > { %3021 = vrot.lane.b32.xlu1 %v8373_v47, %s11036_s13  ;;  %3019 = vrot.lane.b32.xlu0 %v8371_v20, %s11036_s13 }
 0x32c   : > { %3027 = vrot.lane.b32.xlu1 %v8373_v47, %s11045_s16  ;;  %3025 = vrot.lane.b32.xlu0 %v8371_v20, %s11045_s16 }
 0x330   : > { %3033 = vrot.lane.b32.xlu1 %v8373_v47, %s11060_s17  ;;  %3031 = vrot.lane.b32.xlu0 %v8371_v20, %s11060_s17 }
 0x334   : > { %3039 = vrot.lane.b32.xlu1 %v8373_v47, %s11070_s7  ;;  %3037 = vrot.lane.b32.xlu0 %v8371_v20, %s11070_s7 }
 0x338   : > { %3045 = vrot.lane.b32.xlu1 %v8373_v47, %s11077_s11  ;;  %3043 = vrot.lane.b32.xlu0 %v8371_v20, %s11077_s11 }
 0x33c   : > { %3119 = vrot.lane.b32.xlu1 %v8373_v47, %s11086_s8  ;;  %3117 = vrot.lane.b32.xlu0 %v8371_v20, %s11086_s8 }
 0x340   : > { %3125 = vrot.lane.b32.xlu1 %v8373_v47, %s11093_s5  ;;  %3123 = vrot.lane.b32.xlu0 %v8371_v20, %s11093_s5 }
 0x344   : > { %3131 = vrot.lane.b32.xlu1 %v8373_v47, %s11100_s15  ;;  %3129 = vrot.lane.b32.xlu0 %v8371_v20, %s11100_s15 }
 0x348   : > { %3137 = vrot.lane.b32.xlu1 %v8373_v47, %s10726_s18  ;;  %3135 = vrot.lane.b32.xlu0 %v8371_v20, %s10726_s18 }
 0x34c   : > { %3143 = vrot.lane.b32.xlu1 %v8373_v47, %s10728_s19  ;;  %3141 = vrot.lane.b32.xlu0 %v8371_v20, %s10728_s19 }
 0x350   : > { %3217 = vrot.lane.b32.xlu1 %v8373_v47, %s11347_s6  ;;  %3215 = vrot.lane.b32.xlu0 %v8371_v20, %s11347_s6 }
 0x354   : > { %3223 = vrot.lane.b32.xlu1 %v8373_v47, %s11348_s14  ;;  %3221 = vrot.lane.b32.xlu0 %v8371_v20, %s11348_s14 }
 0x358   : > { %3229 = vrot.lane.b32.xlu1 %v8373_v47, %s10743_s23  ;;  %3227 = vrot.lane.b32.xlu0 %v8371_v20, %s10743_s23 }
 0x35c   : > { %3235 = vrot.lane.b32.xlu1 %v8373_v47, %s10741_s24  ;;  %3233 = vrot.lane.b32.xlu0 %v8371_v20, %s10741_s24 }
 0x360   : > { %3241 = vrot.lane.b32.xlu1 %v8373_v47, %s10738_s26  ;;  %3239 = vrot.lane.b32.xlu0 %v8371_v20, %s10738_s26 }
 0x364   : > { %3319 = vrot.lane.b32.xlu1 %v8497_v21, %s10736_s27  ;;  %3317 = vrot.lane.b32.xlu0 %v8495_v52, %s10736_s27 }
 0x368   : > { %3325 = vrot.lane.b32.xlu1 %v8497_v21, %s10734_s28  ;;  %3323 = vrot.lane.b32.xlu0 %v8495_v52, %s10734_s28 }
 0x36c   : > { %3331 = vrot.lane.b32.xlu1 %v8497_v21, %s10732_s29  ;;  %3329 = vrot.lane.b32.xlu0 %v8495_v52, %s10732_s29 }
 0x370   : > { %3337 = vrot.lane.b32.xlu1 %v8497_v21, %s10730_s30  ;;  %3335 = vrot.lane.b32.xlu0 %v8495_v52, %s10730_s30 }
 0x374   : > { %3411 = vrot.lane.b32.xlu1 %v8497_v21, %s10724_s4  ;;  %3409 = vrot.lane.b32.xlu0 %v8495_v52, %s10724_s4 }
 0x376   : > { %v8519_v42 = vpop.permute.xlu1 %2831  ;;  %v8521_v33 = vpop.permute.xlu0 %2829 }
 0x378   : > { %3417 = vrot.lane.b32.xlu1 %v8497_v21, %s11345_s21  ;;  %3415 = vrot.lane.b32.xlu0 %v8495_v52, %s11345_s21 }
 0x37a   : > { %v8527_v37 = vpop.permute.xlu1 %2837  ;;  %v8529_v63 = vpop.permute.xlu0 %2835 }
 0x37c   : > { %3423 = vrot.lane.b32.xlu1 %v8497_v21, %s11346_s22  ;;  %3421 = vrot.lane.b32.xlu0 %v8495_v52, %s11346_s22 }
 0x37e   : > { %v8535_v13 = vpop.permute.xlu1 %2843  ;;  %v8537_v62 = vpop.permute.xlu0 %2841 }
 0x380   : > { %3429 = vrot.lane.b32.xlu1 %v8497_v21, %s11018_s9  ;;  %3427 = vrot.lane.b32.xlu0 %v8495_v52, %s11018_s9 }
 0x382   : > { %v8543_v48 = vpop.permute.xlu1 %2849  ;;  %v8545_v60 = vpop.permute.xlu0 %2847 }
 0x384   : > { %3435 = vrot.lane.b32.xlu1 %v8497_v21, %s11027_s10  ;;  %3433 = vrot.lane.b32.xlu0 %v8495_v52, %s11027_s10 }
 0x386   : > { %v8551_v58 = vpop.permute.xlu1 %2923  ;;  %v8553_v2 = vpop.permute.xlu0 %2921 }
 0x388   : > { %3509 = vrot.lane.b32.xlu1 %v8497_v21, %s11036_s13  ;;  %3507 = vrot.lane.b32.xlu0 %v8495_v52, %s11036_s13 }
 0x38a   : > { %v8559_v27 = vpop.permute.xlu1 %2929  ;;  %v8561_v57 = vpop.permute.xlu0 %2927 }
 0x38c   : > { %3515 = vrot.lane.b32.xlu1 %v8497_v21, %s11045_s16  ;;  %3513 = vrot.lane.b32.xlu0 %v8495_v52, %s11045_s16 }
 0x38e   : > { %v8567_v51 = vpop.permute.xlu1 %2935  ;;  %v8569_v32 = vpop.permute.xlu0 %2933 }
 0x390   : > { %3521 = vrot.lane.b32.xlu1 %v8497_v21, %s11060_s17  ;;  %3519 = vrot.lane.b32.xlu0 %v8495_v52, %s11060_s17 }
 0x392   : > { %v8575_v12 = vpop.permute.xlu1 %2941  ;;  %v8577_v19 = vpop.permute.xlu0 %2939 }
 0x394   : > { %3527 = vrot.lane.b32.xlu1 %v8497_v21, %s11070_s7  ;;  %3525 = vrot.lane.b32.xlu0 %v8495_v52, %s11070_s7 }
 0x396   : > { %v8583_v0 = vpop.permute.xlu1 %2947  ;;  %v8585_v38 = vpop.permute.xlu0 %2945 }
 0x398   : > { %3533 = vrot.lane.b32.xlu1 %v8497_v21, %s11077_s11  ;;  %3531 = vrot.lane.b32.xlu0 %v8495_v52, %s11077_s11 }
 0x39a   : > { %v8591_v8 = vpop.permute.xlu1 %3021  ;;  %v8593_v35 = vpop.permute.xlu0 %3019 }
 0x39c   : > { %3607 = vrot.lane.b32.xlu1 %v8497_v21, %s11086_s8  ;;  %3605 = vrot.lane.b32.xlu0 %v8495_v52, %s11086_s8 }
 0x39e   : > { %v8599_v36 = vpop.permute.xlu1 %3027  ;;  %v8601_v24 = vpop.permute.xlu0 %3025 }
 0x3a0   : > { %3613 = vrot.lane.b32.xlu1 %v8497_v21, %s11093_s5  ;;  %3611 = vrot.lane.b32.xlu0 %v8495_v52, %s11093_s5 }
 0x3a2   : > { %v8607_v39 = vpop.permute.xlu1 %3033  ;;  %v8609_v1 = vpop.permute.xlu0 %3031 }
 0x3a4   : > { %3619 = vrot.lane.b32.xlu1 %v8497_v21, %s11100_s15  ;;  %3617 = vrot.lane.b32.xlu0 %v8495_v52, %s11100_s15 }
 0x3a6   : > { %v8615_v50 = vpop.permute.xlu1 %3039  ;;  %v8617_v49 = vpop.permute.xlu0 %3037 }
 0x3a8   : > { %3625 = vrot.lane.b32.xlu1 %v8497_v21, %s10726_s18  ;;  %3623 = vrot.lane.b32.xlu0 %v8495_v52, %s10726_s18 }
 0x3aa   : > { %v8623_v23 = vpop.permute.xlu1 %3045  ;;  %v8625_v10 = vpop.permute.xlu0 %3043 }
 0x3ac   : > { %3631 = vrot.lane.b32.xlu1 %v8497_v21, %s10728_s19  ;;  %3629 = vrot.lane.b32.xlu0 %v8495_v52, %s10728_s19 }
 0x3ae   : > { %v8631_v53 = vpop.permute.xlu1 %3119  ;;  %v8633_v26 = vpop.permute.xlu0 %3117 }
 0x3af   : > { %11351 = vst [vmem:[#allocation100_spill] sm:$0xff] %v8631_v53  ;;  %11352 = vst [vmem:[#allocation97_spill] sm:$0xff] %v8633_v26  ;;  %v5591_v26 = vld [vmem:[%s10567_s1 + $0x4] ss:$8 sm:$0x3] }
 0x3b0   : > { %3705 = vrot.lane.b32.xlu1 %v8497_v21, %s11347_s6  ;;  %3703 = vrot.lane.b32.xlu0 %v8495_v52, %s11347_s6  ;;  %v5592_v53 = vld [vmem:[%s10567_s1 + $0x44] ss:$8 sm:$0x3] }
 0x3b2   : > { %v8639_v41 = vpop.permute.xlu1 %3125  ;;  %v8641_v16 = vpop.permute.xlu0 %3123 }
 0x3b3   : > { %11353 = vst [vmem:[#allocation101_spill] sm:$0xff] %v8639_v41  ;;  %11354 = vst [vmem:[#allocation23_spill] sm:$0xff] %v8641_v16  ;;  %v5593_v41 = vld [vmem:[%s10567_s1 + $0x84] ss:$8 sm:$0x3] }
 0x3b4   : > { %3711 = vrot.lane.b32.xlu1 %v8497_v21, %s11348_s14  ;;  %3709 = vrot.lane.b32.xlu0 %v8495_v52, %s11348_s14 }
 0x3b6   : > { %v8647_v6 = vpop.permute.xlu1 %3131  ;;  %v8649_v5 = vpop.permute.xlu0 %3129 }
 0x3b7   : > { %11355 = vst [vmem:[#allocation115_spill] sm:$0xff] %v8647_v6  ;;  %11356 = vst [vmem:[#allocation116_spill] sm:$0xff] %v8649_v5 }
 0x3b8   : > { %3717 = vrot.lane.b32.xlu1 %v8497_v21, %s10743_s23  ;;  %3715 = vrot.lane.b32.xlu0 %v8495_v52, %s10743_s23 }
 0x3ba   : > { %v8655_v28 = vpop.permute.xlu1 %3137  ;;  %v8657_v9 = vpop.permute.xlu0 %3135 }
 0x3bb   : > { %11357 = vst [vmem:[#allocation102_spill] sm:$0xff] %v8655_v28  ;;  %11358 = vst [vmem:[#allocation103_spill] sm:$0xff] %v8657_v9 }
 0x3bc   : > { %3723 = vrot.lane.b32.xlu1 %v8497_v21, %s10741_s24  ;;  %3721 = vrot.lane.b32.xlu0 %v8495_v52, %s10741_s24 }
 0x3be   : > { %v8663_v34 = vpop.permute.xlu1 %3143  ;;  %v8665_v59 = vpop.permute.xlu0 %3141 }
 0x3bf   : > { %11359 = vst [vmem:[#allocation24_spill] sm:$0xff] %v8663_v34  ;;  %11360 = vst [vmem:[#allocation118_spill] sm:$0xff] %v8665_v59  ;;  %v5589_v34 = vld [vmem:[%s10567_s1 + $0x43] ss:$8 sm:$0x3] }
 0x3c0   : > { %3729 = vrot.lane.b32.xlu1 %v8497_v21, %s10738_s26  ;;  %3727 = vrot.lane.b32.xlu0 %v8495_v52, %s10738_s26  ;;  %v5583_v52 = vld [vmem:[%s10567_s1 + $0x41] ss:$8 sm:$0x3]  ;;  %s11405_s26 = smov 68  }
 0x3c2   : > { %v8671_v61 = vpop.permute.xlu1 %3217  ;;  %v8673_v18 = vpop.permute.xlu0 %3215 }
 0x3c3   : > { %11361 = vst [vmem:[#allocation26_spill] sm:$0xff] %v8671_v61  ;;  %11362 = vst [vmem:[#allocation123_spill] sm:$0xff] %v8673_v18  ;;  %v5588_v61 = vld [vmem:[%s10567_s1 + $0x3] ss:$8 sm:$0x3] }
 0x3c4   : > { %3807 = vrot.lane.b32.xlu1 %v8675_v30, %s10736_s27  ;;  %3805 = vrot.lane.b32.xlu0 %v8677_v45, %s10736_s27 }
 0x3c6   : > { %v8683_v15 = vpop.permute.xlu1 %3223  ;;  %v8685_v56 = vpop.permute.xlu0 %3221 }
 0x3c7   : > { %11363 = vst [vmem:[#allocation110_spill] sm:$0xff] %v8683_v15  ;;  %11364 = vst [vmem:[#allocation130_spill] sm:$0xff] %v8685_v56 }
 0x3c8   : > { %3813 = vrot.lane.b32.xlu1 %v8675_v30, %s10734_s28  ;;  %3811 = vrot.lane.b32.xlu0 %v8677_v45, %s10734_s28  ;;  %s11442_s28 = smov 108  }
 0x3ca   : > { %v8691_v7 = vpop.permute.xlu1 %3229  ;;  %v8693_v11 = vpop.permute.xlu0 %3227 }
 0x3cb   : > { %11365 = vst [vmem:[#allocation132_spill] sm:$0xff] %v8691_v7  ;;  %11366 = vst [vmem:[#allocation124_spill] sm:$0xff] %v8693_v11  ;;  %v11407_v11 = vld [vmem:[#allocation99_spill] sm:$0xff]  ;;  %v5587_v7 = vld [vmem:[%s10567_s1 + $0x82] ss:$8 sm:$0x3] }
 0x3cc   : > { %3819 = vrot.lane.b32.xlu1 %v8675_v30, %s10732_s29  ;;  %3817 = vrot.lane.b32.xlu0 %v8677_v45, %s10732_s29  ;;  %v8928_v28 = vrot.slane %v5583_v52, %v11407_v11  ;;  %v8954_v16 = vrot.slane %v5587_v7, %v11407_v11 }
 0x3ce   : > { %v8699_v31 = vpop.permute.xlu1 %3235  ;;  %v8701_v4 = vpop.permute.xlu0 %3233  ;;  %11414 = vst [vmem:[#allocation32_spill] sm:$0xff] %v8954_v16  ;;  %v8974_v16 = vrot.slane %v5588_v61, %v11407_v11 }
 0x3cf   : > { %11367 = vst [vmem:[#allocation112_spill] sm:$0xff] %v8699_v31  ;;  %11368 = vst [vmem:[#allocation131_spill] sm:$0xff] %v8701_v4 }
 0x3d0   : > { %3825 = vrot.lane.b32.xlu1 %v8675_v30, %s10730_s30  ;;  %3823 = vrot.lane.b32.xlu0 %v8677_v45, %s10730_s30  ;;  %11418 = vst [vmem:[#allocation44_spill] sm:$0xff] %v8974_v16  ;;  %s11439_s30 = smov 72  }
 0x3d2   : > { %v8707_v55 = vpop.permute.xlu1 %3241  ;;  %v8709_v29 = vpop.permute.xlu0 %3239 }
 0x3d3   : > { %11369 = vst [vmem:[#allocation133_spill] sm:$0xff] %v8707_v55  ;;  %11370 = vst [vmem:[#allocation134_spill] sm:$0xff] %v8709_v29  ;;  %v5585_v29 = vld [vmem:[%s10567_s1 + $0x2] ss:$8 sm:$0x3] }
 0x3d4   : > { %3899 = vrot.lane.b32.xlu1 %v8675_v30, %s10724_s4  ;;  %3897 = vrot.lane.b32.xlu0 %v8677_v45, %s10724_s4  ;;  %s5578_s4 = sld [smem:[#allocation3 + $0x1]]  ;;  %v5586_v55 = vld [vmem:[%s10567_s1 + $0x42] ss:$8 sm:$0x3] }
 0x3d6   : > { %v8715_v40 = vpop.permute.xlu1 %3319  ;;  %v8717_v44 = vpop.permute.xlu0 %3317 }
 0x3d7   : > { %11371 = vst [vmem:[#allocation135_spill] sm:$0xff] %v8715_v40  ;;  %11372 = vst [vmem:[#allocation29_spill] sm:$0xff] %v8717_v44  ;;  %v5584_v44 = vld [vmem:[%s10567_s1 + $0x81] ss:$8 sm:$0x3] }
 0x3d8   : > { %3905 = vrot.lane.b32.xlu1 %v8675_v30, %s11345_s21  ;;  %3903 = vrot.lane.b32.xlu0 %v8677_v45, %s11345_s21  ;;  %v8931_v5 = vrot.slane %v5584_v44, %v11407_v11 }
 0x3da   : > { %v8723_v46 = vpop.permute.xlu1 %3325  ;;  %v8725_v3 = vpop.permute.xlu0 %3323 }
 0x3db   : > { %11373 = vst [vmem:[#allocation138_spill] sm:$0xff] %v8723_v46  ;;  %11374 = vst [vmem:[#allocation136_spill] sm:$0xff] %v8725_v3  ;;  %v11406_v46 = vld [vmem:[#allocation98_spill] sm:$0xff] }
 0x3dc   : > { %3911 = vrot.lane.b32.xlu1 %v8675_v30, %s11346_s22  ;;  %3909 = vrot.lane.b32.xlu0 %v8677_v45, %s11346_s22  ;;  %v8934_v6 = vrot.slane %v5585_v29, %v11406_v46 }
 0x3de   : > { %v8731_v54 = vpop.permute.xlu1 %3331  ;;  %v8733_v43 = vpop.permute.xlu0 %3329 }
 0x3df   : > { %11375 = vst [vmem:[#allocation120_spill] sm:$0xff] %v8731_v54  ;;  %11376 = vst [vmem:[#allocation104_spill] sm:$0xff] %v8733_v43  ;;  %v8859_v54 = vstv %s2819_s25  ;;  %s11435_s25 = smov 36  }
 0x3e0   : > { %3917 = vrot.lane.b32.xlu1 %v8675_v30, %s11018_s9  ;;  %3915 = vrot.lane.b32.xlu0 %v8677_v45, %s11018_s9 }
 0x3e2   : > { %v8739_v17 = vpop.permute.xlu1 %3337  ;;  %v8741_v22 = vpop.permute.xlu0 %3335 }
 0x3e3   : > { %11377 = vst [vmem:[#allocation139_spill] sm:$0xff] %v8739_v17  ;;  %11378 = vst [vmem:[#allocation137_spill] sm:$0xff] %v8741_v22 }
 0x3e4   : > { %3923 = vrot.lane.b32.xlu1 %v8675_v30, %s11027_s10  ;;  %3921 = vrot.lane.b32.xlu0 %v8677_v45, %s11027_s10 }
 0x3e6   : > { %v8747_v25 = vpop.permute.xlu1 %3411  ;;  %v8749_v14 = vpop.permute.xlu0 %3409 }
 0x3e7   : > { %11379 = vst [vmem:[#allocation106_spill] sm:$0xff] %v8747_v25  ;;  %11380 = vst [vmem:[#allocation105_spill] sm:$0xff] %v8749_v14 }
 0x3e8   : > { %3997 = vrot.lane.b32.xlu1 %v8675_v30, %s11036_s13  ;;  %3995 = vrot.lane.b32.xlu0 %v8677_v45, %s11036_s13 }
 0x3ea   : > { %v8755_v43 = vpop.permute.xlu1 %3417  ;;  %v8757_v17 = vpop.permute.xlu0 %3415 }
 0x3eb   : > { %11381 = vst [vmem:[#allocation107_spill] sm:$0xff] %v8755_v43  ;;  %11382 = vst [vmem:[#allocation8_spill] sm:$0xff] %v8757_v17 }
 0x3ec   : > { %4003 = vrot.lane.b32.xlu1 %v8675_v30, %s11045_s16  ;;  %4001 = vrot.lane.b32.xlu0 %v8677_v45, %s11045_s16 }
 0x3ee   : > { %v8763_v22 = vpop.permute.xlu1 %3423  ;;  %v8765_v25 = vpop.permute.xlu0 %3421 }
 0x3ef   : > { %11383 = vst [vmem:[#allocation10_spill] sm:$0xff] %v8763_v22  ;;  %11384 = vst [vmem:[#allocation12_spill] sm:$0xff] %v8765_v25 }
 0x3f0   : > { %4009 = vrot.lane.b32.xlu1 %v8675_v30, %s11060_s17  ;;  %4007 = vrot.lane.b32.xlu0 %v8677_v45, %s11060_s17 }
 0x3f2   : > { %v8771_v14 = vpop.permute.xlu1 %3429  ;;  %v8773_v43 = vpop.permute.xlu0 %3427 }
 0x3f3   : > { %11385 = vst [vmem:[#allocation108_spill] sm:$0xff] %v8771_v14  ;;  %11386 = vst [vmem:[#allocation18_spill] sm:$0xff] %v8773_v43 }
 0x3f4   : > { %4015 = vrot.lane.b32.xlu1 %v8675_v30, %s11070_s7  ;;  %4013 = vrot.lane.b32.xlu0 %v8677_v45, %s11070_s7 }
 0x3f6   : > { %v8779_v17 = vpop.permute.xlu1 %3435  ;;  %v8781_v22 = vpop.permute.xlu0 %3433 }
 0x3f7   : > { %11387 = vst [vmem:[#allocation9_spill] sm:$0xff] %v8779_v17  ;;  %11388 = vst [vmem:[#allocation109_spill] sm:$0xff] %v8781_v22 }
 0x3f8   : > { %4021 = vrot.lane.b32.xlu1 %v8675_v30, %s11077_s11  ;;  %4019 = vrot.lane.b32.xlu0 %v8677_v45, %s11077_s11 }
 0x3fa   : > { %v8787_v25 = vpop.permute.xlu1 %3509  ;;  %v8789_v14 = vpop.permute.xlu0 %3507 }
 0x3fb   : > { %11389 = vst [vmem:[#allocation16_spill] sm:$0xff] %v8787_v25  ;;  %11390 = vst [vmem:[#allocation20_spill] sm:$0xff] %v8789_v14 }
 0x3fc   : > { %4095 = vrot.lane.b32.xlu1 %v8675_v30, %s11086_s8  ;;  %4093 = vrot.lane.b32.xlu0 %v8677_v45, %s11086_s8 }
 0x3fe   : > { %v8795_v43 = vpop.permute.xlu1 %3515  ;;  %v8797_v17 = vpop.permute.xlu0 %3513 }
 0x3ff   : > { %11391 = vst [vmem:[#allocation113_spill] sm:$0xff] %v8795_v43  ;;  %11392 = vst [vmem:[#allocation21_spill] sm:$0xff] %v8797_v17 }
 0x400   : > { %4101 = vrot.lane.b32.xlu1 %v8675_v30, %s11093_s5  ;;  %4099 = vrot.lane.b32.xlu0 %v8677_v45, %s11093_s5 }
 0x402   : > { %v8803_v22 = vpop.permute.xlu1 %3521  ;;  %v8805_v25 = vpop.permute.xlu0 %3519 }
 0x403   : > { %11393 = vst [vmem:[#allocation19_spill] sm:$0xff] %v8803_v22  ;;  %11394 = vst [vmem:[#allocation25_spill] sm:$0xff] %v8805_v25 }
 0x404   : > { %4107 = vrot.lane.b32.xlu1 %v8675_v30, %s11100_s15  ;;  %4105 = vrot.lane.b32.xlu0 %v8677_v45, %s11100_s15 }
 0x406   : > { %v8811_v14 = vpop.permute.xlu1 %3527  ;;  %v8813_v43 = vpop.permute.xlu0 %3525 }
 0x407   : > { %11395 = vst [vmem:[#allocation119_spill] sm:$0xff] %v8811_v14  ;;  %11396 = vst [vmem:[#allocation114_spill] sm:$0xff] %v8813_v43 }
 0x408   : > { %4113 = vrot.lane.b32.xlu1 %v8675_v30, %s10726_s18  ;;  %4111 = vrot.lane.b32.xlu0 %v8677_v45, %s10726_s18  ;;  %s5579_s18 = sld [smem:[#allocation3 + $0x2]] }
 0x40a   : > { %v8819_v17 = vpop.permute.xlu1 %3533  ;;  %v8821_v22 = vpop.permute.xlu0 %3531 }
 0x40b   : > { %11397 = vst [vmem:[#allocation17_spill] sm:$0xff] %v8819_v17  ;;  %11398 = vst [vmem:[#allocation117_spill] sm:$0xff] %v8821_v22 }
 0x40c   : > { %4119 = vrot.lane.b32.xlu1 %v8675_v30, %s10728_s19  ;;  %4117 = vrot.lane.b32.xlu0 %v8677_v45, %s10728_s19  ;;  %s11423_s19 = smov 12  }
 0x40e   : > { %v8827_v25 = vpop.permute.xlu1 %3607  ;;  %v8829_v14 = vpop.permute.xlu0 %3605  ;;  %v8888_v4 = vstv %s5579_s18  ;;  %s11446_s18 = smov 16  }
 0x40f   : > { %11399 = vst [vmem:[#allocation28_spill] sm:$0xff] %v8827_v25  ;;  %11400 = vst [vmem:[#allocation30_spill] sm:$0xff] %v8829_v14  ;;  %v2861_v14 = vld [vmem:[%s10567_s1] ss:$8 sm:$0x3] }
 0x410   : > { %4193 = vrot.lane.b32.xlu1 %v8675_v30, %s11347_s6  ;;  %4191 = vrot.lane.b32.xlu0 %v8677_v45, %s11347_s6  ;;  %v5580_v25 = vld [vmem:[%s10567_s1 + $0x40] ss:$8 sm:$0x3]  ;;  %v8872_v21 = vrot.slane %v2861_v14, %v11406_v46  ;;  %v8891_v18 = vrot.slane %v2861_v14, %v11407_v11  ;;  %v8911_v14 = vrot.slane %v5583_v52, %v11406_v46 }
 0x411   : > { %v8894_v56 = vrot.slane %v5580_v25, %v11407_v11  ;;  %v8948_v52 = vrot.slane %v5585_v29, %v11407_v11  ;;  %v8965_v29 = vrot.slane %v5588_v61, %v11406_v46  ;;  %v5595_v61 = vld [vmem:[%s10567_s1 + $0x45] ss:$8 sm:$0x3] }
 0x412   : > { %v8835_v22 = vpop.permute.xlu1 %3613  ;;  %v8837_v17 = vpop.permute.xlu0 %3611 }
 0x413   : > { %11401 = vst [vmem:[#allocation27_spill] sm:$0xff] %v8835_v22  ;;  %11402 = vst [vmem:[#allocation126_spill] sm:$0xff] %v8837_v17  ;;  %v5581_v22 = vld [vmem:[%s10567_s1 + $0x80] ss:$8 sm:$0x3] }
 0x414   : > { %4199 = vrot.lane.b32.xlu1 %v8675_v30, %s11348_s14  ;;  %4197 = vrot.lane.b32.xlu0 %v8677_v45, %s11348_s14  ;;  %v5582_v17 = vld [vmem:[%s10567_s1 + $0x1] ss:$8 sm:$0x3]  ;;  %v8878_v40 = vrot.slane %v5581_v22, %v11406_v46  ;;  %v8897_v31 = vrot.slane %v5581_v22, %v11407_v11  ;;  %11412 = vst [vmem:[#allocation34_spill] sm:$0xff] %v8948_v52  ;;  %11415 = vst [vmem:[#allocation36_spill] sm:$0xff] %v8965_v29 }
 0x415   : > { %v8908_v59 = vrot.slane %v5582_v17, %v11406_v46  ;;  %v8917_v22 = vrot.slane %v5582_v17, %v11407_v11  ;;  %v8937_v17 = vrot.slane %v5586_v55, %v11406_v46  ;;  %v8985_v29 = vrot.slane %v5589_v34, %v11407_v11 }
 0x416   : > { %v8852_v43 = vpop.permute.xlu1 %3619  ;;  %v8857_v3 = vpop.permute.xlu0 %3617 }
 0x417   : > { %11403 = vst [vmem:[#allocation42_spill] sm:$0xff] %v8852_v43  ;;  %11404 = vst [vmem:[#allocation127_spill] sm:$0xff] %v8857_v3  ;;  %v8869_v43 = vstv %s5578_s4  ;;  %v8875_v3 = vrot.slane %v5580_v25, %v11406_v46  ;;  %v8914_v25 = vrot.slane %v5584_v44, %v11406_v46  ;;  %s11410_s4 = smov 104   ;;  %v8951_v44 = vrot.slane %v5586_v55, %v11407_v11 }
 0x418   : > { %4205 = vrot.lane.b32.xlu1 %v8675_v30, %s11405_s26  ;;  %4203 = vrot.lane.b32.xlu0 %v8677_v45, %s11405_s26  ;;  %v8968_v55 = vrot.slane %v5589_v34, %v11406_v46  ;;  %v9007_v34 = vrot.slane %v5593_v41, %v11406_v46 }
 0x419   : > { %11413 = vst [vmem:[#allocation122_spill] sm:$0xff] %v8951_v44  ;;  %v5594_v44 = vld [vmem:[%s10567_s1 + $0x5] ss:$8 sm:$0x3] }
 0x41a   : > { %v8905_v15 = vpop.permute.xlu1 %3625  ;;  %v8925_v9 = vpop.permute.xlu0 %3623  ;;  %11416 = vst [vmem:[#allocation38_spill] sm:$0xff] %v8968_v55 }
 0x41b   : > { %11408 = vst [vmem:[#allocation121_spill] sm:$0xff] %v8905_v15  ;;  %v5590_v15 = vld [vmem:[%s10567_s1 + $0x83] ss:$8 sm:$0x3]  ;;  %11409 = vst [vmem:[#allocation31_spill] sm:$0xff] %v8925_v9  ;;  %v8945_v9 = vrot.slane %v5587_v7, %v11406_v46 }
 0x41c   : > { %4211 = vrot.lane.b32.xlu1 %v8675_v30, %s11410_s4  ;;  %4209 = vrot.lane.b32.xlu0 %v8677_v45, %s11410_s4  ;;  %v8971_v7 = vrot.slane %v5590_v15, %v11406_v46  ;;  %v8988_v55 = vrot.slane %v5590_v15, %v11407_v11  ;;  %v9010_v15 = vrot.slane %v5591_v26, %v11407_v11 }
 0x41d   : > { %11411 = vst [vmem:[#allocation33_spill] sm:$0xff] %v8945_v9  ;;  %v2854_v9 = vsel %vm234_vm2, %v8373_v47, %v8519_v42  ;;  %v9004_v42 = vrot.slane %v5592_v53, %v11406_v46 }
 0x41e   : > { %11417 = vst [vmem:[#allocation37_spill] sm:$0xff] %v8971_v7  ;;  %v8979_v52 = vpop.permute.xlu1 %3631  ;;  %v8991_v7 = vrot.slane %v5591_v26, %v11406_v46  ;;  %v8999_v16 = vpop.permute.xlu0 %3629  ;;  %v2856_v47 = vsel %vm237_vm3, %v2854_v9, %v8527_v37  ;;  %11422 = vst [vmem:[#allocation40_spill] sm:$0xff] %v9010_v15  ;;  %v9020_v37 = vrot.slane %v5592_v53, %v11407_v11  ;;  %v5597_v26 = vld [vmem:[%s10567_s1 + $0x6] ss:$8 sm:$0x3] }
 0x41f   : > { %11419 = vst [vmem:[#allocation35_spill] sm:$0xff] %v8979_v52  ;;  %v5596_v52 = vld [vmem:[%s10567_s1 + $0x85] ss:$8 sm:$0x3]  ;;  %11421 = vst [vmem:[#allocation41_spill] sm:$0xff] %v8999_v16  ;;  %v2858_v16 = vsel %vm240_vm4, %v2856_v47, %v8535_v13  ;;  %v9023_v9 = vrot.slane %v5593_v41, %v11407_v11  ;;  %v9039_v53 = vrot.slane %v5595_v61, %v11406_v46 }
 0x420   : > { %11420 = vst [vmem:[#allocation48_spill] sm:$0xff] %v8991_v7  ;;  %4217 = vrot.lane.b32.xlu1 %v8675_v30, %s11423_s19  ;;  %v2853_v7 = vsel %vm234_vm2, %v8371_v20, %v8521_v33  ;;  %11424 = vst [vmem:[#allocation47_spill] sm:$0xff] %v9020_v37  ;;  %v5598_v30 = vld [vmem:[%s10567_s1 + $0x46] ss:$8 sm:$0x3]  ;;  %4215 = vrot.lane.b32.xlu0 %v8677_v45, %s11423_s19  ;;  %v9036_v33 = vrot.slane %v5594_v44, %v11406_v46 }
 0x421   : > { %11425 = vst [vmem:[#allocation45_spill] sm:$0xff] %v9023_v9  ;;  %v2855_v20 = vsel %vm237_vm3, %v2853_v7, %v8529_v63  ;;  %11427 = vst [vmem:[#allocation129_spill] sm:$0xff] %v9039_v53  ;;  %v9042_v41 = vrot.slane %v5596_v52, %v11406_v46  ;;  %v5599_v47 = vld [vmem:[%s10567_s1 + $0x86] ss:$8 sm:$0x3]  ;;  %v9054_v45 = vrot.slane %v5594_v44, %v11407_v11 }
 0x422   : > { %11426 = vst [vmem:[#allocation43_spill] sm:$0xff] %v9036_v33  ;;  %v9047_v9 = vpop.permute.xlu1 %3705  ;;  %v9049_v37 = vld [vmem:[#allocation2 + $0xb] sm:$0xf]  ;;  %v2857_v63 = vsel %vm240_vm4, %v2855_v20, %v8537_v62  ;;  %v9057_v7 = vrot.slane %v5595_v61, %v11407_v11  ;;  %v9060_v53 = vrot.slane %v5596_v52, %v11407_v11  ;;  %v9064_v33 = vld [vmem:[#allocation2 + $0x3] sm:$0xff]  ;;  %v2860_v15 = vsel %vm243_vm5, %v8535_v13, %v8543_v48 }
 0x423   : > { %11428 = vst [vmem:[#allocation125_spill] sm:$0xff] %v9042_v41  ;;  %11429 = vst [vmem:[#allocation39_spill] sm:$0xff] %v9047_v9  ;;  %v9062_v41 = vpop.permute.xlu0 %3703  ;;  %v2875_v9 = vmul.f32 %v8872_v21, %v2858_v16  ;;  %v9071_v20 = vrot.slane %v5597_v26, %v11406_v46  ;;  %v9074_v44 = vrot.slane %v5598_v30, %v11406_v46 }
 0x424   : > { %11430 = vst [vmem:[#allocation128_spill] sm:$0xff] %v9057_v7  ;;  %11431 = vst [vmem:[#allocation46_spill] sm:$0xff] %v9060_v53  ;;  %4295 = vrot.lane.b32.xlu1 %v9049_v37, %s11435_s25  ;;  %v2895_v52 = vmul.f32 %v8875_v3, %v2858_v16  ;;  %v2915_v61 = vmul.f32 %v8878_v40, %v2858_v16  ;;  %v9084_v53 = vrot.slane %v5599_v47, %v11406_v46 }
 0x425   : > { %11432 = vst [vmem:[#allocation50_spill] sm:$0xff] %v9062_v41  ;;  %11433 = vst [vmem:[#allocation49_spill] sm:$0xff] %v9071_v20  ;;  %v2859_v41 = vsel %vm243_vm5, %v8537_v62, %v8545_v60  ;;  %4293 = vrot.lane.b32.xlu0 %v9064_v33, %s11435_s25  ;;  %v2873_v13 = vmul.f32 %v8872_v21, %v2857_v63  ;;  %v2893_v48 = vmul.f32 %v8875_v3, %v2857_v63 }
 0x426   : > { %11434 = vst [vmem:[#allocation58_spill] sm:$0xff] %v9074_v44  ;;  %11436 = vst [vmem:[#allocation56_spill] sm:$0xff] %v9084_v53  ;;  %v2913_v44 = vmul.f32 %v8878_v40, %v2857_v63  ;;  %v9092_v20 = vrot.slane %v5597_v26, %v11407_v11  ;;  %v9094_v16 = vpop.permute.xlu1 %3711  ;;  %v2876_v7 = vmul.f32 %v8891_v18, %v2860_v15 }
 0x427   : > { %11437 = vst [vmem:[#allocation52_spill] sm:$0xff] %v9094_v16  ;;  %v2896_v62 = vmul.f32 %v8894_v56, %v2860_v15  ;;  %v9099_v60 = vrot.slane %v5598_v30, %v11407_v11  ;;  %v9102_v53 = vrot.slane %v5599_v47, %v11407_v11  ;;  %v9104_v21 = vpop.permute.xlu0 %3709  ;;  %v2879_v3 = vadd.f32 %v2875_v9, %v8859_v54 }
 0x428   : > { %11438 = vst [vmem:[#allocation60_spill] sm:$0xff] %v9104_v21  ;;  %v2916_v40 = vmul.f32 %v8897_v31, %v2860_v15  ;;  %v2874_v26 = vmul.f32 %v8891_v18, %v2859_v41  ;;  %v2894_v63 = vmul.f32 %v8894_v56, %v2859_v41  ;;  %4301 = vrot.lane.b32.xlu1 %v9049_v37, %s11439_s30 }
 0x429   : > { %v2899_v16 = vadd.f32 %v2895_v52, %v8869_v43  ;;  %v2919_v30 = vadd.f32 %v2915_v61, %v8888_v4  ;;  %v2914_v47 = vmul.f32 %v8897_v31, %v2859_v41  ;;  %v2952_v21 = vsel %vm234_vm2, %v8551_v58, %v8559_v27  ;;  %4299 = vrot.lane.b32.xlu0 %v9064_v33, %s11439_s30  ;;  %v5600_v31 = vld [vmem:[%s10567_s1 + $0x7] ss:$8 sm:$0x3] }
 0x42a   : > { %v2877_v18 = vadd.f32 %v2873_v13, %v8859_v54  ;;  %v2897_v56 = vadd.f32 %v2893_v48, %v8869_v43  ;;  %v2917_v15 = vadd.f32 %v2913_v44, %v8888_v4  ;;  %v2954_v9 = vsel %vm237_vm3, %v2952_v21, %v8567_v51  ;;  %v5601_v58 = vld [vmem:[%s10567_s1 + $0x47] ss:$8 sm:$0x3]  ;;  %v9131_v27 = vpop.permute.xlu1 %3717 }
 0x42b   : > { %11440 = vst [vmem:[#allocation54_spill] sm:$0xff] %v9131_v27  ;;  %v2880_v41 = vadd.f32 %v2876_v7, %v8859_v54  ;;  %v2900_v52 = vadd.f32 %v2896_v62, %v8869_v43  ;;  %v2951_v44 = vsel %vm234_vm2, %v8553_v2, %v8561_v57  ;;  %v2956_v51 = vsel %vm240_vm4, %v2954_v9, %v8575_v12  ;;  %v5602_v61 = vld [vmem:[%s10567_s1 + $0x87] ss:$8 sm:$0x3]  ;;  %v9143_v13 = vpop.permute.xlu0 %3715 }
 0x42c   : > { %11441 = vst [vmem:[#allocation53_spill] sm:$0xff] %v9143_v13  ;;  %v2920_v48 = vadd.f32 %v2916_v40, %v8888_v4  ;;  %v2878_v21 = vadd.f32 %v2874_v26, %v8859_v54  ;;  %v2898_v7 = vadd.f32 %v2894_v63, %v8869_v43  ;;  %v2953_v62 = vsel %vm237_vm3, %v2951_v44, %v8569_v32 }
 0x42d   : > { %4307 = vrot.lane.b32.xlu1 %v9049_v37, %s11442_s28  ;;  %v2918_v2 = vadd.f32 %v2914_v47, %v8888_v4  ;;  %v2955_v57 = vsel %vm240_vm4, %v2953_v62, %v8577_v19  ;;  %v9156_v9 = vrot.slane %v5600_v31, %v11406_v46  ;;  %v9159_v40 = vrot.slane %v5601_v58, %v11406_v46 }
 0x42e   : > { %4305 = vrot.lane.b32.xlu0 %v9064_v33, %s11442_s28  ;;  %v2973_v54 = vmul.f32 %v8908_v59, %v2956_v51  ;;  %v2958_v32 = vsel %vm243_vm5, %v8575_v12, %v8583_v0  ;;  %v9168_v4 = vrot.slane %v5602_v61, %v11406_v46  ;;  %v9171_v43 = vrot.slane %v5600_v31, %v11407_v11  ;;  %v9173_v26 = vpop.permute.xlu1 %3723 }
 0x42f   : > { %11443 = vst [vmem:[#allocation57_spill] sm:$0xff] %v9173_v26  ;;  %v2993_v63 = vmul.f32 %v8911_v14, %v2956_v51  ;;  %v3013_v47 = vmul.f32 %v8914_v25, %v2956_v51  ;;  %v2957_v44 = vsel %vm243_vm5, %v8577_v19, %v8585_v38  ;;  %v9181_v62 = vrot.slane %v5601_v58, %v11407_v11  ;;  %v9183_v12 = vpop.permute.xlu0 %3721 }
 0x430   : > { %11444 = vst [vmem:[#allocation55_spill] sm:$0xff] %v9183_v12  ;;  %v2971_v0 = vmul.f32 %v8908_v59, %v2955_v57  ;;  %v2991_v31 = vmul.f32 %v8911_v14, %v2955_v57  ;;  %v3011_v13 = vmul.f32 %v8914_v25, %v2955_v57  ;;  %v9189_v26 = vrot.slane %v5602_v61, %v11407_v11 }
 0x431   : > { %4313 = vrot.lane.b32.xlu1 %v9049_v37, %s11446_s18  ;;  %v2974_v51 = vmul.f32 %v8917_v22, %v2958_v32  ;;  %v2994_v19 = vmul.f32 %v8928_v28, %v2958_v32  ;;  %v3014_v38 = vmul.f32 %v8931_v5, %v2958_v32  ;;  %v3050_v59 = vsel %vm234_vm2, %v8591_v8, %v8599_v36 }
 0x432   : > { %11445 = vst [vmem:[#allocation61_spill] sm:$0xff] %v9189_v26  ;;  %4311 = vrot.lane.b32.xlu0 %v9064_v33, %s11446_s18  ;;  %v2977_v14 = vadd.f32 %v2973_v54, %v2879_v3  ;;  %v2972_v25 = vmul.f32 %v8917_v22, %v2957_v44  ;;  %v2992_v58 = vmul.f32 %v8928_v28, %v2957_v44  ;;  %v9205_v57 = vpop.permute.xlu1 %3729 }
 0x433   : > { %v3052_v61 = vsel %vm237_vm3, %v3050_v59, %v8607_v39  ;;  %v2997_v12 = vadd.f32 %v2993_v63, %v2899_v16  ;;  %v3017_v27 = vadd.f32 %v3013_v47, %v2919_v30  ;;  %v3012_v32 = vmul.f32 %v8931_v5, %v2957_v44  ;;  %v9210_v36 = vpop.permute.xlu0 %3727  ;;  %v5603_v39 = vld [vmem:[%s10567_s1 + $0x10] ss:$8 sm:$0x3]  ;;  %v11450_v44 = vld [vmem:[#allocation33_spill] sm:$0xff] }
 0x434   : > { %v3054_v8 = vsel %vm240_vm4, %v3052_v61, %v8615_v50  ;;  %v2975_v26 = vadd.f32 %v2971_v0, %v2877_v18  ;;  %v2995_v3 = vadd.f32 %v2991_v31, %v2897_v56  ;;  %v3015_v54 = vadd.f32 %v3011_v13, %v2917_v15  ;;  %v5604_v5 = vld [vmem:[%s10567_s1 + $0x50] ss:$8 sm:$0x3] }
 0x435   : > { %v3049_v28 = vsel %vm234_vm2, %v8593_v35, %v8601_v24  ;;  %4387 = vrot.lane.b32.xlu1 %v9049_v37, %s11447_s0  ;;  %v2978_v22 = vadd.f32 %v2974_v51, %v2880_v41  ;;  %v2998_v16 = vadd.f32 %v2994_v19, %v2900_v52  ;;  %v3018_v30 = vadd.f32 %v3014_v38, %v2920_v48  ;;  %v5605_v35 = vld [vmem:[%s10567_s1 + $0x90] ss:$8 sm:$0x3] }
 0x436   : > { %v3051_v18 = vsel %vm237_vm3, %v3049_v28, %v8609_v1  ;;  %4385 = vrot.lane.b32.xlu0 %v9064_v33, %s11447_s0  ;;  %v2976_v24 = vadd.f32 %v2972_v25, %v2878_v21  ;;  %v2996_v56 = vadd.f32 %v2992_v58, %v2898_v7  ;;  %v3071_v15 = vmul.f32 %v8934_v6, %v3054_v8  ;;  %v9233_v41 = vpop.permute.xlu1 %3807  ;;  %v11451_v38 = vld [vmem:[#allocation34_spill] sm:$0xff]  ;;  %v11455_v28 = vld [vmem:[#allocation101_spill] sm:$0xff] }
 0x437   : > { %v3053_v13 = vsel %vm240_vm4, %v3051_v18, %v8617_v49  ;;  %11448 = vst [vmem:[#allocation63_spill] sm:$0xff] %v9233_v41  ;;  %v3016_v52 = vadd.f32 %v3012_v32, %v2918_v2  ;;  %v3056_v1 = vsel %vm243_vm5, %v8615_v50, %v8623_v23  ;;  %v9239_v48 = vrot.slane %v5603_v39, %v11406_v46  ;;  %v9244_v21 = vpop.permute.xlu0 %3805  ;;  %v11453_v58 = vld [vmem:[#allocation122_spill] sm:$0xff]  ;;  %v11454_v32 = vld [vmem:[#allocation32_spill] sm:$0xff] }
 0x438   : > { %v9242_v63 = vrot.slane %v5604_v5, %v11406_v46  ;;  %11449 = vst [vmem:[#allocation65_spill] sm:$0xff] %v9244_v21  ;;  %v3055_v7 = vsel %vm243_vm5, %v8617_v49, %v8625_v10  ;;  %v9250_v47 = vrot.slane %v5605_v35, %v11406_v46  ;;  %v9253_v2 = vrot.slane %v5603_v39, %v11407_v11  ;;  %v11456_v39 = vld [vmem:[#allocation100_spill] sm:$0xff]  ;;  %v11478_v41 = vld [vmem:[#allocation26_spill] sm:$0xff] }
 0x439   : > { %v9256_v50 = vrot.slane %v5604_v5, %v11407_v11  ;;  %4393 = vrot.lane.b32.xlu1 %v9049_v37, %s11345_s21  ;;  %v3091_v23 = vmul.f32 %v8937_v17, %v3054_v8  ;;  %v3111_v0 = vmul.f32 %v11450_v44, %v3054_v8  ;;  %v3069_v31 = vmul.f32 %v8934_v6, %v3053_v13 }
 0x43a   : > { %v9264_v49 = vrot.slane %v5605_v35, %v11407_v11  ;;  %4391 = vrot.lane.b32.xlu0 %v9064_v33, %s11345_s21  ;;  %v3075_v10 = vadd.f32 %v3071_v15, %v2977_v14  ;;  %v3089_v51 = vmul.f32 %v8937_v17, %v3053_v13  ;;  %v3109_v19 = vmul.f32 %v11450_v44, %v3053_v13  ;;  %v9271_v25 = vpop.permute.xlu1 %3813  ;;  %v11458_v35 = vld [vmem:[#allocation23_spill] sm:$0xff]  ;;  %v11459_v15 = vld [vmem:[#allocation97_spill] sm:$0xff] }
 0x43b   : > { %v3072_v59 = vmul.f32 %v11451_v38, %v3056_v1  ;;  %11452 = vst [vmem:[#allocation59_spill] sm:$0xff] %v9271_v25  ;;  %v3092_v61 = vmul.f32 %v11453_v58, %v3056_v1  ;;  %v3112_v8 = vmul.f32 %v11454_v32, %v3056_v1  ;;  %v3070_v6 = vmul.f32 %v11451_v38, %v3055_v7  ;;  %v9279_v18 = vpop.permute.xlu0 %3811  ;;  %v11460_v44 = vld [vmem:[#allocation115_spill] sm:$0xff]  ;;  %v11461_v25 = vld [vmem:[#allocation116_spill] sm:$0xff] }
 0x43c   : > { %v3148_v5 = vsel %vm234_vm2, %v11456_v39, %v11455_v28  ;;  %11457 = vst [vmem:[#allocation62_spill] sm:$0xff] %v9279_v18  ;;  %v3090_v17 = vmul.f32 %v11453_v58, %v3055_v7  ;;  %v3110_v14 = vmul.f32 %v11454_v32, %v3055_v7  ;;  %v3147_v13 = vsel %vm234_vm2, %v11459_v15, %v11458_v35  ;;  %v11462_v39 = vld [vmem:[#allocation102_spill] sm:$0xff]  ;;  %v11463_v15 = vld [vmem:[#allocation103_spill] sm:$0xff] }
 0x43d   : > { %v3150_v21 = vsel %vm237_vm3, %v3148_v5, %v11460_v44  ;;  %4399 = vrot.lane.b32.xlu1 %v9049_v37, %s11346_s22  ;;  %v3095_v1 = vadd.f32 %v3091_v23, %v2997_v12  ;;  %v3115_v38 = vadd.f32 %v3111_v0, %v3017_v27  ;;  %v3149_v28 = vsel %vm237_vm3, %v3147_v13, %v11461_v25  ;;  %v5606_v12 = vld [vmem:[%s10567_s1 + $0x11] ss:$8 sm:$0x3] }
 0x43e   : > { %v3152_v58 = vsel %vm240_vm4, %v3150_v21, %v11462_v39  ;;  %4397 = vrot.lane.b32.xlu0 %v9064_v33, %s11346_s22  ;;  %v3073_v7 = vadd.f32 %v3069_v31, %v2975_v26  ;;  %v3093_v32 = vadd.f32 %v3089_v51, %v2995_v3  ;;  %v3113_v35 = vadd.f32 %v3109_v19, %v3015_v54  ;;  %v9301_v27 = vpop.permute.xlu1 %3819  ;;  %v5607_v21 = vld [vmem:[%s10567_s1 + $0x51] ss:$8 sm:$0x3]  ;;  %v11466_v51 = vld [vmem:[#allocation36_spill] sm:$0xff] }
 0x43f   : > { %v3151_v5 = vsel %vm240_vm4, %v3149_v28, %v11463_v15  ;;  %11464 = vst [vmem:[#allocation51_spill] sm:$0xff] %v9301_v27  ;;  %v3076_v23 = vadd.f32 %v3072_v59, %v2978_v22  ;;  %v3096_v0 = vadd.f32 %v3092_v61, %v2998_v16  ;;  %v3116_v25 = vadd.f32 %v3112_v8, %v3018_v30  ;;  %v5608_v26 = vld [vmem:[%s10567_s1 + $0x91] ss:$8 sm:$0x3]  ;;  %v9309_v3 = vpop.permute.xlu0 %3817  ;;  %v11468_v22 = vld [vmem:[#allocation37_spill] sm:$0xff]  ;;  %v11476_v27 = vld [vmem:[#allocation44_spill] sm:$0xff] }
 0x440   : > { %v3074_v13 = vadd.f32 %v3070_v6, %v2976_v24  ;;  %11465 = vst [vmem:[#allocation66_spill] sm:$0xff] %v9309_v3  ;;  %v3094_v54 = vadd.f32 %v3090_v17, %v2996_v56  ;;  %v3114_v31 = vadd.f32 %v3110_v14, %v3016_v52  ;;  %v3169_v19 = vmul.f32 %v11466_v51, %v3152_v58  ;;  %v11467_v44 = vld [vmem:[#allocation38_spill] sm:$0xff]  ;;  %v11469_v24 = vld [vmem:[#allocation24_spill] sm:$0xff] }
 0x441   : > { %v3189_v28 = vmul.f32 %v11467_v44, %v3152_v58  ;;  %4405 = vrot.lane.b32.xlu1 %v9049_v37, %s11018_s9  ;;  %v3209_v16 = vmul.f32 %v11468_v22, %v3152_v58  ;;  %v3167_v30 = vmul.f32 %v11466_v51, %v3151_v5  ;;  %v3154_v59 = vsel %vm243_vm5, %v11462_v39, %v11469_v24  ;;  %v11473_v58 = vld [vmem:[#allocation118_spill] sm:$0xff] }
 0x442   : > { %v9321_v61 = vrot.slane %v5606_v12, %v11406_v46  ;;  %4403 = vrot.lane.b32.xlu0 %v9064_v33, %s11018_s9  ;;  %v9326_v56 = vrot.slane %v5607_v21, %v11406_v46  ;;  %v9329_v52 = vrot.slane %v5608_v26, %v11406_v46  ;;  %v9332_v8 = vrot.slane %v5606_v12, %v11407_v11  ;;  %v9337_v17 = vpop.permute.xlu1 %3825 }
 0x443   : > { %v9335_v6 = vrot.slane %v5607_v21, %v11407_v11  ;;  %11472 = vst [vmem:[#allocation68_spill] sm:$0xff] %v9337_v17  ;;  %v3187_v14 = vmul.f32 %v11467_v44, %v3151_v5  ;;  %v3207_v39 = vmul.f32 %v11468_v22, %v3151_v5  ;;  %v3153_v51 = vsel %vm243_vm5, %v11463_v15, %v11473_v58  ;;  %v9347_v3 = vpop.permute.xlu0 %3823  ;;  %v11479_v22 = vld [vmem:[#allocation132_spill] sm:$0xff]  ;;  %v11482_v58 = vld [vmem:[#allocation130_spill] sm:$0xff] }
 0x444   : > { %11470 = vst [vmem:[#allocation64_spill] sm:$0xff] %v9332_v8  ;;  %v9345_v24 = vrot.slane %v5608_v26, %v11407_v11  ;;  %11475 = vst [vmem:[#allocation72_spill] sm:$0xff] %v9347_v3  ;;  %v3173_v12 = vadd.f32 %v3169_v19, %v3075_v10  ;;  %v3193_v18 = vadd.f32 %v3189_v28, %v3095_v1  ;;  %v5609_v10 = vld [vmem:[%s10567_s1 + $0x12] ss:$8 sm:$0x3]  ;;  %v11480_v19 = vld [vmem:[#allocation112_spill] sm:$0xff] }
 0x445   : > { %11471 = vst [vmem:[#allocation70_spill] sm:$0xff] %v9335_v6  ;;  %v3170_v21 = vmul.f32 %v11476_v27, %v3154_v59  ;;  %v11477_v6 = vld [vmem:[#allocation110_spill] sm:$0xff]  ;;  %4411 = vrot.lane.b32.xlu1 %v9049_v37, %s11027_s10  ;;  %v3213_v5 = vadd.f32 %v3209_v16, %v3115_v38  ;;  %v3171_v44 = vadd.f32 %v3167_v30, %v3073_v7  ;;  %v11485_v8 = vld [vmem:[#allocation124_spill] sm:$0xff] }
 0x446   : > { %11474 = vst [vmem:[#allocation67_spill] sm:$0xff] %v9345_v24  ;;  %v3246_v17 = vsel %vm234_vm2, %v11478_v41, %v11477_v6  ;;  %v3190_v15 = vmul.f32 %v8985_v29, %v3154_v59  ;;  %v5610_v1 = vld [vmem:[%s10567_s1 + $0x52] ss:$8 sm:$0x3]  ;;  %4409 = vrot.lane.b32.xlu0 %v9064_v33, %s11027_s10  ;;  %v3210_v41 = vmul.f32 %v8988_v55, %v3154_v59  ;;  %v9371_v16 = vpop.permute.xlu1 %3899 }
 0x447   : > { %v3248_v26 = vsel %vm237_vm3, %v3246_v17, %v11479_v22  ;;  %v3168_v38 = vmul.f32 %v11476_v27, %v3153_v51  ;;  %v3188_v7 = vmul.f32 %v8985_v29, %v3153_v51  ;;  %11481 = vst [vmem:[#allocation69_spill] sm:$0xff] %v9371_v16  ;;  %v3191_v30 = vadd.f32 %v3187_v14, %v3093_v32  ;;  %v11483_v22 = vld [vmem:[#allocation123_spill] sm:$0xff]  ;;  %v9377_v24 = vpop.permute.xlu0 %3897  ;;  %v11490_v16 = vld [vmem:[#allocation133_spill] sm:$0xff] }
 0x448   : > { %v3250_v28 = vsel %vm240_vm4, %v3248_v26, %v11480_v19  ;;  %v3211_v6 = vadd.f32 %v3207_v39, %v3113_v35  ;;  %v3208_v17 = vmul.f32 %v8988_v55, %v3153_v51  ;;  %v3245_v3 = vsel %vm234_vm2, %v11483_v22, %v11482_v58  ;;  %11484 = vst [vmem:[#allocation71_spill] sm:$0xff] %v9377_v24  ;;  %v5611_v55 = vld [vmem:[%s10567_s1 + $0x92] ss:$8 sm:$0x3]  ;;  %v11487_v35 = vld [vmem:[#allocation48_spill] sm:$0xff] }
 0x449   : > { %v3174_v59 = vadd.f32 %v3170_v21, %v3076_v23  ;;  %v3247_v27 = vsel %vm237_vm3, %v3245_v3, %v11485_v8  ;;  %v9382_v29 = vrot.slane %v5609_v10, %v11406_v46  ;;  %v9385_v26 = vrot.slane %v5610_v1, %v11406_v46  ;;  %4485 = vrot.lane.b32.xlu1 %v9049_v37, %s11036_s13  ;;  %v11488_v39 = vld [vmem:[#allocation131_spill] sm:$0xff] }
 0x44a   : > { %v3194_v32 = vadd.f32 %v3190_v15, %v3096_v0  ;;  %v3267_v14 = vmul.f32 %v11487_v35, %v3250_v28  ;;  %v3287_v23 = vmul.f32 %v9004_v42, %v3250_v28  ;;  %v3249_v3 = vsel %vm240_vm4, %v3247_v27, %v11488_v39  ;;  %4483 = vrot.lane.b32.xlu0 %v9064_v33, %s11036_s13  ;;  %v9399_v22 = vpop.permute.xlu1 %3905 }
 0x44b   : > { %11486 = vst [vmem:[#allocation73_spill] sm:$0xff] %v9385_v26  ;;  %v3214_v8 = vadd.f32 %v3210_v41, %v3116_v25  ;;  %v3172_v51 = vadd.f32 %v3168_v38, %v3074_v13  ;;  %v3192_v21 = vadd.f32 %v3188_v7, %v3094_v54  ;;  %v3307_v58 = vmul.f32 %v9007_v34, %v3250_v28  ;;  %v9410_v26 = vpop.permute.xlu0 %3903  ;;  %v11493_v13 = vld [vmem:[#allocation134_spill] sm:$0xff] }
 0x44c   : > { %11489 = vst [vmem:[#allocation6_spill] sm:$0xff] %v9399_v22  ;;  %v3212_v24 = vadd.f32 %v3208_v17, %v3114_v31  ;;  %v3252_v0 = vsel %vm243_vm5, %v11480_v19, %v11490_v16  ;;  %v9405_v15 = vrot.slane %v5611_v55, %v11406_v46  ;;  %v9408_v27 = vrot.slane %v5609_v10, %v11407_v11  ;;  %v11496_v16 = vld [vmem:[#allocation40_spill] sm:$0xff]  ;;  %v11512_v22 = vld [vmem:[#allocation139_spill] sm:$0xff] }
 0x44d   : > { %11492 = vst [vmem:[#allocation76_spill] sm:$0xff] %v9410_v26  ;;  %v3265_v25 = vmul.f32 %v11487_v35, %v3249_v3  ;;  %v3251_v54 = vsel %vm243_vm5, %v11488_v39, %v11493_v13  ;;  %v9417_v31 = vrot.slane %v5610_v1, %v11407_v11  ;;  %v9420_v41 = vrot.slane %v5611_v55, %v11407_v11  ;;  %v11497_v1 = vld [vmem:[#allocation47_spill] sm:$0xff]  ;;  %v11499_v55 = vld [vmem:[#allocation93_spill] sm:$0xff] }
 0x44e   : > { %11491 = vst [vmem:[#allocation74_spill] sm:$0xff] %v9408_v27  ;;  %4491 = vrot.lane.b32.xlu1 %v9049_v37, %s11045_s16  ;;  %v3271_v38 = vadd.f32 %v3267_v14, %v3173_v12  ;;  %v3291_v10 = vadd.f32 %v3287_v23, %v3193_v18  ;;  %v3285_v7 = vmul.f32 %v9004_v42, %v3249_v3  ;;  %v11498_v39 = vld [vmem:[#allocation135_spill] sm:$0xff]  ;;  %v11501_v18 = vld [vmem:[#allocation45_spill] sm:$0xff]  ;;  %v11502_v14 = vld [vmem:[#allocation138_spill] sm:$0xff] }
 0x44f   : > { %11494 = vst [vmem:[#allocation75_spill] sm:$0xff] %v9417_v31  ;;  %11495 = vst [vmem:[#allocation78_spill] sm:$0xff] %v9420_v41  ;;  %v3305_v19 = vmul.f32 %v9007_v34, %v3249_v3  ;;  %4489 = vrot.lane.b32.xlu0 %v9064_v33, %s11045_s16  ;;  %v3311_v28 = vadd.f32 %v3307_v58, %v3213_v5  ;;  %v3268_v17 = vmul.f32 %v11496_v16, %v3252_v0  ;;  %v9433_v41 = vpop.permute.xlu1 %3911  ;;  %v5612_v42 = vld [vmem:[%s10567_s1 + $0x13] ss:$8 sm:$0x3]  ;;  %v9443_v3 = vpop.permute.xlu0 %3909  ;;  %v11504_v31 = vld [vmem:[#allocation29_spill] sm:$0xff] }
 0x450   : > { %v3288_v35 = vmul.f32 %v11497_v1, %v3252_v0  ;;  %v3342_v13 = vsel %vm234_vm2, %v11499_v55, %v11498_v39  ;;  %11500 = vst [vmem:[#allocation85_spill] sm:$0xff] %v9433_v41  ;;  %v3308_v34 = vmul.f32 %v11501_v18, %v3252_v0  ;;  %v3266_v12 = vmul.f32 %v11496_v16, %v3251_v54  ;;  %v5613_v58 = vld [vmem:[%s10567_s1 + $0x53] ss:$8 sm:$0x3]  ;;  %v11506_v27 = vld [vmem:[#allocation120_spill] sm:$0xff] }
 0x451   : > { %v3286_v5 = vmul.f32 %v11497_v1, %v3251_v54  ;;  %v3344_v23 = vsel %vm237_vm3, %v3342_v13, %v11502_v14  ;;  %11503 = vst [vmem:[#allocation94_spill] sm:$0xff] %v9443_v3  ;;  %v3269_v39 = vadd.f32 %v3265_v25, %v3171_v44  ;;  %v3306_v55 = vmul.f32 %v11501_v18, %v3251_v54  ;;  %v11505_v26 = vld [vmem:[#allocation95_spill] sm:$0xff]  ;;  %v11507_v14 = vld [vmem:[#allocation136_spill] sm:$0xff] }
 0x452   : > { %v3341_v0 = vsel %vm234_vm2, %v11505_v26, %v11504_v31  ;;  %v3346_v16 = vsel %vm240_vm4, %v3344_v23, %v11506_v27  ;;  %4497 = vrot.lane.b32.xlu1 %v9049_v37, %s11060_s17  ;;  %v3289_v1 = vadd.f32 %v3285_v7, %v3191_v30  ;;  %v3309_v13 = vadd.f32 %v3305_v19, %v3211_v6  ;;  %v5614_v26 = vld [vmem:[%s10567_s1 + $0x93] ss:$8 sm:$0x3]  ;;  %v11509_v31 = vld [vmem:[#allocation104_spill] sm:$0xff] }
 0x453   : > { %v3343_v3 = vsel %vm237_vm3, %v3341_v0, %v11507_v14  ;;  %4495 = vrot.lane.b32.xlu0 %v9064_v33, %s11060_s17  ;;  %v9461_v44 = vrot.slane %v5612_v42, %v11406_v46  ;;  %v3272_v25 = vadd.f32 %v3268_v17, %v3174_v59  ;;  %v3292_v54 = vadd.f32 %v3288_v35, %v3194_v32  ;;  %v9471_v6 = vpop.permute.xlu1 %3917  ;;  %v11511_v0 = vld [vmem:[#allocation43_spill] sm:$0xff] }
 0x454   : > { %v3345_v18 = vsel %vm240_vm4, %v3343_v3, %v11509_v31  ;;  %v9469_v30 = vrot.slane %v5613_v58, %v11406_v46  ;;  %v3312_v7 = vadd.f32 %v3308_v34, %v3214_v8  ;;  %v3270_v19 = vadd.f32 %v3266_v12, %v3172_v51  ;;  %v11515_v8 = vld [vmem:[#allocation129_spill] sm:$0xff] }
 0x455   : > { %11508 = vst [vmem:[#allocation77_spill] sm:$0xff] %v9461_v44  ;;  %v3290_v23 = vadd.f32 %v3286_v5, %v3192_v21  ;;  %v3363_v14 = vmul.f32 %v11511_v0, %v3346_v16  ;;  %v9474_v44 = vpop.permute.xlu0 %3915  ;;  %v3310_v41 = vadd.f32 %v3306_v55, %v3212_v24  ;;  %v3348_v59 = vsel %vm243_vm5, %v11506_v27, %v11512_v22  ;;  %v11516_v21 = vld [vmem:[#allocation125_spill] sm:$0xff] }
 0x456   : > { %11510 = vst [vmem:[#allocation92_spill] sm:$0xff] %v9469_v30  ;;  %v9480_v32 = vrot.slane %v5614_v26, %v11406_v46  ;;  %4503 = vrot.lane.b32.xlu1 %v9049_v37, %s11070_s7  ;;  %v9485_v17 = vrot.slane %v5612_v42, %v11407_v11  ;;  %v3383_v51 = vmul.f32 %v11515_v8, %v3346_v16  ;;  %v11517_v24 = vld [vmem:[#allocation137_spill] sm:$0xff]  ;;  %v11529_v30 = vld [vmem:[#allocation108_spill] sm:$0xff] }
 0x457   : > { %v3403_v35 = vmul.f32 %v11516_v21, %v3346_v16  ;;  %v3361_v34 = vmul.f32 %v11511_v0, %v3345_v18  ;;  %v3347_v12 = vsel %vm243_vm5, %v11509_v31, %v11517_v24  ;;  %4501 = vrot.lane.b32.xlu0 %v9064_v33, %s11070_s7  ;;  %v3381_v22 = vmul.f32 %v11515_v8, %v3345_v18  ;;  %v9503_v3 = vpop.permute.xlu1 %3923  ;;  %v11521_v0 = vld [vmem:[#allocation128_spill] sm:$0xff]  ;;  %v11522_v24 = vld [vmem:[#allocation46_spill] sm:$0xff] }
 0x458   : > { %11513 = vst [vmem:[#allocation22_spill] sm:$0xff] %v9480_v32  ;;  %11514 = vst [vmem:[#allocation79_spill] sm:$0xff] %v9485_v17  ;;  %v3401_v27 = vmul.f32 %v11516_v21, %v3345_v18  ;;  %v9498_v42 = vrot.slane %v5613_v58, %v11407_v11  ;;  %v9501_v5 = vrot.slane %v5614_v26, %v11407_v11  ;;  %v11524_v21 = vld [vmem:[#allocation107_spill] sm:$0xff]  ;;  %v11525_v26 = vld [vmem:[#allocation106_spill] sm:$0xff] }
 0x459   : > { %11520 = vst [vmem:[#allocation96_spill] sm:$0xff] %v9503_v3  ;;  %v3367_v55 = vadd.f32 %v3363_v14, %v3271_v38  ;;  %v3364_v16 = vmul.f32 %v9054_v45, %v3348_v59  ;;  %v3384_v31 = vmul.f32 %v11521_v0, %v3348_v59  ;;  %v3404_v17 = vmul.f32 %v11522_v24, %v3348_v59  ;;  %v9508_v32 = vpop.permute.xlu0 %3921  ;;  %v11526_v3 = vld [vmem:[#allocation10_spill] sm:$0xff] }
 0x45a   : > { %11518 = vst [vmem:[#allocation7_spill] sm:$0xff] %v9498_v42  ;;  %11519 = vst [vmem:[#allocation80_spill] sm:$0xff] %v9501_v5  ;;  %v3362_v8 = vmul.f32 %v9054_v45, %v3347_v12  ;;  %v3382_v18 = vmul.f32 %v11521_v0, %v3347_v12  ;;  %v3402_v58 = vmul.f32 %v11522_v24, %v3347_v12  ;;  %4509 = vrot.lane.b32.xlu1 %v9049_v37, %s11077_s11  ;;  %v11528_v12 = vld [vmem:[#allocation105_spill] sm:$0xff] }
 0x45b   : > { %11523 = vst [vmem:[#allocation11_spill] sm:$0xff] %v9508_v32  ;;  %v3440_v5 = vsel %vm234_vm2, %v11525_v26, %v11524_v21  ;;  %v3387_v38 = vadd.f32 %v3383_v51, %v3291_v10  ;;  %v3407_v14 = vadd.f32 %v3403_v35, %v3311_v28  ;;  %v3365_v42 = vadd.f32 %v3361_v34, %v3269_v39  ;;  %v11527_v32 = vld [vmem:[#allocation8_spill] sm:$0xff]  ;;  %v9527_v26 = vpop.permute.xlu1 %3997  ;;  %v5615_v10 = vld [vmem:[%s10567_s1 + $0x14] ss:$8 sm:$0x3] }
 0x45c   : > { %v3442_v59 = vsel %vm237_vm3, %v3440_v5, %v11526_v3  ;;  %4507 = vrot.lane.b32.xlu0 %v9064_v33, %s11077_s11  ;;  %v3385_v45 = vadd.f32 %v3381_v22, %v3289_v1  ;;  %v3405_v0 = vadd.f32 %v3401_v27, %v3309_v13  ;;  %v3439_v24 = vsel %vm234_vm2, %v11528_v12, %v11527_v32  ;;  %v5616_v28 = vld [vmem:[%s10567_s1 + $0x54] ss:$8 sm:$0x3]  ;;  %v11530_v51 = vld [vmem:[#allocation12_spill] sm:$0xff] }
 0x45d   : > { %v3444_v21 = vsel %vm240_vm4, %v3442_v59, %v11529_v30  ;;  %v3368_v39 = vadd.f32 %v3364_v16, %v3272_v25  ;;  %v3388_v1 = vadd.f32 %v3384_v31, %v3292_v54  ;;  %v3408_v13 = vadd.f32 %v3404_v17, %v3312_v7  ;;  %v9537_v32 = vpop.permute.xlu0 %3995  ;;  %v5617_v34 = vld [vmem:[%s10567_s1 + $0x94] ss:$8 sm:$0x3]  ;;  %v11533_v25 = vld [vmem:[#allocation49_spill] sm:$0xff]  ;;  %v11541_v12 = vld [vmem:[#allocation56_spill] sm:$0xff] }
 0x45e   : > { %v3441_v35 = vsel %vm237_vm3, %v3439_v24, %v11530_v51  ;;  %11531 = vst [vmem:[#allocation81_spill] sm:$0xff] %v9537_v32  ;;  %v3366_v22 = vadd.f32 %v3362_v8, %v3270_v19  ;;  %v3386_v27 = vadd.f32 %v3382_v18, %v3290_v23  ;;  %v3406_v5 = vadd.f32 %v3402_v58, %v3310_v41  ;;  %v11532_v3 = vld [vmem:[#allocation18_spill] sm:$0xff]  ;;  %v11534_v7 = vld [vmem:[#allocation9_spill] sm:$0xff]  ;;  %v11547_v32 = vld [vmem:[#allocation19_spill] sm:$0xff] }
 0x45f   : > { %v3443_v59 = vsel %vm240_vm4, %v3441_v35, %v11532_v3  ;;  %4583 = vrot.lane.b32.xlu1 %v9049_v37, %s11086_s8  ;;  %v3461_v54 = vmul.f32 %v11533_v25, %v3444_v21  ;;  %v3446_v17 = vsel %vm243_vm5, %v11529_v30, %v11534_v7  ;;  %v9553_v16 = vrot.slane %v5615_v10, %v11406_v46  ;;  %v11537_v19 = vld [vmem:[#allocation58_spill] sm:$0xff]  ;;  %v11538_v31 = vld [vmem:[#allocation109_spill] sm:$0xff]  ;;  %v9562_v18 = vpop.permute.xlu1 %4003 }
 0x460   : > { %4581 = vrot.lane.b32.xlu0 %v9064_v33, %s11086_s8  ;;  %v9556_v41 = vrot.slane %v5616_v28, %v11406_v46  ;;  %v3481_v23 = vmul.f32 %v11537_v19, %v3444_v21  ;;  %v3445_v8 = vsel %vm243_vm5, %v11532_v3, %v11538_v31  ;;  %v9565_v58 = vrot.slane %v5617_v34, %v11406_v46 }
 0x461   : > { %11535 = vst [vmem:[#allocation13_spill] sm:$0xff] %v9553_v16  ;;  %v9568_v30 = vrot.slane %v5615_v10, %v11407_v11  ;;  %v3501_v24 = vmul.f32 %v11541_v12, %v3444_v21  ;;  %v3459_v51 = vmul.f32 %v11533_v25, %v3443_v59  ;;  %v3479_v35 = vmul.f32 %v11537_v19, %v3443_v59  ;;  %v9573_v7 = vpop.permute.xlu0 %4001 }
 0x462   : > { %11536 = vst [vmem:[#allocation14_spill] sm:$0xff] %v9556_v41  ;;  %11539 = vst [vmem:[#allocation15_spill] sm:$0xff] %v9565_v58  ;;  %v9576_v41 = vrot.slane %v5616_v28, %v11407_v11  ;;  %v3499_v3 = vmul.f32 %v11541_v12, %v3443_v59  ;;  %v3462_v31 = vmul.f32 %v9092_v20, %v3446_v17  ;;  %v11546_v28 = vld [vmem:[#allocation16_spill] sm:$0xff] }
 0x463   : > { %11540 = vst [vmem:[#allocation84_spill] sm:$0xff] %v9568_v30  ;;  %11542 = vst [vmem:[#allocation82_spill] sm:$0xff] %v9573_v7  ;;  %v3482_v58 = vmul.f32 %v9099_v60, %v3446_v17  ;;  %4589 = vrot.lane.b32.xlu1 %v9049_v37, %s11093_s5  ;;  %v9584_v21 = vrot.slane %v5617_v34, %v11407_v11  ;;  %v3465_v10 = vadd.f32 %v3461_v54, %v3367_v55  ;;  %v11545_v30 = vld [vmem:[#allocation113_spill] sm:$0xff]  ;;  %v9597_v55 = vpop.permute.xlu1 %4009  ;;  %v11551_v7 = vld [vmem:[#allocation20_spill] sm:$0xff] }
 0x464   : > { %11543 = vst [vmem:[#allocation86_spill] sm:$0xff] %v9576_v41  ;;  %v3502_v25 = vmul.f32 %v9102_v53, %v3446_v17  ;;  %v3460_v19 = vmul.f32 %v9092_v20, %v3445_v8  ;;  %v3538_v41 = vsel %vm234_vm2, %v11546_v28, %v11545_v30  ;;  %4587 = vrot.lane.b32.xlu0 %v9064_v33, %s11093_s5  ;;  %v5618_v20 = vld [vmem:[%s10567_s1 + $0x15] ss:$8 sm:$0x3] }
 0x465   : > { %11544 = vst [vmem:[#allocation88_spill] sm:$0xff] %v9584_v21  ;;  %v3485_v59 = vadd.f32 %v3481_v23, %v3387_v38  ;;  %v3480_v12 = vmul.f32 %v9099_v60, %v3445_v8  ;;  %v3500_v16 = vmul.f32 %v9102_v53, %v3445_v8  ;;  %v3540_v34 = vsel %vm237_vm3, %v3538_v41, %v11547_v32  ;;  %v11548_v28 = vld [vmem:[#allocation119_spill] sm:$0xff]  ;;  %v9604_v38 = vpop.permute.xlu0 %4007  ;;  %v11550_v8 = vld [vmem:[#allocation21_spill] sm:$0xff] }
 0x466   : > { %v3505_v54 = vadd.f32 %v3501_v24, %v3407_v14  ;;  %v3463_v17 = vadd.f32 %v3459_v51, %v3365_v42  ;;  %v3483_v30 = vadd.f32 %v3479_v35, %v3385_v45  ;;  %v3542_v21 = vsel %vm240_vm4, %v3540_v34, %v11548_v28  ;;  %11549 = vst [vmem:[#allocation83_spill] sm:$0xff] %v9604_v38  ;;  %v5619_v42 = vld [vmem:[%s10567_s1 + $0x55] ss:$8 sm:$0x3] }
 0x467   : > { %v3503_v60 = vadd.f32 %v3499_v3, %v3405_v0  ;;  %v3466_v23 = vadd.f32 %v3462_v31, %v3368_v39  ;;  %v3486_v53 = vadd.f32 %v3482_v58, %v3388_v1  ;;  %v3537_v32 = vsel %vm234_vm2, %v11551_v7, %v11550_v8  ;;  %4595 = vrot.lane.b32.xlu1 %v9049_v37, %s11100_s15  ;;  %v5620_v14 = vld [vmem:[%s10567_s1 + $0x95] ss:$8 sm:$0x3]  ;;  %v11552_v0 = vld [vmem:[#allocation25_spill] sm:$0xff]  ;;  %v9627_v3 = vpop.permute.xlu1 %4015 }
 0x468   : > { %v3506_v45 = vadd.f32 %v3502_v25, %v3408_v13  ;;  %v3464_v41 = vadd.f32 %v3460_v19, %v3366_v22  ;;  %v3539_v39 = vsel %vm237_vm3, %v3537_v32, %v11552_v0  ;;  %4593 = vrot.lane.b32.xlu0 %v9064_v33, %s11100_s15  ;;  %v9622_v1 = vrot.slane %v5618_v20, %v11406_v46  ;;  %v11554_v35 = vld [vmem:[#allocation114_spill] sm:$0xff]  ;;  %v11555_v22 = vld [vmem:[#allocation17_spill] sm:$0xff] }
 0x469   : > { %v3484_v58 = vadd.f32 %v3480_v12, %v3386_v27  ;;  %v3504_v24 = vadd.f32 %v3500_v16, %v3406_v5  ;;  %v3559_v51 = vmul.f32 %v9156_v9, %v3542_v21  ;;  %v3541_v7 = vsel %vm240_vm4, %v3539_v39, %v11554_v35  ;;  %v9633_v25 = vpop.permute.xlu0 %4013  ;;  %v11558_v5 = vld [vmem:[#allocation117_spill] sm:$0xff] }
 0x46a   : > { %11553 = vst [vmem:[#allocation87_spill] sm:$0xff] %v9622_v1  ;;  %v3579_v13 = vmul.f32 %v9159_v40, %v3542_v21  ;;  %v3544_v31 = vsel %vm243_vm5, %v11548_v28, %v11555_v22  ;;  %v9636_v19 = vrot.slane %v5619_v42, %v11406_v46  ;;  %v9639_v27 = vrot.slane %v5620_v14, %v11406_v46  ;;  %v11563_v22 = vld [vmem:[#allocation27_spill] sm:$0xff] }
 0x46b   : > { %v3543_v16 = vsel %vm243_vm5, %v11554_v35, %v11558_v5  ;;  %4601 = vrot.lane.b32.xlu1 %v9049_v37, %s11559_s2  ;;  %v9647_v12 = vrot.slane %v5618_v20, %v11407_v11  ;;  %v9650_v34 = vrot.slane %v5619_v42, %v11407_v11  ;;  %v9653_v28 = vrot.slane %v5620_v14, %v11407_v11  ;;  %v11564_v5 = vld [vmem:[#allocation28_spill] sm:$0xff] }
 0x46c   : > { %11556 = vst [vmem:[#allocation111_spill] sm:$0xff] %v9636_v19  ;;  %11557 = vst [vmem:[#allocation89_spill] sm:$0xff] %v9639_v27  ;;  %v3599_v8 = vmul.f32 %v9168_v4, %v3542_v21  ;;  %v3557_v32 = vmul.f32 %v9156_v9, %v3541_v7  ;;  %v3577_v0 = vmul.f32 %v9159_v40, %v3541_v7  ;;  %4599 = vrot.lane.b32.xlu0 %v9064_v33, %s11559_s2  ;;  %v9666_v27 = vpop.permute.xlu1 %4021  ;;  %v11565_v9 = vld [vmem:[#allocation61_spill] sm:$0xff] }
 0x46d   : > { %11560 = vst [vmem:[#allocation90_spill] sm:$0xff] %v9647_v12  ;;  %11561 = vst [vmem:[#allocation91_spill] sm:$0xff] %v9650_v34  ;;  %v3597_v39 = vmul.f32 %v9168_v4, %v3541_v7  ;;  %v3563_v35 = vadd.f32 %v3559_v51, %v3465_v10  ;;  %v3560_v20 = vmul.f32 %v9171_v43, %v3544_v31  ;;  %v11566_v4 = vld [vmem:[#allocation42_spill] sm:$0xff]  ;;  %v9672_v1 = vpop.permute.xlu0 %4019 }
 0x46e   : > { %11562 = vst [vmem:[#allocation33_spill] sm:$0xff] %v9653_v28  ;;  %v3580_v42 = vmul.f32 %v9181_v62, %v3544_v31  ;;  %v3636_v14 = vsel %vm234_vm2, %v11564_v5, %v11563_v22  ;;  %v3583_v21 = vadd.f32 %v3579_v13, %v3485_v59  ;;  %v3600_v19 = vmul.f32 %v11565_v9, %v3544_v31  ;;  %v11567_v28 = vld [vmem:[#allocation126_spill] sm:$0xff]  ;;  %v11569_v5 = vld [vmem:[#allocation121_spill] sm:$0xff] }
 0x46f   : > { %v3558_v40 = vmul.f32 %v9171_v43, %v3543_v16  ;;  %v3638_v7 = vsel %vm237_vm3, %v3636_v14, %v11566_v4  ;;  %v3578_v10 = vmul.f32 %v9181_v62, %v3543_v16  ;;  %v3598_v51 = vmul.f32 %v11565_v9, %v3543_v16  ;;  %v11568_v34 = vld [vmem:[#allocation30_spill] sm:$0xff]  ;;  %4607 = vrot.lane.b32.xlu1 %v9049_v37, %s11570_s3  ;;  %v11571_v62 = vld [vmem:[#allocation127_spill] sm:$0xff] }
 0x470   : > { %v3635_v22 = vsel %vm234_vm2, %v11568_v34, %v11567_v28  ;;  %v3640_v59 = vsel %vm240_vm4, %v3638_v7, %v11569_v5  ;;  %v5621_v43 = vld [vmem:[%s10567_s1 + $0x16] ss:$8 sm:$0x3]  ;;  %v3603_v13 = vadd.f32 %v3599_v8, %v3505_v54  ;;  %v3561_v31 = vadd.f32 %v3557_v32, %v3463_v17  ;;  %4605 = vrot.lane.b32.xlu0 %v9064_v33, %s11570_s3  ;;  %v9695_v38 = vpop.permute.xlu1 %4095 }
 0x471   : > { %v3581_v14 = vadd.f32 %v3577_v0, %v3483_v30  ;;  %v3637_v16 = vsel %vm237_vm3, %v3635_v22, %v11571_v62  ;;  %v5622_v34 = vld [vmem:[%s10567_s1 + $0x56] ss:$8 sm:$0x3]  ;;  %v3601_v28 = vadd.f32 %v3597_v39, %v3503_v60  ;;  %v3564_v9 = vadd.f32 %v3560_v20, %v3466_v23  ;;  %v9702_v32 = vpop.permute.xlu0 %4093 }
 0x472   : > { %v3584_v4 = vadd.f32 %v3580_v42, %v3486_v53  ;;  %v11572_v7 = vld [vmem:[#allocation31_spill] sm:$0xff]  ;;  %v3604_v17 = vadd.f32 %v3600_v19, %v3506_v45  ;;  %v3657_v30 = vmul.f32 %v9239_v48, %v3640_v59  ;;  %v3677_v8 = vmul.f32 %v9242_v63, %v3640_v59 }
 0x473   : > { %v3639_v12 = vsel %vm240_vm4, %v3637_v16, %v11572_v7  ;;  %v5623_v54 = vld [vmem:[%s10567_s1 + $0x96] ss:$8 sm:$0x3]  ;;  %v9705_v60 = vrot.slane %v5621_v43, %v11406_v46  ;;  %v3562_v23 = vadd.f32 %v3558_v40, %v3464_v41  ;;  %v3582_v53 = vadd.f32 %v3578_v10, %v3484_v58  ;;  %4681 = vrot.lane.b32.xlu1 %v9049_v37, %s11347_s6 }
 0x474   : > { %v3602_v0 = vadd.f32 %v3598_v51, %v3504_v24  ;;  %v9710_v39 = vrot.slane %v5622_v34, %v11406_v46  ;;  %v3697_v45 = vmul.f32 %v9250_v47, %v3640_v59  ;;  %v3655_v19 = vmul.f32 %v9239_v48, %v3639_v12  ;;  %v11575_v20 = vld [vmem:[#allocation35_spill] sm:$0xff]  ;;  %4679 = vrot.lane.b32.xlu0 %v9064_v33, %s11347_s6  ;;  %v9723_v24 = vpop.permute.xlu1 %4101 }
 0x475   : > { %11573 = vst [vmem:[#allocation34_spill] sm:$0xff] %v9705_v60  ;;  %v3642_v42 = vsel %vm243_vm5, %v11569_v5, %v11575_v20  ;;  %v9720_v41 = vrot.slane %v5623_v54, %v11406_v46  ;;  %v3675_v58 = vmul.f32 %v9242_v63, %v3639_v12  ;;  %v9726_v40 = vrot.slane %v5621_v43, %v11407_v11  ;;  %v5624_v51 = vld [vmem:[%s10567_s1 + $0x17] ss:$8 sm:$0x3]  ;;  %v11578_v63 = vld [vmem:[#allocation41_spill] sm:$0xff]  ;;  %v9741_v43 = vpop.permute.xlu0 %4099  ;;  %v11579_v20 = vld [vmem:[#allocation52_spill] sm:$0xff] }
 0x476   : > { %11574 = vst [vmem:[#allocation122_spill] sm:$0xff] %v9710_v39  ;;  %v9729_v10 = vrot.slane %v5622_v34, %v11407_v11  ;;  %v9732_v48 = vrot.slane %v5623_v54, %v11407_v11  ;;  %v3661_v22 = vadd.f32 %v3657_v30, %v3563_v35  ;;  %v3681_v5 = vadd.f32 %v3677_v8, %v3583_v21  ;;  %v11581_v21 = vld [vmem:[#allocation54_spill] sm:$0xff] }
 0x477   : > { %11576 = vst [vmem:[#allocation32_spill] sm:$0xff] %v9720_v41  ;;  %v3695_v59 = vmul.f32 %v9250_v47, %v3639_v12  ;;  %v3641_v62 = vsel %vm243_vm5, %v11572_v7, %v11578_v63  ;;  %v3658_v16 = vmul.f32 %v9253_v2, %v3642_v42  ;;  %v3678_v34 = vmul.f32 %v9256_v50, %v3642_v42  ;;  %v11580_v41 = vld [vmem:[#allocation39_spill] sm:$0xff]  ;;  %v11583_v63 = vld [vmem:[#allocation57_spill] sm:$0xff] }
 0x478   : > { %11577 = vst [vmem:[#allocation101_spill] sm:$0xff] %v9732_v48  ;;  %v3698_v54 = vmul.f32 %v9264_v49, %v3642_v42  ;;  %v3734_v39 = vsel %vm234_vm2, %v11580_v41, %v11579_v20  ;;  %4687 = vrot.lane.b32.xlu1 %v9049_v37, %s11348_s14  ;;  %v5625_v47 = vld [vmem:[%s10567_s1 + $0x57] ss:$8 sm:$0x3]  ;;  %v3701_v12 = vadd.f32 %v3697_v45, %v3603_v13  ;;  %v9765_v60 = vpop.permute.xlu1 %4107  ;;  %v11584_v45 = vld [vmem:[#allocation60_spill] sm:$0xff] }
 0x479   : > { %v3659_v35 = vadd.f32 %v3655_v19, %v3561_v31  ;;  %v3736_v7 = vsel %vm237_vm3, %v3734_v39, %v11581_v21  ;;  %4685 = vrot.lane.b32.xlu0 %v9064_v33, %s11348_s14  ;;  %v9759_v30 = vrot.slane %v5624_v51, %v11406_v46  ;;  %v3679_v8 = vadd.f32 %v3675_v58, %v3581_v14  ;;  %v5626_v13 = vld [vmem:[%s10567_s1 + $0x97] ss:$8 sm:$0x3]  ;;  %v9774_v58 = vpop.permute.xlu0 %4105 }
 0x47a   : > { %v3656_v42 = vmul.f32 %v9253_v2, %v3641_v62  ;;  %v3676_v41 = vmul.f32 %v9256_v50, %v3641_v62  ;;  %v3738_v20 = vsel %vm240_vm4, %v3736_v7, %v11583_v63  ;;  %v3699_v31 = vadd.f32 %v3695_v59, %v3601_v28  ;;  %v11585_v19 = vld [vmem:[#allocation50_spill] sm:$0xff]  ;;  %v11588_v59 = vld [vmem:[#allocation55_spill] sm:$0xff] }
 0x47b   : > { %11582 = vst [vmem:[#allocation100_spill] sm:$0xff] %v9759_v30  ;;  %v3696_v39 = vmul.f32 %v9264_v49, %v3641_v62  ;;  %v3733_v14 = vsel %vm234_vm2, %v11585_v19, %v11584_v45  ;;  %v9777_v2 = vrot.slane %v5625_v47, %v11406_v46  ;;  %v3662_v50 = vadd.f32 %v3658_v16, %v3564_v9  ;;  %v11587_v30 = vld [vmem:[#allocation53_spill] sm:$0xff] }
 0x47c   : > { %v3682_v21 = vadd.f32 %v3678_v34, %v3584_v4  ;;  %v3702_v7 = vadd.f32 %v3698_v54, %v3604_v17  ;;  %v3735_v48 = vsel %vm237_vm3, %v3733_v14, %v11587_v30  ;;  %4693 = vrot.lane.b32.xlu1 %v9049_v37, %s11405_s26  ;;  %v3755_v49 = vmul.f32 %v9321_v61, %v3738_v20  ;;  %v9796_v54 = vpop.permute.xlu1 %4113  ;;  %v11595_v14 = vld [vmem:[#allocation67_spill] sm:$0xff] }
 0x47d   : > { %11586 = vst [vmem:[#allocation23_spill] sm:$0xff] %v9777_v2  ;;  %v3775_v28 = vmul.f32 %v9326_v56, %v3738_v20  ;;  %v3737_v62 = vsel %vm240_vm4, %v3735_v48, %v11588_v59  ;;  %4691 = vrot.lane.b32.xlu0 %v9064_v33, %s11405_s26  ;;  %v9790_v9 = vrot.slane %v5626_v13, %v11406_v46  ;;  %v9798_v45 = vpop.permute.xlu0 %4111 }
 0x47e   : > { %v3660_v4 = vadd.f32 %v3656_v42, %v3562_v23  ;;  %v3680_v17 = vadd.f32 %v3676_v41, %v3582_v53  ;;  %v3795_v16 = vmul.f32 %v9329_v52, %v3738_v20  ;;  %v3740_v34 = vsel %vm243_vm5, %v11583_v63, %v9205_v57  ;;  %v11592_v63 = vld [vmem:[#allocation64_spill] sm:$0xff] }
 0x47f   : > { %11589 = vst [vmem:[#allocation97_spill] sm:$0xff] %v9790_v9  ;;  %v3700_v30 = vadd.f32 %v3696_v39, %v3602_v0  ;;  %v9801_v48 = vrot.slane %v5624_v51, %v11407_v11  ;;  %v9804_v19 = vrot.slane %v5625_v47, %v11407_v11  ;;  %v9807_v23 = vrot.slane %v5626_v13, %v11407_v11  ;;  %v5627_v51 = vld [vmem:[%s10567_s1 + $0x20] ss:$8 sm:$0x3]  ;;  %v11593_v13 = vld [vmem:[#allocation63_spill] sm:$0xff] }
 0x480   : > { %v3753_v53 = vmul.f32 %v9321_v61, %v3737_v62  ;;  %v3773_v42 = vmul.f32 %v9326_v56, %v3737_v62  ;;  %v3793_v57 = vmul.f32 %v9329_v52, %v3737_v62  ;;  %v3739_v0 = vsel %vm243_vm5, %v11588_v59, %v9210_v36  ;;  %4699 = vrot.lane.b32.xlu1 %v9049_v37, %s11410_s4  ;;  %v5830_v61 = vld [vmem:[#allocation2 + $0xa] sm:$0xf]  ;;  %v11594_v36 = vld [vmem:[#allocation70_spill] sm:$0xff]  ;;  %v11596_v62 = vld [vmem:[#allocation59_spill] sm:$0xff]  ;;  %v9829_v2 = vpop.permute.xlu1 %4119 }
 0x481   : > { %11590 = vst [vmem:[#allocation115_spill] sm:$0xff] %v9804_v19  ;;  %11591 = vst [vmem:[#allocation116_spill] sm:$0xff] %v9807_v23  ;;  %v3759_v47 = vadd.f32 %v3755_v49, %v3661_v22  ;;  %v3779_v41 = vadd.f32 %v3775_v28, %v3681_v5  ;;  %v3756_v20 = vmul.f32 %v11592_v63, %v3740_v34  ;;  %4697 = vrot.lane.b32.xlu0 %v9064_v33, %s11410_s4  ;;  %v5628_v22 = vld [vmem:[%s10567_s1 + $0x60] ss:$8 sm:$0x3]  ;;  %v11597_v28 = vld [vmem:[#allocation51_spill] sm:$0xff] }
 0x482   : > { %v3830_v56 = vsel %vm234_vm2, %v5830_v61, %v11593_v13  ;;  %v3799_v52 = vadd.f32 %v3795_v16, %v3701_v12  ;;  %v3776_v39 = vmul.f32 %v11594_v36, %v3740_v34  ;;  %v3796_v59 = vmul.f32 %v11595_v14, %v3740_v34  ;;  %v9838_v16 = vpop.permute.xlu0 %4117  ;;  %v11599_v23 = vld [vmem:[#allocation65_spill] sm:$0xff] }
 0x483   : > { %v3832_v9 = vsel %vm237_vm3, %v3830_v56, %v11596_v62  ;;  %v3754_v5 = vmul.f32 %v11592_v63, %v3739_v0  ;;  %v3774_v49 = vmul.f32 %v11594_v36, %v3739_v0  ;;  %v9841_v34 = vrot.slane %v5627_v51, %v11406_v46  ;;  %v5831_v62 = vld [vmem:[#allocation2 + $0x2] sm:$0xff]  ;;  %v9853_v63 = vld [vmem:[#allocation2 + $0xc] sm:$0xf] }
 0x484   : > { %v3834_v12 = vsel %vm240_vm4, %v3832_v9, %v11597_v28  ;;  %v3757_v61 = vadd.f32 %v3753_v53, %v3659_v35  ;;  %v3777_v13 = vadd.f32 %v3773_v42, %v3679_v8  ;;  %v3794_v56 = vmul.f32 %v11595_v14, %v3739_v0  ;;  %4705 = vrot.lane.b32.xlu1 %v9049_v37, %s11423_s19  ;;  %v9851_v9 = vld [vmem:[%s10567_s1 + $0xa0] ss:$8 sm:$0x3]  ;;  %v11601_v35 = vld [vmem:[#allocation62_spill] sm:$0xff] }
 0x485   : > { %11598 = vst [vmem:[#allocation102_spill] sm:$0xff] %v9841_v34  ;;  %v3829_v19 = vsel %vm234_vm2, %v5831_v62, %v11599_v23  ;;  %11600 = vst [vmem:[#allocation103_spill] sm:$0xff] %v9851_v9  ;;  %v3797_v36 = vadd.f32 %v3793_v57, %v3699_v31  ;;  %v3760_v34 = vadd.f32 %v3756_v20, %v3662_v50  ;;  %4703 = vrot.lane.b32.xlu0 %v9064_v33, %s11423_s19  ;;  %v11603_v0 = vld [vmem:[#allocation66_spill] sm:$0xff]  ;;  %v9865_v62 = vpop.permute.xlu1 %4193  ;;  %v11604_v57 = vld [vmem:[#allocation73_spill] sm:$0xff] }
 0x486   : > { %v3831_v8 = vsel %vm237_vm3, %v3829_v19, %v11601_v35  ;;  %v9860_v23 = vrot.slane %v5628_v22, %v11406_v46  ;;  %v3780_v53 = vadd.f32 %v3776_v39, %v3682_v21  ;;  %v3800_v37 = vadd.f32 %v3796_v59, %v3702_v7  ;;  %v9868_v19 = vpop.permute.xlu0 %4191  ;;  %v9874_v35 = vld [vmem:[#allocation2 + $0x4] sm:$0xff] }
 0x487   : > { %v3851_v42 = vmul.f32 %v9382_v29, %v3834_v12  ;;  %v3833_v14 = vsel %vm240_vm4, %v3831_v8, %v11603_v0  ;;  %v3758_v31 = vadd.f32 %v3754_v5, %v3660_v4  ;;  %v3778_v50 = vadd.f32 %v3774_v49, %v3680_v17  ;;  %11605 = vst [vmem:[#allocation38_spill] sm:$0xff] %v9868_v19  ;;  %v11607_v39 = vld [vmem:[#allocation68_spill] sm:$0xff]  ;;  %v11609_v49 = vld [vmem:[#allocation6_spill] sm:$0xff]  ;;  %v11610_v8 = vld [vmem:[#allocation69_spill] sm:$0xff] }
 0x488   : > { %11602 = vst [vmem:[#allocation36_spill] sm:$0xff] %v9860_v23  ;;  %v3871_v20 = vmul.f32 %v11604_v57, %v3834_v12  ;;  %v9872_v33 = vrot.slane %v9851_v9, %v11406_v46  ;;  %v3798_v21 = vadd.f32 %v3794_v56, %v3700_v30  ;;  %v3891_v7 = vmul.f32 %v9405_v15, %v3834_v12  ;;  %v11616_v23 = vld [vmem:[#allocation71_spill] sm:$0xff]  ;;  %v11623_v19 = vld [vmem:[#allocation22_spill] sm:$0xff] }
 0x489   : > { %v3836_v59 = vsel %vm243_vm5, %v11597_v28, %v11607_v39  ;;  %4783 = vrot.lane.b32.xlu1 %v9853_v63, %s11435_s25  ;;  %v9883_v4 = vrot.slane %v5627_v51, %v11407_v11  ;;  %v3849_v17 = vmul.f32 %v9382_v29, %v3833_v14  ;;  %v3869_v5 = vmul.f32 %v11604_v57, %v3833_v14  ;;  %v11612_v39 = vld [vmem:[#allocation72_spill] sm:$0xff]  ;;  %v11613_v29 = vld [vmem:[#allocation85_spill] sm:$0xff]  ;;  %v9901_v46 = vpop.permute.xlu1 %4199 }
 0x48a   : > { %11606 = vst [vmem:[#allocation37_spill] sm:$0xff] %v9872_v33  ;;  %v3928_v30 = vsel %vm234_vm2, %v11610_v8, %v11609_v49  ;;  %4781 = vrot.lane.b32.xlu0 %v9874_v35, %s11435_s25  ;;  %v9893_v12 = vrot.slane %v5628_v22, %v11407_v11  ;;  %v3855_v28 = vadd.f32 %v3851_v42, %v3759_v47  ;;  %v11614_v49 = vld [vmem:[#allocation74_spill] sm:$0xff]  ;;  %v11615_v33 = vld [vmem:[#allocation76_spill] sm:$0xff] }
 0x48b   : > { %11608 = vst [vmem:[#allocation24_spill] sm:$0xff] %v9883_v4  ;;  %v3889_v56 = vmul.f32 %v9405_v15, %v3833_v14  ;;  %v3835_v51 = vsel %vm243_vm5, %v11603_v0, %v11612_v39  ;;  %v3930_v57 = vsel %vm237_vm3, %v3928_v30, %v11613_v29  ;;  %v3875_v4 = vadd.f32 %v3871_v20, %v3779_v41  ;;  %v9909_v15 = vpop.permute.xlu0 %4197  ;;  %v11618_v14 = vld [vmem:[#allocation75_spill] sm:$0xff]  ;;  %v11619_v39 = vld [vmem:[#allocation78_spill] sm:$0xff]  ;;  %v11622_v11 = vld [vmem:[#allocation92_spill] sm:$0xff] }
 0x48c   : > { %11611 = vst [vmem:[#allocation118_spill] sm:$0xff] %v9893_v12  ;;  %v3852_v8 = vmul.f32 %v11614_v49, %v3836_v59  ;;  %v3927_v22 = vsel %vm234_vm2, %v11616_v23, %v11615_v33  ;;  %v3932_v47 = vsel %vm240_vm4, %v3930_v57, %v9471_v6  ;;  %11617 = vst [vmem:[#allocation44_spill] sm:$0xff] %v9909_v15  ;;  %v11620_v30 = vld [vmem:[#allocation94_spill] sm:$0xff]  ;;  %v11621_v57 = vld [vmem:[#allocation77_spill] sm:$0xff] }
 0x48d   : > { %v3895_v42 = vadd.f32 %v3891_v7, %v3799_v52  ;;  %v3872_v0 = vmul.f32 %v11618_v14, %v3836_v59  ;;  %v3892_v12 = vmul.f32 %v11619_v39, %v3836_v59  ;;  %v3929_v29 = vsel %vm237_vm3, %v3927_v22, %v11620_v30  ;;  %4789 = vrot.lane.b32.xlu1 %v9853_v63, %s11439_s30  ;;  %v9925_v30 = vpop.permute.xlu1 %4205  ;;  %v11624_v15 = vld [vmem:[#allocation96_spill] sm:$0xff] }
 0x48e   : > { %v3850_v41 = vmul.f32 %v11614_v49, %v3835_v51  ;;  %v3870_v23 = vmul.f32 %v11618_v14, %v3835_v51  ;;  %v3890_v20 = vmul.f32 %v11619_v39, %v3835_v51  ;;  %v3931_v33 = vsel %vm240_vm4, %v3929_v29, %v9474_v44  ;;  %4787 = vrot.lane.b32.xlu0 %v9874_v35, %s11439_s30 }
 0x48f   : > { %v3853_v52 = vadd.f32 %v3849_v17, %v3757_v61  ;;  %v3873_v7 = vadd.f32 %v3869_v5, %v3777_v13  ;;  %v3893_v59 = vadd.f32 %v3889_v56, %v3797_v36  ;;  %v3949_v22 = vmul.f32 %v11621_v57, %v3932_v47  ;;  %v9932_v39 = vpop.permute.xlu0 %4203 }
 0x490   : > { %v3856_v9 = vadd.f32 %v3852_v8, %v3760_v34  ;;  %v3969_v49 = vmul.f32 %v11622_v11, %v3932_v47  ;;  %v3989_v14 = vmul.f32 %v11623_v19, %v3932_v47  ;;  %v3934_v51 = vsel %vm243_vm5, %v9471_v6, %v11624_v15  ;;  %v11625_v8 = vld [vmem:[#allocation79_spill] sm:$0xff] }
 0x491   : > { %v3876_v29 = vadd.f32 %v3872_v0, %v3780_v53  ;;  %v3947_v61 = vmul.f32 %v11621_v57, %v3931_v33  ;;  %v3967_v13 = vmul.f32 %v11622_v11, %v3931_v33  ;;  %v3987_v36 = vmul.f32 %v11623_v19, %v3931_v33  ;;  %4795 = vrot.lane.b32.xlu1 %v9853_v63, %s11442_s28  ;;  %v11626_v53 = vld [vmem:[#allocation11_spill] sm:$0xff]  ;;  %v9948_v19 = vpop.permute.xlu1 %4211 }
 0x492   : > { %v3896_v34 = vadd.f32 %v3892_v12, %v3800_v37  ;;  %v3854_v17 = vadd.f32 %v3850_v41, %v3758_v31  ;;  %v3874_v5 = vadd.f32 %v3870_v23, %v3778_v50  ;;  %v3894_v56 = vadd.f32 %v3890_v20, %v3798_v21  ;;  %4793 = vrot.lane.b32.xlu0 %v9874_v35, %s11442_s28  ;;  %v11627_v50 = vld [vmem:[#allocation7_spill] sm:$0xff] }
 0x493   : > { %v3953_v6 = vadd.f32 %v3949_v22, %v3855_v28  ;;  %v3950_v47 = vmul.f32 %v11625_v8, %v3934_v51  ;;  %v3933_v15 = vsel %vm243_vm5, %v9474_v44, %v11626_v53  ;;  %v4026_v11 = vsel %vm234_vm2, %v9527_v26, %v9562_v18  ;;  %v9955_v28 = vpop.permute.xlu0 %4209  ;;  %v11628_v18 = vld [vmem:[#allocation80_spill] sm:$0xff]  ;;  %v11635_v53 = vld [vmem:[#allocation86_spill] sm:$0xff] }
 0x494   : > { %v3973_v37 = vadd.f32 %v3969_v49, %v3875_v4  ;;  %v9950_v31 = vadd.f32 %v3989_v14, %v3895_v42  ;;  %v3970_v21 = vmul.f32 %v11627_v50, %v3934_v51  ;;  %v4028_v12 = vsel %vm237_vm3, %v4026_v11, %v9597_v55  ;;  %v11631_v14 = vld [vmem:[#allocation83_spill] sm:$0xff]  ;;  %v11636_v11 = vld [vmem:[#allocation88_spill] sm:$0xff] }
 0x495   : > { %v9957_v0 = vadd.f32 %v3947_v61, %v3853_v52  ;;  %v9959_v41 = vadd.f32 %v3967_v13, %v3873_v7  ;;  %v9961_v44 = vadd.f32 %v3987_v36, %v3893_v59  ;;  %v4030_v26 = vsel %vm240_vm4, %v4028_v12, %v9627_v3  ;;  %4801 = vrot.lane.b32.xlu1 %v9853_v63, %s11446_s18  ;;  %v11629_v52 = vld [vmem:[#allocation82_spill] sm:$0xff]  ;;  %v11630_v7 = vld [vmem:[#allocation81_spill] sm:$0xff]  ;;  %v4218_v22 = vpop.permute.xlu1 %4217 }
 0x496   : > { %v3990_v4 = vmul.f32 %v11628_v18, %v3934_v51  ;;  %v3948_v42 = vmul.f32 %v11625_v8, %v3933_v15  ;;  %v3968_v55 = vmul.f32 %v11627_v50, %v3933_v15  ;;  %v4032_v23 = vsel %vm243_vm5, %v9627_v3, %v9666_v27  ;;  %4799 = vrot.lane.b32.xlu0 %v9874_v35, %s11446_s18  ;;  %v11632_v3 = vld [vmem:[#allocation13_spill] sm:$0xff]  ;;  %v11633_v61 = vld [vmem:[#allocation14_spill] sm:$0xff]  ;;  %v11634_v8 = vld [vmem:[#allocation84_spill] sm:$0xff] }
 0x497   : > { %v3954_v20 = vadd.f32 %v3950_v47, %v3856_v9  ;;  %v3988_v33 = vmul.f32 %v11628_v18, %v3933_v15  ;;  %v4025_v59 = vsel %vm234_vm2, %v11630_v7, %v11629_v52  ;;  %v4031_v57 = vsel %vm243_vm5, %v9633_v25, %v9672_v1  ;;  %v4216_v9 = vpop.permute.xlu0 %4215  ;;  %v11637_v7 = vld [vmem:[#allocation15_spill] sm:$0xff] }
 0x498   : > { %v3974_v49 = vadd.f32 %v3970_v21, %v3876_v29  ;;  %v4027_v51 = vsel %vm237_vm3, %v4025_v59, %v11631_v14  ;;  %v4047_v27 = vmul.f32 %v11632_v3, %v4030_v26  ;;  %v4067_v13 = vmul.f32 %v11633_v61, %v4030_v26 }
 0x499   : > { %v4029_v36 = vsel %vm240_vm4, %v4027_v51, %v9633_v25  ;;  %v4048_v47 = vmul.f32 %v11634_v8, %v4032_v23  ;;  %v4068_v15 = vmul.f32 %v11635_v53, %v4032_v23  ;;  %v4088_v50 = vmul.f32 %v11636_v11, %v4032_v23  ;;  %4875 = vrot.lane.b32.xlu1 %v9853_v63, %s11447_s0  ;;  %v4296_v23 = vpop.permute.xlu1 %4295 }
 0x49a   : > { %v3994_v1 = vadd.f32 %v3990_v4, %v3896_v34  ;;  %v4046_v29 = vmul.f32 %v11634_v8, %v4031_v57  ;;  %v4066_v21 = vmul.f32 %v11635_v53, %v4031_v57  ;;  %v4086_v12 = vmul.f32 %v11636_v11, %v4031_v57  ;;  %4873 = vrot.lane.b32.xlu0 %v9874_v35, %s11447_s0 }
 0x49b   : > { %v3952_v25 = vadd.f32 %v3948_v42, %v3854_v17  ;;  %v3972_v18 = vadd.f32 %v3968_v55, %v3874_v5  ;;  %v3992_v52 = vadd.f32 %v3988_v33, %v3894_v56  ;;  %v9999_v59 = vmul.f32 %v11637_v7, %v4030_v26  ;;  %v4294_v51 = vpop.permute.xlu0 %4293 }
 0x49c   : > { %v10001_v14 = vadd.f32 %v4047_v27, %v3953_v6  ;;  %v10004_v34 = vmul.f32 %v11632_v3, %v4029_v36  ;;  %v10007_v4 = vmul.f32 %v11633_v61, %v4029_v36  ;;  %v10010_v57 = vmul.f32 %v11637_v7, %v4029_v36 }
 0x49d   : > { %v10012_v8 = vadd.f32 %v4067_v13, %v3973_v37  ;;  %v4052_v17 = vadd.f32 %v4048_v47, %v3954_v20  ;;  %v4072_v5 = vadd.f32 %v4068_v15, %v3974_v49  ;;  %v4092_v56 = vadd.f32 %v4088_v50, %v3994_v1  ;;  %4881 = vrot.lane.b32.xlu1 %v9853_v63, %s11345_s21  ;;  %v5832_v49 = vld [vmem:[#allocation2 + $0xb] sm:$0xf]  ;;  %v4302_v27 = vpop.permute.xlu1 %4301  ;;  %v5833_v13 = vld [vmem:[#allocation2 + $0x3] sm:$0xff]  ;;  %v11639_v47 = vld [vmem:[#allocation91_spill] sm:$0xff] }
 0x49e   : > { %v4050_v6 = vadd.f32 %v4046_v29, %v3952_v25  ;;  %v4070_v26 = vadd.f32 %v4066_v21, %v3972_v18  ;;  %v4090_v42 = vadd.f32 %v4086_v12, %v3992_v52  ;;  %v4130_v55 = vsel %vm243_vm5, %v9796_v54, %v9829_v2  ;;  %4879 = vrot.lane.b32.xlu0 %v9874_v35, %s11345_s21 }
 0x49f   : > { %v4124_v37 = vsel %vm234_vm2, %v9695_v38, %v9723_v24  ;;  %v4123_v20 = vsel %vm234_vm2, %v9702_v32, %v9741_v43  ;;  %v4129_v33 = vsel %vm243_vm5, %v9798_v45, %v9838_v16  ;;  %v4318_v3 = vsel %vm234_vm2, %v5832_v49, %v4296_v23  ;;  %v4300_v32 = vpop.permute.xlu0 %4299  ;;  %v11638_v43 = vld [vmem:[#allocation90_spill] sm:$0xff] }
 0x4a0   : > { %v4126_v2 = vsel %vm237_vm3, %v4124_v37, %v9765_v60  ;;  %v4228_v61 = vsel %vm243_vm5, %v9948_v19, %v4218_v22  ;;  %v4317_v38 = vsel %vm234_vm2, %v5833_v13, %v4294_v51  ;;  %v4320_v24 = vsel %vm237_vm3, %v4318_v3, %v4302_v27  ;;  %v11640_v22 = vld [vmem:[#allocation33_spill] sm:$0xff] }
 0x4a1   : > { %v4146_v36 = vmul.f32 %v11638_v43, %v4130_v55  ;;  %v4166_v16 = vmul.f32 %v11639_v47, %v4130_v55  ;;  %v4227_v53 = vsel %vm243_vm5, %v9955_v28, %v4216_v9  ;;  %v4319_v15 = vsel %vm237_vm3, %v4317_v38, %v4300_v32  ;;  %4887 = vrot.lane.b32.xlu1 %v9853_v63, %s11346_s22  ;;  %v4308_v25 = vpop.permute.xlu1 %4307 }
 0x4a2   : > { %v4128_v60 = vsel %vm240_vm4, %v4126_v2, %v9796_v54  ;;  %v4186_v11 = vmul.f32 %v11640_v22, %v4130_v55  ;;  %v4144_v50 = vmul.f32 %v11638_v43, %v4129_v33  ;;  %v4164_v1 = vmul.f32 %v11639_v47, %v4129_v33  ;;  %4885 = vrot.lane.b32.xlu0 %v9874_v35, %s11346_s22  ;;  %v11641_v54 = vld [vmem:[#allocation101_spill] sm:$0xff]  ;;  %v11642_v55 = vld [vmem:[#allocation87_spill] sm:$0xff]  ;;  %v11645_v47 = vld [vmem:[#allocation116_spill] sm:$0xff] }
 0x4a3   : > { %v4125_v9 = vsel %vm237_vm3, %v4123_v20, %v9774_v58  ;;  %v4184_v29 = vmul.f32 %v11640_v22, %v4129_v33  ;;  %v4244_v21 = vmul.f32 %v9726_v40, %v4228_v61  ;;  %v4264_v12 = vmul.f32 %v9729_v10, %v4228_v61  ;;  %v4306_v51 = vpop.permute.xlu0 %4305 }
 0x4a4   : > { %v4284_v18 = vmul.f32 %v11641_v54, %v4228_v61  ;;  %v4242_v52 = vmul.f32 %v9726_v40, %v4227_v53  ;;  %v4262_v7 = vmul.f32 %v9729_v10, %v4227_v53  ;;  %v10060_v23 = vsel %vm240_vm4, %v4320_v24, %v4308_v25  ;;  %v11643_v10 = vld [vmem:[#allocation111_spill] sm:$0xff] }
 0x4a5   : > { %v4145_v37 = vmul.f32 %v11642_v55, %v4128_v60  ;;  %v4150_v58 = vadd.f32 %v4146_v36, %v4052_v17  ;;  %v4170_v20 = vadd.f32 %v4166_v16, %v4072_v5  ;;  %v10064_v33 = vsel %vm240_vm4, %v4319_v15, %v4306_v51  ;;  %4893 = vrot.lane.b32.xlu1 %v9853_v63, %s11018_s9  ;;  %v4314_v5 = vpop.permute.xlu1 %4313 }
 0x4a6   : > { %v4190_v49 = vadd.f32 %v4186_v11, %v4092_v56  ;;  %v4148_v3 = vadd.f32 %v4144_v50, %v4050_v6  ;;  %v4168_v27 = vadd.f32 %v4164_v1, %v4070_v26  ;;  %v4282_v40 = vmul.f32 %v11641_v54, %v4227_v53  ;;  %4891 = vrot.lane.b32.xlu0 %v9874_v35, %s11018_s9  ;;  %v11644_v6 = vld [vmem:[#allocation115_spill] sm:$0xff] }
 0x4a7   : > { %v4165_v2 = vmul.f32 %v11643_v10, %v4128_v60  ;;  %v4188_v61 = vadd.f32 %v4184_v29, %v4090_v42  ;;  %v4248_v13 = vadd.f32 %v4244_v21, %v4150_v58  ;;  %v4268_v17 = vadd.f32 %v4264_v12, %v4170_v20  ;;  %v4312_v36 = vpop.permute.xlu0 %4311  ;;  %v11648_v58 = vld [vmem:[#allocation38_spill] sm:$0xff] }
 0x4a8   : > { %v4288_v38 = vadd.f32 %v4284_v18, %v4190_v49  ;;  %v4246_v24 = vadd.f32 %v4242_v52, %v4148_v3  ;;  %v4266_v32 = vadd.f32 %v4262_v7, %v4168_v27  ;;  %v4324_v43 = vsel %vm243_vm5, %v4308_v25, %v4314_v5  ;;  %v11652_v5 = vld [vmem:[#allocation100_spill] sm:$0xff] }
 0x4a9   : > { %v4340_v56 = vmul.f32 %v9801_v48, %v4324_v43  ;;  %v4360_v26 = vmul.f32 %v11644_v6, %v4324_v43  ;;  %v4380_v16 = vmul.f32 %v11645_v47, %v4324_v43  ;;  %v4323_v53 = vsel %vm243_vm5, %v4306_v51, %v4312_v36  ;;  %4899 = vrot.lane.b32.xlu1 %v9853_v63, %s11027_s10  ;;  %v4388_v12 = vpop.permute.xlu1 %4387  ;;  %v11647_v51 = vld [vmem:[#allocation44_spill] sm:$0xff]  ;;  %v11654_v36 = vld [vmem:[#allocation97_spill] sm:$0xff] }
 0x4aa   : > { %v4286_v42 = vadd.f32 %v4282_v40, %v4188_v61  ;;  %v4338_v15 = vmul.f32 %v9801_v48, %v4323_v53  ;;  %v4358_v22 = vmul.f32 %v11644_v6, %v4323_v53  ;;  %v4378_v11 = vmul.f32 %v11645_v47, %v4323_v53  ;;  %4897 = vrot.lane.b32.xlu0 %v9874_v35, %s11027_s10 }
 0x4ab   : > { %v4127_v50 = vsel %vm240_vm4, %v4125_v9, %v9798_v45  ;;  %v10086_v1 = vadd.f32 %v4340_v56, %v4248_v13  ;;  %v10088_v29 = vadd.f32 %v4360_v26, %v4268_v17  ;;  %v10090_v21 = vadd.f32 %v4380_v16, %v4288_v38  ;;  %v4386_v52 = vpop.permute.xlu0 %4385  ;;  %v11646_v9 = vld [vmem:[#allocation89_spill] sm:$0xff]  ;;  %v11650_v13 = vld [vmem:[#allocation122_spill] sm:$0xff] }
 0x4ac   : > { %v4222_v48 = vsel %vm234_vm2, %v9865_v62, %v9901_v46  ;;  %v10095_v25 = vadd.f32 %v4338_v15, %v4246_v24  ;;  %v10097_v54 = vadd.f32 %v4358_v22, %v4266_v32  ;;  %v10099_v18 = vadd.f32 %v4378_v11, %v4286_v42  ;;  %v11653_v24 = vld [vmem:[#allocation23_spill] sm:$0xff] }
 0x4ad   : > { %v4091_v45 = vadd.f32 %v9999_v59, %v9950_v31  ;;  %v4185_v7 = vmul.f32 %v11646_v9, %v4128_v60  ;;  %v4221_v20 = vsel %vm234_vm2, %v11648_v58, %v11647_v51  ;;  %v4224_v49 = vsel %vm237_vm3, %v4222_v48, %v9925_v30  ;;  %4973 = vrot.lane.b32.xlu1 %v9853_v63, %s11036_s13  ;;  %v11656_v51 = vld [vmem:[#allocation103_spill] sm:$0xff] }
 0x4ae   : > { %v4049_v46 = vadd.f32 %v10004_v34, %v9957_v0  ;;  %v4143_v62 = vmul.f32 %v11642_v55, %v4127_v50  ;;  %v4223_v31 = vsel %vm237_vm3, %v4221_v20, %v9932_v39  ;;  %v4226_v59 = vsel %vm240_vm4, %v4224_v49, %v9948_v19  ;;  %4971 = vrot.lane.b32.xlu0 %v9874_v35, %s11036_s13  ;;  %v4394_v34 = vpop.permute.xlu1 %4393 }
 0x4af   : > { %v4069_v30 = vadd.f32 %v10007_v4, %v9959_v41  ;;  %v4089_v60 = vadd.f32 %v10010_v57, %v9961_v44  ;;  %v4163_v3 = vmul.f32 %v11643_v10, %v4127_v50  ;;  %v4225_v0 = vsel %vm240_vm4, %v4223_v31, %v9955_v28  ;;  %v4392_v40 = vpop.permute.xlu0 %4391  ;;  %v11649_v41 = vld [vmem:[#allocation34_spill] sm:$0xff]  ;;  %v11651_v10 = vld [vmem:[#allocation32_spill] sm:$0xff] }
 0x4b0   : > { %v4149_v39 = vadd.f32 %v4145_v37, %v10001_v14  ;;  %v4169_v55 = vadd.f32 %v4165_v2, %v10012_v8  ;;  %v4183_v19 = vmul.f32 %v11646_v9, %v4127_v50  ;;  %v4416_v27 = vsel %vm234_vm2, %v4388_v12, %v4394_v34 }
 0x4b1   : > { %v4189_v61 = vadd.f32 %v4185_v7, %v4091_v45  ;;  %v4243_v4 = vmul.f32 %v11649_v41, %v4226_v59  ;;  %v4263_v44 = vmul.f32 %v11650_v13, %v4226_v59  ;;  %v4415_v57 = vsel %vm234_vm2, %v4386_v52, %v4392_v40  ;;  %4979 = vrot.lane.b32.xlu1 %v9853_v63, %s11045_s16  ;;  %v11655_v7 = vld [vmem:[#allocation99_spill] sm:$0xff] }
 0x4b2   : > { %v4147_v28 = vadd.f32 %v4143_v62, %v4049_v46  ;;  %v4283_v14 = vmul.f32 %v11651_v10, %v4226_v59  ;;  %v4241_v8 = vmul.f32 %v11649_v41, %v4225_v0  ;;  %v4261_v37 = vmul.f32 %v11650_v13, %v4225_v0  ;;  %4977 = vrot.lane.b32.xlu0 %v9874_v35, %s11045_s16  ;;  %v4400_v43 = vpop.permute.xlu1 %4399  ;;  %v11657_v59 = vld [vmem:[#allocation102_spill] sm:$0xff] }
 0x4b3   : > { %v4167_v2 = vadd.f32 %v4163_v3, %v4069_v30  ;;  %v4281_v17 = vmul.f32 %v11651_v10, %v4225_v0  ;;  %v4339_v38 = vmul.f32 %v11652_v5, %v10060_v23  ;;  %v4359_v32 = vmul.f32 %v11653_v24, %v10060_v23  ;;  %v4398_v16 = vpop.permute.xlu0 %4397  ;;  %v11659_v3 = vld [vmem:[#allocation37_spill] sm:$0xff] }
 0x4b4   : > { %v4379_v56 = vmul.f32 %v11654_v36, %v10060_v23  ;;  %v4337_v6 = vmul.f32 %v11652_v5, %v10064_v33  ;;  %v4357_v26 = vmul.f32 %v11653_v24, %v10064_v33  ;;  %v4418_v47 = vsel %vm237_vm3, %v4416_v27, %v4400_v43 }
 0x4b5   : > { %v4187_v53 = vadd.f32 %v4183_v19, %v4089_v60  ;;  %v4247_v42 = vadd.f32 %v4243_v4, %v4149_v39  ;;  %v4267_v15 = vadd.f32 %v4263_v44, %v4169_v55  ;;  %v4417_v22 = vsel %vm237_vm3, %v4415_v57, %v4398_v16  ;;  %4985 = vrot.lane.b32.xlu1 %v9853_v63, %s11060_s17  ;;  %v11658_v60 = vld [vmem:[#allocation36_spill] sm:$0xff] }
 0x4b6   : > { %v4287_v11 = vadd.f32 %v4283_v14, %v4189_v61  ;;  %v4245_v50 = vadd.f32 %v4241_v8, %v4147_v28  ;;  %v4265_v23 = vadd.f32 %v4261_v37, %v4167_v2  ;;  %v4377_v12 = vmul.f32 %v11654_v36, %v10064_v33  ;;  %4983 = vrot.lane.b32.xlu0 %v9874_v35, %s11060_s17  ;;  %v4406_v9 = vpop.permute.xlu1 %4405  ;;  %v11660_v14 = vld [vmem:[#allocation24_spill] sm:$0xff]  ;;  %v11661_v37 = vld [vmem:[#allocation118_spill] sm:$0xff] }
 0x4b7   : > { %v4285_v48 = vadd.f32 %v4281_v17, %v4187_v53  ;;  %v4343_v52 = vadd.f32 %v4339_v38, %v4247_v42  ;;  %v4363_v45 = vadd.f32 %v4359_v32, %v4267_v15  ;;  %v4472_v58 = vrot.slane %v11656_v51, %v11655_v7  ;;  %v4404_v31 = vpop.permute.xlu0 %4403 }
 0x4b8   : > { %v4383_v20 = vadd.f32 %v4379_v56, %v4287_v11  ;;  %v4341_v49 = vadd.f32 %v4337_v6, %v4245_v50  ;;  %v4361_v46 = vadd.f32 %v4357_v26, %v4265_v23  ;;  %v4420_v62 = vsel %vm240_vm4, %v4418_v47, %v4406_v9  ;;  %v11662_v23 = vld [vmem:[#allocation98_spill] sm:$0xff] }
 0x4b9   : > { %v4437_v30 = vmul.f32 %v11657_v59, %v4420_v62  ;;  %v4457_v33 = vmul.f32 %v11658_v60, %v4420_v62  ;;  %v4477_v0 = vmul.f32 %v11659_v3, %v4420_v62  ;;  %v4419_v34 = vsel %vm240_vm4, %v4417_v22, %v4404_v31  ;;  %4991 = vrot.lane.b32.xlu1 %v9853_v63, %s11070_s7 }
 0x4ba   : > { %v4381_v39 = vadd.f32 %v4377_v12, %v4285_v48  ;;  %v4435_v55 = vmul.f32 %v11657_v59, %v4419_v34  ;;  %v4455_v19 = vmul.f32 %v11658_v60, %v4419_v34  ;;  %v4475_v27 = vmul.f32 %v11659_v3, %v4419_v34  ;;  %4989 = vrot.lane.b32.xlu0 %v9874_v35, %s11070_s7  ;;  %v4412_v4 = vpop.permute.xlu1 %4411 }
 0x4bb   : > { %v4441_v40 = vadd.f32 %v4437_v30, %v4343_v52  ;;  %v4461_v61 = vadd.f32 %v4457_v33, %v4363_v45  ;;  %v4481_v41 = vadd.f32 %v4477_v0, %v4383_v20  ;;  %v4422_v28 = vsel %vm243_vm5, %v4406_v9, %v4412_v4  ;;  %v4410_v10 = vpop.permute.xlu0 %4409 }
 0x4bc   : > { %v4439_v13 = vadd.f32 %v4435_v55, %v4341_v49  ;;  %v4459_v44 = vadd.f32 %v4455_v19, %v4361_v46  ;;  %v4479_v57 = vadd.f32 %v4475_v27, %v4381_v39  ;;  %v4438_v8 = vmul.f32 %v11660_v14, %v4422_v28 }
 0x4bd   : > { %v4458_v2 = vmul.f32 %v11661_v37, %v4422_v28  ;;  %v4478_v17 = vmul.f32 %v4472_v58, %v4422_v28  ;;  %v4421_v5 = vsel %vm243_vm5, %v4404_v31, %v4410_v10  ;;  %4997 = vrot.lane.b32.xlu1 %v9853_v63, %s11077_s11 }
 0x4be   : > { %v4436_v38 = vmul.f32 %v11660_v14, %v4421_v5  ;;  %v4456_v24 = vmul.f32 %v11661_v37, %v4421_v5  ;;  %v4476_v32 = vmul.f32 %v4472_v58, %v4421_v5  ;;  %4995 = vrot.lane.b32.xlu0 %v9874_v35, %s11077_s11  ;;  %v4442_v43 = vadd.f32 %v4438_v8, %v10086_v1  ;;  %v4486_v6 = vpop.permute.xlu1 %4485 }
 0x4bf   : > { %v4462_v36 = vadd.f32 %v4458_v2, %v10088_v29  ;;  %v4482_v56 = vadd.f32 %v4478_v17, %v10090_v21  ;;  %v4484_v53 = vpop.permute.xlu0 %4483 }
 0x4c0   : > { %v4440_v26 = vadd.f32 %v4436_v38, %v10095_v25  ;;  %v4460_v47 = vadd.f32 %v4456_v24, %v10097_v54  ;;  %v4480_v16 = vadd.f32 %v4476_v32, %v10099_v18  ;;  %v5630_v25 = vld [vmem:[%s10567_s1 + $0x21] ss:$8 sm:$0x3] }
 0x4c1   : > { %5071 = vrot.lane.b32.xlu1 %v9853_v63, %s11086_s8  ;;  %v5631_v54 = vld [vmem:[%s10567_s1 + $0x61] ss:$8 sm:$0x3]  ;;  %v4526_v12 = vrot.slane %v5630_v25, %v11662_v23  ;;  %v4530_v58 = vrot.slane %v5630_v25, %v11655_v7 }
 0x4c2   : > { %5069 = vrot.lane.b32.xlu0 %v9874_v35, %s11086_s8  ;;  %v4492_v42 = vpop.permute.xlu1 %4491  ;;  %v5632_v18 = vld [vmem:[%s10567_s1 + $0xa1] ss:$8 sm:$0x3]  ;;  %v4546_v48 = vrot.slane %v5631_v54, %v11662_v23  ;;  %v4550_v20 = vrot.slane %v5631_v54, %v11655_v7 }
 0x4c3   : > { %v4514_v1 = vsel %vm234_vm2, %v4486_v6, %v4492_v42  ;;  %v4490_v29 = vpop.permute.xlu0 %4489  ;;  %v4566_v52 = vrot.slane %v5632_v18, %v11662_v23  ;;  %v4570_v49 = vrot.slane %v5632_v18, %v11655_v7 }
 0x4c4   : > { %v4513_v21 = vsel %vm234_vm2, %v4484_v53, %v4490_v29 }
 0x4c5   : > { %5077 = vrot.lane.b32.xlu1 %v9853_v63, %s11093_s5 }
 0x4c6   : > { %5075 = vrot.lane.b32.xlu0 %v9874_v35, %s11093_s5  ;;  %v4498_v15 = vpop.permute.xlu1 %4497 }
 0x4c7   : > { %v4516_v22 = vsel %vm237_vm3, %v4514_v1, %v4498_v15  ;;  %v4496_v11 = vpop.permute.xlu0 %4495 }
 0x4c8   : > { %v4515_v50 = vsel %vm237_vm3, %v4513_v21, %v4496_v11 }
 0x4c9   : > { %5083 = vrot.lane.b32.xlu1 %v9853_v63, %s11100_s15 }
 0x4ca   : > { %5081 = vrot.lane.b32.xlu0 %v9874_v35, %s11100_s15  ;;  %v4504_v45 = vpop.permute.xlu1 %4503 }
 0x4cb   : > { %v4518_v9 = vsel %vm240_vm4, %v4516_v22, %v4504_v45  ;;  %v4502_v51 = vpop.permute.xlu0 %4501 }
 0x4cc   : > { %v4535_v46 = vmul.f32 %v4526_v12, %v4518_v9  ;;  %v4555_v62 = vmul.f32 %v4546_v48, %v4518_v9  ;;  %v4575_v31 = vmul.f32 %v4566_v52, %v4518_v9  ;;  %v4517_v59 = vsel %vm240_vm4, %v4515_v50, %v4502_v51 }
 0x4cd   : > { %5089 = vrot.lane.b32.xlu1 %v9853_v63, %s11559_s2  ;;  %v4533_v30 = vmul.f32 %v4526_v12, %v4517_v59  ;;  %v4553_v60 = vmul.f32 %v4546_v48, %v4517_v59  ;;  %v4573_v33 = vmul.f32 %v4566_v52, %v4517_v59 }
 0x4ce   : > { %5087 = vrot.lane.b32.xlu0 %v9874_v35, %s11559_s2  ;;  %v4539_v3 = vadd.f32 %v4535_v46, %v4441_v40  ;;  %v4559_v0 = vadd.f32 %v4555_v62, %v4461_v61  ;;  %v4579_v34 = vadd.f32 %v4575_v31, %v4481_v41  ;;  %v4510_v39 = vpop.permute.xlu1 %4509 }
 0x4cf   : > { %v4537_v55 = vadd.f32 %v4533_v30, %v4439_v13  ;;  %v4557_v19 = vadd.f32 %v4553_v60, %v4459_v44  ;;  %v4577_v27 = vadd.f32 %v4573_v33, %v4479_v57  ;;  %v4520_v4 = vsel %vm243_vm5, %v4504_v45, %v4510_v39  ;;  %v4508_v28 = vpop.permute.xlu0 %4507 }
 0x4d0   : > { %v4536_v10 = vmul.f32 %v4530_v58, %v4520_v4  ;;  %v4556_v14 = vmul.f32 %v4550_v20, %v4520_v4  ;;  %v4576_v8 = vmul.f32 %v4570_v49, %v4520_v4  ;;  %v4519_v37 = vsel %vm243_vm5, %v4502_v51, %v4508_v28 }
 0x4d1   : > { %5095 = vrot.lane.b32.xlu1 %v9853_v63, %s11570_s3  ;;  %v4534_v2 = vmul.f32 %v4530_v58, %v4519_v37  ;;  %v4554_v17 = vmul.f32 %v4550_v20, %v4519_v37  ;;  %v4574_v40 = vmul.f32 %v4570_v49, %v4519_v37 }
 0x4d2   : > { %5093 = vrot.lane.b32.xlu0 %v9874_v35, %s11570_s3  ;;  %v4540_v61 = vadd.f32 %v4536_v10, %v4442_v43  ;;  %v4560_v41 = vadd.f32 %v4556_v14, %v4462_v36  ;;  %v4580_v13 = vadd.f32 %v4576_v8, %v4482_v56  ;;  %v4584_v44 = vpop.permute.xlu1 %4583  ;;  %v5633_v43 = vld [vmem:[%s10567_s1 + $0x22] ss:$8 sm:$0x3] }
 0x4d3   : > { %v4538_v57 = vadd.f32 %v4534_v2, %v4440_v26  ;;  %v4558_v5 = vadd.f32 %v4554_v17, %v4460_v47  ;;  %v4578_v38 = vadd.f32 %v4574_v40, %v4480_v16  ;;  %v4582_v24 = vpop.permute.xlu0 %4581  ;;  %v5634_v36 = vld [vmem:[%s10567_s1 + $0x62] ss:$8 sm:$0x3]  ;;  %v4624_v29 = vrot.slane %v5633_v43, %v11662_v23 }
 0x4d4   : > { %v5635_v56 = vld [vmem:[%s10567_s1 + $0xa2] ss:$8 sm:$0x3]  ;;  %v4644_v21 = vrot.slane %v5634_v36, %v11662_v23  ;;  %v4628_v22 = vrot.slane %v5633_v43, %v11655_v7  ;;  %v4648_v11 = vrot.slane %v5634_v36, %v11655_v7 }
 0x4d5   : > { %5169 = vrot.lane.b32.xlu1 %v9853_v63, %s11347_s6  ;;  %v4664_v25 = vrot.slane %v5635_v56, %v11662_v23  ;;  %v4668_v50 = vrot.slane %v5635_v56, %v11655_v7 }
 0x4d6   : > { %5167 = vrot.lane.b32.xlu0 %v9874_v35, %s11347_s6  ;;  %v4590_v32 = vpop.permute.xlu1 %4589 }
 0x4d7   : > { %v4612_v6 = vsel %vm234_vm2, %v4584_v44, %v4590_v32  ;;  %v4588_v53 = vpop.permute.xlu0 %4587 }
 0x4d8   : > { %v4611_v42 = vsel %vm234_vm2, %v4582_v24, %v4588_v53 }
 0x4d9   : > { %5175 = vrot.lane.b32.xlu1 %v9853_v63, %s11348_s14 }
 0x4da   : > { %5173 = vrot.lane.b32.xlu0 %v9874_v35, %s11348_s14  ;;  %v4596_v26 = vpop.permute.xlu1 %4595 }
 0x4db   : > { %v4614_v47 = vsel %vm237_vm3, %v4612_v6, %v4596_v26  ;;  %v4594_v16 = vpop.permute.xlu0 %4593  ;;  %v5636_v6 = vld [vmem:[%s10567_s1 + $0x23] ss:$8 sm:$0x3] }
 0x4dc   : > { %v4613_v1 = vsel %vm237_vm3, %v4611_v42, %v4594_v16  ;;  %v4722_v53 = vrot.slane %v5636_v6, %v11662_v23 }
 0x4dd   : > { %5181 = vrot.lane.b32.xlu1 %v9853_v63, %s11405_s26 }
 0x4de   : > { %5179 = vrot.lane.b32.xlu0 %v9874_v35, %s11405_s26  ;;  %v4602_v54 = vpop.permute.xlu1 %4601 }
 0x4df   : > { %v4616_v18 = vsel %vm240_vm4, %v4614_v47, %v4602_v54  ;;  %v4600_v15 = vpop.permute.xlu0 %4599  ;;  %v4726_v47 = vrot.slane %v5636_v6, %v11655_v7 }
 0x4e0   : > { %v4633_v12 = vmul.f32 %v4624_v29, %v4616_v18  ;;  %v4653_v48 = vmul.f32 %v4644_v21, %v4616_v18  ;;  %v4673_v52 = vmul.f32 %v4664_v25, %v4616_v18  ;;  %v4615_v45 = vsel %vm240_vm4, %v4613_v1, %v4600_v15 }
 0x4e1   : > { %5187 = vrot.lane.b32.xlu1 %v9853_v63, %s11410_s4  ;;  %v4631_v9 = vmul.f32 %v4624_v29, %v4615_v45  ;;  %v4651_v51 = vmul.f32 %v4644_v21, %v4615_v45  ;;  %v4671_v58 = vmul.f32 %v4664_v25, %v4615_v45 }
 0x4e2   : > { %5185 = vrot.lane.b32.xlu0 %v9874_v35, %s11410_s4  ;;  %v4637_v20 = vadd.f32 %v4633_v12, %v4539_v3  ;;  %v4657_v49 = vadd.f32 %v4653_v48, %v4559_v0  ;;  %v4677_v46 = vadd.f32 %v4673_v52, %v4579_v34  ;;  %v4608_v62 = vpop.permute.xlu1 %4607 }
 0x4e3   : > { %v4635_v31 = vadd.f32 %v4631_v9, %v4537_v55  ;;  %v4655_v59 = vadd.f32 %v4651_v51, %v4557_v19  ;;  %v4675_v30 = vadd.f32 %v4671_v58, %v4577_v27  ;;  %v4618_v60 = vsel %vm243_vm5, %v4602_v54, %v4608_v62  ;;  %v4606_v33 = vpop.permute.xlu0 %4605 }
 0x4e4   : > { %v4634_v39 = vmul.f32 %v4628_v22, %v4618_v60  ;;  %v4654_v4 = vmul.f32 %v4648_v11, %v4618_v60  ;;  %v4674_v28 = vmul.f32 %v4668_v50, %v4618_v60  ;;  %v4617_v10 = vsel %vm243_vm5, %v4600_v15, %v4606_v33 }
 0x4e5   : > { %5193 = vrot.lane.b32.xlu1 %v9853_v63, %s11423_s19  ;;  %v4632_v14 = vmul.f32 %v4628_v22, %v4617_v10  ;;  %v4652_v8 = vmul.f32 %v4648_v11, %v4617_v10  ;;  %v4672_v3 = vmul.f32 %v4668_v50, %v4617_v10 }
 0x4e6   : > { %5191 = vrot.lane.b32.xlu0 %v9874_v35, %s11423_s19  ;;  %v4638_v0 = vadd.f32 %v4634_v39, %v4540_v61  ;;  %v4658_v34 = vadd.f32 %v4654_v4, %v4560_v41  ;;  %v4678_v55 = vadd.f32 %v4674_v28, %v4580_v13  ;;  %v4682_v19 = vpop.permute.xlu1 %4681  ;;  %v5637_v61 = vld [vmem:[%s10567_s1 + $0x63] ss:$8 sm:$0x3] }
 0x4e7   : > { %v4636_v27 = vadd.f32 %v4632_v14, %v4538_v57  ;;  %v4656_v37 = vadd.f32 %v4652_v8, %v4558_v5  ;;  %v4676_v2 = vadd.f32 %v4672_v3, %v4578_v38  ;;  %v4680_v17 = vpop.permute.xlu0 %4679  ;;  %v5638_v41 = vld [vmem:[%s10567_s1 + $0xa3] ss:$8 sm:$0x3]  ;;  %v4742_v42 = vrot.slane %v5637_v61, %v11662_v23 }
 0x4e8   : > { %v4762_v43 = vrot.slane %v5638_v41, %v11662_v23  ;;  %v4746_v16 = vrot.slane %v5637_v61, %v11655_v7  ;;  %v4766_v1 = vrot.slane %v5638_v41, %v11655_v7 }
 0x4ea   : > { %v4688_v40 = vpop.permute.xlu1 %4687 }
 0x4eb   : > { %v4710_v44 = vsel %vm234_vm2, %v4682_v19, %v4688_v40  ;;  %v4686_v24 = vpop.permute.xlu0 %4685  ;;  %v5640_v19 = vld [vmem:[%s10567_s1 + $0x64] ss:$8 sm:$0x3] }
 0x4ec   : > { %v4709_v32 = vsel %vm234_vm2, %v4680_v17, %v4686_v24  ;;  %v5641_v17 = vld [vmem:[%s10567_s1 + $0xa4] ss:$8 sm:$0x3]  ;;  %v4842_v41 = vrot.slane %v5640_v19, %v11655_v7 }
 0x4ed   : > { %v4858_v24 = vrot.slane %v5641_v17, %v11662_v23 }
 0x4ee   : > { %v4694_v13 = vpop.permute.xlu1 %4693 }
 0x4ef   : > { %v4712_v57 = vsel %vm237_vm3, %v4710_v44, %v4694_v13  ;;  %v4692_v5 = vpop.permute.xlu0 %4691  ;;  %v4838_v44 = vrot.slane %v5640_v19, %v11662_v23 }
 0x4f0   : > { %v4711_v38 = vsel %vm237_vm3, %v4709_v32, %v4692_v5 }
 0x4f2   : > { %v4700_v36 = vpop.permute.xlu1 %4699 }
 0x4f3   : > { %v4714_v56 = vsel %vm240_vm4, %v4712_v57, %v4700_v36  ;;  %v4698_v26 = vpop.permute.xlu0 %4697 }
 0x4f4   : > { %v4731_v29 = vmul.f32 %v4722_v53, %v4714_v56  ;;  %v4751_v21 = vmul.f32 %v4742_v42, %v4714_v56  ;;  %v4771_v25 = vmul.f32 %v4762_v43, %v4714_v56  ;;  %v4713_v54 = vsel %vm240_vm4, %v4711_v38, %v4698_v26 }
 0x4f5   : > { %v4729_v18 = vmul.f32 %v4722_v53, %v4713_v54  ;;  %v4749_v15 = vmul.f32 %v4742_v42, %v4713_v54  ;;  %v4769_v22 = vmul.f32 %v4762_v43, %v4713_v54 }
 0x4f6   : > { %v4735_v11 = vadd.f32 %v4731_v29, %v4637_v20  ;;  %v4755_v50 = vadd.f32 %v4751_v21, %v4657_v49  ;;  %v4775_v12 = vadd.f32 %v4771_v25, %v4677_v46  ;;  %v4706_v48 = vpop.permute.xlu1 %4705 }
 0x4f7   : > { %v4733_v52 = vadd.f32 %v4729_v18, %v4635_v31  ;;  %v4753_v45 = vadd.f32 %v4749_v15, %v4655_v59  ;;  %v4773_v9 = vadd.f32 %v4769_v22, %v4675_v30  ;;  %v4716_v51 = vsel %vm243_vm5, %v4700_v36, %v4706_v48  ;;  %v4704_v58 = vpop.permute.xlu0 %4703  ;;  %v5639_v30 = vld [vmem:[%s10567_s1 + $0x24] ss:$8 sm:$0x3] }
 0x4f8   : > { %v4732_v62 = vmul.f32 %v4726_v47, %v4716_v51  ;;  %v4752_v60 = vmul.f32 %v4746_v16, %v4716_v51  ;;  %v4772_v33 = vmul.f32 %v4766_v1, %v4716_v51  ;;  %v4715_v39 = vsel %vm243_vm5, %v4698_v26, %v4704_v58 }
 0x4f9   : > { %v4730_v4 = vmul.f32 %v4726_v47, %v4715_v39  ;;  %v4750_v28 = vmul.f32 %v4746_v16, %v4715_v39  ;;  %v4770_v10 = vmul.f32 %v4766_v1, %v4715_v39  ;;  %v4818_v40 = vrot.slane %v5639_v30, %v11662_v23 }
 0x4fa   : > { %v4736_v14 = vadd.f32 %v4732_v62, %v4638_v0  ;;  %v4756_v8 = vadd.f32 %v4752_v60, %v4658_v34  ;;  %v4776_v20 = vadd.f32 %v4772_v33, %v4678_v55 }
 0x4fb   : > { %v4784_v49 = vpop.permute.xlu1 %4783  ;;  %v4734_v46 = vadd.f32 %v4730_v4, %v4636_v27  ;;  %v4754_v3 = vadd.f32 %v4750_v28, %v4656_v37  ;;  %v4774_v31 = vadd.f32 %v4770_v10, %v4676_v2  ;;  %v5642_v4 = vld [vmem:[%s10567_s1 + $0x25] ss:$8 sm:$0x3] }
 0x4fc   : > { %v4782_v59 = vpop.permute.xlu0 %4781  ;;  %v4806_v0 = vsel %vm234_vm2, %v9853_v63, %v4784_v49  ;;  %v4822_v63 = vrot.slane %v5639_v30, %v11655_v7  ;;  %v5643_v28 = vld [vmem:[%s10567_s1 + $0x65] ss:$8 sm:$0x3] }
 0x4fd   : > { %v4805_v55 = vsel %vm234_vm2, %v9874_v35, %v4782_v59  ;;  %v4862_v35 = vrot.slane %v5641_v17, %v11655_v7  ;;  %v5644_v10 = vld [vmem:[%s10567_s1 + $0xa5] ss:$8 sm:$0x3]  ;;  %v4936_v49 = vrot.slane %v5643_v28, %v11662_v23 }
 0x4ff   : > { %v4790_v34 = vpop.permute.xlu1 %4789 }
 0x500   : > { %v4808_v27 = vsel %vm237_vm3, %v4806_v0, %v4790_v34  ;;  %v4788_v37 = vpop.permute.xlu0 %4787 }
 0x501   : > { %v4807_v2 = vsel %vm237_vm3, %v4805_v55, %v4788_v37 }
 0x503   : > { %v4796_v32 = vpop.permute.xlu1 %4795 }
 0x504   : > { %v4810_v6 = vsel %vm240_vm4, %v4808_v27, %v4796_v32  ;;  %v4794_v61 = vpop.permute.xlu0 %4793 }
 0x505   : > { %v4827_v13 = vmul.f32 %v4818_v40, %v4810_v6  ;;  %v4847_v57 = vmul.f32 %v4838_v44, %v4810_v6  ;;  %v4867_v5 = vmul.f32 %v4858_v24, %v4810_v6  ;;  %v4809_v38 = vsel %vm240_vm4, %v4807_v2, %v4794_v61 }
 0x506   : > { %v4825_v53 = vmul.f32 %v4818_v40, %v4809_v38  ;;  %v4845_v42 = vmul.f32 %v4838_v44, %v4809_v38  ;;  %v4865_v43 = vmul.f32 %v4858_v24, %v4809_v38 }
 0x507   : > { %v4831_v36 = vadd.f32 %v4827_v13, %v4735_v11  ;;  %v4851_v56 = vadd.f32 %v4847_v57, %v4755_v50  ;;  %v4871_v26 = vadd.f32 %v4867_v5, %v4775_v12  ;;  %v4802_v47 = vpop.permute.xlu1 %4801 }
 0x508   : > { %v4829_v16 = vadd.f32 %v4825_v53, %v4733_v52  ;;  %v4849_v1 = vadd.f32 %v4845_v42, %v4753_v45  ;;  %v4869_v29 = vadd.f32 %v4865_v43, %v4773_v9  ;;  %v4812_v21 = vsel %vm243_vm5, %v4796_v32, %v4802_v47  ;;  %v4800_v25 = vpop.permute.xlu0 %4799 }
 0x509   : > { %v4828_v54 = vmul.f32 %v4822_v63, %v4812_v21  ;;  %v4848_v18 = vmul.f32 %v4842_v41, %v4812_v21  ;;  %v4868_v15 = vmul.f32 %v4862_v35, %v4812_v21  ;;  %v4811_v22 = vsel %vm243_vm5, %v4794_v61, %v4800_v25  ;;  %v5645_v21 = vld [vmem:[%s10567_s1 + $0x26] ss:$8 sm:$0x3] }
 0x50a   : > { %v4826_v48 = vmul.f32 %v4822_v63, %v4811_v22  ;;  %v4846_v51 = vmul.f32 %v4842_v41, %v4811_v22  ;;  %v4866_v58 = vmul.f32 %v4862_v35, %v4811_v22  ;;  %v4920_v22 = vrot.slane %v5642_v4, %v11655_v7 }
 0x50b   : > { %v10324_v62 = vadd.f32 %v4828_v54, %v4736_v14  ;;  %v10326_v11 = vadd.f32 %v4848_v18, %v4756_v8  ;;  %v10328_v50 = vadd.f32 %v4868_v15, %v4776_v20  ;;  %v4876_v12 = vpop.permute.xlu1 %4875  ;;  %v4916_v20 = vrot.slane %v5642_v4, %v11662_v23  ;;  %v5646_v54 = vld [vmem:[%s10567_s1 + $0x66] ss:$8 sm:$0x3]  ;;  %v5648_v15 = vld [vmem:[%s10567_s1 + $0x27] ss:$8 sm:$0x3] }
 0x50c   : > { %v10330_v52 = vadd.f32 %v4826_v48, %v4734_v46  ;;  %v10332_v45 = vadd.f32 %v4846_v51, %v4754_v3  ;;  %v10334_v9 = vadd.f32 %v4866_v58, %v4774_v31  ;;  %v4874_v60 = vpop.permute.xlu0 %4873  ;;  %v4956_v46 = vrot.slane %v5644_v10, %v11662_v23  ;;  %v5647_v18 = vld [vmem:[%s10567_s1 + $0xa6] ss:$8 sm:$0x3]  ;;  %v5649_v58 = vld [vmem:[%s10567_s1 + $0x67] ss:$8 sm:$0x3] }
 0x50d   : > { %v4940_v48 = vrot.slane %v5643_v28, %v11655_v7  ;;  %v5054_v4 = vrot.slane %v5647_v18, %v11662_v23 }
 0x50f   : > { %v4882_v33 = vpop.permute.xlu1 %4881 }
 0x510   : > { %v4880_v39 = vpop.permute.xlu0 %4879  ;;  %v4904_v3 = vsel %vm234_vm2, %v4876_v12, %v4882_v33  ;;  %v5650_v12 = vld [vmem:[%s10567_s1 + $0xa7] ss:$8 sm:$0x3]  ;;  %v5014_v33 = vrot.slane %v5645_v21, %v11662_v23 }
 0x511   : > { %v4903_v31 = vsel %vm234_vm2, %v4874_v60, %v4880_v39  ;;  %v4960_v60 = vrot.slane %v5644_v10, %v11655_v7  ;;  %v5034_v39 = vrot.slane %v5646_v54, %v11662_v23 }
 0x513   : > { %v4888_v14 = vpop.permute.xlu1 %4887 }
 0x514   : > { %v4886_v8 = vpop.permute.xlu0 %4885  ;;  %v4906_v59 = vsel %vm237_vm3, %v4904_v3, %v4888_v14  ;;  %v10423_v3 = vrot.slane %v5649_v58, %v11662_v23 }
 0x515   : > { %v4905_v19 = vsel %vm237_vm3, %v4903_v31, %v4886_v8  ;;  %v10410_v8 = vrot.slane %v5645_v21, %v11655_v7  ;;  %v10426_v31 = vrot.slane %v5650_v12, %v11662_v23 }
 0x517   : > { %v4894_v30 = vpop.permute.xlu1 %4893 }
 0x518   : > { %v4908_v17 = vsel %vm240_vm4, %v4906_v59, %v4894_v30  ;;  %v4892_v0 = vpop.permute.xlu0 %4891  ;;  %v5651_v59 = vld [vmem:[%s10567_s1 + $0x30] ss:$8 sm:$0x3] }
 0x519   : > { %v4925_v34 = vmul.f32 %v4916_v20, %v4908_v17  ;;  %v4945_v55 = vmul.f32 %v4936_v49, %v4908_v17  ;;  %v4965_v27 = vmul.f32 %v4956_v46, %v4908_v17  ;;  %v4907_v37 = vsel %vm240_vm4, %v4905_v19, %v4892_v0 }
 0x51a   : > { %v4923_v2 = vmul.f32 %v4916_v20, %v4907_v37  ;;  %v4943_v40 = vmul.f32 %v4936_v49, %v4907_v37  ;;  %v4963_v44 = vmul.f32 %v4956_v46, %v4907_v37  ;;  %v10413_v20 = vrot.slane %v5646_v54, %v11655_v7 }
 0x51b   : > { %v10354_v24 = vadd.f32 %v4925_v34, %v4831_v36  ;;  %v10356_v32 = vadd.f32 %v4945_v55, %v4851_v56  ;;  %v10358_v6 = vadd.f32 %v4965_v27, %v4871_v26  ;;  %v4900_v61 = vpop.permute.xlu1 %4899  ;;  %v10416_v49 = vrot.slane %v5647_v18, %v11655_v7 }
 0x51c   : > { %v10360_v63 = vadd.f32 %v4923_v2, %v4829_v16  ;;  %v10362_v41 = vadd.f32 %v4943_v40, %v4849_v1  ;;  %v10364_v35 = vadd.f32 %v4963_v44, %v4869_v29  ;;  %v4898_v13 = vpop.permute.xlu0 %4897  ;;  %v4910_v28 = vsel %vm243_vm5, %v4894_v30, %v4900_v61  ;;  %v5653_v61 = vld [vmem:[%s10567_s1 + $0xb0] ss:$8 sm:$0x3] }
 0x51d   : > { %v10420_v46 = vrot.slane %v5648_v15, %v11662_v23  ;;  %v4909_v30 = vsel %vm243_vm5, %v4892_v0, %v4898_v13  ;;  %v10436_v34 = vrot.slane %v5648_v15, %v11655_v7  ;;  %v10439_v55 = vrot.slane %v5649_v58, %v11655_v7  ;;  %v5652_v0 = vld [vmem:[%s10567_s1 + $0x70] ss:$8 sm:$0x3] }
 0x51e   : > { %v4926_v27 = vmul.f32 %v4920_v22, %v4910_v28  ;;  %v10445_v44 = vrot.slane %v5650_v12, %v11655_v7  ;;  %v4946_v13 = vmul.f32 %v4940_v48, %v4910_v28  ;;  %v4964_v21 = vmul.f32 %v4960_v60, %v4909_v30 }
 0x51f   : > { %v4974_v57 = vpop.permute.xlu1 %4973  ;;  %v10460_v58 = vrot.slane %v5652_v0, %v11662_v23  ;;  %v10463_v12 = vrot.slane %v5653_v61, %v11662_v23 }
 0x520   : > { %v4972_v5 = vpop.permute.xlu0 %4971 }
 0x523   : > { %v4980_v38 = vpop.permute.xlu1 %4979 }
 0x524   : > { %v4978_v53 = vpop.permute.xlu0 %4977  ;;  %v5002_v10 = vsel %vm234_vm2, %v4974_v57, %v4980_v38  ;;  %v4966_v57 = vmul.f32 %v4960_v60, %v4910_v28  ;;  %v10466_v28 = vrot.slane %v5651_v59, %v11655_v7  ;;  %v10473_v60 = vrot.slane %v5653_v61, %v11655_v7 }
 0x525   : > { %v5001_v37 = vsel %vm234_vm2, %v4972_v5, %v4978_v53  ;;  %v10455_v5 = vrot.slane %v5651_v59, %v11662_v23  ;;  %v4924_v53 = vmul.f32 %v4920_v22, %v4909_v30 }
 0x526   : > { %11663 = vst [vmem:[#allocation110_spill] sm:$0xff] %v10466_v28 }
 0x527   : > { %v4986_v42 = vpop.permute.xlu1 %4985 }
 0x528   : > { %v4984_v43 = vpop.permute.xlu0 %4983  ;;  %v5004_v19 = vsel %vm237_vm3, %v5002_v10, %v4986_v42  ;;  %v4944_v42 = vmul.f32 %v4940_v48, %v4909_v30  ;;  %v10470_v48 = vrot.slane %v5652_v0, %v11655_v7  ;;  %v4950_v30 = vadd.f32 %v4946_v13, %v10326_v11 }
 0x529   : > { %v5003_v38 = vsel %vm237_vm3, %v5001_v37, %v4984_v43  ;;  %v4930_v43 = vadd.f32 %v4926_v27, %v10324_v62  ;;  %v4968_v62 = vadd.f32 %v4964_v21, %v10334_v9 }
 0x52a   : > { %v4948_v59 = vadd.f32 %v4944_v42, %v10332_v45 }
 0x52b   : > { %v10366_v36 = vpop.permute.xlu1 %4991 }
 0x52c   : > { %v10368_v56 = vpop.permute.xlu0 %4989  ;;  %v5006_v2 = vsel %vm240_vm4, %v5004_v19, %v10366_v36  ;;  %v4970_v19 = vadd.f32 %v4966_v57, %v10328_v50 }
 0x52d   : > { %v5005_v54 = vsel %vm240_vm4, %v5003_v38, %v10368_v56  ;;  %v5023_v18 = vmul.f32 %v5014_v33, %v5006_v2  ;;  %v5043_v10 = vmul.f32 %v5034_v39, %v5006_v2  ;;  %v5063_v37 = vmul.f32 %v5054_v4, %v5006_v2 }
 0x52e   : > { %v5021_v23 = vmul.f32 %v5014_v33, %v5005_v54  ;;  %v4928_v38 = vadd.f32 %v4924_v53, %v10330_v52  ;;  %v5041_v27 = vmul.f32 %v5034_v39, %v5005_v54  ;;  %v5061_v0 = vmul.f32 %v5054_v4, %v5005_v54 }
 0x52f   : > { %v10370_v26 = vpop.permute.xlu1 %4997  ;;  %v5027_v28 = vadd.f32 %v5023_v18, %v10354_v24  ;;  %v5047_v33 = vadd.f32 %v5043_v10, %v10356_v32 }
 0x530   : > { %v10372_v47 = vpop.permute.xlu0 %4995  ;;  %v5008_v7 = vsel %vm243_vm5, %v10366_v36, %v10370_v26  ;;  %v5067_v36 = vadd.f32 %v5063_v37, %v10358_v6  ;;  %v5025_v26 = vadd.f32 %v5021_v23, %v10360_v63 }
 0x531   : > { %v5007_v52 = vsel %vm243_vm5, %v10368_v56, %v10372_v47  ;;  %v5044_v56 = vmul.f32 %v10413_v20, %v5008_v7  ;;  %v5064_v47 = vmul.f32 %v10416_v49, %v5008_v7 }
 0x532   : > { %v5022_v6 = vmul.f32 %v10410_v8, %v5007_v52  ;;  %v5042_v63 = vmul.f32 %v10413_v20, %v5007_v52  ;;  %v5062_v4 = vmul.f32 %v10416_v49, %v5007_v52 }
 0x533   : > { %v10374_v16 = vpop.permute.xlu1 %5071  ;;  %v5048_v53 = vadd.f32 %v5044_v56, %v4950_v30  ;;  %v5068_v42 = vadd.f32 %v5064_v47, %v4970_v19 }
 0x534   : > { %v10376_v1 = vpop.permute.xlu0 %5069  ;;  %v5026_v21 = vadd.f32 %v5022_v6, %v4928_v38  ;;  %v5046_v54 = vadd.f32 %v5042_v63, %v4948_v59  ;;  %v5066_v10 = vadd.f32 %v5062_v4, %v4968_v62 }
 0x537   : > { %v10378_v29 = vpop.permute.xlu1 %5077 }
 0x538   : > { %v10383_v25 = vpop.permute.xlu0 %5075  ;;  %v5100_v11 = vsel %vm234_vm2, %v10374_v16, %v10378_v29  ;;  %v5024_v29 = vmul.f32 %v10410_v8, %v5008_v7 }
 0x539   : > { %v5099_v45 = vsel %vm234_vm2, %v10376_v1, %v10383_v25  ;;  %v5045_v25 = vadd.f32 %v5041_v27, %v10362_v41 }
 0x53a   : > { %v5028_v20 = vadd.f32 %v5024_v29, %v4930_v43 }
 0x53b   : > { %v10396_v51 = vpop.permute.xlu1 %5083 }
 0x53c   : > { %v5082_v14 = vpop.permute.xlu0 %5081  ;;  %v5102_v9 = vsel %vm237_vm3, %v5100_v11, %v10396_v51  ;;  %v5065_v51 = vadd.f32 %v5061_v0, %v10364_v35 }
 0x53d   : > { %v5101_v16 = vsel %vm237_vm3, %v5099_v45, %v5082_v14 }
 0x53f   : > { %v10433_v17 = vpop.permute.xlu1 %5089 }
 0x540   : > { %v5088_v40 = vpop.permute.xlu0 %5087  ;;  %v5104_v32 = vsel %vm240_vm4, %v5102_v9, %v10433_v17 }
 0x541   : > { %v5103_v1 = vsel %vm240_vm4, %v5101_v16, %v5088_v40  ;;  %v5121_v14 = vmul.f32 %v10420_v46, %v5104_v32  ;;  %v5141_v2 = vmul.f32 %v10423_v3, %v5104_v32  ;;  %v5161_v57 = vmul.f32 %v10426_v31, %v5104_v32 }
 0x542   : > { %v5119_v41 = vmul.f32 %v10420_v46, %v5103_v1  ;;  %v5139_v35 = vmul.f32 %v10423_v3, %v5103_v1  ;;  %v5159_v49 = vmul.f32 %v10426_v31, %v5103_v1 }
 0x543   : > { %v5096_v15 = vpop.permute.xlu1 %5095  ;;  %v5125_v37 = vadd.f32 %v5121_v14, %v5027_v28  ;;  %v5165_v43 = vadd.f32 %v5161_v57, %v5067_v36 }
 0x544   : > { %v5094_v22 = vpop.permute.xlu0 %5093  ;;  %v5106_v61 = vsel %vm243_vm5, %v10433_v17, %v5096_v15  ;;  %v5143_v30 = vadd.f32 %v5139_v35, %v5045_v25  ;;  %v5163_v19 = vadd.f32 %v5159_v49, %v5065_v51 }
 0x545   : > { %v5105_v8 = vsel %vm243_vm5, %v5088_v40, %v5094_v22  ;;  %v5122_v18 = vmul.f32 %v10436_v34, %v5106_v61  ;;  %v5142_v17 = vmul.f32 %v10439_v55, %v5106_v61  ;;  %v5162_v46 = vmul.f32 %v10445_v44, %v5106_v61  ;;  %v11664_v61 = vld [vmem:[#allocation110_spill] sm:$0xff] }
 0x546   : > { %v5120_v3 = vmul.f32 %v10436_v34, %v5105_v8  ;;  %v5145_v40 = vadd.f32 %v5141_v2, %v5047_v33  ;;  %v5123_v22 = vadd.f32 %v5119_v41, %v5025_v26  ;;  %v5140_v31 = vmul.f32 %v10439_v55, %v5105_v8 }
 0x547   : > { %v5170_v50 = vpop.permute.xlu1 %5169  ;;  %v5160_v38 = vmul.f32 %v10445_v44, %v5105_v8  ;;  %v5126_v27 = vadd.f32 %v5122_v18, %v5028_v20  ;;  %v5146_v0 = vadd.f32 %v5142_v17, %v5048_v53  ;;  %v5166_v34 = vadd.f32 %v5162_v46, %v5068_v42 }
 0x548   : > { %v5168_v24 = vpop.permute.xlu0 %5167  ;;  %v5124_v11 = vadd.f32 %v5120_v3, %v5026_v21  ;;  %v5144_v36 = vadd.f32 %v5140_v31, %v5046_v54 }
 0x549   : > { %v5164_v32 = vadd.f32 %v5160_v38, %v5066_v10 }
 0x54b   : > { %v5176_v39 = vpop.permute.xlu1 %5175 }
 0x54c   : > { %v5174_v13 = vpop.permute.xlu0 %5173  ;;  %v5198_v59 = vsel %vm234_vm2, %v5170_v50, %v5176_v39 }
 0x54d   : > { %v5197_v28 = vsel %vm234_vm2, %v5168_v24, %v5174_v13 }
 0x54f   : > { %v5182_v15 = vpop.permute.xlu1 %5181 }
 0x550   : > { %v5180_v23 = vpop.permute.xlu0 %5179  ;;  %v5200_v62 = vsel %vm237_vm3, %v5198_v59, %v5182_v15 }
 0x551   : > { %v5199_v33 = vsel %vm237_vm3, %v5197_v28, %v5180_v23 }
 0x553   : > { %v5188_v7 = vpop.permute.xlu1 %5187 }
 0x554   : > { %v5202_v52 = vsel %vm240_vm4, %v5200_v62, %v5188_v7  ;;  %v5186_v45 = vpop.permute.xlu0 %5185 }
 0x555   : > { %v5219_v55 = vmul.f32 %v10455_v5, %v5202_v52  ;;  %v5239_v44 = vmul.f32 %v10460_v58, %v5202_v52  ;;  %v5259_v50 = vmul.f32 %v10463_v12, %v5202_v52  ;;  %v5201_v9 = vsel %vm240_vm4, %v5199_v33, %v5186_v45 }
 0x556   : > { %v5217_v24 = vmul.f32 %v10455_v5, %v5201_v9  ;;  %v5237_v26 = vmul.f32 %v10460_v58, %v5201_v9  ;;  %v5257_v16 = vmul.f32 %v10463_v12, %v5201_v9 }
 0x557   : > { %v5223_v29 = vadd.f32 %v5219_v55, %v5125_v37  ;;  %v5243_v56 = vadd.f32 %v5239_v44, %v5145_v40  ;;  %v5263_v47 = vadd.f32 %v5259_v50, %v5165_v43  ;;  %v5194_v1 = vpop.permute.xlu1 %5193 }
 0x558   : > { %v5221_v25 = vadd.f32 %v5217_v24, %v5123_v22  ;;  %v5241_v51 = vadd.f32 %v5237_v26, %v5143_v30  ;;  %v5261_v6 = vadd.f32 %v5257_v16, %v5163_v19  ;;  %v5204_v63 = vsel %vm243_vm5, %v5188_v7, %v5194_v1  ;;  %v5192_v39 = vpop.permute.xlu0 %5191 }
 0x559   : > { %v5656_v4 = vmul.f32 -1.442695, %v5223_v29  ;;  %v5664_v14 = vmul.f32 -1.442695, %v5243_v56  ;;  %v5672_v2 = vmul.f32 -1.442695, %v5263_v47  ;;  %v5220_v5 = vmul.f32 %v11664_v61, %v5204_v63 }
 0x55a   : > { %v5654_v13 = vmul.f32 -1.442695, %v5221_v25  ;;  %v5662_v58 = vmul.f32 -1.442695, %v5241_v51  ;;  %v5670_v57 = vmul.f32 -1.442695, %v5261_v6  ;;  %v5240_v12 = vmul.f32 %v10470_v48, %v5204_v63 }
 0x55b   : > { %5774 = vpow2.f32 %v5656_v4  ;;  %v5224_v41 = vadd.f32 %v5220_v5, %v5126_v27  ;;  %v5260_v35 = vmul.f32 %v10473_v60, %v5204_v63  ;;  %v5203_v8 = vsel %vm243_vm5, %v5186_v45, %v5192_v39 }
 0x55c   : > { %5776 = vpow2.f32 %v5664_v14  ;;  %v5244_v20 = vadd.f32 %v5240_v12, %v5146_v0  ;;  %v5218_v53 = vmul.f32 %v11664_v61, %v5203_v8  ;;  %v5238_v42 = vmul.f32 %v10470_v48, %v5203_v8 }
 0x55d   : > { %5778 = vpow2.f32 %v5672_v2  ;;  %v5264_v49 = vadd.f32 %v5260_v35, %v5166_v34  ;;  %v5657_v21 = vmul.f32 -1.442695, %v5224_v41  ;;  %v5258_v54 = vmul.f32 %v10473_v60, %v5203_v8 }
 0x55e   : > { %5780 = vpow2.f32 %v5654_v13  ;;  %v5665_v18 = vmul.f32 -1.442695, %v5244_v20  ;;  %v5222_v17 = vadd.f32 %v5218_v53, %v5124_v11  ;;  %v5242_v15 = vadd.f32 %v5238_v42, %v5144_v36 }
 0x55f   : > { %5782 = vpow2.f32 %v5662_v58  ;;  %v5673_v10 = vmul.f32 -1.442695, %v5264_v49  ;;  %v5262_v37 = vadd.f32 %v5258_v54, %v5164_v32 }
 0x560   : > { %5784 = vpow2.f32 %v5670_v57  ;;  %v5655_v46 = vmul.f32 -1.442695, %v5222_v17  ;;  %v5663_v3 = vmul.f32 -1.442695, %v5242_v15 }
 0x561   : > { %5786 = vpow2.f32 %v5657_v21  ;;  %v5671_v23 = vmul.f32 -1.442695, %v5262_v37 }
 0x562   : > { %5788 = vpow2.f32 %v5665_v18 }
 0x563   : > { %5790 = vpow2.f32 %v5673_v10 }
 0x564   : > { %5792 = vpow2.f32 %v5655_v46 }
 0x565   : > { %5794 = vpow2.f32 %v5663_v3 }
 0x566   : > { %5796 = vpow2.f32 %v5671_v23 }
 0x568   : > { %v5775_v48 = vpop.eup %5774 }
 0x569   : > { %v5777_v40 = vpop.eup %5776  ;;  %v5279_v60 = vadd.f32 1.0, %v5775_v48 }
 0x56a   : > { %v5779_v43 = vpop.eup %5778  ;;  %v5308_v22 = vadd.f32 1.0, %v5777_v40 }
 0x56b   : > { %v5781_v30 = vpop.eup %5780  ;;  %5798 = vrcp.f32 %v5279_v60  ;;  %v5337_v19 = vadd.f32 1.0, %v5779_v43 }
 0x56c   : > { %v5783_v31 = vpop.eup %5782  ;;  %5800 = vrcp.f32 %v5308_v22  ;;  %v5277_v38 = vadd.f32 1.0, %v5781_v30 }
 0x56d   : > { %v5785_v59 = vpop.eup %5784  ;;  %5802 = vrcp.f32 %v5337_v19  ;;  %v5306_v27 = vadd.f32 1.0, %v5783_v31 }
 0x56e   : > { %v5787_v0 = vpop.eup %5786  ;;  %5804 = vrcp.f32 %v5277_v38  ;;  %v5335_v28 = vadd.f32 1.0, %v5785_v59 }
 0x56f   : > { %v5789_v62 = vpop.eup %5788  ;;  %5806 = vrcp.f32 %v5306_v27  ;;  %v5280_v7 = vadd.f32 1.0, %v5787_v0 }
 0x570   : > { %v5791_v34 = vpop.eup %5790  ;;  %5808 = vrcp.f32 %v5335_v28  ;;  %v5309_v11 = vadd.f32 1.0, %v5789_v62 }
 0x571   : > { %v5793_v33 = vpop.eup %5792  ;;  %5810 = vrcp.f32 %v5280_v7  ;;  %v5338_v52 = vadd.f32 1.0, %v5791_v34 }
 0x572   : > { %v5795_v45 = vpop.eup %5794  ;;  %5812 = vrcp.f32 %v5309_v11  ;;  %v5278_v55 = vadd.f32 1.0, %v5793_v33 }
 0x573   : > { %v5797_v44 = vpop.eup %5796  ;;  %5814 = vrcp.f32 %v5338_v52  ;;  %v5307_v50 = vadd.f32 1.0, %v5795_v45 }
 0x574   : > { %5816 = vrcp.f32 %v5278_v55  ;;  %v5336_v9 = vadd.f32 1.0, %v5797_v44 }
 0x575   : > { %5818 = vrcp.f32 %v5307_v50 }
 0x576   : > { %5820 = vrcp.f32 %v5336_v9 }
 0x578   : > { %v5799_v36 = vpop.eup %5798 }
 0x579   : > { %v5801_v24 = vpop.eup %5800  ;;  %5660 = vst [vmem:[%s8399_s20 + $0x70] sm:$0xf] %v5799_v36 }
 0x57a   : > { %v5803_v26 = vpop.eup %5802  ;;  %5668 = vst [vmem:[%s8399_s20 + $0x90] sm:$0xf] %v5801_v24 }
 0x57b   : > { %v5805_v16 = vpop.eup %5804  ;;  %5676 = vst [vmem:[%s8399_s20 + $0xb0] sm:$0xf] %v5803_v26 }
 0x57c   : > { %v5807_v32 = vpop.eup %5806  ;;  %5658 = vst [vmem:[%s8399_s20 + $0x60] sm:$0xff] %v5805_v16 }
 0x57d   : > { %v5809_v29 = vpop.eup %5808  ;;  %5666 = vst [vmem:[%s8399_s20 + $0x80] sm:$0xff] %v5807_v32 }
 0x57e   : > { %v5811_v56 = vpop.eup %5810  ;;  %5674 = vst [vmem:[%s8399_s20 + $0xa0] sm:$0xff] %v5809_v29 }
 0x57f   : > { %v5813_v47 = vpop.eup %5812  ;;  %5661 = vst.msk [vmem:[%s8399_s20 + $0x78] sm:$0xf] %vm2752_vm7, %v5811_v56 }
 0x580   : > { %v5815_v1 = vpop.eup %5814  ;;  %5669 = vst.msk [vmem:[%s8399_s20 + $0x98] sm:$0xf] %vm2752_vm7, %v5813_v47 }
 0x581   : > { %v5817_v25 = vpop.eup %5816  ;;  %5677 = vst.msk [vmem:[%s8399_s20 + $0xb8] sm:$0xf] %vm2752_vm7, %v5815_v1 }
 0x582   : > { %v5819_v51 = vpop.eup %5818  ;;  %5659 = vst.msk [vmem:[%s8399_s20 + $0x68] sm:$0xff] %vm2749_vm6, %v5817_v25 }
 0x583   : > { %v5821_v6 = vpop.eup %5820  ;;  %5667 = vst.msk [vmem:[%s8399_s20 + $0x88] sm:$0xff] %vm2749_vm6, %v5819_v51 }
 0x584   : > { %5675 = vst.msk [vmem:[%s8399_s20 + $0xa8] sm:$0xff] %vm2749_vm6, %v5821_v6 }
 0x585 PF: > { %s14_s12 = sadd.s32 1, %s5859_s12  }
 0x586   : > { %p11_p1 = scmp.ge.s32.totalorder %s14_s12, 4  }
 0x588   :  { %13 = sbr.rel (!%p11_p1) target bundleno = 5 (0x5), region = 147 }
 0x58d   :  { %5376 = vsyncpa [#allocation4], 1 }
 0x58e   :  { %5378 = vsyncpa [#allocation4 + $0x1], 1 }

</bundles_post_ra>
